<compile_context>
chip_gen: v5e
topology: v5e:2x2
jax: 0.10.0
libtpu: 0.0.40
codegen_flags: <defaults>
</compile_context>

<pallas_src>
import functools
import math

import numpy as np
import jax
import jax.numpy as jnp
from jax import lax
from jax.experimental import pallas as pl
from jax.experimental.pallas import tpu as pltpu

# ---------------- small synthetic FastSpeech2 config ----------------
VOCAB = 40                # phoneme vocab (padding_idx = 0)
H = 32                    # encoder_hidden == decoder_hidden
N_HEAD = 2
D_K = H // N_HEAD         # 16
N_ENC_LAYERS = 2
N_DEC_LAYERS = 2
FFN_FILTER = 64
FFN_K1, FFN_K2 = 9, 1     # conv_kernel_size
MAX_SEQ_LEN = 64
VP_FILTER = 32            # variance predictor filter size
VP_KERNEL = 3
N_BINS = 16               # pitch / energy quantization bins
N_MEL = 16                # n_mel_channels
POSTNET_DIM = 32
POSTNET_K = 5
POSTNET_LAYERS = 5
LN_EPS = 1e-5

# Explicit scoped-VMEM limit (review item).  Toy working set is ~100 KiB; at
# real FastSpeech2 sizes (H=256, T~1000) re-derive this and tile T on v7x
# (64 MiB VMEM).
VMEM_LIMIT = 32 * 1024 * 1024


def _vmem():
    return pl.BlockSpec(memory_space=pltpu.MemorySpace.VMEM)


def _smem():
    return pl.BlockSpec(memory_space=pltpu.MemorySpace.SMEM)


# ============================ in-kernel helpers ============================

def _ln(x, g, b):
    """One-pass LayerNorm over last dim (f32): var = E[x^2] - mu^2."""
    mu = jnp.mean(x, axis=-1, keepdims=True)
    ms = jnp.mean(x * x, axis=-1, keepdims=True)
    var = jnp.maximum(ms - mu * mu, 0.0)
    return (x - mu) * lax.rsqrt(var + LN_EPS) * g + b


def _im2col_b(x, ksize, pad):
    """x: (B, T, C) -> (B*T, ksize*C) for a stride-1 'same' conv.

    Per-sequence zero padding along T (batch kept as leading dim) so sequences
    never bleed into each other when the batch is collapsed into the M axis.
    """
    B, T, C = x.shape
    if ksize == 1:
        return x.reshape(B * T, C)
    z = jnp.zeros((B, pad, C), x.dtype)
    xp = jnp.concatenate([z, x, z], axis=1)                      # (B, T+2p, C)
    cols = jnp.concatenate([xp[:, k:k + T, :] for k in range(ksize)], axis=-1)
    return cols.reshape(B * T, ksize * C)


def _key_add_mask(lens_ref, B, T):
    """Additive key-padding mask (B, 1, T) f32: 0 valid, -1e30 pad."""
    rows = []
    for b in range(B):
        L = lens_ref[b]
        kpos = lax.broadcasted_iota(jnp.int32, (1, 1, T), 2)
        rows.append(jnp.where(kpos >= L, -1e30, 0.0))
    return jnp.concatenate(rows, axis=0)


def _valid_mask(lens_ref, B, T):
    """Multiplicative query-valid mask (B*T, 1) f32: 1 valid, 0 pad."""
    rows = []
    for b in range(B):
        L = lens_ref[b]
        qpos = lax.broadcasted_iota(jnp.int32, (T, 1), 0)
        rows.append((qpos < L).astype(jnp.float32))
    return jnp.concatenate(rows, axis=0)


# ============================ fused FFT block ============================

def _fft_block_kernel(lens_ref, x_ref, wqkv_ref, bqkv_ref, wo_ref, bo_ref,
                      g1_ref, b1_ref, w1_ref, c1_ref, w2_ref, c2_ref,
                      g2_ref, b2_ref, o_ref, *, n_head, d_k, k1, pad1,
                      inv_temp):
    B, T, Hd = x_ref.shape
    kmask = _key_add_mask(lens_ref, B, T)            # (B, 1, T) f32
    valid = _valid_mask(lens_ref, B, T)              # (B*T, 1) f32

    x3 = x_ref[...]                                  # (B, T, H) f32 residual
    x2 = x3.reshape(B * T, Hd)
    xb = x2.astype(jnp.bfloat16)

    # ---- fused QKV projection, M = B*T; single bf16 cast of the result ----
    qkv = jnp.dot(xb, wqkv_ref[...], preferred_element_type=jnp.float32)
    qkv = (qkv + bqkv_ref[...]).astype(jnp.bfloat16)             # (B*T, 3H)
    qkv3 = qkv.reshape(B, T, 3 * Hd)

    # ---- per-head attention; merged output projection ----
    ctxs = []
    for h in range(n_head):
        qh = qkv3[:, :, h * d_k:(h + 1) * d_k]
        kh = qkv3[:, :, Hd + h * d_k:Hd + (h + 1) * d_k]
        vh = qkv3[:, :, 2 * Hd + h * d_k:2 * Hd + (h + 1) * d_k]
        s = jnp.einsum("btd,bsd->bts", qh, kh,
                       preferred_element_type=jnp.float32) * inv_temp
        s = s + kmask                                # mask padded keys
        s = s - jnp.max(s, axis=-1, keepdims=True)
        p = jnp.exp(s)
        # approx reciprocal (EUP) -- tiny deviation vs exact softmax division.
        p = p * pl.reciprocal(jnp.sum(p, axis=-1, keepdims=True), approx=True)
        ctxs.append(jnp.einsum("bts,bsd->btd", p.astype(jnp.bfloat16), vh,
                               preferred_element_type=jnp.float32))
    ctx = jnp.concatenate(ctxs, axis=-1).reshape(B * T, Hd).astype(jnp.bfloat16)
    attn = jnp.dot(ctx, wo_ref[...],
                   preferred_element_type=jnp.float32) + bo_ref[...]

    h1 = _ln(attn + x2, g1_ref[...], b1_ref[...]) * valid        # (B*T, H)

    # ---- FFN: conv1 (K=k1) as one im2col dot, relu, conv2 (K=1) matmul ----
    cols = _im2col_b(h1.reshape(B, T, Hd), k1, pad1).astype(jnp.bfloat16)
    f = jnp.dot(cols, w1_ref[...], preferred_element_type=jnp.float32)
    f = jnp.maximum(f + c1_ref[...], 0.0).astype(jnp.bfloat16)
    f2 = jnp.dot(f, w2_ref[...],
                 preferred_element_type=jnp.float32) + c2_ref[...]
    h2 = _ln(f2 + h1, g2_ref[...], b2_ref[...]) * valid

    o_ref[...] = h2.reshape(B, T, Hd)


def fft_block(x, lengths, p):
    """x: (B, T, H) f32, lengths: (B,) int32 valid lengths."""
    B, T, _ = x.shape
    kernel = functools.partial(_fft_block_kernel, n_head=N_HEAD, d_k=D_K,
                               k1=FFN_K1, pad1=(FFN_K1 - 1) // 2,
                               inv_temp=1.0 / math.sqrt(D_K))
    return pl.pallas_call(
        kernel,
        out_shape=jax.ShapeDtypeStruct((B, T, H), jnp.float32),
        in_specs=[_smem()] + [_vmem()] * 13,
        out_specs=_vmem(),
        compiler_params=pltpu.CompilerParams(vmem_limit_bytes=VMEM_LIMIT),
    )(lengths, x, p["wqkv"], p["bqkv"], p["wo"], p["bo"],
      p["ln1_g"], p["ln1_b"], p["ffn_w1"], p["ffn_b1"],
      p["ffn_w2"], p["ffn_b2"], p["ln2_g"], p["ln2_b"])


# ==================== fused variance predictors (n in one call) ====================

def _vp_kernel(lens_ref, x_ref, *rest, n_pred, ksize, pad):
    o_ref = rest[-1]
    wrefs = rest[:-1]
    B, T, Hd = x_ref.shape
    valid = _valid_mask(lens_ref, B, T)              # (B*T, 1) f32

    x3 = x_ref[...]                                  # (B, T, H) f32
    # Shared first-layer im2col (duration & pitch predictors see the same x).
    cols1 = _im2col_b(x3, ksize, pad).astype(jnp.bfloat16)       # (B*T, K*H)

    preds = []
    for i in range(n_pred):
        (w1, c1, g1, b1, w2, c2, g2, b2, wl, cl) = wrefs[i * 10:(i + 1) * 10]
        h = jnp.dot(cols1, w1[...], preferred_element_type=jnp.float32)
        h = jnp.maximum(h + c1[...], 0.0)
        h = _ln(h, g1[...], b1[...])

        cols2 = _im2col_b(h.reshape(B, T, h.shape[-1]), ksize,
                          pad).astype(jnp.bfloat16)
        h = jnp.dot(cols2, w2[...], preferred_element_type=jnp.float32)
        h = jnp.maximum(h + c2[...], 0.0)
        h = _ln(h, g2[...], b2[...])

        # final (F, 1) linear as VPU multiply + lane reduce (no N=1 MXU dot)
        pred = jnp.sum(h * wl[...], axis=-1, keepdims=True) + cl[...]
        preds.append(pred * valid)                   # (B*T, 1)

    out = jnp.concatenate(preds, axis=-1)            # (B*T, n_pred) packed
    o_ref[...] = out.reshape(B, T, n_pred)


def variance_predictors(x, lengths, plist):
    """Run len(plist) variance predictors on the same x in one launch.

    Returns (B, T, n) f32 predictions (masked to 0 at padded positions)."""
    B, T, _ = x.shape
    n = len(plist)
    args = [lengths, x]
    for p in plist:
        args += [p["c1_w"], p["c1_b"], p["ln1_g"], p["ln1_b"],
                 p["c2_w"], p["c2_b"], p["ln2_g"], p["ln2_b"],
                 p["lin_w"], p["lin_b"]]
    return pl.pallas_call(
        functools.partial(_vp_kernel, n_pred=n, ksize=VP_KERNEL,
                          pad=(VP_KERNEL - 1) // 2),
        out_shape=jax.ShapeDtypeStruct((B, T, n), jnp.float32),
        in_specs=[_smem()] + [_vmem()] * (1 + 10 * n),
        out_specs=_vmem(),
        compiler_params=pltpu.CompilerParams(vmem_limit_bytes=VMEM_LIMIT),
    )(*args)


# ============================ fused mel linear + postnet ============================

def _mel_postnet_kernel(x_ref, mw_ref, mb_ref, *rest, n_layers, ksize, pad):
    mel_ref, post_ref = rest[-2], rest[-1]
    wrefs = rest[:-2]
    B, T, Hd = x_ref.shape

    x2 = x_ref[...].reshape(B * T, Hd).astype(jnp.bfloat16)
    mel = jnp.dot(x2, mw_ref[...],
                  preferred_element_type=jnp.float32) + mb_ref[...]   # (B*T, M)
    M = mel.shape[-1]
    mel_ref[...] = mel.reshape(B, T, M)

    h = mel
    for i in range(n_layers):
        w, bb = wrefs[2 * i], wrefs[2 * i + 1]
        cols = _im2col_b(h.reshape(B, T, h.shape[-1]), ksize,
                         pad).astype(jnp.bfloat16)
        h = jnp.dot(cols, w[...], preferred_element_type=jnp.float32) + bb[...]
        if i < n_layers - 1:
            h = jnp.tanh(h)
    post_ref[...] = (h + mel).reshape(B, T, M)


def mel_and_postnet(x, params):
    B, T, _ = x.shape
    args = [x, params["mel_w"], params["mel_b"]]
    for lp in params["postnet"]:
        args += [lp["w"], lp["b"]]
    mel, post = pl.pallas_call(
        functools.partial(_mel_postnet_kernel, n_layers=POSTNET_LAYERS,
                          ksize=POSTNET_K, pad=(POSTNET_K - 1) // 2),
        out_shape=(jax.ShapeDtypeStruct((B, T, N_MEL), jnp.float32),
                   jax.ShapeDtypeStruct((B, T, N_MEL), jnp.float32)),
        in_specs=[_vmem()] * len(args),
        out_specs=(_vmem(), _vmem()),
        compiler_params=pltpu.CompilerParams(vmem_limit_bytes=VMEM_LIMIT),
    )(*args)
    return mel, post


# ============================ model glue ============================

def get_mask_from_lengths(lengths, max_len):
    ids = jnp.arange(max_len)
    return ids[None, :] >= lengths[:, None]        # True == padding


def sinusoid_table(n_position, d_hid):
    pos = np.arange(n_position)[:, None].astype(np.float64)
    i = np.arange(d_hid)[None, :]
    angle = pos / np.power(10000.0, 2.0 * (i // 2) / d_hid)
    table = np.zeros((n_position, d_hid), dtype=np.float64)
    table[:, 0::2] = np.sin(angle[:, 0::2])
    table[:, 1::2] = np.cos(angle[:, 1::2])
    return jnp.asarray(table, dtype=jnp.float32)


def encoder(texts, src_lens, params):
    B, T = texts.shape
    x = params["word_emb"][texts] + params["pos_enc"][None, :T, :]
    for lp in params["layers"]:
        x = fft_block(x, src_lens, lp)
    return x


def decoder(x, mel_lens, params):
    B, T, _ = x.shape
    x = x + params["pos_enc"][None, :T, :]
    for lp in params["layers"]:
        x = fft_block(x, mel_lens, lp)
    return x


def length_regulate(x, durations, max_len):
    # TODO(synk): data-dependent expansion stays in JAX glue (gather).
    B, T_src, _ = x.shape
    cum = jnp.cumsum(durations, axis=1)                       # (B, T_src)
    mel_len = cum[:, -1]
    frame_pos = jnp.arange(max_len)
    idx = jnp.sum(cum[:, None, :] <= frame_pos[None, :, None], axis=-1)
    idx = jnp.clip(idx, 0, T_src - 1)
    out = jnp.take_along_axis(x, idx[:, :, None], axis=1)
    valid = frame_pos[None, :] < mel_len[:, None]
    out = jnp.where(valid[:, :, None], out, 0.0)
    return out, mel_len


def variance_adaptor(x, src_lens, src_mask, mel_mask, max_mel_len,
                     p_targets, e_targets, d_targets,
                     p_control, e_control, d_control, params):
    # TODO(synk): inference path (predicted duration/pitch/energy scaled by
    # p/e/d_control) is not implemented; only the ground-truth-target path is.
    # Duration + pitch predictors share the same input x -> one fused launch.
    dp = variance_predictors(x, src_lens, [params["duration"], params["pitch"]])
    log_d_pred = dp[..., 0]
    p_pred = dp[..., 1]
    # TODO(synk): jnp.searchsorted may differ from torch.bucketize by one bin
    # at exact boundary values.
    p_idx = jnp.searchsorted(params["pitch_bins"], p_targets)
    x = x + params["pitch_emb"][p_idx]
    # energy predictor runs on x + pitch_embedding (as in the reference).
    e_pred = variance_predictors(x, src_lens, [params["energy"]])[..., 0]
    e_idx = jnp.searchsorted(params["energy_bins"], e_targets)
    x = x + params["energy_emb"][e_idx]
    # duration target supplied -> length regulation with ground-truth durations
    x, mel_len = length_regulate(x, d_targets, max_mel_len)
    d_rounded = d_targets
    return x, p_pred, e_pred, log_d_pred, d_rounded, mel_len, mel_mask


def fastspeech2_forward(params, speakers, texts, src_lens, max_src_len,
                        mel_lens, max_mel_len, p_targets, e_targets, d_targets,
                        p_control=1.0, e_control=1.0, d_control=1.0):
    src_masks = get_mask_from_lengths(src_lens, max_src_len)
    mel_masks = get_mask_from_lengths(mel_lens, max_mel_len)

    output = encoder(texts, src_lens, params["encoder"])
    # multi_speaker=False -> speaker_emb is None, speakers unused

    (output, p_pred, e_pred, log_d_pred, d_rounded,
     mel_lens_out, mel_masks) = variance_adaptor(
        output, src_lens, src_masks, mel_masks, max_mel_len,
        p_targets, e_targets, d_targets,
        p_control, e_control, d_control, params["variance_adaptor"])

    output = decoder(output, mel_lens, params["decoder"])
    mel_out, postnet_out = mel_and_postnet(output, params)

    return (mel_out, postnet_out, p_pred, e_pred, log_d_pred, d_rounded,
            src_masks, mel_masks, src_lens, mel_lens_out)


# ============================ parameter init ============================

class ParamGen:
    def __init__(self, key):
        self.key = key
        self.i = 0

    def __call__(self, shape, scale=0.1):
        self.i += 1
        return scale * jax.random.normal(jax.random.fold_in(self.key, self.i),
                                         shape, dtype=jnp.float32)


def make_params(key):
    pg = ParamGen(key)
    bf16 = lambda a: a.astype(jnp.bfloat16)

    def fft_layer():
        wq, wk, wv = pg((H, H)), pg((H, H)), pg((H, H))
        bq, bk, bv = pg((H,), 0.02), pg((H,), 0.02), pg((H,), 0.02)
        return dict(
            wqkv=bf16(jnp.concatenate([wq, wk, wv], axis=1)),          # (H, 3H)
            bqkv=jnp.concatenate([bq, bk, bv]).reshape(1, 3 * H),
            wo=bf16(pg((H, H))), bo=pg((H,), 0.02).reshape(1, H),
            ln1_g=jnp.ones((1, H), jnp.float32),
            ln1_b=jnp.zeros((1, H), jnp.float32),
            ffn_w1=bf16(pg((FFN_K1, H, FFN_FILTER)).reshape(FFN_K1 * H,
                                                            FFN_FILTER)),
            ffn_b1=pg((FFN_FILTER,), 0.02).reshape(1, FFN_FILTER),
            ffn_w2=bf16(pg((FFN_FILTER, H))),
            ffn_b2=pg((H,), 0.02).reshape(1, H),
            ln2_g=jnp.ones((1, H), jnp.float32),
            ln2_b=jnp.zeros((1, H), jnp.float32),
        )

    word_emb = pg((VOCAB, H)).at[0].set(0.0)        # padding_idx = 0
    enc = dict(word_emb=word_emb,
               pos_enc=sinusoid_table(MAX_SEQ_LEN + 1, H),
               layers=[fft_layer() for _ in range(N_ENC_LAYERS)])
    dec = dict(pos_enc=sinusoid_table(MAX_SEQ_LEN + 1, H),
               layers=[fft_layer() for _ in range(N_DEC_LAYERS)])

    def vp():
        return dict(
            c1_w=bf16(pg((VP_KERNEL, H, VP_FILTER)).reshape(VP_KERNEL * H,
                                                            VP_FILTER)),
            c1_b=pg((VP_FILTER,), 0.02).reshape(1, VP_FILTER),
            ln1_g=jnp.ones((1, VP_FILTER), jnp.float32),
            ln1_b=jnp.zeros((1, VP_FILTER), jnp.float32),
            c2_w=bf16(pg((VP_KERNEL, VP_FILTER, VP_FILTER)).reshape(
                VP_KERNEL * VP_FILTER, VP_FILTER)),
            c2_b=pg((VP_FILTER,), 0.02).reshape(1, VP_FILTER),
            ln2_g=jnp.ones((1, VP_FILTER), jnp.float32),
            ln2_b=jnp.zeros((1, VP_FILTER), jnp.float32),
            lin_w=pg((VP_FILTER,)).reshape(1, VP_FILTER),   # f32, VPU reduce
            lin_b=pg((1,), 0.02).reshape(1, 1),
        )

    va = dict(duration=vp(), pitch=vp(), energy=vp(),
              pitch_bins=jnp.linspace(-2.0, 2.0, N_BINS - 1),
              energy_bins=jnp.linspace(-2.0, 2.0, N_BINS - 1),
              pitch_emb=pg((N_BINS, H)), energy_emb=pg((N_BINS, H)))

    # PostNet with eval-mode BatchNorm folded into conv (mean=0, var=1,
    # gamma=1, beta=0).  TODO(synk): fold real running stats for a trained
    # checkpoint.
    post = []
    dims = [(N_MEL, POSTNET_DIM)] + [(POSTNET_DIM, POSTNET_DIM)] * 3 + \
           [(POSTNET_DIM, N_MEL)]
    for cin, cout in dims:
        w = pg((POSTNET_K, cin, cout))
        b = pg((cout,), 0.02)
        gamma = jnp.ones((cout,), jnp.float32)
        beta = jnp.zeros((cout,), jnp.float32)
        mean = jnp.zeros((cout,), jnp.float32)
        var = jnp.ones((cout,), jnp.float32)
        scale = gamma / jnp.sqrt(var + 1e-5)
        post.append(dict(
            w=bf16((w * scale[None, None, :]).reshape(POSTNET_K * cin, cout)),
            b=((b - mean) * scale + beta).reshape(1, cout)))

    return dict(encoder=enc, decoder=dec, variance_adaptor=va,
                mel_w=bf16(pg((H, N_MEL))),
                mel_b=pg((N_MEL,), 0.02).reshape(1, N_MEL),
                postnet=post)


# ============================ main ============================

if __name__ == "__main__":
    key = jax.random.PRNGKey(0)
    params = make_params(key)

    B, T_SRC = 2, 8
    MAX_MEL = 16

    k1, k2, k3 = jax.random.split(jax.random.fold_in(key, 999), 3)
    texts = jax.random.randint(k1, (B, T_SRC), 1, VOCAB).astype(jnp.int32)
    src_lens = jnp.array([8, 6], dtype=jnp.int32)
    texts = jnp.where(jnp.arange(T_SRC)[None, :] < src_lens[:, None], texts, 0)
    speakers = jnp.zeros((B,), dtype=jnp.int32)

    d_targets = jnp.array([[2, 2, 2, 2, 2, 2, 2, 2],
                           [3, 2, 2, 3, 2, 2, 0, 0]], dtype=jnp.int32)
    mel_lens = jnp.sum(d_targets, axis=1).astype(jnp.int32)      # [16, 14]
    p_targets = jax.random.normal(k2, (B, T_SRC), dtype=jnp.float32)
    e_targets = jax.random.normal(k3, (B, T_SRC), dtype=jnp.float32)

    fwd = jax.jit(fastspeech2_forward, static_argnums=(4, 6))
    outs = fwd(params, speakers, texts, src_lens, T_SRC,
               mel_lens, MAX_MEL, p_targets, e_targets, d_targets)
    outs = jax.block_until_ready(outs)

    mel_out, post_out = outs[0], outs[1]
    assert mel_out.shape == (B, MAX_MEL, N_MEL)
    assert post_out.shape == (B, MAX_MEL, N_MEL)
    assert bool(jnp.all(jnp.isfinite(mel_out)))
    assert bool(jnp.all(jnp.isfinite(post_out)))
    print("KERNEL_OK")
</pallas_src>

<mosaic_0001>
module attributes {stable_mosaic.version = 11 : i64} {
  func.func @_fft_block_kernel(%arg0: memref<2xi32, #tpu.memory_space<smem>>, %arg1: memref<2x8x32xf32, #tpu.memory_space<vmem>>, %arg2: memref<32x96xbf16, #tpu.memory_space<vmem>>, %arg3: memref<1x96xf32, #tpu.memory_space<vmem>>, %arg4: memref<32x32xbf16, #tpu.memory_space<vmem>>, %arg5: memref<1x32xf32, #tpu.memory_space<vmem>>, %arg6: memref<1x32xf32, #tpu.memory_space<vmem>>, %arg7: memref<1x32xf32, #tpu.memory_space<vmem>>, %arg8: memref<288x64xbf16, #tpu.memory_space<vmem>>, %arg9: memref<1x64xf32, #tpu.memory_space<vmem>>, %arg10: memref<64x32xbf16, #tpu.memory_space<vmem>>, %arg11: memref<1x32xf32, #tpu.memory_space<vmem>>, %arg12: memref<1x32xf32, #tpu.memory_space<vmem>>, %arg13: memref<1x32xf32, #tpu.memory_space<vmem>>, %arg14: memref<2x8x32xf32, #tpu.memory_space<vmem>>) attributes {dimension_semantics = [], scalar_prefetch = 0 : i64, scratch_operands = 0 : i64, tpu.core_type = #tpu.core_type<tc>} {
    %c0 = arith.constant 0 : index
    %0 = memref.load %arg0[%c0] : memref<2xi32, #tpu.memory_space<smem>>
    %1 = tpu.iota {dimensions = array<i32: 2>} : vector<1x1x8xi32>
    %2 = vector.broadcast %0 : i32 to vector<1x1x8xi32>
    %3 = arith.cmpi sge, %1, %2 : vector<1x1x8xi32>
    %cst = arith.constant -1.000000e+30 : f32
    %cst_0 = arith.constant 0.000000e+00 : f32
    %4 = vector.broadcast %cst : f32 to vector<1x1x8xf32>
    %5 = vector.broadcast %cst_0 : f32 to vector<1x1x8xf32>
    %6 = arith.select %3, %4, %5 : vector<1x1x8xi1>, vector<1x1x8xf32>
    %c1 = arith.constant 1 : index
    %7 = memref.load %arg0[%c1] : memref<2xi32, #tpu.memory_space<smem>>
    %8 = tpu.iota {dimensions = array<i32: 2>} : vector<1x1x8xi32>
    %9 = vector.broadcast %7 : i32 to vector<1x1x8xi32>
    %10 = arith.cmpi sge, %8, %9 : vector<1x1x8xi32>
    %cst_1 = arith.constant -1.000000e+30 : f32
    %cst_2 = arith.constant 0.000000e+00 : f32
    %11 = vector.broadcast %cst_1 : f32 to vector<1x1x8xf32>
    %12 = vector.broadcast %cst_2 : f32 to vector<1x1x8xf32>
    %13 = arith.select %10, %11, %12 : vector<1x1x8xi1>, vector<1x1x8xf32>
    %14 = tpu.concatenate %6, %13 in 0 : vector<1x1x8xf32>, vector<1x1x8xf32> -> vector<2x1x8xf32>
    %c0_3 = arith.constant 0 : index
    %15 = memref.load %arg0[%c0_3] : memref<2xi32, #tpu.memory_space<smem>>
    %16 = tpu.iota {dimensions = array<i32: 0>} : vector<8x1xi32>
    %17 = vector.broadcast %15 : i32 to vector<8x1xi32>
    %18 = arith.cmpi slt, %16, %17 : vector<8x1xi32>
    %19 = arith.extui %18 : vector<8x1xi1> to vector<8x1xi32>
    %20 = arith.sitofp %19 : vector<8x1xi32> to vector<8x1xf32>
    %c1_4 = arith.constant 1 : index
    %21 = memref.load %arg0[%c1_4] : memref<2xi32, #tpu.memory_space<smem>>
    %22 = tpu.iota {dimensions = array<i32: 0>} : vector<8x1xi32>
    %23 = vector.broadcast %21 : i32 to vector<8x1xi32>
    %24 = arith.cmpi slt, %22, %23 : vector<8x1xi32>
    %25 = arith.extui %24 : vector<8x1xi1> to vector<8x1xi32>
    %26 = arith.sitofp %25 : vector<8x1xi32> to vector<8x1xf32>
    %27 = tpu.concatenate %20, %26 in 0 : vector<8x1xf32>, vector<8x1xf32> -> vector<16x1xf32>
    %c0_5 = arith.constant 0 : index
    %c0_6 = arith.constant 0 : index
    %c0_7 = arith.constant 0 : index
    %28 = vector.load %arg1[%c0_5, %c0_6, %c0_7] : memref<2x8x32xf32, #tpu.memory_space<vmem>>, vector<2x8x32xf32>
    %29 = vector.shape_cast %28 : vector<2x8x32xf32> to vector<16x32xf32>
    %30 = arith.truncf %29 : vector<16x32xf32> to vector<16x32xbf16>
    %c0_8 = arith.constant 0 : index
    %c0_9 = arith.constant 0 : index
    %31 = vector.load %arg2[%c0_8, %c0_9] : memref<32x96xbf16, #tpu.memory_space<vmem>>, vector<32x96xbf16>
    %cst_10 = arith.constant dense<0.000000e+00> : vector<16x96xf32>
    %32 = tpu.matmul %30, %31, %cst_10 {dimension_numbers = #tpu.dot_dimension_numbers<[1], [0], [0], [1], [0, 0, 1, 1], [], []>} : vector<16x32xbf16>, vector<32x96xbf16>, vector<16x96xf32> -> vector<16x96xf32>
    %c0_11 = arith.constant 0 : index
    %c0_12 = arith.constant 0 : index
    %33 = vector.load %arg3[%c0_11, %c0_12] : memref<1x96xf32, #tpu.memory_space<vmem>>, vector<1x96xf32>
    %34 = vector.broadcast %33 : vector<1x96xf32> to vector<16x96xf32>
    %35 = arith.addf %32, %34 : vector<16x96xf32>
    %36 = arith.truncf %35 : vector<16x96xf32> to vector<16x96xbf16>
    %37 = vector.shape_cast %36 : vector<16x96xbf16> to vector<2x8x96xbf16>
    %38 = vector.extract_strided_slice %37 {offsets = [0, 0, 0], sizes = [2, 8, 16], strides = [1, 1, 1]} : vector<2x8x96xbf16> to vector<2x8x16xbf16>
    %39 = vector.extract_strided_slice %37 {offsets = [0, 0, 32], sizes = [2, 8, 16], strides = [1, 1, 1]} : vector<2x8x96xbf16> to vector<2x8x16xbf16>
    %40 = vector.extract_strided_slice %37 {offsets = [0, 0, 64], sizes = [2, 8, 16], strides = [1, 1, 1]} : vector<2x8x96xbf16> to vector<2x8x16xbf16>
    "tpu.trace_start"() <{level = 10 : i32, message = "btd,bsd->bts"}> : () -> ()
    %cst_13 = arith.constant dense<0.000000e+00> : vector<2x8x8xf32>
    %41 = tpu.matmul %38, %39, %cst_13 {dimension_numbers = #tpu.dot_dimension_numbers<[2], [2], [1], [1], [0, 0, 0, 1, 1, 1], [0], [0]>} : vector<2x8x16xbf16>, vector<2x8x16xbf16>, vector<2x8x8xf32> -> vector<2x8x8xf32>
    "tpu.trace_stop"() : () -> ()
    %cst_14 = arith.constant 2.500000e-01 : f32
    %42 = vector.broadcast %cst_14 : f32 to vector<2x8x8xf32>
    %43 = arith.mulf %41, %42 : vector<2x8x8xf32>
    %44 = vector.broadcast %14 : vector<2x1x8xf32> to vector<2x8x8xf32>
    %45 = arith.addf %43, %44 : vector<2x8x8xf32>
    %cst_15 = arith.constant dense<0xFF800000> : vector<2x8xf32>
    %46 = vector.multi_reduction <maximumf>, %45, %cst_15 [2] : vector<2x8x8xf32> to vector<2x8xf32>
    %47 = vector.shape_cast %46 : vector<2x8xf32> to vector<2x8x1xf32>
    %48 = vector.broadcast %47 : vector<2x8x1xf32> to vector<2x8x8xf32>
    %49 = arith.subf %45, %48 : vector<2x8x8xf32>
    %50 = math.exp %49 : vector<2x8x8xf32>
    %cst_16 = arith.constant dense<0.000000e+00> : vector<2x8xf32>
    %51 = vector.multi_reduction <add>, %50, %cst_16 [2] : vector<2x8x8xf32> to vector<2x8xf32>
    %52 = vector.shape_cast %51 : vector<2x8xf32> to vector<2x8x1xf32>
    %53 = tpu.reciprocal %52 {approx = true} : vector<2x8x1xf32> -> vector<2x8x1xf32>
    %54 = vector.broadcast %53 : vector<2x8x1xf32> to vector<2x8x8xf32>
    %55 = arith.mulf %50, %54 : vector<2x8x8xf32>
    %56 = arith.truncf %55 : vector<2x8x8xf32> to vector<2x8x8xbf16>
    "tpu.trace_start"() <{level = 10 : i32, message = "bts,bsd->btd"}> : () -> ()
    %cst_17 = arith.constant dense<0.000000e+00> : vector<2x8x16xf32>
    %57 = tpu.matmul %56, %40, %cst_17 {dimension_numbers = #tpu.dot_dimension_numbers<[2], [1], [1], [2], [0, 0, 0, 1, 1, 2], [0], [0]>} : vector<2x8x8xbf16>, vector<2x8x16xbf16>, vector<2x8x16xf32> -> vector<2x8x16xf32>
    "tpu.trace_stop"() : () -> ()
    %58 = vector.extract_strided_slice %37 {offsets = [0, 0, 16], sizes = [2, 8, 16], strides = [1, 1, 1]} : vector<2x8x96xbf16> to vector<2x8x16xbf16>
    %59 = vector.extract_strided_slice %37 {offsets = [0, 0, 48], sizes = [2, 8, 16], strides = [1, 1, 1]} : vector<2x8x96xbf16> to vector<2x8x16xbf16>
    %60 = vector.extract_strided_slice %37 {offsets = [0, 0, 80], sizes = [2, 8, 16], strides = [1, 1, 1]} : vector<2x8x96xbf16> to vector<2x8x16xbf16>
    "tpu.trace_start"() <{level = 10 : i32, message = "btd,bsd->bts"}> : () -> ()
    %cst_18 = arith.constant dense<0.000000e+00> : vector<2x8x8xf32>
    %61 = tpu.matmul %58, %59, %cst_18 {dimension_numbers = #tpu.dot_dimension_numbers<[2], [2], [1], [1], [0, 0, 0, 1, 1, 1], [0], [0]>} : vector<2x8x16xbf16>, vector<2x8x16xbf16>, vector<2x8x8xf32> -> vector<2x8x8xf32>
    "tpu.trace_stop"() : () -> ()
    %cst_19 = arith.constant 2.500000e-01 : f32
    %62 = vector.broadcast %cst_19 : f32 to vector<2x8x8xf32>
    %63 = arith.mulf %61, %62 : vector<2x8x8xf32>
    %64 = vector.broadcast %14 : vector<2x1x8xf32> to vector<2x8x8xf32>
    %65 = arith.addf %63, %64 : vector<2x8x8xf32>
    %cst_20 = arith.constant dense<0xFF800000> : vector<2x8xf32>
    %66 = vector.multi_reduction <maximumf>, %65, %cst_20 [2] : vector<2x8x8xf32> to vector<2x8xf32>
    %67 = vector.shape_cast %66 : vector<2x8xf32> to vector<2x8x1xf32>
    %68 = vector.broadcast %67 : vector<2x8x1xf32> to vector<2x8x8xf32>
    %69 = arith.subf %65, %68 : vector<2x8x8xf32>
    %70 = math.exp %69 : vector<2x8x8xf32>
    %cst_21 = arith.constant dense<0.000000e+00> : vector<2x8xf32>
    %71 = vector.multi_reduction <add>, %70, %cst_21 [2] : vector<2x8x8xf32> to vector<2x8xf32>
    %72 = vector.shape_cast %71 : vector<2x8xf32> to vector<2x8x1xf32>
    %73 = tpu.reciprocal %72 {approx = true} : vector<2x8x1xf32> -> vector<2x8x1xf32>
    %74 = vector.broadcast %73 : vector<2x8x1xf32> to vector<2x8x8xf32>
    %75 = arith.mulf %70, %74 : vector<2x8x8xf32>
    %76 = arith.truncf %75 : vector<2x8x8xf32> to vector<2x8x8xbf16>
    "tpu.trace_start"() <{level = 10 : i32, message = "bts,bsd->btd"}> : () -> ()
    %cst_22 = arith.constant dense<0.000000e+00> : vector<2x8x16xf32>
    %77 = tpu.matmul %76, %60, %cst_22 {dimension_numbers = #tpu.dot_dimension_numbers<[2], [1], [1], [2], [0, 0, 0, 1, 1, 2], [0], [0]>} : vector<2x8x8xbf16>, vector<2x8x16xbf16>, vector<2x8x16xf32> -> vector<2x8x16xf32>
    "tpu.trace_stop"() : () -> ()
    %78 = tpu.concatenate %57, %77 in 2 : vector<2x8x16xf32>, vector<2x8x16xf32> -> vector<2x8x32xf32>
    %79 = vector.shape_cast %78 : vector<2x8x32xf32> to vector<16x32xf32>
    %80 = arith.truncf %79 : vector<16x32xf32> to vector<16x32xbf16>
    %c0_23 = arith.constant 0 : index
    %c0_24 = arith.constant 0 : index
    %81 = vector.load %arg4[%c0_23, %c0_24] : memref<32x32xbf16, #tpu.memory_space<vmem>>, vector<32x32xbf16>
    %cst_25 = arith.constant dense<0.000000e+00> : vector<16x32xf32>
    %82 = tpu.matmul %80, %81, %cst_25 {dimension_numbers = #tpu.dot_dimension_numbers<[1], [0], [0], [1], [0, 0, 1, 1], [], []>} : vector<16x32xbf16>, vector<32x32xbf16>, vector<16x32xf32> -> vector<16x32xf32>
    %c0_26 = arith.constant 0 : index
    %c0_27 = arith.constant 0 : index
    %83 = vector.load %arg5[%c0_26, %c0_27] : memref<1x32xf32, #tpu.memory_space<vmem>>, vector<1x32xf32>
    %84 = vector.broadcast %83 : vector<1x32xf32> to vector<16x32xf32>
    %85 = arith.addf %82, %84 : vector<16x32xf32>
    %86 = arith.addf %85, %29 : vector<16x32xf32>
    %c0_28 = arith.constant 0 : index
    %c0_29 = arith.constant 0 : index
    %87 = vector.load %arg6[%c0_28, %c0_29] : memref<1x32xf32, #tpu.memory_space<vmem>>, vector<1x32xf32>
    %c0_30 = arith.constant 0 : index
    %c0_31 = arith.constant 0 : index
    %88 = vector.load %arg7[%c0_30, %c0_31] : memref<1x32xf32, #tpu.memory_space<vmem>>, vector<1x32xf32>
    %cst_32 = arith.constant dense<0.000000e+00> : vector<16xf32>
    %89 = vector.multi_reduction <add>, %86, %cst_32 [1] : vector<16x32xf32> to vector<16xf32>
    %90 = vector.shape_cast %89 : vector<16xf32> to vector<16x1xf32>
    %cst_33 = arith.constant 3.200000e+01 : f32
    %91 = vector.broadcast %cst_33 : f32 to vector<16x1xf32>
    %92 = arith.divf %90, %91 : vector<16x1xf32>
    %93 = arith.mulf %86, %86 : vector<16x32xf32>
    %cst_34 = arith.constant dense<0.000000e+00> : vector<16xf32>
    %94 = vector.multi_reduction <add>, %93, %cst_34 [1] : vector<16x32xf32> to vector<16xf32>
    %95 = vector.shape_cast %94 : vector<16xf32> to vector<16x1xf32>
    %cst_35 = arith.constant 3.200000e+01 : f32
    %96 = vector.broadcast %cst_35 : f32 to vector<16x1xf32>
    %97 = arith.divf %95, %96 : vector<16x1xf32>
    %98 = arith.mulf %92, %92 : vector<16x1xf32>
    %99 = arith.subf %97, %98 : vector<16x1xf32>
    %cst_36 = arith.constant 0.000000e+00 : f32
    %100 = vector.broadcast %cst_36 : f32 to vector<16x1xf32>
    %101 = arith.maximumf %99, %100 : vector<16x1xf32>
    %102 = vector.broadcast %92 : vector<16x1xf32> to vector<16x32xf32>
    %103 = arith.subf %86, %102 : vector<16x32xf32>
    %cst_37 = arith.constant 9.99999974E-6 : f32
    %104 = vector.broadcast %cst_37 : f32 to vector<16x1xf32>
    %105 = arith.addf %101, %104 : vector<16x1xf32>
    %106 = math.rsqrt %105 : vector<16x1xf32>
    %107 = vector.broadcast %106 : vector<16x1xf32> to vector<16x32xf32>
    %108 = arith.mulf %103, %107 : vector<16x32xf32>
    %109 = vector.broadcast %87 : vector<1x32xf32> to vector<16x32xf32>
    %110 = arith.mulf %108, %109 : vector<16x32xf32>
    %111 = vector.broadcast %88 : vector<1x32xf32> to vector<16x32xf32>
    %112 = arith.addf %110, %111 : vector<16x32xf32>
    %113 = vector.broadcast %27 : vector<16x1xf32> to vector<16x32xf32>
    %114 = arith.mulf %112, %113 : vector<16x32xf32>
    %115 = vector.shape_cast %114 : vector<16x32xf32> to vector<2x8x32xf32>
    %cst_38 = arith.constant 0.000000e+00 : f32
    %116 = vector.broadcast %cst_38 : f32 to vector<2x4x32xf32>
    %117 = tpu.concatenate %116, %115, %116 in 1 : vector<2x4x32xf32>, vector<2x8x32xf32>, vector<2x4x32xf32> -> vector<2x16x32xf32>
    %118 = vector.extract_strided_slice %117 {offsets = [0, 0, 0], sizes = [2, 8, 32], strides = [1, 1, 1]} : vector<2x16x32xf32> to vector<2x8x32xf32>
    %119 = vector.extract_strided_slice %117 {offsets = [0, 1, 0], sizes = [2, 8, 32], strides = [1, 1, 1]} : vector<2x16x32xf32> to vector<2x8x32xf32>
    %120 = vector.extract_strided_slice %117 {offsets = [0, 2, 0], sizes = [2, 8, 32], strides = [1, 1, 1]} : vector<2x16x32xf32> to vector<2x8x32xf32>
    %121 = vector.extract_strided_slice %117 {offsets = [0, 3, 0], sizes = [2, 8, 32], strides = [1, 1, 1]} : vector<2x16x32xf32> to vector<2x8x32xf32>
    %122 = vector.extract_strided_slice %117 {offsets = [0, 4, 0], sizes = [2, 8, 32], strides = [1, 1, 1]} : vector<2x16x32xf32> to vector<2x8x32xf32>
    %123 = vector.extract_strided_slice %117 {offsets = [0, 5, 0], sizes = [2, 8, 32], strides = [1, 1, 1]} : vector<2x16x32xf32> to vector<2x8x32xf32>
    %124 = vector.extract_strided_slice %117 {offsets = [0, 6, 0], sizes = [2, 8, 32], strides = [1, 1, 1]} : vector<2x16x32xf32> to vector<2x8x32xf32>
    %125 = vector.extract_strided_slice %117 {offsets = [0, 7, 0], sizes = [2, 8, 32], strides = [1, 1, 1]} : vector<2x16x32xf32> to vector<2x8x32xf32>
    %126 = vector.extract_strided_slice %117 {offsets = [0, 8, 0], sizes = [2, 8, 32], strides = [1, 1, 1]} : vector<2x16x32xf32> to vector<2x8x32xf32>
    %127 = tpu.concatenate %118, %119, %120, %121, %122, %123, %124, %125, %126 in 2 : vector<2x8x32xf32>, vector<2x8x32xf32>, vector<2x8x32xf32>, vector<2x8x32xf32>, vector<2x8x32xf32>, vector<2x8x32xf32>, vector<2x8x32xf32>, vector<2x8x32xf32>, vector<2x8x32xf32> -> vector<2x8x288xf32>
    %128 = vector.shape_cast %127 : vector<2x8x288xf32> to vector<16x288xf32>
    %129 = arith.truncf %128 : vector<16x288xf32> to vector<16x288xbf16>
    %c0_39 = arith.constant 0 : index
    %c0_40 = arith.constant 0 : index
    %130 = vector.load %arg8[%c0_39, %c0_40] : memref<288x64xbf16, #tpu.memory_space<vmem>>, vector<288x64xbf16>
    %cst_41 = arith.constant dense<0.000000e+00> : vector<16x64xf32>
    %131 = tpu.matmul %129, %130, %cst_41 {dimension_numbers = #tpu.dot_dimension_numbers<[1], [0], [0], [1], [0, 0, 1, 1], [], []>} : vector<16x288xbf16>, vector<288x64xbf16>, vector<16x64xf32> -> vector<16x64xf32>
    %c0_42 = arith.constant 0 : index
    %c0_43 = arith.constant 0 : index
    %132 = vector.load %arg9[%c0_42, %c0_43] : memref<1x64xf32, #tpu.memory_space<vmem>>, vector<1x64xf32>
    %133 = vector.broadcast %132 : vector<1x64xf32> to vector<16x64xf32>
    %134 = arith.addf %131, %133 : vector<16x64xf32>
    %cst_44 = arith.constant 0.000000e+00 : f32
    %135 = vector.broadcast %cst_44 : f32 to vector<16x64xf32>
    %136 = arith.maximumf %134, %135 : vector<16x64xf32>
    %137 = arith.truncf %136 : vector<16x64xf32> to vector<16x64xbf16>
    %c0_45 = arith.constant 0 : index
    %c0_46 = arith.constant 0 : index
    %138 = vector.load %arg10[%c0_45, %c0_46] : memref<64x32xbf16, #tpu.memory_space<vmem>>, vector<64x32xbf16>
    %cst_47 = arith.constant dense<0.000000e+00> : vector<16x32xf32>
    %139 = tpu.matmul %137, %138, %cst_47 {dimension_numbers = #tpu.dot_dimension_numbers<[1], [0], [0], [1], [0, 0, 1, 1], [], []>} : vector<16x64xbf16>, vector<64x32xbf16>, vector<16x32xf32> -> vector<16x32xf32>
    %c0_48 = arith.constant 0 : index
    %c0_49 = arith.constant 0 : index
    %140 = vector.load %arg11[%c0_48, %c0_49] : memref<1x32xf32, #tpu.memory_space<vmem>>, vector<1x32xf32>
    %141 = vector.broadcast %140 : vector<1x32xf32> to vector<16x32xf32>
    %142 = arith.addf %139, %141 : vector<16x32xf32>
    %143 = arith.addf %142, %114 : vector<16x32xf32>
    %c0_50 = arith.constant 0 : index
    %c0_51 = arith.constant 0 : index
    %144 = vector.load %arg12[%c0_50, %c0_51] : memref<1x32xf32, #tpu.memory_space<vmem>>, vector<1x32xf32>
    %c0_52 = arith.constant 0 : index
    %c0_53 = arith.constant 0 : index
    %145 = vector.load %arg13[%c0_52, %c0_53] : memref<1x32xf32, #tpu.memory_space<vmem>>, vector<1x32xf32>
    %cst_54 = arith.constant dense<0.000000e+00> : vector<16xf32>
    %146 = vector.multi_reduction <add>, %143, %cst_54 [1] : vector<16x32xf32> to vector<16xf32>
    %147 = vector.shape_cast %146 : vector<16xf32> to vector<16x1xf32>
    %cst_55 = arith.constant 3.200000e+01 : f32
    %148 = vector.broadcast %cst_55 : f32 to vector<16x1xf32>
    %149 = arith.divf %147, %148 : vector<16x1xf32>
    %150 = arith.mulf %143, %143 : vector<16x32xf32>
    %cst_56 = arith.constant dense<0.000000e+00> : vector<16xf32>
    %151 = vector.multi_reduction <add>, %150, %cst_56 [1] : vector<16x32xf32> to vector<16xf32>
    %152 = vector.shape_cast %151 : vector<16xf32> to vector<16x1xf32>
    %cst_57 = arith.constant 3.200000e+01 : f32
    %153 = vector.broadcast %cst_57 : f32 to vector<16x1xf32>
    %154 = arith.divf %152, %153 : vector<16x1xf32>
    %155 = arith.mulf %149, %149 : vector<16x1xf32>
    %156 = arith.subf %154, %155 : vector<16x1xf32>
    %cst_58 = arith.constant 0.000000e+00 : f32
    %157 = vector.broadcast %cst_58 : f32 to vector<16x1xf32>
    %158 = arith.maximumf %156, %157 : vector<16x1xf32>
    %159 = vector.broadcast %149 : vector<16x1xf32> to vector<16x32xf32>
    %160 = arith.subf %143, %159 : vector<16x32xf32>
    %cst_59 = arith.constant 9.99999974E-6 : f32
    %161 = vector.broadcast %cst_59 : f32 to vector<16x1xf32>
    %162 = arith.addf %158, %161 : vector<16x1xf32>
    %163 = math.rsqrt %162 : vector<16x1xf32>
    %164 = vector.broadcast %163 : vector<16x1xf32> to vector<16x32xf32>
    %165 = arith.mulf %160, %164 : vector<16x32xf32>
    %166 = vector.broadcast %144 : vector<1x32xf32> to vector<16x32xf32>
    %167 = arith.mulf %165, %166 : vector<16x32xf32>
    %168 = vector.broadcast %145 : vector<1x32xf32> to vector<16x32xf32>
    %169 = arith.addf %167, %168 : vector<16x32xf32>
    %170 = vector.broadcast %27 : vector<16x1xf32> to vector<16x32xf32>
    %171 = arith.mulf %169, %170 : vector<16x32xf32>
    %172 = vector.shape_cast %171 : vector<16x32xf32> to vector<2x8x32xf32>
    %c0_60 = arith.constant 0 : index
    %c0_61 = arith.constant 0 : index
    %c0_62 = arith.constant 0 : index
    %173 = vector.load %arg14[%c0_60, %c0_61, %c0_62] : memref<2x8x32xf32, #tpu.memory_space<vmem>>, vector<2x8x32xf32>
    tpu.vector_store %arg14[%c0_60, %c0_61, %c0_62], %172 {strides = array<i32>} : memref<2x8x32xf32, #tpu.memory_space<vmem>>, vector<2x8x32xf32>,
    return
  }
}

module attributes {stable_mosaic.version = 11 : i64} {
  func.func @_fft_block_kernel(%arg0: memref<2xi32, #tpu.memory_space<smem>>, %arg1: memref<2x16x32xf32, #tpu.memory_space<vmem>>, %arg2: memref<32x96xbf16, #tpu.memory_space<vmem>>, %arg3: memref<1x96xf32, #tpu.memory_space<vmem>>, %arg4: memref<32x32xbf16, #tpu.memory_space<vmem>>, %arg5: memref<1x32xf32, #tpu.memory_space<vmem>>, %arg6: memref<1x32xf32, #tpu.memory_space<vmem>>, %arg7: memref<1x32xf32, #tpu.memory_space<vmem>>, %arg8: memref<288x64xbf16, #tpu.memory_space<vmem>>, %arg9: memref<1x64xf32, #tpu.memory_space<vmem>>, %arg10: memref<64x32xbf16, #tpu.memory_space<vmem>>, %arg11: memref<1x32xf32, #tpu.memory_space<vmem>>, %arg12: memref<1x32xf32, #tpu.memory_space<vmem>>, %arg13: memref<1x32xf32, #tpu.memory_space<vmem>>, %arg14: memref<2x16x32xf32, #tpu.memory_space<vmem>>) attributes {dimension_semantics = [], scalar_prefetch = 0 : i64, scratch_operands = 0 : i64, tpu.core_type = #tpu.core_type<tc>} {
    %c0 = arith.constant 0 : index
    %0 = memref.load %arg0[%c0] : memref<2xi32, #tpu.memory_space<smem>>
    %1 = tpu.iota {dimensions = array<i32: 2>} : vector<1x1x16xi32>
    %2 = vector.broadcast %0 : i32 to vector<1x1x16xi32>
    %3 = arith.cmpi sge, %1, %2 : vector<1x1x16xi32>
    %cst = arith.constant -1.000000e+30 : f32
    %cst_0 = arith.constant 0.000000e+00 : f32
    %4 = vector.broadcast %cst : f32 to vector<1x1x16xf32>
    %5 = vector.broadcast %cst_0 : f32 to vector<1x1x16xf32>
    %6 = arith.select %3, %4, %5 : vector<1x1x16xi1>, vector<1x1x16xf32>
    %c1 = arith.constant 1 : index
    %7 = memref.load %arg0[%c1] : memref<2xi32, #tpu.memory_space<smem>>
    %8 = tpu.iota {dimensions = array<i32: 2>} : vector<1x1x16xi32>
    %9 = vector.broadcast %7 : i32 to vector<1x1x16xi32>
    %10 = arith.cmpi sge, %8, %9 : vector<1x1x16xi32>
    %cst_1 = arith.constant -1.000000e+30 : f32
    %cst_2 = arith.constant 0.000000e+00 : f32
    %11 = vector.broadcast %cst_1 : f32 to vector<1x1x16xf32>
    %12 = vector.broadcast %cst_2 : f32 to vector<1x1x16xf32>
    %13 = arith.select %10, %11, %12 : vector<1x1x16xi1>, vector<1x1x16xf32>
    %14 = tpu.concatenate %6, %13 in 0 : vector<1x1x16xf32>, vector<1x1x16xf32> -> vector<2x1x16xf32>
    %c0_3 = arith.constant 0 : index
    %15 = memref.load %arg0[%c0_3] : memref<2xi32, #tpu.memory_space<smem>>
    %16 = tpu.iota {dimensions = array<i32: 0>} : vector<16x1xi32>
    %17 = vector.broadcast %15 : i32 to vector<16x1xi32>
    %18 = arith.cmpi slt, %16, %17 : vector<16x1xi32>
    %19 = arith.extui %18 : vector<16x1xi1> to vector<16x1xi32>
    %20 = arith.sitofp %19 : vector<16x1xi32> to vector<16x1xf32>
    %c1_4 = arith.constant 1 : index
    %21 = memref.load %arg0[%c1_4] : memref<2xi32, #tpu.memory_space<smem>>
    %22 = tpu.iota {dimensions = array<i32: 0>} : vector<16x1xi32>
    %23 = vector.broadcast %21 : i32 to vector<16x1xi32>
    %24 = arith.cmpi slt, %22, %23 : vector<16x1xi32>
    %25 = arith.extui %24 : vector<16x1xi1> to vector<16x1xi32>
    %26 = arith.sitofp %25 : vector<16x1xi32> to vector<16x1xf32>
    %27 = tpu.concatenate %20, %26 in 0 : vector<16x1xf32>, vector<16x1xf32> -> vector<32x1xf32>
    %c0_5 = arith.constant 0 : index
    %c0_6 = arith.constant 0 : index
    %c0_7 = arith.constant 0 : index
    %28 = vector.load %arg1[%c0_5, %c0_6, %c0_7] : memref<2x16x32xf32, #tpu.memory_space<vmem>>, vector<2x16x32xf32>
    %29 = vector.shape_cast %28 : vector<2x16x32xf32> to vector<32x32xf32>
    %30 = arith.truncf %29 : vector<32x32xf32> to vector<32x32xbf16>
    %c0_8 = arith.constant 0 : index
    %c0_9 = arith.constant 0 : index
    %31 = vector.load %arg2[%c0_8, %c0_9] : memref<32x96xbf16, #tpu.memory_space<vmem>>, vector<32x96xbf16>
    %cst_10 = arith.constant dense<0.000000e+00> : vector<32x96xf32>
    %32 = tpu.matmul %30, %31, %cst_10 {dimension_numbers = #tpu.dot_dimension_numbers<[1], [0], [0], [1], [0, 0, 1, 1], [], []>} : vector<32x32xbf16>, vector<32x96xbf16>, vector<32x96xf32> -> vector<32x96xf32>
    %c0_11 = arith.constant 0 : index
    %c0_12 = arith.constant 0 : index
    %33 = vector.load %arg3[%c0_11, %c0_12] : memref<1x96xf32, #tpu.memory_space<vmem>>, vector<1x96xf32>
    %34 = vector.broadcast %33 : vector<1x96xf32> to vector<32x96xf32>
    %35 = arith.addf %32, %34 : vector<32x96xf32>
    %36 = arith.truncf %35 : vector<32x96xf32> to vector<32x96xbf16>
    %37 = vector.shape_cast %36 : vector<32x96xbf16> to vector<2x16x96xbf16>
    %38 = vector.extract_strided_slice %37 {offsets = [0, 0, 0], sizes = [2, 16, 16], strides = [1, 1, 1]} : vector<2x16x96xbf16> to vector<2x16x16xbf16>
    %39 = vector.extract_strided_slice %37 {offsets = [0, 0, 32], sizes = [2, 16, 16], strides = [1, 1, 1]} : vector<2x16x96xbf16> to vector<2x16x16xbf16>
    %40 = vector.extract_strided_slice %37 {offsets = [0, 0, 64], sizes = [2, 16, 16], strides = [1, 1, 1]} : vector<2x16x96xbf16> to vector<2x16x16xbf16>
    "tpu.trace_start"() <{level = 10 : i32, message = "btd,bsd->bts"}> : () -> ()
    %cst_13 = arith.constant dense<0.000000e+00> : vector<2x16x16xf32>
    %41 = tpu.matmul %38, %39, %cst_13 {dimension_numbers = #tpu.dot_dimension_numbers<[2], [2], [1], [1], [0, 0, 0, 1, 1, 1], [0], [0]>} : vector<2x16x16xbf16>, vector<2x16x16xbf16>, vector<2x16x16xf32> -> vector<2x16x16xf32>
    "tpu.trace_stop"() : () -> ()
    %cst_14 = arith.constant 2.500000e-01 : f32
    %42 = vector.broadcast %cst_14 : f32 to vector<2x16x16xf32>
    %43 = arith.mulf %41, %42 : vector<2x16x16xf32>
    %44 = vector.broadcast %14 : vector<2x1x16xf32> to vector<2x16x16xf32>
    %45 = arith.addf %43, %44 : vector<2x16x16xf32>
    %cst_15 = arith.constant dense<0xFF800000> : vector<2x16xf32>
    %46 = vector.multi_reduction <maximumf>, %45, %cst_15 [2] : vector<2x16x16xf32> to vector<2x16xf32>
    %47 = vector.shape_cast %46 : vector<2x16xf32> to vector<2x16x1xf32>
    %48 = vector.broadcast %47 : vector<2x16x1xf32> to vector<2x16x16xf32>
    %49 = arith.subf %45, %48 : vector<2x16x16xf32>
    %50 = math.exp %49 : vector<2x16x16xf32>
    %cst_16 = arith.constant dense<0.000000e+00> : vector<2x16xf32>
    %51 = vector.multi_reduction <add>, %50, %cst_16 [2] : vector<2x16x16xf32> to vector<2x16xf32>
    %52 = vector.shape_cast %51 : vector<2x16xf32> to vector<2x16x1xf32>
    %53 = tpu.reciprocal %52 {approx = true} : vector<2x16x1xf32> -> vector<2x16x1xf32>
    %54 = vector.broadcast %53 : vector<2x16x1xf32> to vector<2x16x16xf32>
    %55 = arith.mulf %50, %54 : vector<2x16x16xf32>
    %56 = arith.truncf %55 : vector<2x16x16xf32> to vector<2x16x16xbf16>
    "tpu.trace_start"() <{level = 10 : i32, message = "bts,bsd->btd"}> : () -> ()
    %cst_17 = arith.constant dense<0.000000e+00> : vector<2x16x16xf32>
    %57 = tpu.matmul %56, %40, %cst_17 {dimension_numbers = #tpu.dot_dimension_numbers<[2], [1], [1], [2], [0, 0, 0, 1, 1, 2], [0], [0]>} : vector<2x16x16xbf16>, vector<2x16x16xbf16>, vector<2x16x16xf32> -> vector<2x16x16xf32>
    "tpu.trace_stop"() : () -> ()
    %58 = vector.extract_strided_slice %37 {offsets = [0, 0, 16], sizes = [2, 16, 16], strides = [1, 1, 1]} : vector<2x16x96xbf16> to vector<2x16x16xbf16>
    %59 = vector.extract_strided_slice %37 {offsets = [0, 0, 48], sizes = [2, 16, 16], strides = [1, 1, 1]} : vector<2x16x96xbf16> to vector<2x16x16xbf16>
    %60 = vector.extract_strided_slice %37 {offsets = [0, 0, 80], sizes = [2, 16, 16], strides = [1, 1, 1]} : vector<2x16x96xbf16> to vector<2x16x16xbf16>
    "tpu.trace_start"() <{level = 10 : i32, message = "btd,bsd->bts"}> : () -> ()
    %cst_18 = arith.constant dense<0.000000e+00> : vector<2x16x16xf32>
    %61 = tpu.matmul %58, %59, %cst_18 {dimension_numbers = #tpu.dot_dimension_numbers<[2], [2], [1], [1], [0, 0, 0, 1, 1, 1], [0], [0]>} : vector<2x16x16xbf16>, vector<2x16x16xbf16>, vector<2x16x16xf32> -> vector<2x16x16xf32>
    "tpu.trace_stop"() : () -> ()
    %cst_19 = arith.constant 2.500000e-01 : f32
    %62 = vector.broadcast %cst_19 : f32 to vector<2x16x16xf32>
    %63 = arith.mulf %61, %62 : vector<2x16x16xf32>
    %64 = vector.broadcast %14 : vector<2x1x16xf32> to vector<2x16x16xf32>
    %65 = arith.addf %63, %64 : vector<2x16x16xf32>
    %cst_20 = arith.constant dense<0xFF800000> : vector<2x16xf32>
    %66 = vector.multi_reduction <maximumf>, %65, %cst_20 [2] : vector<2x16x16xf32> to vector<2x16xf32>
    %67 = vector.shape_cast %66 : vector<2x16xf32> to vector<2x16x1xf32>
    %68 = vector.broadcast %67 : vector<2x16x1xf32> to vector<2x16x16xf32>
    %69 = arith.subf %65, %68 : vector<2x16x16xf32>
    %70 = math.exp %69 : vector<2x16x16xf32>
    %cst_21 = arith.constant dense<0.000000e+00> : vector<2x16xf32>
    %71 = vector.multi_reduction <add>, %70, %cst_21 [2] : vector<2x16x16xf32> to vector<2x16xf32>
    %72 = vector.shape_cast %71 : vector<2x16xf32> to vector<2x16x1xf32>
    %73 = tpu.reciprocal %72 {approx = true} : vector<2x16x1xf32> -> vector<2x16x1xf32>
    %74 = vector.broadcast %73 : vector<2x16x1xf32> to vector<2x16x16xf32>
    %75 = arith.mulf %70, %74 : vector<2x16x16xf32>
    %76 = arith.truncf %75 : vector<2x16x16xf32> to vector<2x16x16xbf16>
    "tpu.trace_start"() <{level = 10 : i32, message = "bts,bsd->btd"}> : () -> ()
    %cst_22 = arith.constant dense<0.000000e+00> : vector<2x16x16xf32>
    %77 = tpu.matmul %76, %60, %cst_22 {dimension_numbers = #tpu.dot_dimension_numbers<[2], [1], [1], [2], [0, 0, 0, 1, 1, 2], [0], [0]>} : vector<2x16x16xbf16>, vector<2x16x16xbf16>, vector<2x16x16xf32> -> vector<2x16x16xf32>
    "tpu.trace_stop"() : () -> ()
    %78 = tpu.concatenate %57, %77 in 2 : vector<2x16x16xf32>, vector<2x16x16xf32> -> vector<2x16x32xf32>
    %79 = vector.shape_cast %78 : vector<2x16x32xf32> to vector<32x32xf32>
    %80 = arith.truncf %79 : vector<32x32xf32> to vector<32x32xbf16>
    %c0_23 = arith.constant 0 : index
    %c0_24 = arith.constant 0 : index
    %81 = vector.load %arg4[%c0_23, %c0_24] : memref<32x32xbf16, #tpu.memory_space<vmem>>, vector<32x32xbf16>
    %cst_25 = arith.constant dense<0.000000e+00> : vector<32x32xf32>
    %82 = tpu.matmul %80, %81, %cst_25 {dimension_numbers = #tpu.dot_dimension_numbers<[1], [0], [0], [1], [0, 0, 1, 1], [], []>} : vector<32x32xbf16>, vector<32x32xbf16>, vector<32x32xf32> -> vector<32x32xf32>
    %c0_26 = arith.constant 0 : index
    %c0_27 = arith.constant 0 : index
    %83 = vector.load %arg5[%c0_26, %c0_27] : memref<1x32xf32, #tpu.memory_space<vmem>>, vector<1x32xf32>
    %84 = vector.broadcast %83 : vector<1x32xf32> to vector<32x32xf32>
    %85 = arith.addf %82, %84 : vector<32x32xf32>
    %86 = arith.addf %85, %29 : vector<32x32xf32>
    %c0_28 = arith.constant 0 : index
    %c0_29 = arith.constant 0 : index
    %87 = vector.load %arg6[%c0_28, %c0_29] : memref<1x32xf32, #tpu.memory_space<vmem>>, vector<1x32xf32>
    %c0_30 = arith.constant 0 : index
    %c0_31 = arith.constant 0 : index
    %88 = vector.load %arg7[%c0_30, %c0_31] : memref<1x32xf32, #tpu.memory_space<vmem>>, vector<1x32xf32>
    %cst_32 = arith.constant dense<0.000000e+00> : vector<32xf32>
    %89 = vector.multi_reduction <add>, %86, %cst_32 [1] : vector<32x32xf32> to vector<32xf32>
    %90 = vector.shape_cast %89 : vector<32xf32> to vector<32x1xf32>
    %cst_33 = arith.constant 3.200000e+01 : f32
    %91 = vector.broadcast %cst_33 : f32 to vector<32x1xf32>
    %92 = arith.divf %90, %91 : vector<32x1xf32>
    %93 = arith.mulf %86, %86 : vector<32x32xf32>
    %cst_34 = arith.constant dense<0.000000e+00> : vector<32xf32>
    %94 = vector.multi_reduction <add>, %93, %cst_34 [1] : vector<32x32xf32> to vector<32xf32>
    %95 = vector.shape_cast %94 : vector<32xf32> to vector<32x1xf32>
    %cst_35 = arith.constant 3.200000e+01 : f32
    %96 = vector.broadcast %cst_35 : f32 to vector<32x1xf32>
    %97 = arith.divf %95, %96 : vector<32x1xf32>
    %98 = arith.mulf %92, %92 : vector<32x1xf32>
    %99 = arith.subf %97, %98 : vector<32x1xf32>
    %cst_36 = arith.constant 0.000000e+00 : f32
    %100 = vector.broadcast %cst_36 : f32 to vector<32x1xf32>
    %101 = arith.maximumf %99, %100 : vector<32x1xf32>
    %102 = vector.broadcast %92 : vector<32x1xf32> to vector<32x32xf32>
    %103 = arith.subf %86, %102 : vector<32x32xf32>
    %cst_37 = arith.constant 9.99999974E-6 : f32
    %104 = vector.broadcast %cst_37 : f32 to vector<32x1xf32>
    %105 = arith.addf %101, %104 : vector<32x1xf32>
    %106 = math.rsqrt %105 : vector<32x1xf32>
    %107 = vector.broadcast %106 : vector<32x1xf32> to vector<32x32xf32>
    %108 = arith.mulf %103, %107 : vector<32x32xf32>
    %109 = vector.broadcast %87 : vector<1x32xf32> to vector<32x32xf32>
    %110 = arith.mulf %108, %109 : vector<32x32xf32>
    %111 = vector.broadcast %88 : vector<1x32xf32> to vector<32x32xf32>
    %112 = arith.addf %110, %111 : vector<32x32xf32>
    %113 = vector.broadcast %27 : vector<32x1xf32> to vector<32x32xf32>
    %114 = arith.mulf %112, %113 : vector<32x32xf32>
    %115 = vector.shape_cast %114 : vector<32x32xf32> to vector<2x16x32xf32>
    %cst_38 = arith.constant 0.000000e+00 : f32
    %116 = vector.broadcast %cst_38 : f32 to vector<2x4x32xf32>
    %117 = tpu.concatenate %116, %115, %116 in 1 : vector<2x4x32xf32>, vector<2x16x32xf32>, vector<2x4x32xf32> -> vector<2x24x32xf32>
    %118 = vector.extract_strided_slice %117 {offsets = [0, 0, 0], sizes = [2, 16, 32], strides = [1, 1, 1]} : vector<2x24x32xf32> to vector<2x16x32xf32>
    %119 = vector.extract_strided_slice %117 {offsets = [0, 1, 0], sizes = [2, 16, 32], strides = [1, 1, 1]} : vector<2x24x32xf32> to vector<2x16x32xf32>
    %120 = vector.extract_strided_slice %117 {offsets = [0, 2, 0], sizes = [2, 16, 32], strides = [1, 1, 1]} : vector<2x24x32xf32> to vector<2x16x32xf32>
    %121 = vector.extract_strided_slice %117 {offsets = [0, 3, 0], sizes = [2, 16, 32], strides = [1, 1, 1]} : vector<2x24x32xf32> to vector<2x16x32xf32>
    %122 = vector.extract_strided_slice %117 {offsets = [0, 4, 0], sizes = [2, 16, 32], strides = [1, 1, 1]} : vector<2x24x32xf32> to vector<2x16x32xf32>
    %123 = vector.extract_strided_slice %117 {offsets = [0, 5, 0], sizes = [2, 16, 32], strides = [1, 1, 1]} : vector<2x24x32xf32> to vector<2x16x32xf32>
    %124 = vector.extract_strided_slice %117 {offsets = [0, 6, 0], sizes = [2, 16, 32], strides = [1, 1, 1]} : vector<2x24x32xf32> to vector<2x16x32xf32>
    %125 = vector.extract_strided_slice %117 {offsets = [0, 7, 0], sizes = [2, 16, 32], strides = [1, 1, 1]} : vector<2x24x32xf32> to vector<2x16x32xf32>
    %126 = vector.extract_strided_slice %117 {offsets = [0, 8, 0], sizes = [2, 16, 32], strides = [1, 1, 1]} : vector<2x24x32xf32> to vector<2x16x32xf32>
    %127 = tpu.concatenate %118, %119, %120, %121, %122, %123, %124, %125, %126 in 2 : vector<2x16x32xf32>, vector<2x16x32xf32>, vector<2x16x32xf32>, vector<2x16x32xf32>, vector<2x16x32xf32>, vector<2x16x32xf32>, vector<2x16x32xf32>, vector<2x16x32xf32>, vector<2x16x32xf32> -> vector<2x16x288xf32>
    %128 = vector.shape_cast %127 : vector<2x16x288xf32> to vector<32x288xf32>
    %129 = arith.truncf %128 : vector<32x288xf32> to vector<32x288xbf16>
    %c0_39 = arith.constant 0 : index
    %c0_40 = arith.constant 0 : index
    %130 = vector.load %arg8[%c0_39, %c0_40] : memref<288x64xbf16, #tpu.memory_space<vmem>>, vector<288x64xbf16>
    %cst_41 = arith.constant dense<0.000000e+00> : vector<32x64xf32>
    %131 = tpu.matmul %129, %130, %cst_41 {dimension_numbers = #tpu.dot_dimension_numbers<[1], [0], [0], [1], [0, 0, 1, 1], [], []>} : vector<32x288xbf16>, vector<288x64xbf16>, vector<32x64xf32> -> vector<32x64xf32>
    %c0_42 = arith.constant 0 : index
    %c0_43 = arith.constant 0 : index
    %132 = vector.load %arg9[%c0_42, %c0_43] : memref<1x64xf32, #tpu.memory_space<vmem>>, vector<1x64xf32>
    %133 = vector.broadcast %132 : vector<1x64xf32> to vector<32x64xf32>
    %134 = arith.addf %131, %133 : vector<32x64xf32>
    %cst_44 = arith.constant 0.000000e+00 : f32
    %135 = vector.broadcast %cst_44 : f32 to vector<32x64xf32>
    %136 = arith.maximumf %134, %135 : vector<32x64xf32>
    %137 = arith.truncf %136 : vector<32x64xf32> to vector<32x64xbf16>
    %c0_45 = arith.constant 0 : index
    %c0_46 = arith.constant 0 : index
    %138 = vector.load %arg10[%c0_45, %c0_46] : memref<64x32xbf16, #tpu.memory_space<vmem>>, vector<64x32xbf16>
    %cst_47 = arith.constant dense<0.000000e+00> : vector<32x32xf32>
    %139 = tpu.matmul %137, %138, %cst_47 {dimension_numbers = #tpu.dot_dimension_numbers<[1], [0], [0], [1], [0, 0, 1, 1], [], []>} : vector<32x64xbf16>, vector<64x32xbf16>, vector<32x32xf32> -> vector<32x32xf32>
    %c0_48 = arith.constant 0 : index
    %c0_49 = arith.constant 0 : index
    %140 = vector.load %arg11[%c0_48, %c0_49] : memref<1x32xf32, #tpu.memory_space<vmem>>, vector<1x32xf32>
    %141 = vector.broadcast %140 : vector<1x32xf32> to vector<32x32xf32>
    %142 = arith.addf %139, %141 : vector<32x32xf32>
    %143 = arith.addf %142, %114 : vector<32x32xf32>
    %c0_50 = arith.constant 0 : index
    %c0_51 = arith.constant 0 : index
    %144 = vector.load %arg12[%c0_50, %c0_51] : memref<1x32xf32, #tpu.memory_space<vmem>>, vector<1x32xf32>
    %c0_52 = arith.constant 0 : index
    %c0_53 = arith.constant 0 : index
    %145 = vector.load %arg13[%c0_52, %c0_53] : memref<1x32xf32, #tpu.memory_space<vmem>>, vector<1x32xf32>
    %cst_54 = arith.constant dense<0.000000e+00> : vector<32xf32>
    %146 = vector.multi_reduction <add>, %143, %cst_54 [1] : vector<32x32xf32> to vector<32xf32>
    %147 = vector.shape_cast %146 : vector<32xf32> to vector<32x1xf32>
    %cst_55 = arith.constant 3.200000e+01 : f32
    %148 = vector.broadcast %cst_55 : f32 to vector<32x1xf32>
    %149 = arith.divf %147, %148 : vector<32x1xf32>
    %150 = arith.mulf %143, %143 : vector<32x32xf32>
    %cst_56 = arith.constant dense<0.000000e+00> : vector<32xf32>
    %151 = vector.multi_reduction <add>, %150, %cst_56 [1] : vector<32x32xf32> to vector<32xf32>
    %152 = vector.shape_cast %151 : vector<32xf32> to vector<32x1xf32>
    %cst_57 = arith.constant 3.200000e+01 : f32
    %153 = vector.broadcast %cst_57 : f32 to vector<32x1xf32>
    %154 = arith.divf %152, %153 : vector<32x1xf32>
    %155 = arith.mulf %149, %149 : vector<32x1xf32>
    %156 = arith.subf %154, %155 : vector<32x1xf32>
    %cst_58 = arith.constant 0.000000e+00 : f32
    %157 = vector.broadcast %cst_58 : f32 to vector<32x1xf32>
    %158 = arith.maximumf %156, %157 : vector<32x1xf32>
    %159 = vector.broadcast %149 : vector<32x1xf32> to vector<32x32xf32>
    %160 = arith.subf %143, %159 : vector<32x32xf32>
    %cst_59 = arith.constant 9.99999974E-6 : f32
    %161 = vector.broadcast %cst_59 : f32 to vector<32x1xf32>
    %162 = arith.addf %158, %161 : vector<32x1xf32>
    %163 = math.rsqrt %162 : vector<32x1xf32>
    %164 = vector.broadcast %163 : vector<32x1xf32> to vector<32x32xf32>
    %165 = arith.mulf %160, %164 : vector<32x32xf32>
    %166 = vector.broadcast %144 : vector<1x32xf32> to vector<32x32xf32>
    %167 = arith.mulf %165, %166 : vector<32x32xf32>
    %168 = vector.broadcast %145 : vector<1x32xf32> to vector<32x32xf32>
    %169 = arith.addf %167, %168 : vector<32x32xf32>
    %170 = vector.broadcast %27 : vector<32x1xf32> to vector<32x32xf32>
    %171 = arith.mulf %169, %170 : vector<32x32xf32>
    %172 = vector.shape_cast %171 : vector<32x32xf32> to vector<2x16x32xf32>
    %c0_60 = arith.constant 0 : index
    %c0_61 = arith.constant 0 : index
    %c0_62 = arith.constant 0 : index
    %173 = vector.load %arg14[%c0_60, %c0_61, %c0_62] : memref<2x16x32xf32, #tpu.memory_space<vmem>>, vector<2x16x32xf32>
    tpu.vector_store %arg14[%c0_60, %c0_61, %c0_62], %172 {strides = array<i32>} : memref<2x16x32xf32, #tpu.memory_space<vmem>>, vector<2x16x32xf32>,
    return
  }
}

module attributes {stable_mosaic.version = 11 : i64} {
  func.func @_vp_kernel(%arg0: memref<2xi32, #tpu.memory_space<smem>>, %arg1: memref<2x8x32xf32, #tpu.memory_space<vmem>>, %arg2: memref<96x32xbf16, #tpu.memory_space<vmem>>, %arg3: memref<1x32xf32, #tpu.memory_space<vmem>>, %arg4: memref<1x32xf32, #tpu.memory_space<vmem>>, %arg5: memref<1x32xf32, #tpu.memory_space<vmem>>, %arg6: memref<96x32xbf16, #tpu.memory_space<vmem>>, %arg7: memref<1x32xf32, #tpu.memory_space<vmem>>, %arg8: memref<1x32xf32, #tpu.memory_space<vmem>>, %arg9: memref<1x32xf32, #tpu.memory_space<vmem>>, %arg10: memref<1x32xf32, #tpu.memory_space<vmem>>, %arg11: memref<1x1xf32, #tpu.memory_space<vmem>>, %arg12: memref<2x8x1xf32, #tpu.memory_space<vmem>>) attributes {dimension_semantics = [], scalar_prefetch = 0 : i64, scratch_operands = 0 : i64, tpu.core_type = #tpu.core_type<tc>} {
    %c0 = arith.constant 0 : index
    %0 = memref.load %arg0[%c0] : memref<2xi32, #tpu.memory_space<smem>>
    %1 = tpu.iota {dimensions = array<i32: 0>} : vector<8x1xi32>
    %2 = vector.broadcast %0 : i32 to vector<8x1xi32>
    %3 = arith.cmpi slt, %1, %2 : vector<8x1xi32>
    %4 = arith.extui %3 : vector<8x1xi1> to vector<8x1xi32>
    %5 = arith.sitofp %4 : vector<8x1xi32> to vector<8x1xf32>
    %c1 = arith.constant 1 : index
    %6 = memref.load %arg0[%c1] : memref<2xi32, #tpu.memory_space<smem>>
    %7 = tpu.iota {dimensions = array<i32: 0>} : vector<8x1xi32>
    %8 = vector.broadcast %6 : i32 to vector<8x1xi32>
    %9 = arith.cmpi slt, %7, %8 : vector<8x1xi32>
    %10 = arith.extui %9 : vector<8x1xi1> to vector<8x1xi32>
    %11 = arith.sitofp %10 : vector<8x1xi32> to vector<8x1xf32>
    %12 = tpu.concatenate %5, %11 in 0 : vector<8x1xf32>, vector<8x1xf32> -> vector<16x1xf32>
    %c0_0 = arith.constant 0 : index
    %c0_1 = arith.constant 0 : index
    %c0_2 = arith.constant 0 : index
    %13 = vector.load %arg1[%c0_0, %c0_1, %c0_2] : memref<2x8x32xf32, #tpu.memory_space<vmem>>, vector<2x8x32xf32>
    %cst = arith.constant 0.000000e+00 : f32
    %14 = vector.broadcast %cst : f32 to vector<2x1x32xf32>
    %15 = tpu.concatenate %14, %13, %14 in 1 : vector<2x1x32xf32>, vector<2x8x32xf32>, vector<2x1x32xf32> -> vector<2x10x32xf32>
    %16 = vector.extract_strided_slice %15 {offsets = [0, 0, 0], sizes = [2, 8, 32], strides = [1, 1, 1]} : vector<2x10x32xf32> to vector<2x8x32xf32>
    %17 = vector.extract_strided_slice %15 {offsets = [0, 1, 0], sizes = [2, 8, 32], strides = [1, 1, 1]} : vector<2x10x32xf32> to vector<2x8x32xf32>
    %18 = vector.extract_strided_slice %15 {offsets = [0, 2, 0], sizes = [2, 8, 32], strides = [1, 1, 1]} : vector<2x10x32xf32> to vector<2x8x32xf32>
    %19 = tpu.concatenate %16, %17, %18 in 2 : vector<2x8x32xf32>, vector<2x8x32xf32>, vector<2x8x32xf32> -> vector<2x8x96xf32>
    %20 = vector.shape_cast %19 : vector<2x8x96xf32> to vector<16x96xf32>
    %21 = arith.truncf %20 : vector<16x96xf32> to vector<16x96xbf16>
    %c0_3 = arith.constant 0 : index
    %c0_4 = arith.constant 0 : index
    %22 = vector.load %arg2[%c0_3, %c0_4] : memref<96x32xbf16, #tpu.memory_space<vmem>>, vector<96x32xbf16>
    %cst_5 = arith.constant dense<0.000000e+00> : vector<16x32xf32>
    %23 = tpu.matmul %21, %22, %cst_5 {dimension_numbers = #tpu.dot_dimension_numbers<[1], [0], [0], [1], [0, 0, 1, 1], [], []>} : vector<16x96xbf16>, vector<96x32xbf16>, vector<16x32xf32> -> vector<16x32xf32>
    %c0_6 = arith.constant 0 : index
    %c0_7 = arith.constant 0 : index
    %24 = vector.load %arg3[%c0_6, %c0_7] : memref<1x32xf32, #tpu.memory_space<vmem>>, vector<1x32xf32>
    %25 = vector.broadcast %24 : vector<1x32xf32> to vector<16x32xf32>
    %26 = arith.addf %23, %25 : vector<16x32xf32>
    %cst_8 = arith.constant 0.000000e+00 : f32
    %27 = vector.broadcast %cst_8 : f32 to vector<16x32xf32>
    %28 = arith.maximumf %26, %27 : vector<16x32xf32>
    %c0_9 = arith.constant 0 : index
    %c0_10 = arith.constant 0 : index
    %29 = vector.load %arg4[%c0_9, %c0_10] : memref<1x32xf32, #tpu.memory_space<vmem>>, vector<1x32xf32>
    %c0_11 = arith.constant 0 : index
    %c0_12 = arith.constant 0 : index
    %30 = vector.load %arg5[%c0_11, %c0_12] : memref<1x32xf32, #tpu.memory_space<vmem>>, vector<1x32xf32>
    %cst_13 = arith.constant dense<0.000000e+00> : vector<16xf32>
    %31 = vector.multi_reduction <add>, %28, %cst_13 [1] : vector<16x32xf32> to vector<16xf32>
    %32 = vector.shape_cast %31 : vector<16xf32> to vector<16x1xf32>
    %cst_14 = arith.constant 3.200000e+01 : f32
    %33 = vector.broadcast %cst_14 : f32 to vector<16x1xf32>
    %34 = arith.divf %32, %33 : vector<16x1xf32>
    %35 = arith.mulf %28, %28 : vector<16x32xf32>
    %cst_15 = arith.constant dense<0.000000e+00> : vector<16xf32>
    %36 = vector.multi_reduction <add>, %35, %cst_15 [1] : vector<16x32xf32> to vector<16xf32>
    %37 = vector.shape_cast %36 : vector<16xf32> to vector<16x1xf32>
    %cst_16 = arith.constant 3.200000e+01 : f32
    %38 = vector.broadcast %cst_16 : f32 to vector<16x1xf32>
    %39 = arith.divf %37, %38 : vector<16x1xf32>
    %40 = arith.mulf %34, %34 : vector<16x1xf32>
    %41 = arith.subf %39, %40 : vector<16x1xf32>
    %cst_17 = arith.constant 0.000000e+00 : f32
    %42 = vector.broadcast %cst_17 : f32 to vector<16x1xf32>
    %43 = arith.maximumf %41, %42 : vector<16x1xf32>
    %44 = vector.broadcast %34 : vector<16x1xf32> to vector<16x32xf32>
    %45 = arith.subf %28, %44 : vector<16x32xf32>
    %cst_18 = arith.constant 9.99999974E-6 : f32
    %46 = vector.broadcast %cst_18 : f32 to vector<16x1xf32>
    %47 = arith.addf %43, %46 : vector<16x1xf32>
    %48 = math.rsqrt %47 : vector<16x1xf32>
    %49 = vector.broadcast %48 : vector<16x1xf32> to vector<16x32xf32>
    %50 = arith.mulf %45, %49 : vector<16x32xf32>
    %51 = vector.broadcast %29 : vector<1x32xf32> to vector<16x32xf32>
    %52 = arith.mulf %50, %51 : vector<16x32xf32>
    %53 = vector.broadcast %30 : vector<1x32xf32> to vector<16x32xf32>
    %54 = arith.addf %52, %53 : vector<16x32xf32>
    %55 = vector.shape_cast %54 : vector<16x32xf32> to vector<2x8x32xf32>
    %cst_19 = arith.constant 0.000000e+00 : f32
    %56 = vector.broadcast %cst_19 : f32 to vector<2x1x32xf32>
    %57 = tpu.concatenate %56, %55, %56 in 1 : vector<2x1x32xf32>, vector<2x8x32xf32>, vector<2x1x32xf32> -> vector<2x10x32xf32>
    %58 = vector.extract_strided_slice %57 {offsets = [0, 0, 0], sizes = [2, 8, 32], strides = [1, 1, 1]} : vector<2x10x32xf32> to vector<2x8x32xf32>
    %59 = vector.extract_strided_slice %57 {offsets = [0, 1, 0], sizes = [2, 8, 32], strides = [1, 1, 1]} : vector<2x10x32xf32> to vector<2x8x32xf32>
    %60 = vector.extract_strided_slice %57 {offsets = [0, 2, 0], sizes = [2, 8, 32], strides = [1, 1, 1]} : vector<2x10x32xf32> to vector<2x8x32xf32>
    %61 = tpu.concatenate %58, %59, %60 in 2 : vector<2x8x32xf32>, vector<2x8x32xf32>, vector<2x8x32xf32> -> vector<2x8x96xf32>
    %62 = vector.shape_cast %61 : vector<2x8x96xf32> to vector<16x96xf32>
    %63 = arith.truncf %62 : vector<16x96xf32> to vector<16x96xbf16>
    %c0_20 = arith.constant 0 : index
    %c0_21 = arith.constant 0 : index
    %64 = vector.load %arg6[%c0_20, %c0_21] : memref<96x32xbf16, #tpu.memory_space<vmem>>, vector<96x32xbf16>
    %cst_22 = arith.constant dense<0.000000e+00> : vector<16x32xf32>
    %65 = tpu.matmul %63, %64, %cst_22 {dimension_numbers = #tpu.dot_dimension_numbers<[1], [0], [0], [1], [0, 0, 1, 1], [], []>} : vector<16x96xbf16>, vector<96x32xbf16>, vector<16x32xf32> -> vector<16x32xf32>
    %c0_23 = arith.constant 0 : index
    %c0_24 = arith.constant 0 : index
    %66 = vector.load %arg7[%c0_23, %c0_24] : memref<1x32xf32, #tpu.memory_space<vmem>>, vector<1x32xf32>
    %67 = vector.broadcast %66 : vector<1x32xf32> to vector<16x32xf32>
    %68 = arith.addf %65, %67 : vector<16x32xf32>
    %cst_25 = arith.constant 0.000000e+00 : f32
    %69 = vector.broadcast %cst_25 : f32 to vector<16x32xf32>
    %70 = arith.maximumf %68, %69 : vector<16x32xf32>
    %c0_26 = arith.constant 0 : index
    %c0_27 = arith.constant 0 : index
    %71 = vector.load %arg8[%c0_26, %c0_27] : memref<1x32xf32, #tpu.memory_space<vmem>>, vector<1x32xf32>
    %c0_28 = arith.constant 0 : index
    %c0_29 = arith.constant 0 : index
    %72 = vector.load %arg9[%c0_28, %c0_29] : memref<1x32xf32, #tpu.memory_space<vmem>>, vector<1x32xf32>
    %cst_30 = arith.constant dense<0.000000e+00> : vector<16xf32>
    %73 = vector.multi_reduction <add>, %70, %cst_30 [1] : vector<16x32xf32> to vector<16xf32>
    %74 = vector.shape_cast %73 : vector<16xf32> to vector<16x1xf32>
    %cst_31 = arith.constant 3.200000e+01 : f32
    %75 = vector.broadcast %cst_31 : f32 to vector<16x1xf32>
    %76 = arith.divf %74, %75 : vector<16x1xf32>
    %77 = arith.mulf %70, %70 : vector<16x32xf32>
    %cst_32 = arith.constant dense<0.000000e+00> : vector<16xf32>
    %78 = vector.multi_reduction <add>, %77, %cst_32 [1] : vector<16x32xf32> to vector<16xf32>
    %79 = vector.shape_cast %78 : vector<16xf32> to vector<16x1xf32>
    %cst_33 = arith.constant 3.200000e+01 : f32
    %80 = vector.broadcast %cst_33 : f32 to vector<16x1xf32>
    %81 = arith.divf %79, %80 : vector<16x1xf32>
    %82 = arith.mulf %76, %76 : vector<16x1xf32>
    %83 = arith.subf %81, %82 : vector<16x1xf32>
    %cst_34 = arith.constant 0.000000e+00 : f32
    %84 = vector.broadcast %cst_34 : f32 to vector<16x1xf32>
    %85 = arith.maximumf %83, %84 : vector<16x1xf32>
    %86 = vector.broadcast %76 : vector<16x1xf32> to vector<16x32xf32>
    %87 = arith.subf %70, %86 : vector<16x32xf32>
    %cst_35 = arith.constant 9.99999974E-6 : f32
    %88 = vector.broadcast %cst_35 : f32 to vector<16x1xf32>
    %89 = arith.addf %85, %88 : vector<16x1xf32>
    %90 = math.rsqrt %89 : vector<16x1xf32>
    %91 = vector.broadcast %90 : vector<16x1xf32> to vector<16x32xf32>
    %92 = arith.mulf %87, %91 : vector<16x32xf32>
    %93 = vector.broadcast %71 : vector<1x32xf32> to vector<16x32xf32>
    %94 = arith.mulf %92, %93 : vector<16x32xf32>
    %95 = vector.broadcast %72 : vector<1x32xf32> to vector<16x32xf32>
    %96 = arith.addf %94, %95 : vector<16x32xf32>
    %c0_36 = arith.constant 0 : index
    %c0_37 = arith.constant 0 : index
    %97 = vector.load %arg10[%c0_36, %c0_37] : memref<1x32xf32, #tpu.memory_space<vmem>>, vector<1x32xf32>
    %98 = vector.broadcast %97 : vector<1x32xf32> to vector<16x32xf32>
    %99 = arith.mulf %96, %98 : vector<16x32xf32>
    %cst_38 = arith.constant dense<0.000000e+00> : vector<16xf32>
    %100 = vector.multi_reduction <add>, %99, %cst_38 [1] : vector<16x32xf32> to vector<16xf32>
    %101 = vector.shape_cast %100 : vector<16xf32> to vector<16x1xf32>
    %c0_39 = arith.constant 0 : index
    %c0_40 = arith.constant 0 : index
    %102 = vector.load %arg11[%c0_39, %c0_40] : memref<1x1xf32, #tpu.memory_space<vmem>>, vector<1x1xf32>
    %103 = vector.broadcast %102 : vector<1x1xf32> to vector<16x1xf32>
    %104 = arith.addf %101, %103 : vector<16x1xf32>
    %105 = arith.mulf %104, %12 : vector<16x1xf32>
    %106 = vector.shape_cast %105 : vector<16x1xf32> to vector<2x8x1xf32>
    %c0_41 = arith.constant 0 : index
    %c0_42 = arith.constant 0 : index
    %c0_43 = arith.constant 0 : index
    %107 = vector.load %arg12[%c0_41, %c0_42, %c0_43] : memref<2x8x1xf32, #tpu.memory_space<vmem>>, vector<2x8x1xf32>
    tpu.vector_store %arg12[%c0_41, %c0_42, %c0_43], %106 {strides = array<i32>} : memref<2x8x1xf32, #tpu.memory_space<vmem>>, vector<2x8x1xf32>,
    return
  }
}

module attributes {stable_mosaic.version = 11 : i64} {
  func.func @_mel_postnet_kernel(%arg0: memref<2x16x32xf32, #tpu.memory_space<vmem>>, %arg1: memref<32x16xbf16, #tpu.memory_space<vmem>>, %arg2: memref<1x16xf32, #tpu.memory_space<vmem>>, %arg3: memref<80x32xbf16, #tpu.memory_space<vmem>>, %arg4: memref<1x32xf32, #tpu.memory_space<vmem>>, %arg5: memref<160x32xbf16, #tpu.memory_space<vmem>>, %arg6: memref<1x32xf32, #tpu.memory_space<vmem>>, %arg7: memref<160x32xbf16, #tpu.memory_space<vmem>>, %arg8: memref<1x32xf32, #tpu.memory_space<vmem>>, %arg9: memref<160x32xbf16, #tpu.memory_space<vmem>>, %arg10: memref<1x32xf32, #tpu.memory_space<vmem>>, %arg11: memref<160x16xbf16, #tpu.memory_space<vmem>>, %arg12: memref<1x16xf32, #tpu.memory_space<vmem>>, %arg13: memref<2x16x16xf32, #tpu.memory_space<vmem>>, %arg14: memref<2x16x16xf32, #tpu.memory_space<vmem>>) attributes {dimension_semantics = [], scalar_prefetch = 0 : i64, scratch_operands = 0 : i64, tpu.core_type = #tpu.core_type<tc>} {
    %c0 = arith.constant 0 : index
    %c0_0 = arith.constant 0 : index
    %c0_1 = arith.constant 0 : index
    %0 = vector.load %arg0[%c0, %c0_0, %c0_1] : memref<2x16x32xf32, #tpu.memory_space<vmem>>, vector<2x16x32xf32>
    %1 = vector.shape_cast %0 : vector<2x16x32xf32> to vector<32x32xf32>
    %2 = arith.truncf %1 : vector<32x32xf32> to vector<32x32xbf16>
    %c0_2 = arith.constant 0 : index
    %c0_3 = arith.constant 0 : index
    %3 = vector.load %arg1[%c0_2, %c0_3] : memref<32x16xbf16, #tpu.memory_space<vmem>>, vector<32x16xbf16>
    %cst = arith.constant dense<0.000000e+00> : vector<32x16xf32>
    %4 = tpu.matmul %2, %3, %cst {dimension_numbers = #tpu.dot_dimension_numbers<[1], [0], [0], [1], [0, 0, 1, 1], [], []>} : vector<32x32xbf16>, vector<32x16xbf16>, vector<32x16xf32> -> vector<32x16xf32>
    %c0_4 = arith.constant 0 : index
    %c0_5 = arith.constant 0 : index
    %5 = vector.load %arg2[%c0_4, %c0_5] : memref<1x16xf32, #tpu.memory_space<vmem>>, vector<1x16xf32>
    %6 = vector.broadcast %5 : vector<1x16xf32> to vector<32x16xf32>
    %7 = arith.addf %4, %6 : vector<32x16xf32>
    %8 = vector.shape_cast %7 : vector<32x16xf32> to vector<2x16x16xf32>
    %c0_6 = arith.constant 0 : index
    %c0_7 = arith.constant 0 : index
    %c0_8 = arith.constant 0 : index
    %9 = vector.load %arg13[%c0_6, %c0_7, %c0_8] : memref<2x16x16xf32, #tpu.memory_space<vmem>>, vector<2x16x16xf32>
    tpu.vector_store %arg13[%c0_6, %c0_7, %c0_8], %8 {strides = array<i32>} : memref<2x16x16xf32, #tpu.memory_space<vmem>>, vector<2x16x16xf32>,
    %10 = vector.shape_cast %7 : vector<32x16xf32> to vector<2x16x16xf32>
    %cst_9 = arith.constant 0.000000e+00 : f32
    %11 = vector.broadcast %cst_9 : f32 to vector<2x2x16xf32>
    %12 = tpu.concatenate %11, %10, %11 in 1 : vector<2x2x16xf32>, vector<2x16x16xf32>, vector<2x2x16xf32> -> vector<2x20x16xf32>
    %13 = vector.extract_strided_slice %12 {offsets = [0, 0, 0], sizes = [2, 16, 16], strides = [1, 1, 1]} : vector<2x20x16xf32> to vector<2x16x16xf32>
    %14 = vector.extract_strided_slice %12 {offsets = [0, 1, 0], sizes = [2, 16, 16], strides = [1, 1, 1]} : vector<2x20x16xf32> to vector<2x16x16xf32>
    %15 = vector.extract_strided_slice %12 {offsets = [0, 2, 0], sizes = [2, 16, 16], strides = [1, 1, 1]} : vector<2x20x16xf32> to vector<2x16x16xf32>
    %16 = vector.extract_strided_slice %12 {offsets = [0, 3, 0], sizes = [2, 16, 16], strides = [1, 1, 1]} : vector<2x20x16xf32> to vector<2x16x16xf32>
    %17 = vector.extract_strided_slice %12 {offsets = [0, 4, 0], sizes = [2, 16, 16], strides = [1, 1, 1]} : vector<2x20x16xf32> to vector<2x16x16xf32>
    %18 = tpu.concatenate %13, %14, %15, %16, %17 in 2 : vector<2x16x16xf32>, vector<2x16x16xf32>, vector<2x16x16xf32>, vector<2x16x16xf32>, vector<2x16x16xf32> -> vector<2x16x80xf32>
    %19 = vector.shape_cast %18 : vector<2x16x80xf32> to vector<32x80xf32>
    %20 = arith.truncf %19 : vector<32x80xf32> to vector<32x80xbf16>
    %c0_10 = arith.constant 0 : index
    %c0_11 = arith.constant 0 : index
    %21 = vector.load %arg3[%c0_10, %c0_11] : memref<80x32xbf16, #tpu.memory_space<vmem>>, vector<80x32xbf16>
    %cst_12 = arith.constant dense<0.000000e+00> : vector<32x32xf32>
    %22 = tpu.matmul %20, %21, %cst_12 {dimension_numbers = #tpu.dot_dimension_numbers<[1], [0], [0], [1], [0, 0, 1, 1], [], []>} : vector<32x80xbf16>, vector<80x32xbf16>, vector<32x32xf32> -> vector<32x32xf32>
    %c0_13 = arith.constant 0 : index
    %c0_14 = arith.constant 0 : index
    %23 = vector.load %arg4[%c0_13, %c0_14] : memref<1x32xf32, #tpu.memory_space<vmem>>, vector<1x32xf32>
    %24 = vector.broadcast %23 : vector<1x32xf32> to vector<32x32xf32>
    %25 = arith.addf %22, %24 : vector<32x32xf32>
    %26 = math.tanh %25 : vector<32x32xf32>
    %27 = vector.shape_cast %26 : vector<32x32xf32> to vector<2x16x32xf32>
    %cst_15 = arith.constant 0.000000e+00 : f32
    %28 = vector.broadcast %cst_15 : f32 to vector<2x2x32xf32>
    %29 = tpu.concatenate %28, %27, %28 in 1 : vector<2x2x32xf32>, vector<2x16x32xf32>, vector<2x2x32xf32> -> vector<2x20x32xf32>
    %30 = vector.extract_strided_slice %29 {offsets = [0, 0, 0], sizes = [2, 16, 32], strides = [1, 1, 1]} : vector<2x20x32xf32> to vector<2x16x32xf32>
    %31 = vector.extract_strided_slice %29 {offsets = [0, 1, 0], sizes = [2, 16, 32], strides = [1, 1, 1]} : vector<2x20x32xf32> to vector<2x16x32xf32>
    %32 = vector.extract_strided_slice %29 {offsets = [0, 2, 0], sizes = [2, 16, 32], strides = [1, 1, 1]} : vector<2x20x32xf32> to vector<2x16x32xf32>
    %33 = vector.extract_strided_slice %29 {offsets = [0, 3, 0], sizes = [2, 16, 32], strides = [1, 1, 1]} : vector<2x20x32xf32> to vector<2x16x32xf32>
    %34 = vector.extract_strided_slice %29 {offsets = [0, 4, 0], sizes = [2, 16, 32], strides = [1, 1, 1]} : vector<2x20x32xf32> to vector<2x16x32xf32>
    %35 = tpu.concatenate %30, %31, %32, %33, %34 in 2 : vector<2x16x32xf32>, vector<2x16x32xf32>, vector<2x16x32xf32>, vector<2x16x32xf32>, vector<2x16x32xf32> -> vector<2x16x160xf32>
    %36 = vector.shape_cast %35 : vector<2x16x160xf32> to vector<32x160xf32>
    %37 = arith.truncf %36 : vector<32x160xf32> to vector<32x160xbf16>
    %c0_16 = arith.constant 0 : index
    %c0_17 = arith.constant 0 : index
    %38 = vector.load %arg5[%c0_16, %c0_17] : memref<160x32xbf16, #tpu.memory_space<vmem>>, vector<160x32xbf16>
    %cst_18 = arith.constant dense<0.000000e+00> : vector<32x32xf32>
    %39 = tpu.matmul %37, %38, %cst_18 {dimension_numbers = #tpu.dot_dimension_numbers<[1], [0], [0], [1], [0, 0, 1, 1], [], []>} : vector<32x160xbf16>, vector<160x32xbf16>, vector<32x32xf32> -> vector<32x32xf32>
    %c0_19 = arith.constant 0 : index
    %c0_20 = arith.constant 0 : index
    %40 = vector.load %arg6[%c0_19, %c0_20] : memref<1x32xf32, #tpu.memory_space<vmem>>, vector<1x32xf32>
    %41 = vector.broadcast %40 : vector<1x32xf32> to vector<32x32xf32>
    %42 = arith.addf %39, %41 : vector<32x32xf32>
    %43 = math.tanh %42 : vector<32x32xf32>
    %44 = vector.shape_cast %43 : vector<32x32xf32> to vector<2x16x32xf32>
    %cst_21 = arith.constant 0.000000e+00 : f32
    %45 = vector.broadcast %cst_21 : f32 to vector<2x2x32xf32>
    %46 = tpu.concatenate %45, %44, %45 in 1 : vector<2x2x32xf32>, vector<2x16x32xf32>, vector<2x2x32xf32> -> vector<2x20x32xf32>
    %47 = vector.extract_strided_slice %46 {offsets = [0, 0, 0], sizes = [2, 16, 32], strides = [1, 1, 1]} : vector<2x20x32xf32> to vector<2x16x32xf32>
    %48 = vector.extract_strided_slice %46 {offsets = [0, 1, 0], sizes = [2, 16, 32], strides = [1, 1, 1]} : vector<2x20x32xf32> to vector<2x16x32xf32>
    %49 = vector.extract_strided_slice %46 {offsets = [0, 2, 0], sizes = [2, 16, 32], strides = [1, 1, 1]} : vector<2x20x32xf32> to vector<2x16x32xf32>
    %50 = vector.extract_strided_slice %46 {offsets = [0, 3, 0], sizes = [2, 16, 32], strides = [1, 1, 1]} : vector<2x20x32xf32> to vector<2x16x32xf32>
    %51 = vector.extract_strided_slice %46 {offsets = [0, 4, 0], sizes = [2, 16, 32], strides = [1, 1, 1]} : vector<2x20x32xf32> to vector<2x16x32xf32>
    %52 = tpu.concatenate %47, %48, %49, %50, %51 in 2 : vector<2x16x32xf32>, vector<2x16x32xf32>, vector<2x16x32xf32>, vector<2x16x32xf32>, vector<2x16x32xf32> -> vector<2x16x160xf32>
    %53 = vector.shape_cast %52 : vector<2x16x160xf32> to vector<32x160xf32>
    %54 = arith.truncf %53 : vector<32x160xf32> to vector<32x160xbf16>
    %c0_22 = arith.constant 0 : index
    %c0_23 = arith.constant 0 : index
    %55 = vector.load %arg7[%c0_22, %c0_23] : memref<160x32xbf16, #tpu.memory_space<vmem>>, vector<160x32xbf16>
    %cst_24 = arith.constant dense<0.000000e+00> : vector<32x32xf32>
    %56 = tpu.matmul %54, %55, %cst_24 {dimension_numbers = #tpu.dot_dimension_numbers<[1], [0], [0], [1], [0, 0, 1, 1], [], []>} : vector<32x160xbf16>, vector<160x32xbf16>, vector<32x32xf32> -> vector<32x32xf32>
    %c0_25 = arith.constant 0 : index
    %c0_26 = arith.constant 0 : index
    %57 = vector.load %arg8[%c0_25, %c0_26] : memref<1x32xf32, #tpu.memory_space<vmem>>, vector<1x32xf32>
    %58 = vector.broadcast %57 : vector<1x32xf32> to vector<32x32xf32>
    %59 = arith.addf %56, %58 : vector<32x32xf32>
    %60 = math.tanh %59 : vector<32x32xf32>
    %61 = vector.shape_cast %60 : vector<32x32xf32> to vector<2x16x32xf32>
    %cst_27 = arith.constant 0.000000e+00 : f32
    %62 = vector.broadcast %cst_27 : f32 to vector<2x2x32xf32>
    %63 = tpu.concatenate %62, %61, %62 in 1 : vector<2x2x32xf32>, vector<2x16x32xf32>, vector<2x2x32xf32> -> vector<2x20x32xf32>
    %64 = vector.extract_strided_slice %63 {offsets = [0, 0, 0], sizes = [2, 16, 32], strides = [1, 1, 1]} : vector<2x20x32xf32> to vector<2x16x32xf32>
    %65 = vector.extract_strided_slice %63 {offsets = [0, 1, 0], sizes = [2, 16, 32], strides = [1, 1, 1]} : vector<2x20x32xf32> to vector<2x16x32xf32>
    %66 = vector.extract_strided_slice %63 {offsets = [0, 2, 0], sizes = [2, 16, 32], strides = [1, 1, 1]} : vector<2x20x32xf32> to vector<2x16x32xf32>
    %67 = vector.extract_strided_slice %63 {offsets = [0, 3, 0], sizes = [2, 16, 32], strides = [1, 1, 1]} : vector<2x20x32xf32> to vector<2x16x32xf32>
    %68 = vector.extract_strided_slice %63 {offsets = [0, 4, 0], sizes = [2, 16, 32], strides = [1, 1, 1]} : vector<2x20x32xf32> to vector<2x16x32xf32>
    %69 = tpu.concatenate %64, %65, %66, %67, %68 in 2 : vector<2x16x32xf32>, vector<2x16x32xf32>, vector<2x16x32xf32>, vector<2x16x32xf32>, vector<2x16x32xf32> -> vector<2x16x160xf32>
    %70 = vector.shape_cast %69 : vector<2x16x160xf32> to vector<32x160xf32>
    %71 = arith.truncf %70 : vector<32x160xf32> to vector<32x160xbf16>
    %c0_28 = arith.constant 0 : index
    %c0_29 = arith.constant 0 : index
    %72 = vector.load %arg9[%c0_28, %c0_29] : memref<160x32xbf16, #tpu.memory_space<vmem>>, vector<160x32xbf16>
    %cst_30 = arith.constant dense<0.000000e+00> : vector<32x32xf32>
    %73 = tpu.matmul %71, %72, %cst_30 {dimension_numbers = #tpu.dot_dimension_numbers<[1], [0], [0], [1], [0, 0, 1, 1], [], []>} : vector<32x160xbf16>, vector<160x32xbf16>, vector<32x32xf32> -> vector<32x32xf32>
    %c0_31 = arith.constant 0 : index
    %c0_32 = arith.constant 0 : index
    %74 = vector.load %arg10[%c0_31, %c0_32] : memref<1x32xf32, #tpu.memory_space<vmem>>, vector<1x32xf32>
    %75 = vector.broadcast %74 : vector<1x32xf32> to vector<32x32xf32>
    %76 = arith.addf %73, %75 : vector<32x32xf32>
    %77 = math.tanh %76 : vector<32x32xf32>
    %78 = vector.shape_cast %77 : vector<32x32xf32> to vector<2x16x32xf32>
    %cst_33 = arith.constant 0.000000e+00 : f32
    %79 = vector.broadcast %cst_33 : f32 to vector<2x2x32xf32>
    %80 = tpu.concatenate %79, %78, %79 in 1 : vector<2x2x32xf32>, vector<2x16x32xf32>, vector<2x2x32xf32> -> vector<2x20x32xf32>
    %81 = vector.extract_strided_slice %80 {offsets = [0, 0, 0], sizes = [2, 16, 32], strides = [1, 1, 1]} : vector<2x20x32xf32> to vector<2x16x32xf32>
    %82 = vector.extract_strided_slice %80 {offsets = [0, 1, 0], sizes = [2, 16, 32], strides = [1, 1, 1]} : vector<2x20x32xf32> to vector<2x16x32xf32>
    %83 = vector.extract_strided_slice %80 {offsets = [0, 2, 0], sizes = [2, 16, 32], strides = [1, 1, 1]} : vector<2x20x32xf32> to vector<2x16x32xf32>
    %84 = vector.extract_strided_slice %80 {offsets = [0, 3, 0], sizes = [2, 16, 32], strides = [1, 1, 1]} : vector<2x20x32xf32> to vector<2x16x32xf32>
    %85 = vector.extract_strided_slice %80 {offsets = [0, 4, 0], sizes = [2, 16, 32], strides = [1, 1, 1]} : vector<2x20x32xf32> to vector<2x16x32xf32>
    %86 = tpu.concatenate %81, %82, %83, %84, %85 in 2 : vector<2x16x32xf32>, vector<2x16x32xf32>, vector<2x16x32xf32>, vector<2x16x32xf32>, vector<2x16x32xf32> -> vector<2x16x160xf32>
    %87 = vector.shape_cast %86 : vector<2x16x160xf32> to vector<32x160xf32>
    %88 = arith.truncf %87 : vector<32x160xf32> to vector<32x160xbf16>
    %c0_34 = arith.constant 0 : index
    %c0_35 = arith.constant 0 : index
    %89 = vector.load %arg11[%c0_34, %c0_35] : memref<160x16xbf16, #tpu.memory_space<vmem>>, vector<160x16xbf16>
    %cst_36 = arith.constant dense<0.000000e+00> : vector<32x16xf32>
    %90 = tpu.matmul %88, %89, %cst_36 {dimension_numbers = #tpu.dot_dimension_numbers<[1], [0], [0], [1], [0, 0, 1, 1], [], []>} : vector<32x160xbf16>, vector<160x16xbf16>, vector<32x16xf32> -> vector<32x16xf32>
    %c0_37 = arith.constant 0 : index
    %c0_38 = arith.constant 0 : index
    %91 = vector.load %arg12[%c0_37, %c0_38] : memref<1x16xf32, #tpu.memory_space<vmem>>, vector<1x16xf32>
    %92 = vector.broadcast %91 : vector<1x16xf32> to vector<32x16xf32>
    %93 = arith.addf %90, %92 : vector<32x16xf32>
    %94 = arith.addf %93, %7 : vector<32x16xf32>
    %95 = vector.shape_cast %94 : vector<32x16xf32> to vector<2x16x16xf32>
    %c0_39 = arith.constant 0 : index
    %c0_40 = arith.constant 0 : index
    %c0_41 = arith.constant 0 : index
    %96 = vector.load %arg14[%c0_39, %c0_40, %c0_41] : memref<2x16x16xf32, #tpu.memory_space<vmem>>, vector<2x16x16xf32>
    tpu.vector_store %arg14[%c0_39, %c0_40, %c0_41], %95 {strides = array<i32>} : memref<2x16x16xf32, #tpu.memory_space<vmem>>, vector<2x16x16xf32>,
    return
  }
}

module attributes {stable_mosaic.version = 11 : i64} {
  func.func @_vp_kernel(%arg0: memref<2xi32, #tpu.memory_space<smem>>, %arg1: memref<2x8x32xf32, #tpu.memory_space<vmem>>, %arg2: memref<96x32xbf16, #tpu.memory_space<vmem>>, %arg3: memref<1x32xf32, #tpu.memory_space<vmem>>, %arg4: memref<1x32xf32, #tpu.memory_space<vmem>>, %arg5: memref<1x32xf32, #tpu.memory_space<vmem>>, %arg6: memref<96x32xbf16, #tpu.memory_space<vmem>>, %arg7: memref<1x32xf32, #tpu.memory_space<vmem>>, %arg8: memref<1x32xf32, #tpu.memory_space<vmem>>, %arg9: memref<1x32xf32, #tpu.memory_space<vmem>>, %arg10: memref<1x32xf32, #tpu.memory_space<vmem>>, %arg11: memref<1x1xf32, #tpu.memory_space<vmem>>, %arg12: memref<96x32xbf16, #tpu.memory_space<vmem>>, %arg13: memref<1x32xf32, #tpu.memory_space<vmem>>, %arg14: memref<1x32xf32, #tpu.memory_space<vmem>>, %arg15: memref<1x32xf32, #tpu.memory_space<vmem>>, %arg16: memref<96x32xbf16, #tpu.memory_space<vmem>>, %arg17: memref<1x32xf32, #tpu.memory_space<vmem>>, %arg18: memref<1x32xf32, #tpu.memory_space<vmem>>, %arg19: memref<1x32xf32, #tpu.memory_space<vmem>>, %arg20: memref<1x32xf32, #tpu.memory_space<vmem>>, %arg21: memref<1x1xf32, #tpu.memory_space<vmem>>, %arg22: memref<2x8x2xf32, #tpu.memory_space<vmem>>) attributes {dimension_semantics = [], scalar_prefetch = 0 : i64, scratch_operands = 0 : i64, tpu.core_type = #tpu.core_type<tc>} {
    %c0 = arith.constant 0 : index
    %0 = memref.load %arg0[%c0] : memref<2xi32, #tpu.memory_space<smem>>
    %1 = tpu.iota {dimensions = array<i32: 0>} : vector<8x1xi32>
    %2 = vector.broadcast %0 : i32 to vector<8x1xi32>
    %3 = arith.cmpi slt, %1, %2 : vector<8x1xi32>
    %4 = arith.extui %3 : vector<8x1xi1> to vector<8x1xi32>
    %5 = arith.sitofp %4 : vector<8x1xi32> to vector<8x1xf32>
    %c1 = arith.constant 1 : index
    %6 = memref.load %arg0[%c1] : memref<2xi32, #tpu.memory_space<smem>>
    %7 = tpu.iota {dimensions = array<i32: 0>} : vector<8x1xi32>
    %8 = vector.broadcast %6 : i32 to vector<8x1xi32>
    %9 = arith.cmpi slt, %7, %8 : vector<8x1xi32>
    %10 = arith.extui %9 : vector<8x1xi1> to vector<8x1xi32>
    %11 = arith.sitofp %10 : vector<8x1xi32> to vector<8x1xf32>
    %12 = tpu.concatenate %5, %11 in 0 : vector<8x1xf32>, vector<8x1xf32> -> vector<16x1xf32>
    %c0_0 = arith.constant 0 : index
    %c0_1 = arith.constant 0 : index
    %c0_2 = arith.constant 0 : index
    %13 = vector.load %arg1[%c0_0, %c0_1, %c0_2] : memref<2x8x32xf32, #tpu.memory_space<vmem>>, vector<2x8x32xf32>
    %cst = arith.constant 0.000000e+00 : f32
    %14 = vector.broadcast %cst : f32 to vector<2x1x32xf32>
    %15 = tpu.concatenate %14, %13, %14 in 1 : vector<2x1x32xf32>, vector<2x8x32xf32>, vector<2x1x32xf32> -> vector<2x10x32xf32>
    %16 = vector.extract_strided_slice %15 {offsets = [0, 0, 0], sizes = [2, 8, 32], strides = [1, 1, 1]} : vector<2x10x32xf32> to vector<2x8x32xf32>
    %17 = vector.extract_strided_slice %15 {offsets = [0, 1, 0], sizes = [2, 8, 32], strides = [1, 1, 1]} : vector<2x10x32xf32> to vector<2x8x32xf32>
    %18 = vector.extract_strided_slice %15 {offsets = [0, 2, 0], sizes = [2, 8, 32], strides = [1, 1, 1]} : vector<2x10x32xf32> to vector<2x8x32xf32>
    %19 = tpu.concatenate %16, %17, %18 in 2 : vector<2x8x32xf32>, vector<2x8x32xf32>, vector<2x8x32xf32> -> vector<2x8x96xf32>
    %20 = vector.shape_cast %19 : vector<2x8x96xf32> to vector<16x96xf32>
    %21 = arith.truncf %20 : vector<16x96xf32> to vector<16x96xbf16>
    %c0_3 = arith.constant 0 : index
    %c0_4 = arith.constant 0 : index
    %22 = vector.load %arg2[%c0_3, %c0_4] : memref<96x32xbf16, #tpu.memory_space<vmem>>, vector<96x32xbf16>
    %cst_5 = arith.constant dense<0.000000e+00> : vector<16x32xf32>
    %23 = tpu.matmul %21, %22, %cst_5 {dimension_numbers = #tpu.dot_dimension_numbers<[1], [0], [0], [1], [0, 0, 1, 1], [], []>} : vector<16x96xbf16>, vector<96x32xbf16>, vector<16x32xf32> -> vector<16x32xf32>
    %c0_6 = arith.constant 0 : index
    %c0_7 = arith.constant 0 : index
    %24 = vector.load %arg3[%c0_6, %c0_7] : memref<1x32xf32, #tpu.memory_space<vmem>>, vector<1x32xf32>
    %25 = vector.broadcast %24 : vector<1x32xf32> to vector<16x32xf32>
    %26 = arith.addf %23, %25 : vector<16x32xf32>
    %cst_8 = arith.constant 0.000000e+00 : f32
    %27 = vector.broadcast %cst_8 : f32 to vector<16x32xf32>
    %28 = arith.maximumf %26, %27 : vector<16x32xf32>
    %c0_9 = arith.constant 0 : index
    %c0_10 = arith.constant 0 : index
    %29 = vector.load %arg4[%c0_9, %c0_10] : memref<1x32xf32, #tpu.memory_space<vmem>>, vector<1x32xf32>
    %c0_11 = arith.constant 0 : index
    %c0_12 = arith.constant 0 : index
    %30 = vector.load %arg5[%c0_11, %c0_12] : memref<1x32xf32, #tpu.memory_space<vmem>>, vector<1x32xf32>
    %cst_13 = arith.constant dense<0.000000e+00> : vector<16xf32>
    %31 = vector.multi_reduction <add>, %28, %cst_13 [1] : vector<16x32xf32> to vector<16xf32>
    %32 = vector.shape_cast %31 : vector<16xf32> to vector<16x1xf32>
    %cst_14 = arith.constant 3.200000e+01 : f32
    %33 = vector.broadcast %cst_14 : f32 to vector<16x1xf32>
    %34 = arith.divf %32, %33 : vector<16x1xf32>
    %35 = arith.mulf %28, %28 : vector<16x32xf32>
    %cst_15 = arith.constant dense<0.000000e+00> : vector<16xf32>
    %36 = vector.multi_reduction <add>, %35, %cst_15 [1] : vector<16x32xf32> to vector<16xf32>
    %37 = vector.shape_cast %36 : vector<16xf32> to vector<16x1xf32>
    %cst_16 = arith.constant 3.200000e+01 : f32
    %38 = vector.broadcast %cst_16 : f32 to vector<16x1xf32>
    %39 = arith.divf %37, %38 : vector<16x1xf32>
    %40 = arith.mulf %34, %34 : vector<16x1xf32>
    %41 = arith.subf %39, %40 : vector<16x1xf32>
    %cst_17 = arith.constant 0.000000e+00 : f32
    %42 = vector.broadcast %cst_17 : f32 to vector<16x1xf32>
    %43 = arith.maximumf %41, %42 : vector<16x1xf32>
    %44 = vector.broadcast %34 : vector<16x1xf32> to vector<16x32xf32>
    %45 = arith.subf %28, %44 : vector<16x32xf32>
    %cst_18 = arith.constant 9.99999974E-6 : f32
    %46 = vector.broadcast %cst_18 : f32 to vector<16x1xf32>
    %47 = arith.addf %43, %46 : vector<16x1xf32>
    %48 = math.rsqrt %47 : vector<16x1xf32>
    %49 = vector.broadcast %48 : vector<16x1xf32> to vector<16x32xf32>
    %50 = arith.mulf %45, %49 : vector<16x32xf32>
    %51 = vector.broadcast %29 : vector<1x32xf32> to vector<16x32xf32>
    %52 = arith.mulf %50, %51 : vector<16x32xf32>
    %53 = vector.broadcast %30 : vector<1x32xf32> to vector<16x32xf32>
    %54 = arith.addf %52, %53 : vector<16x32xf32>
    %55 = vector.shape_cast %54 : vector<16x32xf32> to vector<2x8x32xf32>
    %cst_19 = arith.constant 0.000000e+00 : f32
    %56 = vector.broadcast %cst_19 : f32 to vector<2x1x32xf32>
    %57 = tpu.concatenate %56, %55, %56 in 1 : vector<2x1x32xf32>, vector<2x8x32xf32>, vector<2x1x32xf32> -> vector<2x10x32xf32>
    %58 = vector.extract_strided_slice %57 {offsets = [0, 0, 0], sizes = [2, 8, 32], strides = [1, 1, 1]} : vector<2x10x32xf32> to vector<2x8x32xf32>
    %59 = vector.extract_strided_slice %57 {offsets = [0, 1, 0], sizes = [2, 8, 32], strides = [1, 1, 1]} : vector<2x10x32xf32> to vector<2x8x32xf32>
    %60 = vector.extract_strided_slice %57 {offsets = [0, 2, 0], sizes = [2, 8, 32], strides = [1, 1, 1]} : vector<2x10x32xf32> to vector<2x8x32xf32>
    %61 = tpu.concatenate %58, %59, %60 in 2 : vector<2x8x32xf32>, vector<2x8x32xf32>, vector<2x8x32xf32> -> vector<2x8x96xf32>
    %62 = vector.shape_cast %61 : vector<2x8x96xf32> to vector<16x96xf32>
    %63 = arith.truncf %62 : vector<16x96xf32> to vector<16x96xbf16>
    %c0_20 = arith.constant 0 : index
    %c0_21 = arith.constant 0 : index
    %64 = vector.load %arg6[%c0_20, %c0_21] : memref<96x32xbf16, #tpu.memory_space<vmem>>, vector<96x32xbf16>
    %cst_22 = arith.constant dense<0.000000e+00> : vector<16x32xf32>
    %65 = tpu.matmul %63, %64, %cst_22 {dimension_numbers = #tpu.dot_dimension_numbers<[1], [0], [0], [1], [0, 0, 1, 1], [], []>} : vector<16x96xbf16>, vector<96x32xbf16>, vector<16x32xf32> -> vector<16x32xf32>
    %c0_23 = arith.constant 0 : index
    %c0_24 = arith.constant 0 : index
    %66 = vector.load %arg7[%c0_23, %c0_24] : memref<1x32xf32, #tpu.memory_space<vmem>>, vector<1x32xf32>
    %67 = vector.broadcast %66 : vector<1x32xf32> to vector<16x32xf32>
    %68 = arith.addf %65, %67 : vector<16x32xf32>
    %cst_25 = arith.constant 0.000000e+00 : f32
    %69 = vector.broadcast %cst_25 : f32 to vector<16x32xf32>
    %70 = arith.maximumf %68, %69 : vector<16x32xf32>
    %c0_26 = arith.constant 0 : index
    %c0_27 = arith.constant 0 : index
    %71 = vector.load %arg8[%c0_26, %c0_27] : memref<1x32xf32, #tpu.memory_space<vmem>>, vector<1x32xf32>
    %c0_28 = arith.constant 0 : index
    %c0_29 = arith.constant 0 : index
    %72 = vector.load %arg9[%c0_28, %c0_29] : memref<1x32xf32, #tpu.memory_space<vmem>>, vector<1x32xf32>
    %cst_30 = arith.constant dense<0.000000e+00> : vector<16xf32>
    %73 = vector.multi_reduction <add>, %70, %cst_30 [1] : vector<16x32xf32> to vector<16xf32>
    %74 = vector.shape_cast %73 : vector<16xf32> to vector<16x1xf32>
    %cst_31 = arith.constant 3.200000e+01 : f32
    %75 = vector.broadcast %cst_31 : f32 to vector<16x1xf32>
    %76 = arith.divf %74, %75 : vector<16x1xf32>
    %77 = arith.mulf %70, %70 : vector<16x32xf32>
    %cst_32 = arith.constant dense<0.000000e+00> : vector<16xf32>
    %78 = vector.multi_reduction <add>, %77, %cst_32 [1] : vector<16x32xf32> to vector<16xf32>
    %79 = vector.shape_cast %78 : vector<16xf32> to vector<16x1xf32>
    %cst_33 = arith.constant 3.200000e+01 : f32
    %80 = vector.broadcast %cst_33 : f32 to vector<16x1xf32>
    %81 = arith.divf %79, %80 : vector<16x1xf32>
    %82 = arith.mulf %76, %76 : vector<16x1xf32>
    %83 = arith.subf %81, %82 : vector<16x1xf32>
    %cst_34 = arith.constant 0.000000e+00 : f32
    %84 = vector.broadcast %cst_34 : f32 to vector<16x1xf32>
    %85 = arith.maximumf %83, %84 : vector<16x1xf32>
    %86 = vector.broadcast %76 : vector<16x1xf32> to vector<16x32xf32>
    %87 = arith.subf %70, %86 : vector<16x32xf32>
    %cst_35 = arith.constant 9.99999974E-6 : f32
    %88 = vector.broadcast %cst_35 : f32 to vector<16x1xf32>
    %89 = arith.addf %85, %88 : vector<16x1xf32>
    %90 = math.rsqrt %89 : vector<16x1xf32>
    %91 = vector.broadcast %90 : vector<16x1xf32> to vector<16x32xf32>
    %92 = arith.mulf %87, %91 : vector<16x32xf32>
    %93 = vector.broadcast %71 : vector<1x32xf32> to vector<16x32xf32>
    %94 = arith.mulf %92, %93 : vector<16x32xf32>
    %95 = vector.broadcast %72 : vector<1x32xf32> to vector<16x32xf32>
    %96 = arith.addf %94, %95 : vector<16x32xf32>
    %c0_36 = arith.constant 0 : index
    %c0_37 = arith.constant 0 : index
    %97 = vector.load %arg10[%c0_36, %c0_37] : memref<1x32xf32, #tpu.memory_space<vmem>>, vector<1x32xf32>
    %98 = vector.broadcast %97 : vector<1x32xf32> to vector<16x32xf32>
    %99 = arith.mulf %96, %98 : vector<16x32xf32>
    %cst_38 = arith.constant dense<0.000000e+00> : vector<16xf32>
    %100 = vector.multi_reduction <add>, %99, %cst_38 [1] : vector<16x32xf32> to vector<16xf32>
    %101 = vector.shape_cast %100 : vector<16xf32> to vector<16x1xf32>
    %c0_39 = arith.constant 0 : index
    %c0_40 = arith.constant 0 : index
    %102 = vector.load %arg11[%c0_39, %c0_40] : memref<1x1xf32, #tpu.memory_space<vmem>>, vector<1x1xf32>
    %103 = vector.broadcast %102 : vector<1x1xf32> to vector<16x1xf32>
    %104 = arith.addf %101, %103 : vector<16x1xf32>
    %105 = arith.mulf %104, %12 : vector<16x1xf32>
    %c0_41 = arith.constant 0 : index
    %c0_42 = arith.constant 0 : index
    %106 = vector.load %arg12[%c0_41, %c0_42] : memref<96x32xbf16, #tpu.memory_space<vmem>>, vector<96x32xbf16>
    %cst_43 = arith.constant dense<0.000000e+00> : vector<16x32xf32>
    %107 = tpu.matmul %21, %106, %cst_43 {dimension_numbers = #tpu.dot_dimension_numbers<[1], [0], [0], [1], [0, 0, 1, 1], [], []>} : vector<16x96xbf16>, vector<96x32xbf16>, vector<16x32xf32> -> vector<16x32xf32>
    %c0_44 = arith.constant 0 : index
    %c0_45 = arith.constant 0 : index
    %108 = vector.load %arg13[%c0_44, %c0_45] : memref<1x32xf32, #tpu.memory_space<vmem>>, vector<1x32xf32>
    %109 = vector.broadcast %108 : vector<1x32xf32> to vector<16x32xf32>
    %110 = arith.addf %107, %109 : vector<16x32xf32>
    %cst_46 = arith.constant 0.000000e+00 : f32
    %111 = vector.broadcast %cst_46 : f32 to vector<16x32xf32>
    %112 = arith.maximumf %110, %111 : vector<16x32xf32>
    %c0_47 = arith.constant 0 : index
    %c0_48 = arith.constant 0 : index
    %113 = vector.load %arg14[%c0_47, %c0_48] : memref<1x32xf32, #tpu.memory_space<vmem>>, vector<1x32xf32>
    %c0_49 = arith.constant 0 : index
    %c0_50 = arith.constant 0 : index
    %114 = vector.load %arg15[%c0_49, %c0_50] : memref<1x32xf32, #tpu.memory_space<vmem>>, vector<1x32xf32>
    %cst_51 = arith.constant dense<0.000000e+00> : vector<16xf32>
    %115 = vector.multi_reduction <add>, %112, %cst_51 [1] : vector<16x32xf32> to vector<16xf32>
    %116 = vector.shape_cast %115 : vector<16xf32> to vector<16x1xf32>
    %cst_52 = arith.constant 3.200000e+01 : f32
    %117 = vector.broadcast %cst_52 : f32 to vector<16x1xf32>
    %118 = arith.divf %116, %117 : vector<16x1xf32>
    %119 = arith.mulf %112, %112 : vector<16x32xf32>
    %cst_53 = arith.constant dense<0.000000e+00> : vector<16xf32>
    %120 = vector.multi_reduction <add>, %119, %cst_53 [1] : vector<16x32xf32> to vector<16xf32>
    %121 = vector.shape_cast %120 : vector<16xf32> to vector<16x1xf32>
    %cst_54 = arith.constant 3.200000e+01 : f32
    %122 = vector.broadcast %cst_54 : f32 to vector<16x1xf32>
    %123 = arith.divf %121, %122 : vector<16x1xf32>
    %124 = arith.mulf %118, %118 : vector<16x1xf32>
    %125 = arith.subf %123, %124 : vector<16x1xf32>
    %cst_55 = arith.constant 0.000000e+00 : f32
    %126 = vector.broadcast %cst_55 : f32 to vector<16x1xf32>
    %127 = arith.maximumf %125, %126 : vector<16x1xf32>
    %128 = vector.broadcast %118 : vector<16x1xf32> to vector<16x32xf32>
    %129 = arith.subf %112, %128 : vector<16x32xf32>
    %cst_56 = arith.constant 9.99999974E-6 : f32
    %130 = vector.broadcast %cst_56 : f32 to vector<16x1xf32>
    %131 = arith.addf %127, %130 : vector<16x1xf32>
    %132 = math.rsqrt %131 : vector<16x1xf32>
    %133 = vector.broadcast %132 : vector<16x1xf32> to vector<16x32xf32>
    %134 = arith.mulf %129, %133 : vector<16x32xf32>
    %135 = vector.broadcast %113 : vector<1x32xf32> to vector<16x32xf32>
    %136 = arith.mulf %134, %135 : vector<16x32xf32>
    %137 = vector.broadcast %114 : vector<1x32xf32> to vector<16x32xf32>
    %138 = arith.addf %136, %137 : vector<16x32xf32>
    %139 = vector.shape_cast %138 : vector<16x32xf32> to vector<2x8x32xf32>
    %cst_57 = arith.constant 0.000000e+00 : f32
    %140 = vector.broadcast %cst_57 : f32 to vector<2x1x32xf32>
    %141 = tpu.concatenate %140, %139, %140 in 1 : vector<2x1x32xf32>, vector<2x8x32xf32>, vector<2x1x32xf32> -> vector<2x10x32xf32>
    %142 = vector.extract_strided_slice %141 {offsets = [0, 0, 0], sizes = [2, 8, 32], strides = [1, 1, 1]} : vector<2x10x32xf32> to vector<2x8x32xf32>
    %143 = vector.extract_strided_slice %141 {offsets = [0, 1, 0], sizes = [2, 8, 32], strides = [1, 1, 1]} : vector<2x10x32xf32> to vector<2x8x32xf32>
    %144 = vector.extract_strided_slice %141 {offsets = [0, 2, 0], sizes = [2, 8, 32], strides = [1, 1, 1]} : vector<2x10x32xf32> to vector<2x8x32xf32>
    %145 = tpu.concatenate %142, %143, %144 in 2 : vector<2x8x32xf32>, vector<2x8x32xf32>, vector<2x8x32xf32> -> vector<2x8x96xf32>
    %146 = vector.shape_cast %145 : vector<2x8x96xf32> to vector<16x96xf32>
    %147 = arith.truncf %146 : vector<16x96xf32> to vector<16x96xbf16>
    %c0_58 = arith.constant 0 : index
    %c0_59 = arith.constant 0 : index
    %148 = vector.load %arg16[%c0_58, %c0_59] : memref<96x32xbf16, #tpu.memory_space<vmem>>, vector<96x32xbf16>
    %cst_60 = arith.constant dense<0.000000e+00> : vector<16x32xf32>
    %149 = tpu.matmul %147, %148, %cst_60 {dimension_numbers = #tpu.dot_dimension_numbers<[1], [0], [0], [1], [0, 0, 1, 1], [], []>} : vector<16x96xbf16>, vector<96x32xbf16>, vector<16x32xf32> -> vector<16x32xf32>
    %c0_61 = arith.constant 0 : index
    %c0_62 = arith.constant 0 : index
    %150 = vector.load %arg17[%c0_61, %c0_62] : memref<1x32xf32, #tpu.memory_space<vmem>>, vector<1x32xf32>
    %151 = vector.broadcast %150 : vector<1x32xf32> to vector<16x32xf32>
    %152 = arith.addf %149, %151 : vector<16x32xf32>
    %cst_63 = arith.constant 0.000000e+00 : f32
    %153 = vector.broadcast %cst_63 : f32 to vector<16x32xf32>
    %154 = arith.maximumf %152, %153 : vector<16x32xf32>
    %c0_64 = arith.constant 0 : index
    %c0_65 = arith.constant 0 : index
    %155 = vector.load %arg18[%c0_64, %c0_65] : memref<1x32xf32, #tpu.memory_space<vmem>>, vector<1x32xf32>
    %c0_66 = arith.constant 0 : index
    %c0_67 = arith.constant 0 : index
    %156 = vector.load %arg19[%c0_66, %c0_67] : memref<1x32xf32, #tpu.memory_space<vmem>>, vector<1x32xf32>
    %cst_68 = arith.constant dense<0.000000e+00> : vector<16xf32>
    %157 = vector.multi_reduction <add>, %154, %cst_68 [1] : vector<16x32xf32> to vector<16xf32>
    %158 = vector.shape_cast %157 : vector<16xf32> to vector<16x1xf32>
    %cst_69 = arith.constant 3.200000e+01 : f32
    %159 = vector.broadcast %cst_69 : f32 to vector<16x1xf32>
    %160 = arith.divf %158, %159 : vector<16x1xf32>
    %161 = arith.mulf %154, %154 : vector<16x32xf32>
    %cst_70 = arith.constant dense<0.000000e+00> : vector<16xf32>
    %162 = vector.multi_reduction <add>, %161, %cst_70 [1] : vector<16x32xf32> to vector<16xf32>
    %163 = vector.shape_cast %162 : vector<16xf32> to vector<16x1xf32>
    %cst_71 = arith.constant 3.200000e+01 : f32
    %164 = vector.broadcast %cst_71 : f32 to vector<16x1xf32>
    %165 = arith.divf %163, %164 : vector<16x1xf32>
    %166 = arith.mulf %160, %160 : vector<16x1xf32>
    %167 = arith.subf %165, %166 : vector<16x1xf32>
    %cst_72 = arith.constant 0.000000e+00 : f32
    %168 = vector.broadcast %cst_72 : f32 to vector<16x1xf32>
    %169 = arith.maximumf %167, %168 : vector<16x1xf32>
    %170 = vector.broadcast %160 : vector<16x1xf32> to vector<16x32xf32>
    %171 = arith.subf %154, %170 : vector<16x32xf32>
    %cst_73 = arith.constant 9.99999974E-6 : f32
    %172 = vector.broadcast %cst_73 : f32 to vector<16x1xf32>
    %173 = arith.addf %169, %172 : vector<16x1xf32>
    %174 = math.rsqrt %173 : vector<16x1xf32>
    %175 = vector.broadcast %174 : vector<16x1xf32> to vector<16x32xf32>
    %176 = arith.mulf %171, %175 : vector<16x32xf32>
    %177 = vector.broadcast %155 : vector<1x32xf32> to vector<16x32xf32>
    %178 = arith.mulf %176, %177 : vector<16x32xf32>
    %179 = vector.broadcast %156 : vector<1x32xf32> to vector<16x32xf32>
    %180 = arith.addf %178, %179 : vector<16x32xf32>
    %c0_74 = arith.constant 0 : index
    %c0_75 = arith.constant 0 : index
    %181 = vector.load %arg20[%c0_74, %c0_75] : memref<1x32xf32, #tpu.memory_space<vmem>>, vector<1x32xf32>
    %182 = vector.broadcast %181 : vector<1x32xf32> to vector<16x32xf32>
    %183 = arith.mulf %180, %182 : vector<16x32xf32>
    %cst_76 = arith.constant dense<0.000000e+00> : vector<16xf32>
    %184 = vector.multi_reduction <add>, %183, %cst_76 [1] : vector<16x32xf32> to vector<16xf32>
    %185 = vector.shape_cast %184 : vector<16xf32> to vector<16x1xf32>
    %c0_77 = arith.constant 0 : index
    %c0_78 = arith.constant 0 : index
    %186 = vector.load %arg21[%c0_77, %c0_78] : memref<1x1xf32, #tpu.memory_space<vmem>>, vector<1x1xf32>
    %187 = vector.broadcast %186 : vector<1x1xf32> to vector<16x1xf32>
    %188 = arith.addf %185, %187 : vector<16x1xf32>
    %189 = arith.mulf %188, %12 : vector<16x1xf32>
    %190 = tpu.concatenate %105, %189 in 1 : vector<16x1xf32>, vector<16x1xf32> -> vector<16x2xf32>
    %191 = vector.shape_cast %190 : vector<16x2xf32> to vector<2x8x2xf32>
    %c0_79 = arith.constant 0 : index
    %c0_80 = arith.constant 0 : index
    %c0_81 = arith.constant 0 : index
    %192 = vector.load %arg22[%c0_79, %c0_80, %c0_81] : memref<2x8x2xf32, #tpu.memory_space<vmem>>, vector<2x8x2xf32>
    tpu.vector_store %arg22[%c0_79, %c0_80, %c0_81], %191 {strides = array<i32>} : memref<2x8x2xf32, #tpu.memory_space<vmem>>, vector<2x8x2xf32>,
    return
  }
}

</mosaic_0001>

<bundles_post_ra>
// kernel: custom-call.2
= control target key start
LH: loop header
LB: loop body
LE: loop exit
PB: predicated region body
PF: predicated region fallthrough
CT: control target
= control target key end

     0   :  { %s6_s0 = inlined_call_operand.vmem [shape: u32[2,8], index: 0, kind: output, shape index: {}]  }

// kernel: ne.4
= control target key start
LH: loop header
LB: loop body
LE: loop exit
PB: predicated region body
PF: predicated region fallthrough
CT: control target
= control target key end

     0   :  { %v16_v2 = vmov 0   ;;  %s41_s0 = inlined_call_operand.vmem [shape: f32[2,8], index: 0, kind: input, shape index: {}, may-alias: {0,1}]   ;;  %s42_s1 = inlined_call_operand.vmem [shape: f32[2,8], index: 1, kind: input, shape index: {}, may-alias: {0,1}]   ;;  %s43_s2 = inlined_call_operand.vmem [shape: pred[2,8], index: 2, kind: output, shape index: {}]  }
   0x1   :  { %v3_v0 = vld [vmem:[%s41_s0] sm:$0x3] }
   0x2   :  { %v4_v1 = vld [vmem:[%s42_s1] sm:$0x3] }
   0x3   :  { %vm7_vm0 = vcmp.ne.f32.partialorder %v3_v0, %v4_v1 }
   0x4   :  { %v8_v3 = vsel %vm7_vm0, 1, %v16_v2 }
   0x5   :  { %v10_v4 = vpack.c.b16 0, %v8_v3 }
   0x7   :  { %v11_v5 = vpack.c.b8 0, %v10_v4 }
   0x9   :  { %14 = vst [vmem:[%s43_s2] sm:$0x1] %v11_v5 }

// kernel: squeeze.16
= control target key start
LH: loop header
LB: loop body
LE: loop exit
PB: predicated region body
PF: predicated region fallthrough
CT: control target
= control target key end

     0   :  { %vm7_vm0 = vcmask 64512   ;;  %s39_s0 = inlined_call_operand.vmem [shape: f32[16], index: 0, kind: input, shape index: {}]   ;;  %s40_s1 = inlined_call_operand.vmem [shape: f32[2,8], index: 1, kind: output, shape index: {}]  }
   0x1   :  { %v4_v0 = vld [vmem:[%s39_s0] sm:$0x1]  ;;  %s22_s0 = smov 120  }
   0x2   :  { %5 = vst [vmem:[#allocation1] sm:$0x1] %v4_v0 }
   0x9   :  { %v9_v1 = vld [vmem:[#allocation1] sm:$0x1]  }
   0xa   :  { %v6_v2 = vld [vmem:[#allocation1] sm:$0x1]   ;;  %10 = vrot.lane.b32.xlu0 %v9_v1, %s22_s0 }
   0xb   :  { %8 = vst.msk [vmem:[#allocation0] sm:$0x1] %vm7_vm0, %v6_v2  }
  0x7c   :  { %v11_v3 = vpop.permute.xlu0 %10  }
  0x7d   :  { %14 = vst.msk [vmem:[#allocation0 + $0x1] sm:$0x1] %vm7_vm0, %v11_v3  }
  0x84   :  { %v17_v4 = vld [vmem:[#allocation0] sm:$0x3] }
  0x85   :  { %20 = vst [vmem:[%s40_s1] sm:$0x3] %v17_v4 }

// kernel: fastspeech2_forward.7
= control target key start
LH: loop header
LB: loop body
LE: loop exit
PB: predicated region body
PF: predicated region fallthrough
CT: control target
= control target key end

     0   :  { %19 = vsyncpa [#allocation3], 0  ;;  %s1176_s16 = smov [#allocation2]   ;;  %s1575_s0 = inlined_call_operand.vmem [shape: s32[2], index: 0, kind: input, shape index: {}]   ;;  %s1576_s1 = inlined_call_operand.vmem [shape: f32[2,8,32], index: 1, kind: input, shape index: {}]   ;;  %s1577_s2 = inlined_call_operand.vmem [shape: bf16[32,96], index: 2, kind: input, shape index: {}]   ;;  %s1578_s3 = inlined_call_operand.vmem [shape: f32[1,96], index: 3, kind: input, shape index: {}]   ;;  %s1579_s4 = inlined_call_operand.vmem [shape: bf16[32,32], index: 4, kind: input, shape index: {}]   ;;  %s1580_s5 = inlined_call_operand.vmem [shape: f32[1,32], index: 5, kind: input, shape index: {}]   ;;  %s1581_s6 = inlined_call_operand.vmem [shape: f32[1,32], index: 6, kind: input, shape index: {}]   ;;  %s1582_s7 = inlined_call_operand.vmem [shape: f32[1,32], index: 7, kind: input, shape index: {}]   ;;  %s1583_s8 = inlined_call_operand.vmem [shape: bf16[288,64], index: 8, kind: input, shape index: {}]   ;;  %s1584_s9 = inlined_call_operand.vmem [shape: f32[1,64], index: 9, kind: input, shape index: {}]   ;;  %s1585_s10 = inlined_call_operand.vmem [shape: bf16[64,32], index: 10, kind: input, shape index: {}]   ;;  %s1586_s11 = inlined_call_operand.vmem [shape: f32[1,32], index: 11, kind: input, shape index: {}]   ;;  %s1587_s12 = inlined_call_operand.vmem [shape: f32[1,32], index: 12, kind: input, shape index: {}]   ;;  %s1588_s13 = inlined_call_operand.vmem [shape: f32[1,32], index: 13, kind: input, shape index: {}]   ;;  %s1589_s14 = inlined_call_operand.vmem [shape: f32[2,8,32], index: 14, kind: output, shape index: {}]  }
   0x1   :  { %s25_s15 = sshll.u32 %s1575_s0, 4  ;;  %s26_s15 = int_to_ptr.vmem [resolvable:$true] %s25_s15 }
   0x2   :  { %28 = dma.vmem_to_smem %s26_s15, 16, %s1176_s16, [#allocation3]  }
   0x3   :  { %1174 = dma.done.wait [#allocation3], 16  }
   0x4   :  { %1175 = vsyncadd [#allocation3], 4294967280 }
   0x5   :  { %59 = sfence }
   0x6   :  { %v1051_v0 = vld [vmem:[%s1577_s2 + $0x8] sm:$0xff]  ;;  %v1050_v1 = vld [vmem:[%s1577_s2] sm:$0xff]  ;;  %vm102_vm0 = vcmask 261120   ;;  %s1178_s25 = smov 80   ;;  %s1179_s26 = smov 96   ;;  %vm127_vm1 = vcmask 130048   ;;  %v62_v26 = vlaneseq }
   0x7   :  { %v1274_v2 = vld [vmem:[%s1576_s1] sm:$0xff]  ;;  %v1279_v3 = vld [vmem:[%s1576_s1 + $0x8] sm:$0xff]  ;;  %112 = vmatpush.bf16.msra.mxu0 %v1051_v0  ;;  %s1177_s1 = smov 112   ;;  %v1180_v29 = vmov 0.0   ;;  %s1314_s27 = sld [smem:[#allocation2 + $0x1]]  ;;  %vm177_vm3 = vcmask 64512  }
   0x8   :  { %v81_v4 = vpack.c.bf16 %v1279_v3, %v1274_v2  ;;  %v1128_v5 = vld [vmem:[%s1578_s3] ss:$0 sm:$0xff]  ;;  %s1307_s3 = sld [smem:[#allocation2]]  ;;  %v63_v27 = vand.u32 127, %v62_v26  ;;  %s1181_s28 = smov 64   ;;  %vm207_vm5 = vcmask 1043456  }
   0x9   :  { %s1182_s29 = smov 48   ;;  %s1183_s18 = smov 16   ;;  %vm566_vm15 = vcmask 1041408  }
   0xb   :  { %113 = vmatpush.bf16.msra.mxu0 %v1050_v1 }
   0xd   :  { %v68_v39 = vstv %s1314_s27 }
   0xe   :  { %942 = vmatmul.msk.bf16.vlgmr.msra.gmra.mxu0 %vm102_vm0, %v81_v4  ;;  %v64_v28 = vstv %s1307_s3  ;;  %vm69_vm4 = vcmp.ge.s32.totalorder %v63_v27, %v68_v39 }
   0xf   :  { %vm65_vm2 = vcmp.ge.s32.totalorder %v63_v27, %v64_v28  ;;  %v70_v43 = vsel %vm69_vm4, -1e+30, %v1180_v29  ;;  %vm579_vm4 = vcmask 1040384  }
  0x10   :  { %v66_v30 = vsel %vm65_vm2, -1e+30, %v1180_v29  ;;  %v174_v44 = vperm.slane %v70_v43, 0  ;;  %v1053_v43 = vld [vmem:[%s1579_s4 + $0x8] sm:$0xff]  ;;  %vm519_vm2 = vcmask 1045504  }
  0x11   :  { %v173_v31 = vperm.slane %v66_v30, 0 }
  0x8b   :  { %v115_v6 = vpop.f32.mrf.mxu0 }
  0x8c   :  { %v116_v7 = vadd.f32 %v1128_v5, %v115_v6 }
  0x8e   :  { %v120_v8 = vpack.c.bf16 %v116_v7, %v116_v7 }
  0x90   :  { %v123_v9 = vunpack.c.l.b16 %v120_v8 }
  0x92   :  { %v1287_v10 = vpack.c.b16 %v123_v9, %v123_v9 }
  0x93   :  { %v117_v11 = vpop.f32.mrf.mxu0 }
  0x94   :  { %v118_v12 = vadd.f32 %v1128_v5, %v117_v11  ;;  %245 = vrot.lane.b32.xlu2 %v1287_v10, %s1177_s1  ;;  %247 = vrot.lane.b32.xlu1 %v1287_v10, %s1178_s25 }
  0x95   :  { %125 = vrot.lane.b32.xlu0 %v1287_v10, %s1179_s26 }
  0x96   :  { %v121_v13 = vpack.c.bf16 %v118_v12, %v118_v12 }
  0x98   :  { %v148_v14 = vunpack.c.l.b16 %v121_v13 }
  0x9a   :  { %v1293_v15 = vpack.c.b16 %v148_v14, %v148_v14 }
  0x9c   :  { %268 = vrot.lane.b32.xlu2 %v1293_v15, %s1177_s1  ;;  %270 = vrot.lane.b32.xlu1 %v1293_v15, %s1178_s25 }
  0x9d   :  { %150 = vrot.lane.b32.xlu0 %v1293_v15, %s1179_s26 }
  0xee   :  { %v246_v20 = vpop.permute.xlu2 %245 }
  0xf6   :  { %v269_v25 = vpop.permute.xlu2 %268 }
 0x106   :  { %v248_v16 = vpop.permute.xlu1 %247 }
 0x107   :  { %v126_v17 = vpop.permute.xlu0 %125  ;;  %v253_v18 = vsel %vm127_vm1, %v248_v16, 0 }
 0x108   :  { %v132_v19 = vsel %vm127_vm1, %v126_v17, 0  ;;  %262 = vmatpush.bf16.xpose.msrb.mxu0 %v253_v18 }
 0x109   :  { %141 = vmatpush.bf16.xpose.msra.mxu1 %v132_v19 }
 0x10e   :  { %v271_v21 = vpop.permute.xlu1 %270 }
 0x10f   :  { %v151_v22 = vpop.permute.xlu0 %150  ;;  %947 = vmatmul.msk.bf16.vlgmr.msrb.gmra.mxu0 %vm127_vm1, %v246_v20  ;;  %v276_v23 = vsel %vm127_vm1, %v271_v21, 0 }
 0x110   :  { %943 = vmatmul.msk.bf16.vlgmr.msra.gmra.mxu1 %vm127_vm1, %v120_v8  ;;  %v156_v24 = vsel %vm127_vm1, %v151_v22, 0  ;;  %401 = vmatpush.bf16.msra.mxu0 %v1053_v43 }
 0x111   :  { %165 = vmatpush.bf16.xpose.msra.mxu2 %v156_v24  ;;  %285 = vmatpush.bf16.xpose.msrb.mxu1 %v276_v23 }
 0x118   :  { %944 = vmatmul.msk.bf16.vlgmr.msra.gmra.mxu2 %vm127_vm1, %v121_v13 }
 0x120   :  { %948 = vmatmul.msk.bf16.vlgmr.msrb.gmra.mxu1 %vm127_vm1, %v269_v25 }
 0x18c   :  { %v264_v32 = vpop.f32.mrf.mxu0 }
 0x18d   :  { %v143_v33 = vpop.f32.mrf.mxu1  ;;  %v291_v34 = vmul.f32 0.25, %v264_v32 }
 0x18e   :  { %v171_v35 = vmul.f32 0.25, %v143_v33 }
 0x18f   :  { %v293_v36 = vadd.f32 %v291_v34, %v173_v31 }
 0x190   :  { %v175_v37 = vadd.f32 %v173_v31, %v171_v35 }
 0x191   :  { %v295_v38 = vsel %vm177_vm3, %v293_v36, -inf }
 0x192   :  { %296 = vmax.xlane.f32.xlu2 %v295_v38  ;;  %v178_v40 = vsel %vm177_vm3, %v175_v37, -inf }
 0x193   :  { %179 = vmax.xlane.f32.xlu0 %v178_v40 }
 0x194   :  { %v266_v41 = vpop.f32.mrf.mxu0 }
 0x195   :  { %v145_v42 = vpop.f32.mrf.mxu1 }
 0x19b   :  { %v167_v45 = vpop.f32.mrf.mxu2 }
 0x19c   :  { %v172_v46 = vmul.f32 0.25, %v167_v45 }
 0x19d   :  { %v287_v47 = vpop.f32.mrf.mxu1 }
 0x19e   :  { %v292_v48 = vmul.f32 0.25, %v287_v47  ;;  %v176_v49 = vadd.f32 %v174_v44, %v172_v46 }
 0x1a0   :  { %v181_v50 = vsel %vm177_vm3, %v176_v49, -inf  ;;  %v294_v51 = vadd.f32 %v292_v48, %v174_v44  ;;  %v1052_v44 = vld [vmem:[%s1579_s4] sm:$0xff] }
 0x1a1   :  { %182 = vmax.xlane.f32.xlu1 %v181_v50  ;;  %402 = vmatpush.bf16.msra.mxu0 %v1052_v44 }
 0x1a2   :  { %v298_v52 = vsel %vm177_vm3, %v294_v51, -inf }
 0x1a3   :  { %v169_v53 = vpop.f32.mrf.mxu2  ;;  %299 = vmax.xlane.f32.xlu2 %v298_v52 }
 0x1a5   :  { %v289_v54 = vpop.f32.mrf.mxu1 }
 0x1a7   :  { %224 = vrot.lane.b32.xlu0 %v1293_v15, %s1181_s28 }
 0x1ba   :  { %202 = vrot.lane.b32.xlu1 %v1287_v10, %s1181_s28 }
 0x1c2   :  { %319 = vrot.lane.b32.xlu1 %v1287_v10, %s1182_s29 }
 0x205   :  { %v297_v60 = vpop.xlane.xlu2 %296 }
 0x206   :  { %v180_v55 = vpop.xlane.xlu0 %179  ;;  %v301_v63 = vsub.f32 %v293_v36, %v297_v60 }
 0x207   :  { %v184_v56 = vsub.f32 %v175_v37, %v180_v55 }
 0x208   :  { %v303_v1 = vmul.f32 1.442695, %v301_v63 }
 0x209   :  { %v186_v57 = vmul.f32 1.442695, %v184_v56 }
 0x20b   :  { %1136 = vpow2.f32 %v186_v57 }
 0x211   :  { %v1137_v58 = vpop.eup %1136 }
 0x212   :  { %v190_v59 = vsel %vm177_vm3, %v1137_v58, 0.0 }
 0x213   :  { %191 = vadd.xlane.f32.xlu0 %v190_v59  ;;  %v1129_v59 = vld [vmem:[%s1580_s5] ss:$0 sm:$0xff] }
 0x214   :  { %v183_v61 = vpop.xlane.xlu1 %182 }
 0x215   :  { %v185_v62 = vsub.f32 %v176_v49, %v183_v61 }
 0x216   :  { %v300_v4 = vpop.xlane.xlu2 %299 }
 0x217   :  { %v188_v0 = vmul.f32 1.442695, %v185_v62  ;;  %v302_v6 = vsub.f32 %v294_v51, %v300_v4 }
 0x219   :  { %1138 = vpow2.f32 %v188_v0  ;;  %v305_v8 = vmul.f32 1.442695, %v302_v6  ;;  %v225_v11 = vpop.permute.xlu0 %224 }
 0x21a   :  { %1140 = vpow2.f32 %v303_v1  ;;  %v230_v16 = vsel %vm207_vm5, %v225_v11, 0 }
 0x21b   :  { %1142 = vpow2.f32 %v305_v8 }
 0x21f   :  { %v1139_v5 = vpop.eup %1138 }
 0x220   :  { %v193_v7 = vsel %vm177_vm3, %v1139_v5, 0.0  ;;  %v1141_v9 = vpop.eup %1140 }
 0x221   :  { %194 = vadd.xlane.f32.xlu2 %v193_v7  ;;  %v307_v10 = vsel %vm177_vm3, %v1141_v9, 0.0  ;;  %v1143_v13 = vpop.eup %1142 }
 0x222   :  { %v310_v17 = vsel %vm177_vm3, %v1143_v13, 0.0 }
 0x227   :  { %340 = vrot.lane.b32.xlu0 %v1293_v15, %s1182_s29 }
 0x229   :  { %308 = vadd.xlane.f32.xlu2 %v307_v10 }
 0x22c   :  { %v203_v12 = vpop.permute.xlu1 %202 }
 0x22d   :  { %v209_v14 = vsel %vm207_vm5, %v203_v12, 0  ;;  %v1185_v12 = vmov 32.0  }
 0x22e   :  { %218 = vmatpush.bf16.msra.mxu3 %v209_v14 }
 0x231   :  { %311 = vadd.xlane.f32.xlu2 %v310_v17 }
 0x232   :  { %239 = vmatpush.bf16.msrb.mxu3 %v230_v16 }
 0x234   :  { %v320_v18 = vpop.permute.xlu1 %319 }
 0x235   :  { %v325_v19 = vsel %vm207_vm5, %v320_v18, 0 }
 0x236   :  { %334 = vmatpush.bf16.msrb.mxu2 %v325_v19 }
 0x286   :  { %v192_v15 = vpop.xlane.xlu0 %191 }
 0x287   :  { %1144 = vrcp.f32 %v192_v15 }
 0x28d   :  { %v1145_v20 = vpop.eup %1144 }
 0x28e   :  { %v198_v21 = vmul.f32 %v1145_v20, %v1137_v58  ;;  %v1184_v58 = vmov 0  }
 0x28f   :  { %1092 = vset.pattern.permute.xlu0 %v1184_v58 }
 0x290   :  { %v200_v22 = vpack.c.bf16 %v198_v21, %v198_v21 }
 0x292   :  { %945 = vmatmul.msk.bf16.vlgmr.msra.gmra.mxu3 %vm177_vm3, %v200_v22 }
 0x294   :  { %v195_v23 = vpop.xlane.xlu2 %194 }
 0x295   :  { %1146 = vrcp.f32 %v195_v23 }
 0x299   :  { %v341_v24 = vpop.permute.xlu0 %340 }
 0x29a   :  { %v346_v25 = vsel %vm207_vm5, %v341_v24, 0 }
 0x29b   :  { %v1147_v27 = vpop.eup %1146  ;;  %355 = vmatpush.bf16.msra.mxu3 %v346_v25 }
 0x29c   :  { %v199_v30 = vmul.f32 %v1147_v27, %v1139_v5  ;;  %v309_v31 = vpop.xlane.xlu2 %308  ;;  %v1071_v27 = vld [vmem:[%s1583_s8 + $0x88] sm:$0xff] }
 0x29d   :  { %1148 = vrcp.f32 %v309_v31 }
 0x29e   :  { %v201_v32 = vpack.c.bf16 %v199_v30, %v199_v30 }
 0x2a2   :  { %946 = vmatmul.msk.bf16.vlgmr.msrb.gmra.mxu3 %vm177_vm3, %v201_v32 }
 0x2a3   :  { %v1149_v33 = vpop.eup %1148  ;;  %794 = vmatpush.bf16.msrb.mxu3 %v1071_v27 }
 0x2a4   :  { %v315_v34 = vmul.f32 %v1149_v33, %v1141_v9  ;;  %v312_v35 = vpop.xlane.xlu2 %311  ;;  %v72_v9 = vshrl.u32 %v62_v26, 7  ;;  %v1070_v33 = vld [vmem:[%s1583_s8 + $0x80] sm:$0xff] }
 0x2a5   :  { %1150 = vrcp.f32 %v312_v35 }
 0x2a6   :  { %v317_v36 = vpack.c.bf16 %v315_v34, %v315_v34  ;;  %vm73_vm6 = vcmp.lt.s32.totalorder %v72_v9, %v64_v28  ;;  %vm76_vm7 = vcmp.lt.s32.totalorder %v72_v9, %v68_v39  ;;  %1152 = vrcp.f32 %v1185_v12 }
 0x2a7   :  { %v932_v10 = vsel %vm73_vm6, 1.0, %v1180_v29  ;;  %795 = vmatpush.bf16.msrb.mxu3 %v1070_v33  ;;  %vm506_vm6 = vcmask 1046528  }
 0x2a8   :  { %949 = vmatmul.msk.bf16.vlgmr.msrb.gmra.mxu2 %vm177_vm3, %v317_v36 }
 0x2ab   :  { %v1151_v37 = vpop.eup %1150 }
 0x2ac   :  { %v316_v38 = vmul.f32 %v1151_v37, %v1143_v13  ;;  %v1153_v13 = vpop.eup %1152 }
 0x2ad   :  { %v420_v14 = vmul.f32 32.0, %v1153_v13  ;;  %vm424_vm8 = vweird.f32 %v1153_v13 }
 0x2ae   :  { %v318_v40 = vpack.c.bf16 %v316_v38, %v316_v38 }
 0x2af   :  { %v421_v16 = vsub.f32 1.0, %v420_v14 }
 0x2b1   :  { %v422_v17 = vmul.f32 %v1153_v13, %v421_v16 }
 0x2b2   :  { %950 = vmatmul.msk.bf16.vlgmr.msra.gmra.mxu3 %vm177_vm3, %v318_v40  ;;  %vm532_vm3 = vcmask 1044480  }
 0x2b3   :  { %v423_v18 = vadd.f32 %v1153_v13, %v422_v17 }
 0x2b5   :  { %v1377_v19 = vsel %vm424_vm8, %v1153_v13, %v423_v18  ;;  %vm597_vm8 = vcmask 785408  }
 0x315   :  { %v220_v41 = vpop.f32.mrf.mxu3 }
 0x31d   :  { %v222_v42 = vpop.f32.mrf.mxu3 }
 0x325   :  { %v241_v45 = vpop.f32.mrf.mxu3 }
 0x32b   :  { %v336_v46 = vpop.f32.mrf.mxu2 }
 0x32d   :  { %v243_v47 = vpop.f32.mrf.mxu3 }
 0x333   :  { %v338_v48 = vpop.f32.mrf.mxu2 }
 0x335   :  { %v357_v49 = vpop.f32.mrf.mxu3 }
 0x336   :  { %v1087_v50 = vpack.i.bf16 %v357_v49, %v336_v46  ;;  %v1130_v46 = vld [vmem:[%s1581_s6] ss:$0 sm:$0xff]  ;;  %s1186_s6 = smov 32  }
 0x337   :  { %v1131_v49 = vld [vmem:[%s1582_s7] ss:$0 sm:$0xff] }
 0x338   :  { %1088 = vrot.lane.b32.xlu2 %v1087_v50, %s1183_s18 }
 0x33d   :  { %v359_v51 = vpop.f32.mrf.mxu3 }
 0x392   :  { %v1089_v52 = vpop.permute.xlu2 %1088 }
 0x393   :  { %v1091_v53 = vunpack.i.h.bf16 %v1089_v52  ;;  %v1090_v54 = vunpack.i.l.bf16 %v1089_v52 }
 0x395   :  { %v370_v55 = vsel %vm127_vm1, %v241_v45, %v1091_v53  ;;  %v369_v56 = vsel %vm127_vm1, %v220_v41, %v1090_v54  ;;  %vm553_vm1 = vcmask 1042432  }
 0x396   :  { %v371_v57 = vpack.c.bf16 %v370_v55, %v369_v56 }
 0x398   :  { %959 = vmatmul.msk.bf16.vlgmr.msra.gmra.mxu0 %vm102_vm0, %v371_v57 }
 0x415   :  { %v404_v60 = vpop.f32.mrf.mxu0 }
 0x416   :  { %v405_v61 = vadd.f32 %v1129_v59, %v404_v60 }
 0x418   :  { %v1355_v62 = vadd.f32 %v405_v61, %v1274_v2 }
 0x41a   :  { %v413_v63 = vsel %vm102_vm0, %v1355_v62, 0.0  ;;  %v428_v0 = vmul.f32 %v1355_v62, %v1355_v62 }
 0x41b   :  { %414 = vadd.xlane.f32.xlu1 %v413_v63 }
 0x41c   :  { %v430_v1 = vsel %vm102_vm0, %v428_v0, 0.0 }
 0x41d   :  { %v406_v4 = vpop.f32.mrf.mxu0  ;;  %431 = vadd.xlane.f32.xlu2 %v430_v1 }
 0x41e   :  { %v407_v5 = vadd.f32 %v1129_v59, %v406_v4 }
 0x420   :  { %v1363_v6 = vadd.f32 %v407_v5, %v1279_v3  ;;  %v933_v3 = vsel %vm76_vm7, 1.0, %v1180_v29  ;;  %vm594_vm7 = vcmask 523264  }
 0x421   :  { %v1093_v11 = vpack.i.bf16 %v933_v3, %v932_v10 }
 0x422   :  { %v416_v2 = vsel %vm102_vm0, %v1363_v6, 0.0  ;;  %v429_v7 = vmul.f32 %v1363_v6, %v1363_v6 }
 0x423   :  { %417 = vadd.xlane.f32.xlu0 %v416_v2 }
 0x424   :  { %v433_v8 = vsel %vm102_vm0, %v429_v7, 0.0 }
 0x425   :  { %434 = vadd.xlane.f32.xlu1 %v433_v8 }
 0x437   :  { %1094 = vperm.xlu0 %1092, %v1093_v11  }
 0x48e   :  { %v415_v26 = vpop.xlane.xlu1 %414 }
 0x48f   :  { %v426_v28 = vmul.f32 %v1377_v19, %v415_v26 }
 0x490   :  { %v432_v39 = vpop.xlane.xlu2 %431 }
 0x491   :  { %v438_v15 = vmul.f32 %v426_v28, %v426_v28  ;;  %v436_v20 = vmul.f32 %v432_v39, %v1377_v19  ;;  %v444_v44 = vsub.f32 %v1355_v62, %v426_v28 }
 0x493   :  { %v440_v29 = vsub.f32 %v436_v20, %v438_v15 }
 0x495   :  { %v442_v21 = vmax.f32 %v440_v29, 0.0 }
 0x496   :  { %v418_v22 = vpop.xlane.xlu0 %417 }
 0x497   :  { %v446_v23 = vadd.f32 1e-05, %v442_v21  ;;  %v427_v24 = vmul.f32 %v1377_v19, %v418_v22 }
 0x498   :  { %v435_v25 = vpop.xlane.xlu1 %434 }
 0x499   :  { %1154 = vrsqrt.f32 %v446_v23  ;;  %v439_v30 = vmul.f32 %v427_v24, %v427_v24  ;;  %v437_v31 = vmul.f32 %v435_v25, %v1377_v19  ;;  %vm454_vm10 = vweird.f32 %v446_v23 }
 0x49a   :  { %v445_v58 = vsub.f32 %v1363_v6, %v427_v24 }
 0x49b   :  { %v441_v32 = vsub.f32 %v437_v31, %v439_v30 }
 0x49d   :  { %v443_v34 = vmax.f32 %v441_v32, 0.0 }
 0x49f   :  { %v1155_v35 = vpop.eup %1154  ;;  %v447_v37 = vadd.f32 1e-05, %v443_v34 }
 0x4a0   :  { %v449_v36 = vmul.f32 %v1155_v35, %v446_v23  ;;  %vm455_vm9 = vweird.f32 %v1155_v35 }
 0x4a1   :  { %1156 = vrsqrt.f32 %v447_v37  ;;  %vm456_vm11 = vmor %vm454_vm10, %vm455_vm9  ;;  %vm464_vm13 = vweird.f32 %v447_v37 }
 0x4a2   :  { %v450_v38 = vmul.f32 %v1155_v35, %v449_v36 }
 0x4a4   :  { %v451_v40 = vmul.f32 0.5, %v450_v38 }
 0x4a6   :  { %v452_v41 = vsub.f32 1.5, %v451_v40 }
 0x4a7   :  { %v1157_v42 = vpop.eup %1156 }
 0x4a8   :  { %v453_v43 = vmul.f32 %v1155_v35, %v452_v41  ;;  %v459_v45 = vmul.f32 %v1157_v42, %v447_v37  ;;  %vm465_vm12 = vweird.f32 %v1157_v42 }
 0x4a9   :  { %v1396_v50 = vpop.permute.xlu0 %1094  ;;  %vm466_vm14 = vmor %vm464_vm13, %vm465_vm12 }
 0x4aa   :  { %v457_v47 = vsel %vm456_vm11, %v1155_v35, %v453_v43  ;;  %v460_v48 = vmul.f32 %v1157_v42, %v459_v45  ;;  %v1096_v54 = vunpack.i.l.bf16 %v1396_v50  ;;  %v1097_v62 = vunpack.i.h.bf16 %v1396_v50 }
 0x4ab   :  { %v468_v51 = vmul.f32 %v457_v47, %v444_v44 }
 0x4ac   :  { %v461_v52 = vmul.f32 0.5, %v460_v48 }
 0x4ad   :  { %v473_v53 = vmul.f32 %v1130_v46, %v468_v51 }
 0x4ae   :  { %v462_v55 = vsub.f32 1.5, %v461_v52 }
 0x4af   :  { %v478_v56 = vadd.f32 %v1131_v49, %v473_v53  ;;  %v1069_v53 = vld [vmem:[%s1583_s8 + $0x78] sm:$0xff] }
 0x4b0   :  { %v463_v57 = vmul.f32 %v1157_v42, %v462_v55  ;;  %774 = vmatpush.bf16.msra.mxu2 %v1069_v53  ;;  %v1068_v55 = vld [vmem:[%s1583_s8 + $0x70] sm:$0xff]  ;;  %v1132_v53 = vld [vmem:[%s1584_s9] ss:$0 sm:$0xff] }
 0x4b1   :  { %v1402_v59 = vmul.f32 %v1096_v54, %v478_v56  ;;  %v1061_v56 = vld [vmem:[%s1583_s8 + $0x38] sm:$0xff] }
 0x4b2   :  { %v467_v60 = vsel %vm466_vm14, %v1157_v42, %v463_v57  ;;  %v1067_v57 = vld [vmem:[%s1583_s8 + $0x68] sm:$0xff]  ;;  %760 = vmatpush.bf16.msra.mxu1 %v1061_v56 }
 0x4b3   :  { %v469_v61 = vmul.f32 %v467_v60, %v445_v58  ;;  %v494_v0 = vrot.slane %v1402_v59, 4  ;;  %v1060_v58 = vld [vmem:[%s1583_s8 + $0x30] sm:$0xff]  ;;  %v1066_v60 = vld [vmem:[%s1583_s8 + $0x60] sm:$0xff] }
 0x4b4   :  { %775 = vmatpush.bf16.msra.mxu2 %v1068_v55 }
 0x4b5   :  { %v474_v63 = vmul.f32 %v1130_v46, %v469_v61  ;;  %v1411_v5 = vsel %vm207_vm5, 0.0, %v494_v0  ;;  %v1414_v6 = vsel %vm207_vm5, %v494_v0, 0.0  ;;  %v1065_v61 = vld [vmem:[%s1583_s8 + $0x58] sm:$0xff]  ;;  %v1064_v0 = vld [vmem:[%s1583_s8 + $0x50] sm:$0xff] }
 0x4b6   :  { %v567_v7 = vrot.slane %v1411_v5, 6  ;;  %v568_v8 = vrot.slane %v1414_v6, 6  ;;  %v554_v9 = vrot.slane %v1411_v5, 5  ;;  %v555_v10 = vrot.slane %v1414_v6, 5  ;;  %761 = vmatpush.bf16.msra.mxu1 %v1060_v58 }
 0x4b7   :  { %v479_v1 = vadd.f32 %v1131_v49, %v474_v63  ;;  %v520_v12 = vrot.slane %v1411_v5, 2  ;;  %v521_v13 = vrot.slane %v1414_v6, 2  ;;  %v533_v34 = vrot.slane %v1411_v5, 3  ;;  %v1059_v63 = vld [vmem:[%s1583_s8 + $0x28] sm:$0xff] }
 0x4b8   :  { %v569_v15 = vsel %vm566_vm15, %v567_v7, %v568_v8  ;;  %v556_v29 = vsel %vm553_vm1, %v554_v9, %v555_v10  ;;  %v534_v35 = vrot.slane %v1414_v6, 3  ;;  %v580_v36 = vrot.slane %v1411_v5, 7  ;;  %776 = vmatpush.bf16.msra.mxu2 %v1067_v57  ;;  %v1057_v7 = vld [vmem:[%s1583_s8 + $0x18] sm:$0xff]  ;;  %v1062_v8 = vld [vmem:[%s1583_s8 + $0x40] sm:$0xff]  ;;  %v1056_v9 = vld [vmem:[%s1583_s8 + $0x10] sm:$0xff] }
 0x4b9   :  { %v1408_v4 = vmul.f32 %v1097_v62, %v479_v1  ;;  %v522_v23 = vsel %vm519_vm2, %v520_v12, %v521_v13  ;;  %v581_v37 = vrot.slane %v1414_v6, 7  ;;  %v507_v47 = vrot.slane %v1411_v5, 1  ;;  %v1058_v1 = vld [vmem:[%s1583_s8 + $0x20] sm:$0xff]  ;;  %v1055_v10 = vld [vmem:[%s1583_s8 + $0x8] sm:$0xff] }
 0x4ba   :  { %v535_v41 = vsel %vm532_vm3, %v533_v34, %v534_v35  ;;  %v508_v48 = vrot.slane %v1414_v6, 1  ;;  %762 = vmatpush.bf16.msra.mxu1 %v1059_v63  ;;  %v1054_v12 = vld [vmem:[%s1583_s8] sm:$0xff] }
 0x4bb   :  { %v495_v2 = vrot.slane %v1408_v4, 4  ;;  %v582_v42 = vsel %vm579_vm4, %v580_v36, %v581_v37 }
 0x4bc   :  { %v509_v51 = vsel %vm506_vm6, %v507_v47, %v508_v48  ;;  %777 = vmatpush.bf16.msra.mxu2 %v1066_v60 }
 0x4bd   :  { %v1422_v3 = vsel %vm207_vm5, 0.0, %v495_v2  ;;  %v1425_v11 = vsel %vm207_vm5, %v495_v2, 0.0  ;;  %v1063_v2 = vld [vmem:[%s1583_s8 + $0x48] sm:$0xff] }
 0x4be   :  { %v608_v14 = vpack.c.bf16 %v1425_v11, %v1414_v6  ;;  %v570_v16 = vrot.slane %v1422_v3, 6  ;;  %v571_v17 = vrot.slane %v1425_v11, 6  ;;  %v557_v18 = vrot.slane %v1422_v3, 5  ;;  %763 = vmatpush.bf16.msra.mxu1 %v1058_v1 }
 0x4bf   :  { %v558_v26 = vrot.slane %v1425_v11, 5  ;;  %v523_v28 = vrot.slane %v1422_v3, 2  ;;  %v524_v39 = vrot.slane %v1425_v11, 2  ;;  %v536_v30 = vrot.slane %v1422_v3, 3 }
 0x4c0   :  { %1032 = vmatmul.msk.bf16.vlgmr.msrb.gmra.mxu3 %vm102_vm0, %v608_v14  ;;  %v572_v20 = vsel %vm566_vm15, %v570_v16, %v571_v17  ;;  %v537_v31 = vrot.slane %v1425_v11, 3  ;;  %v583_v32 = vrot.slane %v1422_v3, 7  ;;  %v584_v33 = vrot.slane %v1425_v11, 7  ;;  %778 = vmatpush.bf16.msra.mxu2 %v1065_v61 }
 0x4c1   :  { %v1103_v21 = vpack.i.bf16 %v572_v20, %v569_v15  ;;  %v559_v22 = vsel %vm553_vm1, %v557_v18, %v558_v26  ;;  %v525_v24 = vsel %vm519_vm2, %v523_v28, %v524_v39  ;;  %v510_v45 = vrot.slane %v1422_v3, 1 }
 0x4c2   :  { %v1098_v25 = vpack.i.bf16 %v559_v22, %v556_v29  ;;  %v1118_v27 = vpack.i.bf16 %v525_v24, %v522_v23  ;;  %v538_v38 = vsel %vm532_vm3, %v536_v30, %v537_v31  ;;  %v585_v40 = vsel %vm579_vm4, %v583_v32, %v584_v33  ;;  %764 = vmatpush.bf16.msra.mxu1 %v1057_v7 }
 0x4c3   :  { %1104 = vrot.lane.b32.xlu2 %v1103_v21, %s1181_s28  ;;  %v1123_v43 = vpack.i.bf16 %v538_v38, %v535_v41  ;;  %v1108_v44 = vpack.i.bf16 %v585_v40, %v582_v42  ;;  %v511_v46 = vrot.slane %v1425_v11, 1  ;;  %v545_v14 = vrot.slane %v1411_v5, 4 }
 0x4c4   :  { %1099 = vrot.lane.b32.xlu1 %v1098_v25, %s1186_s6  ;;  %1119 = vrot.lane.b32.xlu0 %v1118_v27, %s1181_s28  ;;  %v546_v16 = vrot.slane %v1414_v6, 4  ;;  %v549_v17 = vrot.slane %v1425_v11, 4  ;;  %v548_v18 = vrot.slane %v1422_v3, 4 }
 0x4c5   :  { %v512_v49 = vsel %vm506_vm6, %v510_v45, %v511_v46  ;;  %779 = vmatpush.bf16.msra.mxu2 %v1064_v0 }
 0x4c6   :  { %v1113_v52 = vpack.i.bf16 %v512_v49, %v509_v51  ;;  %765 = vmatpush.bf16.msra.mxu1 %v1056_v9  ;;  %v547_v15 = vsel %vm207_vm5, %v545_v14, %v546_v16  ;;  %v550_v20 = vsel %vm207_vm5, %v548_v18, %v549_v17  ;;  %v1075_v51 = vld [vmem:[%s1585_s10 + $0x18] sm:$0xff] }
 0x4c7   :  { %848 = vmatpush.bf16.msrb.mxu0 %v1075_v51 }
 0x4c9   :  { %780 = vmatpush.bf16.msra.mxu2 %v1063_v2 }
 0x4ca   :  { %766 = vmatpush.bf16.msra.mxu1 %v1055_v10 }
 0x4cb   :  { %1124 = vrot.lane.b32.xlu2 %v1123_v43, %s1179_s26 }
 0x4cc   :  { %1109 = vrot.lane.b32.xlu1 %v1108_v44, %s1179_s26 }
 0x4cd   :  { %781 = vmatpush.bf16.msra.mxu2 %v1062_v8 }
 0x4ce   :  { %767 = vmatpush.bf16.msra.mxu1 %v1054_v12 }
 0x4d4   :  { %1114 = vrot.lane.b32.xlu1 %v1113_v52, %s1186_s6  ;;  %v1072_v52 = vld [vmem:[%s1585_s10] sm:$0xff] }
 0x51d   :  { %v1105_v39 = vpop.permute.xlu2 %1104 }
 0x51e   :  { %v1107_v22 = vunpack.i.h.bf16 %v1105_v39  ;;  %v1106_v23 = vunpack.i.l.bf16 %v1105_v39 }
 0x525   :  { %v1125_v34 = vpop.permute.xlu2 %1124 }
 0x526   :  { %v1127_v41 = vunpack.i.h.bf16 %v1125_v34  ;;  %v1126_v42 = vunpack.i.l.bf16 %v1125_v34 }
 0x536   :  { %v1100_v13 = vpop.permute.xlu1 %1099  ;;  %v1120_v33 = vpop.permute.xlu0 %1119 }
 0x537   :  { %v1102_v26 = vunpack.i.h.bf16 %v1100_v13  ;;  %v1101_v28 = vunpack.i.l.bf16 %v1100_v13  ;;  %v1122_v38 = vunpack.i.h.bf16 %v1120_v33  ;;  %v1121_v40 = vunpack.i.l.bf16 %v1120_v33  ;;  %v1133_v13 = vld [vmem:[%s1586_s11] ss:$0 sm:$0xff] }
 0x539   :  { %v600_v29 = vsel %vm102_vm0, %v547_v15, %v1101_v28  ;;  %v601_v21 = vsel %vm102_vm0, %v550_v20, %v1102_v26 }
 0x53a   :  { %v602_v25 = vsel %vm594_vm7, %v600_v29, %v1106_v23  ;;  %v603_v27 = vsel %vm594_vm7, %v601_v21, %v1107_v22 }
 0x53e   :  { %v1110_v6 = vpop.permute.xlu1 %1109 }
 0x53f   :  { %v1112_v24 = vunpack.i.h.bf16 %v1110_v6  ;;  %v1111_v11 = vunpack.i.l.bf16 %v1110_v6 }
 0x541   :  { %v604_v30 = vsel %vm597_vm8, %v602_v25, %v1111_v11  ;;  %v605_v31 = vsel %vm597_vm8, %v603_v27, %v1112_v24 }
 0x542   :  { %v607_v32 = vpack.c.bf16 %v605_v31, %v604_v30 }
 0x543   :  { %v797_v57 = vpop.f32.mrf.mxu3 }
 0x544   :  { %782 = vmatmul.bf16.vlgmr.msra.gmra.mxu2 %v607_v32 }
 0x546   :  { %v1115_v35 = vpop.permute.xlu1 %1114 }
 0x547   :  { %v1117_v36 = vunpack.i.h.bf16 %v1115_v35  ;;  %v1116_v37 = vunpack.i.l.bf16 %v1115_v35 }
 0x549   :  { %v593_v43 = vsel %vm102_vm0, %v1422_v3, %v1117_v36  ;;  %v592_v44 = vsel %vm102_vm0, %v1411_v5, %v1116_v37  ;;  %v1074_v3 = vld [vmem:[%s1585_s10 + $0x10] sm:$0xff]  ;;  %v1073_v5 = vld [vmem:[%s1585_s10 + $0x8] sm:$0xff] }
 0x54a   :  { %v596_v45 = vsel %vm594_vm7, %v593_v43, %v1122_v38  ;;  %v595_v46 = vsel %vm594_vm7, %v592_v44, %v1121_v40  ;;  %849 = vmatpush.bf16.msrb.mxu0 %v1074_v3 }
 0x54b   :  { %v598_v47 = vsel %vm597_vm8, %v595_v46, %v1126_v42  ;;  %v599_v48 = vsel %vm597_vm8, %v596_v45, %v1127_v41  ;;  %v799_v7 = vpop.f32.mrf.mxu3 }
 0x54c   :  { %v606_v49 = vpack.c.bf16 %v599_v48, %v598_v47  ;;  %v1134_v47 = vld [vmem:[%s1587_s12] ss:$0 sm:$0xff] }
 0x54e   :  { %768 = vmatmul.bf16.vlgmr.msra.gmra.mxu1 %v606_v49  ;;  %850 = vmatpush.bf16.msrb.mxu0 %v1073_v5  ;;  %v1135_v49 = vld [vmem:[%s1588_s13] ss:$0 sm:$0xff] }
 0x552   :  { %851 = vmatpush.bf16.msrb.mxu0 %v1072_v52 }
 0x5c7   :  { %v783_v55 = vpop.f32.mrf.mxu2 }
 0x5cb   :  { %v769_v56 = vpop.f32.mrf.mxu1 }
 0x5cc   :  { %v770_v58 = vadd.f32 %v1132_v53, %v769_v56 }
 0x5ce   :  { %v784_v60 = vadd.f32 %v783_v55, %v770_v58 }
 0x5cf   :  { %v785_v0 = vpop.f32.mrf.mxu2 }
 0x5d0   :  { %v798_v1 = vadd.f32 %v797_v57, %v784_v60 }
 0x5d2   :  { %v802_v9 = vmax.f32 %v798_v1, 0.0 }
 0x5d3   :  { %v771_v61 = vpop.f32.mrf.mxu1 }
 0x5d4   :  { %v772_v63 = vadd.f32 %v1132_v53, %v771_v61 }
 0x5d6   :  { %v786_v2 = vadd.f32 %v785_v0, %v772_v63 }
 0x5d8   :  { %v800_v8 = vadd.f32 %v799_v7, %v786_v2 }
 0x5da   :  { %v803_v10 = vmax.f32 %v800_v8, 0.0 }
 0x5dc   :  { %v804_v12 = vpack.c.bf16 %v803_v10, %v802_v9 }
 0x5de   :  { %1049 = vmatmul.msk.bf16.vlgmr.msrb.gmra.mxu0 %vm594_vm7, %v804_v12 }
 0x65b   :  { %v853_v14 = vpop.f32.mrf.mxu0 }
 0x65c   :  { %v854_v16 = vadd.f32 %v1133_v13, %v853_v14 }
 0x65e   :  { %v858_v17 = vadd.f32 %v854_v16, %v1402_v59 }
 0x660   :  { %v862_v18 = vsel %vm102_vm0, %v858_v17, 0.0  ;;  %v870_v26 = vmul.f32 %v858_v17, %v858_v17 }
 0x661   :  { %863 = vadd.xlane.f32.xlu1 %v862_v18 }
 0x662   :  { %v872_v28 = vsel %vm102_vm0, %v870_v26, 0.0 }
 0x663   :  { %v855_v39 = vpop.f32.mrf.mxu0  ;;  %873 = vadd.xlane.f32.xlu2 %v872_v28 }
 0x664   :  { %v856_v15 = vadd.f32 %v1133_v13, %v855_v39 }
 0x666   :  { %v859_v20 = vadd.f32 %v856_v15, %v1408_v4 }
 0x668   :  { %v865_v29 = vsel %vm102_vm0, %v859_v20, 0.0  ;;  %v871_v21 = vmul.f32 %v859_v20, %v859_v20 }
 0x669   :  { %866 = vadd.xlane.f32.xlu0 %v865_v29 }
 0x66a   :  { %v875_v22 = vsel %vm102_vm0, %v871_v21, 0.0 }
 0x66b   :  { %876 = vadd.xlane.f32.xlu1 %v875_v22 }
 0x6d4   :  { %v864_v23 = vpop.xlane.xlu1 %863 }
 0x6d5   :  { %v868_v59 = vmul.f32 %v864_v23, %v1377_v19 }
 0x6d6   :  { %v874_v6 = vpop.xlane.xlu2 %873 }
 0x6d7   :  { %v880_v24 = vmul.f32 %v868_v59, %v868_v59  ;;  %v878_v11 = vmul.f32 %v874_v6, %v1377_v19  ;;  %v886_v46 = vsub.f32 %v858_v17, %v868_v59 }
 0x6d9   :  { %v882_v25 = vsub.f32 %v878_v11, %v880_v24 }
 0x6db   :  { %v884_v27 = vmax.f32 %v882_v25, 0.0 }
 0x6dc   :  { %v867_v30 = vpop.xlane.xlu0 %866 }
 0x6dd   :  { %v888_v31 = vadd.f32 1e-05, %v884_v27  ;;  %v869_v4 = vmul.f32 %v867_v30, %v1377_v19 }
 0x6de   :  { %v877_v32 = vpop.xlane.xlu1 %876 }
 0x6df   :  { %1158 = vrsqrt.f32 %v888_v31  ;;  %v881_v33 = vmul.f32 %v869_v4, %v869_v4  ;;  %v879_v34 = vmul.f32 %v877_v32, %v1377_v19  ;;  %vm896_vm9 = vweird.f32 %v888_v31 }
 0x6e0   :  { %v887_v58 = vsub.f32 %v859_v20, %v869_v4 }
 0x6e1   :  { %v883_v35 = vsub.f32 %v879_v34, %v881_v33 }
 0x6e3   :  { %v885_v36 = vmax.f32 %v883_v35, 0.0 }
 0x6e5   :  { %v1159_v37 = vpop.eup %1158  ;;  %v889_v40 = vadd.f32 1e-05, %v885_v36 }
 0x6e6   :  { %v891_v38 = vmul.f32 %v1159_v37, %v888_v31  ;;  %vm897_vm5 = vweird.f32 %v1159_v37 }
 0x6e7   :  { %1160 = vrsqrt.f32 %v889_v40  ;;  %vm898_vm10 = vmor %vm896_vm9, %vm897_vm5  ;;  %vm906_vm12 = vweird.f32 %v889_v40 }
 0x6e8   :  { %v892_v41 = vmul.f32 %v1159_v37, %v891_v38 }
 0x6ea   :  { %v893_v42 = vmul.f32 0.5, %v892_v41 }
 0x6ec   :  { %v894_v43 = vsub.f32 1.5, %v893_v42 }
 0x6ed   :  { %v1161_v44 = vpop.eup %1160 }
 0x6ee   :  { %v895_v45 = vmul.f32 %v1159_v37, %v894_v43  ;;  %v901_v19 = vmul.f32 %v1161_v44, %v889_v40  ;;  %vm907_vm11 = vweird.f32 %v1161_v44 }
 0x6ef   :  { %vm908_vm13 = vmor %vm906_vm12, %vm907_vm11 }
 0x6f0   :  { %v899_v48 = vsel %vm898_vm10, %v1159_v37, %v895_v45  ;;  %v902_v3 = vmul.f32 %v1161_v44, %v901_v19 }
 0x6f1   :  { %v910_v51 = vmul.f32 %v899_v48, %v886_v46 }
 0x6f2   :  { %v903_v52 = vmul.f32 0.5, %v902_v3 }
 0x6f3   :  { %v915_v5 = vmul.f32 %v1134_v47, %v910_v51 }
 0x6f4   :  { %v904_v55 = vsub.f32 1.5, %v903_v52 }
 0x6f5   :  { %v920_v53 = vadd.f32 %v1135_v49, %v915_v5 }
 0x6f6   :  { %v905_v57 = vmul.f32 %v1161_v44, %v904_v55 }
 0x6f7   :  { %v922_v56 = vmul.f32 %v1096_v54, %v920_v53 }
 0x6f8   :  { %v909_v60 = vsel %vm908_vm13, %v1161_v44, %v905_v57 }
 0x6f9   :  { %924 = vst.msk [vmem:[%s1589_s14] sm:$0xff] %vm102_vm0, %v922_v56  ;;  %v911_v61 = vmul.f32 %v909_v60, %v887_v58 }
 0x6fb   :  { %v916_v63 = vmul.f32 %v1134_v47, %v911_v61 }
 0x6fd   :  { %v921_v0 = vadd.f32 %v1135_v49, %v916_v63 }
 0x6ff   :  { %v923_v1 = vmul.f32 %v1097_v62, %v921_v0 }
 0x701   :  { %925 = vst.msk [vmem:[%s1589_s14 + $0x8] sm:$0xff] %vm102_vm0, %v923_v1 }
 0x702   :  { %930 = vsyncpa [#allocation3], 1 }

// kernel: fastspeech2_forward.10
= control target key start
LH: loop header
LB: loop body
LE: loop exit
PB: predicated region body
PF: predicated region fallthrough
CT: control target
= control target key end

     0   :  { %s787_s0 = inlined_call_operand.vmem [shape: s32[2], index: 0, kind: input, shape index: {}]   ;;  %s788_s1 = inlined_call_operand.vmem [shape: f32[2,8,32], index: 1, kind: input, shape index: {}]   ;;  %s789_s2 = inlined_call_operand.vmem [shape: bf16[96,32], index: 2, kind: input, shape index: {}]   ;;  %s790_s3 = inlined_call_operand.vmem [shape: f32[1,32], index: 3, kind: input, shape index: {}]   ;;  %s791_s4 = inlined_call_operand.vmem [shape: f32[1,32], index: 4, kind: input, shape index: {}]   ;;  %s792_s5 = inlined_call_operand.vmem [shape: f32[1,32], index: 5, kind: input, shape index: {}]   ;;  %s793_s6 = inlined_call_operand.vmem [shape: bf16[96,32], index: 6, kind: input, shape index: {}]   ;;  %s794_s7 = inlined_call_operand.vmem [shape: f32[1,32], index: 7, kind: input, shape index: {}]   ;;  %s795_s8 = inlined_call_operand.vmem [shape: f32[1,32], index: 8, kind: input, shape index: {}]   ;;  %s796_s9 = inlined_call_operand.vmem [shape: f32[1,32], index: 9, kind: input, shape index: {}]   ;;  %s797_s10 = inlined_call_operand.vmem [shape: f32[1,32], index: 10, kind: input, shape index: {}]   ;;  %s798_s11 = inlined_call_operand.<no memory space> [shape: f32[1,1], index: 11, kind: input, shape index: {}]   ;;  %s799_s12 = inlined_call_operand.vmem [shape: f32[2,8,1], index: 12, kind: output, shape index: {}]  }
   0x1   :  { %v17_v0 = vstv %s798_s11 }
   0x2   :  { %18 = vst [vmem:[#allocation2] sm:$0x1] %v17_v0 }
   0x3   :  { %19 = vsyncpa [#allocation4], 0  ;;  %s25_s25 = sshll.u32 %s787_s0, 4  ;;  %s586_s26 = smov [#allocation3]   ;;  %s26_s25 = int_to_ptr.vmem [resolvable:$true] %s25_s25 }
   0x4   :  { %28 = dma.vmem_to_smem %s26_s25, 16, %s586_s26, [#allocation4]  }
   0x5   :  { %584 = dma.done.wait [#allocation4], 16  }
   0x6   :  { %585 = vsyncadd [#allocation4], 4294967280 }
   0x7   :  { %55 = sfence }
   0x8   :  { %v69_v1 = vld [vmem:[%s788_s1] sm:$0xff]  ;;  %v70_v2 = vld [vmem:[%s788_s1 + $0x8] sm:$0xff]  ;;  %vm77_vm0 = vcmask 1040384   ;;  %vm86_vm1 = vcmask 1046528   ;;  %vm99_vm2 = vcmask 1045504   ;;  %v520_v22 = vld [vmem:[%s789_s2 + $0x18] sm:$0xff] }
   0x9   :  { %v73_v3 = vrot.slane %v69_v1, 7  ;;  %v74_v4 = vrot.slane %v70_v2, 7  ;;  %v522_v5 = vld [vmem:[%s789_s2 + $0x28] sm:$0xff]  ;;  %v521_v6 = vld [vmem:[%s789_s2 + $0x20] sm:$0xff]  ;;  %s587_s16 = smov 32   ;;  %s588_s17 = smov 64  }
   0xa   :  { %177 = vmatpush.bf16.msra.mxu0 %v522_v5  ;;  %v519_v26 = vld [vmem:[%s789_s2 + $0x10] sm:$0xff]  ;;  %v518_v27 = vld [vmem:[%s789_s2 + $0x8] sm:$0xff]  ;;  %v517_v28 = vld [vmem:[%s789_s2] sm:$0xff]  ;;  %vm112_vm3 = vcmask 261120   ;;  %vm115_vm4 = vcmask 523264   ;;  %vm171_vm5 = vcmask 785408  }
   0xb   :  { %v78_v7 = vsel %vm77_vm0, 0.0, %v73_v3  ;;  %v79_v8 = vsel %vm77_vm0, 0.0, %v74_v4  ;;  %v80_v9 = vsel %vm77_vm0, %v73_v3, 0.0  ;;  %v81_v10 = vsel %vm77_vm0, %v74_v4, 0.0  ;;  %v554_v40 = vld [vmem:[%s790_s3] ss:$0 sm:$0xff] }
   0xc   :  { %v87_v11 = vrot.slane %v78_v7, 1  ;;  %v88_v12 = vrot.slane %v80_v9, 1  ;;  %v90_v13 = vrot.slane %v79_v8, 1  ;;  %v91_v14 = vrot.slane %v81_v10, 1 }
   0xd   :  { %v101_v15 = vrot.slane %v80_v9, 2  ;;  %v104_v16 = vrot.slane %v81_v10, 2  ;;  %v100_v17 = vrot.slane %v78_v7, 2  ;;  %v103_v18 = vrot.slane %v79_v8, 2 }
   0xe   :  { %v89_v19 = vsel %vm86_vm1, %v87_v11, %v88_v12  ;;  %v92_v20 = vsel %vm86_vm1, %v90_v13, %v91_v14  ;;  %178 = vmatpush.bf16.msra.mxu0 %v521_v6  ;;  %v589_v53 = vmov 32.0  }
   0xf   :  { %v534_v21 = vpack.i.bf16 %v92_v20, %v89_v19  ;;  %v102_v23 = vsel %vm99_vm2, %v100_v17, %v101_v15  ;;  %v105_v24 = vsel %vm99_vm2, %v103_v18, %v104_v16  ;;  %562 = vrcp.f32 %v589_v53  ;;  %v528_v15 = vld [vmem:[%s793_s6 + $0x28] sm:$0xff]  ;;  %v527_v17 = vld [vmem:[%s793_s6 + $0x20] sm:$0xff] }
  0x10   :  { %v539_v25 = vpack.i.bf16 %v105_v24, %v102_v23  ;;  %360 = vmatpush.bf16.msra.mxu1 %v528_v15  ;;  %v555_v23 = vld [vmem:[%s791_s4] ss:$0 sm:$0xff] }
  0x11   :  { %535 = vrot.lane.b32.xlu0 %v534_v21, %s587_s16  ;;  %v526_v21 = vld [vmem:[%s793_s6 + $0x18] sm:$0xff] }
  0x12   :  { %179 = vmatpush.bf16.msra.mxu0 %v520_v22 }
  0x14   :  { %361 = vmatpush.bf16.msra.mxu1 %v527_v17 }
  0x15   :  { %v563_v54 = vpop.eup %562 }
  0x16   :  { %180 = vmatpush.bf16.msra.mxu0 %v519_v26  ;;  %v200_v55 = vmul.f32 32.0, %v563_v54  ;;  %vm204_vm6 = vweird.f32 %v563_v54 }
  0x18   :  { %v201_v56 = vsub.f32 1.0, %v200_v55  ;;  %362 = vmatpush.bf16.msra.mxu1 %v526_v21 }
  0x19   :  { %540 = vrot.lane.b32.xlu0 %v539_v25, %s588_s17 }
  0x1a   :  { %181 = vmatpush.bf16.msra.mxu0 %v518_v27  ;;  %v202_v57 = vmul.f32 %v563_v54, %v201_v56 }
  0x1c   :  { %v203_v58 = vadd.f32 %v563_v54, %v202_v57 }
  0x1e   :  { %182 = vmatpush.bf16.msra.mxu0 %v517_v28  ;;  %v713_v59 = vsel %vm204_vm6, %v563_v54, %v203_v58  ;;  %v556_v28 = vld [vmem:[%s792_s5] ss:$0 sm:$0xff] }
  0x83   :  { %v536_v29 = vpop.permute.xlu0 %535 }
  0x84   :  { %v538_v30 = vunpack.i.h.bf16 %v536_v29  ;;  %v537_v31 = vunpack.i.l.bf16 %v536_v29  ;;  %v525_v29 = vld [vmem:[%s793_s6 + $0x10] sm:$0xff] }
  0x85   :  { %363 = vmatpush.bf16.msra.mxu1 %v525_v29 }
  0x86   :  { %v114_v35 = vsel %vm112_vm3, %v79_v8, %v538_v30  ;;  %v113_v36 = vsel %vm112_vm3, %v78_v7, %v537_v31 }
  0x8b   :  { %v541_v32 = vpop.permute.xlu0 %540 }
  0x8c   :  { %v543_v33 = vunpack.i.h.bf16 %v541_v32  ;;  %v542_v34 = vunpack.i.l.bf16 %v541_v32 }
  0x8e   :  { %v116_v37 = vsel %vm115_vm4, %v113_v36, %v542_v34  ;;  %v117_v38 = vsel %vm115_vm4, %v114_v35, %v543_v33  ;;  %v524_v34 = vld [vmem:[%s793_s6 + $0x8] sm:$0xff] }
  0x8f   :  { %v118_v39 = vpack.c.bf16 %v117_v38, %v116_v37  ;;  %364 = vmatpush.bf16.msra.mxu1 %v524_v34 }
  0x91   :  { %491 = vmatmul.msk.bf16.vlgmr.msra.gmra.mxu0 %vm171_vm5, %v118_v39 }
 0x10e   :  { %v184_v41 = vpop.f32.mrf.mxu0 }
 0x10f   :  { %v185_v42 = vadd.f32 %v554_v40, %v184_v41 }
 0x111   :  { %v189_v43 = vmax.f32 %v185_v42, 0.0 }
 0x113   :  { %v193_v44 = vsel %vm112_vm3, %v189_v43, 0.0  ;;  %v208_v45 = vmul.f32 %v189_v43, %v189_v43 }
 0x114   :  { %194 = vadd.xlane.f32.xlu1 %v193_v44 }
 0x115   :  { %v210_v46 = vsel %vm112_vm3, %v208_v45, 0.0 }
 0x116   :  { %v186_v47 = vpop.f32.mrf.mxu0  ;;  %211 = vadd.xlane.f32.xlu2 %v210_v46 }
 0x117   :  { %v187_v48 = vadd.f32 %v554_v40, %v186_v47 }
 0x119   :  { %v706_v49 = vmax.f32 %v187_v48, 0.0 }
 0x11b   :  { %v196_v50 = vsel %vm112_vm3, %v706_v49, 0.0  ;;  %v209_v51 = vmul.f32 %v706_v49, %v706_v49 }
 0x11c   :  { %197 = vadd.xlane.f32.xlu1 %v196_v50 }
 0x11d   :  { %v213_v52 = vsel %vm112_vm3, %v209_v51, 0.0 }
 0x11e   :  { %214 = vadd.xlane.f32.xlu2 %v213_v52 }
 0x187   :  { %v195_v60 = vpop.xlane.xlu1 %194 }
 0x188   :  { %v206_v61 = vmul.f32 %v713_v59, %v195_v60 }
 0x189   :  { %v212_v62 = vpop.xlane.xlu2 %211 }
 0x18a   :  { %v218_v63 = vmul.f32 %v206_v61, %v206_v61  ;;  %v216_v0 = vmul.f32 %v212_v62, %v713_v59  ;;  %v224_v22 = vsub.f32 %v189_v43, %v206_v61  ;;  %v523_v62 = vld [vmem:[%s793_s6] sm:$0xff] }
 0x18b   :  { %365 = vmatpush.bf16.msra.mxu1 %v523_v62 }
 0x18c   :  { %v220_v1 = vsub.f32 %v216_v0, %v218_v63 }
 0x18e   :  { %v222_v2 = vmax.f32 %v220_v1, 0.0 }
 0x18f   :  { %v198_v3 = vpop.xlane.xlu1 %197 }
 0x190   :  { %v226_v4 = vadd.f32 1e-05, %v222_v2  ;;  %v207_v5 = vmul.f32 %v713_v59, %v198_v3 }
 0x191   :  { %v215_v6 = vpop.xlane.xlu2 %214 }
 0x192   :  { %564 = vrsqrt.f32 %v226_v4  ;;  %v219_v7 = vmul.f32 %v207_v5, %v207_v5  ;;  %v217_v8 = vmul.f32 %v215_v6, %v713_v59  ;;  %vm234_vm8 = vweird.f32 %v226_v4 }
 0x193   :  { %v225_v36 = vsub.f32 %v706_v49, %v207_v5 }
 0x194   :  { %v221_v9 = vsub.f32 %v217_v8, %v219_v7 }
 0x196   :  { %v223_v10 = vmax.f32 %v221_v9, 0.0 }
 0x198   :  { %v565_v11 = vpop.eup %564  ;;  %v227_v13 = vadd.f32 1e-05, %v223_v10  ;;  %v557_v10 = vld [vmem:[%s794_s7] ss:$0 sm:$0xff] }
 0x199   :  { %v229_v12 = vmul.f32 %v565_v11, %v226_v4  ;;  %vm235_vm7 = vweird.f32 %v565_v11 }
 0x19a   :  { %566 = vrsqrt.f32 %v227_v13  ;;  %vm236_vm9 = vmor %vm234_vm8, %vm235_vm7  ;;  %vm244_vm11 = vweird.f32 %v227_v13 }
 0x19b   :  { %v230_v14 = vmul.f32 %v565_v11, %v229_v12 }
 0x19d   :  { %v231_v16 = vmul.f32 0.5, %v230_v14 }
 0x19f   :  { %v232_v18 = vsub.f32 1.5, %v231_v16 }
 0x1a0   :  { %v567_v19 = vpop.eup %566 }
 0x1a1   :  { %v233_v20 = vmul.f32 %v565_v11, %v232_v18  ;;  %v239_v24 = vmul.f32 %v567_v19, %v227_v13  ;;  %vm245_vm10 = vweird.f32 %v567_v19 }
 0x1a2   :  { %vm246_vm12 = vmor %vm244_vm11, %vm245_vm10 }
 0x1a3   :  { %v237_v25 = vsel %vm236_vm9, %v565_v11, %v233_v20  ;;  %v240_v27 = vmul.f32 %v567_v19, %v239_v24 }
 0x1a4   :  { %v248_v26 = vmul.f32 %v237_v25, %v224_v22 }
 0x1a5   :  { %v241_v31 = vmul.f32 0.5, %v240_v27 }
 0x1a6   :  { %v253_v30 = vmul.f32 %v555_v23, %v248_v26 }
 0x1a7   :  { %v242_v32 = vsub.f32 1.5, %v241_v31 }
 0x1a8   :  { %v258_v33 = vadd.f32 %v556_v28, %v253_v30 }
 0x1a9   :  { %v243_v35 = vmul.f32 %v567_v19, %v242_v32 }
 0x1aa   :  { %v262_v39 = vrot.slane %v258_v33, 7 }
 0x1ab   :  { %v247_v37 = vsel %vm246_vm12, %v567_v19, %v243_v35 }
 0x1ac   :  { %v249_v38 = vmul.f32 %v247_v37, %v225_v36  ;;  %v266_v42 = vsel %vm77_vm0, 0.0, %v262_v39  ;;  %v268_v43 = vsel %vm77_vm0, %v262_v39, 0.0 }
 0x1ad   :  { %v286_v45 = vrot.slane %v266_v42, 2  ;;  %v287_v46 = vrot.slane %v268_v43, 2  ;;  %v274_v47 = vrot.slane %v266_v42, 1  ;;  %v275_v48 = vrot.slane %v268_v43, 1 }
 0x1ae   :  { %v254_v40 = vmul.f32 %v555_v23, %v249_v38 }
 0x1af   :  { %v288_v55 = vsel %vm99_vm2, %v286_v45, %v287_v46  ;;  %v276_v57 = vsel %vm86_vm1, %v274_v47, %v275_v48 }
 0x1b0   :  { %v259_v41 = vadd.f32 %v556_v28, %v254_v40 }
 0x1b2   :  { %v263_v44 = vrot.slane %v259_v41, 7 }
 0x1b4   :  { %v267_v50 = vsel %vm77_vm0, 0.0, %v263_v44  ;;  %v269_v49 = vsel %vm77_vm0, %v263_v44, 0.0 }
 0x1b5   :  { %v289_v51 = vrot.slane %v267_v50, 2  ;;  %v290_v52 = vrot.slane %v269_v49, 2  ;;  %v277_v53 = vrot.slane %v267_v50, 1  ;;  %v278_v54 = vrot.slane %v269_v49, 1 }
 0x1b7   :  { %v291_v56 = vsel %vm99_vm2, %v289_v51, %v290_v52  ;;  %v279_v58 = vsel %vm86_vm1, %v277_v53, %v278_v54  ;;  %v559_v51 = vld [vmem:[%s796_s9] ss:$0 sm:$0xff]  ;;  %s465_s9 = sld [smem:[#allocation3 + $0x1]] }
 0x1b8   :  { %v549_v60 = vpack.i.bf16 %v291_v56, %v288_v55  ;;  %v544_v61 = vpack.i.bf16 %v279_v58, %v276_v57  ;;  %v560_v54 = vld [vmem:[%s797_s10] ss:$0 sm:$0xff] }
 0x1ba   :  { %550 = vrot.lane.b32.xlu1 %v549_v60, %s588_s17  ;;  %545 = vrot.lane.b32.xlu0 %v544_v61, %s587_s16 }
 0x22c   :  { %v551_v63 = vpop.permute.xlu1 %550  ;;  %v546_v0 = vpop.permute.xlu0 %545 }
 0x22d   :  { %v553_v1 = vunpack.i.h.bf16 %v551_v63  ;;  %v552_v2 = vunpack.i.l.bf16 %v551_v63  ;;  %v548_v3 = vunpack.i.h.bf16 %v546_v0  ;;  %v547_v4 = vunpack.i.l.bf16 %v546_v0 }
 0x22f   :  { %v299_v5 = vsel %vm112_vm3, %v267_v50, %v548_v3  ;;  %v298_v6 = vsel %vm112_vm3, %v266_v42, %v547_v4  ;;  %v58_v4 = vlaneseq }
 0x230   :  { %v300_v7 = vsel %vm115_vm4, %v298_v6, %v552_v2  ;;  %v301_v8 = vsel %vm115_vm4, %v299_v5, %v553_v1 }
 0x231   :  { %v302_v9 = vpack.c.bf16 %v301_v8, %v300_v7  ;;  %v59_v5 = vshrl.u32 %v58_v4, 7  ;;  %v561_v7 = vld [vmem:[#allocation2] ss:$0 sm:$0xff] }
 0x233   :  { %516 = vmatmul.msk.bf16.vlgmr.msra.gmra.mxu1 %vm171_vm5, %v302_v9  ;;  %v590_v9 = vmov 0.0   ;;  %vm456_vm5 = vcmask 7168  }
 0x2b0   :  { %v367_v11 = vpop.f32.mrf.mxu1 }
 0x2b1   :  { %v368_v12 = vadd.f32 %v557_v10, %v367_v11 }
 0x2b3   :  { %v372_v13 = vmax.f32 %v368_v12, 0.0  ;;  %v65_v12 = vstv %s465_s9 }
 0x2b5   :  { %v376_v14 = vsel %vm112_vm3, %v372_v13, 0.0  ;;  %v384_v17 = vmul.f32 %v372_v13, %v372_v13 }
 0x2b6   :  { %377 = vadd.xlane.f32.xlu2 %v376_v14 }
 0x2b7   :  { %v386_v20 = vsel %vm112_vm3, %v384_v17, 0.0 }
 0x2b8   :  { %v369_v15 = vpop.f32.mrf.mxu1 }
 0x2b9   :  { %v370_v16 = vadd.f32 %v557_v10, %v369_v15 }
 0x2bb   :  { %v373_v18 = vmax.f32 %v370_v16, 0.0 }
 0x2bd   :  { %v379_v19 = vsel %vm112_vm3, %v373_v18, 0.0  ;;  %v385_v21 = vmul.f32 %v373_v18, %v373_v18 }
 0x2be   :  { %380 = vadd.xlane.f32.xlu0 %v379_v19  ;;  %387 = vadd.xlane.f32.xlu2 %v386_v20 }
 0x2bf   :  { %v389_v22 = vsel %vm112_vm3, %v385_v21, 0.0 }
 0x2c6   :  { %390 = vadd.xlane.f32.xlu2 %v389_v22 }
 0x329   :  { %v378_v23 = vpop.xlane.xlu2 %377 }
 0x32a   :  { %v382_v24 = vmul.f32 %v378_v23, %v713_v59 }
 0x32c   :  { %v394_v26 = vmul.f32 %v382_v24, %v382_v24  ;;  %v400_v47 = vsub.f32 %v372_v13, %v382_v24 }
 0x331   :  { %v388_v25 = vpop.xlane.xlu2 %387  ;;  %v381_v28 = vpop.xlane.xlu0 %380 }
 0x332   :  { %v392_v27 = vmul.f32 %v388_v25, %v713_v59  ;;  %v383_v30 = vmul.f32 %v381_v28, %v713_v59 }
 0x334   :  { %v396_v29 = vsub.f32 %v392_v27, %v394_v26  ;;  %v395_v34 = vmul.f32 %v383_v30, %v383_v30  ;;  %v401_v58 = vsub.f32 %v373_v18, %v383_v30 }
 0x336   :  { %v398_v31 = vmax.f32 %v396_v29, 0.0 }
 0x338   :  { %v402_v32 = vadd.f32 1e-05, %v398_v31 }
 0x339   :  { %v391_v33 = vpop.xlane.xlu2 %390 }
 0x33a   :  { %568 = vrsqrt.f32 %v402_v32  ;;  %v393_v35 = vmul.f32 %v391_v33, %v713_v59  ;;  %vm410_vm14 = vweird.f32 %v402_v32  ;;  %v558_v59 = vld [vmem:[%s795_s8] ss:$0 sm:$0xff]  ;;  %s57_s8 = sld [smem:[#allocation3]] }
 0x33c   :  { %v397_v36 = vsub.f32 %v393_v35, %v395_v34 }
 0x33e   :  { %v399_v37 = vmax.f32 %v397_v36, 0.0 }
 0x340   :  { %v569_v38 = vpop.eup %568  ;;  %v403_v39 = vadd.f32 1e-05, %v399_v37  ;;  %v60_v6 = vstv %s57_s8 }
 0x341   :  { %v405_v40 = vmul.f32 %v569_v38, %v402_v32  ;;  %vm411_vm13 = vweird.f32 %v569_v38  ;;  %vm61_vm4 = vcmp.lt.s32.totalorder %v59_v5, %v60_v6 }
 0x342   :  { %570 = vrsqrt.f32 %v403_v39  ;;  %vm412_vm15 = vmor %vm410_vm14, %vm411_vm13  ;;  %vm420_vm1 = vweird.f32 %v403_v39  ;;  %v464_v10 = vsel %vm61_vm4, 1.0, %v590_v9 }
 0x343   :  { %v406_v41 = vmul.f32 %v569_v38, %v405_v40 }
 0x345   :  { %v407_v42 = vmul.f32 0.5, %v406_v41 }
 0x347   :  { %v408_v43 = vsub.f32 1.5, %v407_v42 }
 0x348   :  { %v571_v44 = vpop.eup %570 }
 0x349   :  { %v409_v45 = vmul.f32 %v569_v38, %v408_v43  ;;  %v415_v46 = vmul.f32 %v571_v44, %v403_v39  ;;  %vm421_vm0 = vweird.f32 %v571_v44 }
 0x34a   :  { %vm422_vm2 = vmor %vm420_vm1, %vm421_vm0 }
 0x34b   :  { %v416_v48 = vmul.f32 %v571_v44, %v415_v46  ;;  %v413_v50 = vsel %vm412_vm15, %v569_v38, %v409_v45 }
 0x34c   :  { %v424_v49 = vmul.f32 %v413_v50, %v400_v47 }
 0x34d   :  { %v417_v52 = vmul.f32 0.5, %v416_v48 }
 0x34e   :  { %v429_v53 = vmul.f32 %v558_v59, %v424_v49 }
 0x34f   :  { %v418_v55 = vsub.f32 1.5, %v417_v52 }
 0x350   :  { %v434_v56 = vadd.f32 %v559_v51, %v429_v53 }
 0x351   :  { %v419_v57 = vmul.f32 %v571_v44, %v418_v55 }
 0x352   :  { %v440_v60 = vmul.f32 %v560_v54, %v434_v56 }
 0x353   :  { %v423_v61 = vsel %vm422_vm2, %v571_v44, %v419_v57 }
 0x354   :  { %v442_v62 = vsel %vm112_vm3, %v440_v60, 0.0  ;;  %v425_v63 = vmul.f32 %v423_v61, %v401_v58 }
 0x355   :  { %443 = vadd.xlane.f32.xlu2 %v442_v62 }
 0x356   :  { %v430_v0 = vmul.f32 %v558_v59, %v425_v63 }
 0x358   :  { %v435_v1 = vadd.f32 %v559_v51, %v430_v0 }
 0x35a   :  { %v441_v2 = vmul.f32 %v560_v54, %v435_v1 }
 0x35c   :  { %v445_v3 = vsel %vm112_vm3, %v441_v2, 0.0  ;;  %vm66_vm3 = vcmp.lt.s32.totalorder %v59_v5, %v65_v12 }
 0x35d   :  { %446 = vadd.xlane.f32.xlu1 %v445_v3  ;;  %v466_v15 = vsel %vm66_vm3, 1.0, %v590_v9 }
 0x3c8   :  { %v444_v8 = vpop.xlane.xlu2 %443 }
 0x3c9   :  { %v452_v11 = vadd.f32 %v561_v7, %v444_v8 }
 0x3cb   :  { %v454_v13 = vmul.f32 %v464_v10, %v452_v11 }
 0x3cd   :  { %457 = vst.msk [vmem:[%s799_s12] sm:$0xff] %vm456_vm5, %v454_v13 }
 0x3d0   :  { %v447_v14 = vpop.xlane.xlu1 %446 }
 0x3d1   :  { %v453_v16 = vadd.f32 %v561_v7, %v447_v14 }
 0x3d3   :  { %v455_v17 = vmul.f32 %v466_v15, %v453_v16 }
 0x3d5   :  { %458 = vst.msk [vmem:[%s799_s12 + $0x8] sm:$0xff] %vm456_vm5, %v455_v17 }
 0x3d6   :  { %463 = vsyncpa [#allocation4], 1 }

// kernel: fastspeech2_forward.11
= control target key start
LH: loop header
LB: loop body
LE: loop exit
PB: predicated region body
PF: predicated region fallthrough
CT: control target
= control target key end

     0   :  { %19 = vsyncpa [#allocation3], 0  ;;  %s1613_s16 = smov [#allocation2]   ;;  %s2241_s0 = inlined_call_operand.vmem [shape: s32[2], index: 0, kind: input, shape index: {}]   ;;  %s2242_s1 = inlined_call_operand.vmem [shape: f32[2,16,32], index: 1, kind: input, shape index: {}]   ;;  %s2243_s2 = inlined_call_operand.vmem [shape: bf16[32,96], index: 2, kind: input, shape index: {}]   ;;  %s2244_s3 = inlined_call_operand.vmem [shape: f32[1,96], index: 3, kind: input, shape index: {}]   ;;  %s2245_s4 = inlined_call_operand.vmem [shape: bf16[32,32], index: 4, kind: input, shape index: {}]   ;;  %s2246_s5 = inlined_call_operand.vmem [shape: f32[1,32], index: 5, kind: input, shape index: {}]   ;;  %s2247_s6 = inlined_call_operand.vmem [shape: f32[1,32], index: 6, kind: input, shape index: {}]   ;;  %s2248_s7 = inlined_call_operand.vmem [shape: f32[1,32], index: 7, kind: input, shape index: {}]   ;;  %s2249_s8 = inlined_call_operand.vmem [shape: bf16[288,64], index: 8, kind: input, shape index: {}]   ;;  %s2250_s9 = inlined_call_operand.vmem [shape: f32[1,64], index: 9, kind: input, shape index: {}]   ;;  %s2251_s10 = inlined_call_operand.vmem [shape: bf16[64,32], index: 10, kind: input, shape index: {}]   ;;  %s2252_s11 = inlined_call_operand.vmem [shape: f32[1,32], index: 11, kind: input, shape index: {}]   ;;  %s2253_s12 = inlined_call_operand.vmem [shape: f32[1,32], index: 12, kind: input, shape index: {}]   ;;  %s2254_s13 = inlined_call_operand.vmem [shape: f32[1,32], index: 13, kind: input, shape index: {}]   ;;  %s2255_s14 = inlined_call_operand.vmem [shape: f32[2,16,32], index: 14, kind: output, shape index: {}]  }
   0x1   :  { %s25_s15 = sshll.u32 %s2241_s0, 4  ;;  %s26_s15 = int_to_ptr.vmem [resolvable:$true] %s25_s15 }
   0x2   :  { %28 = dma.vmem_to_smem %s26_s15, 16, %s1613_s16, [#allocation3]  }
   0x3   :  { %1611 = dma.done.wait [#allocation3], 16  }
   0x4   :  { %1612 = vsyncadd [#allocation3], 4294967280 }
   0x5   :  { %59 = sfence }
   0x6   :  { %v1423_v0 = vld [vmem:[%s2243_s2 + $0x8] sm:$0xff]  ;;  %v1422_v1 = vld [vmem:[%s2243_s2] sm:$0xff]  ;;  %vm112_vm0 = vcmask 261120   ;;  %v1724_v5 = vld [vmem:[%s2242_s1 + $0x10] sm:$0xff]  ;;  %s1615_s29 = smov 96   ;;  %vm149_vm1 = vcmask 130048   ;;  %v62_v37 = vlaneseq }
   0x7   :  { %v1711_v2 = vld [vmem:[%s2242_s1] sm:$0xff]  ;;  %125 = vmatpush.bf16.msra.mxu0 %v1423_v0  ;;  %v1716_v3 = vld [vmem:[%s2242_s1 + $0x8] sm:$0xff]  ;;  %v1729_v6 = vld [vmem:[%s2242_s1 + $0x18] sm:$0xff]  ;;  %s1614_s1 = smov 80   ;;  %s61_s30 = sld [smem:[#allocation2]]  ;;  %v1617_v40 = vmov 0.0  }
   0x8   :  { %v90_v4 = vpack.c.bf16 %v1716_v3, %v1711_v2  ;;  %v91_v7 = vpack.c.bf16 %v1729_v6, %v1724_v5  ;;  %v1541_v9 = vld [vmem:[%s2244_s3] ss:$0 sm:$0xff]  ;;  %s1616_s3 = smov 112   ;;  %v63_v38 = vand.u32 127, %v62_v37  ;;  %s1297_s15 = sld [smem:[#allocation2 + $0x1]]  ;;  %vm681_vm15 = vcmask 1043456  }
   0x9   :  { %s1618_s16 = smov 64   ;;  %s1619_s17 = smov 48  }
   0xa   :  { %s1620_s20 = smov 16  }
   0xb   :  { %126 = vmatpush.bf16.msra.mxu0 %v1422_v1 }
   0xd   :  { %v1760_v39 = vstv %s61_s30 }
   0xe   :  { %1310 = vmatmul.msk.bf16.vlgmr.msra.gmra.mxu0 %vm112_vm0, %v90_v4  ;;  %vm65_vm2 = vcmp.ge.s32.totalorder %v63_v38, %v1760_v39  ;;  %v1765_v50 = vstv %s1297_s15 }
   0xf   :  { %v66_v41 = vsel %vm65_vm2, -1e+30, %v1617_v40  ;;  %vm69_vm3 = vcmp.ge.s32.totalorder %v63_v38, %v1765_v50  ;;  %vm702_vm2 = vcmask 1046528  }
  0x10   :  { %v201_v42 = vperm.slane %v66_v41, 0  ;;  %v70_v54 = vsel %vm69_vm3, -1e+30, %v1617_v40  ;;  %vm725_vm3 = vcmask 1045504  }
  0x11   :  { %v202_v56 = vperm.slane %v70_v54, 0 }
  0x1e   :  { %1311 = vmatmul.msk.bf16.gmra.mxu0 %vm112_vm0, %v91_v7 }
  0x8b   :  { %v128_v8 = vpop.f32.mrf.mxu0 }
  0x8c   :  { %v129_v10 = vadd.f32 %v1541_v9, %v128_v8 }
  0x8e   :  { %v138_v12 = vpack.c.bf16 %v129_v10, %v129_v10 }
  0x90   :  { %v144_v15 = vunpack.c.l.b16 %v138_v12 }
  0x93   :  { %v130_v11 = vpop.f32.mrf.mxu0 }
  0x94   :  { %v131_v13 = vadd.f32 %v1541_v9, %v130_v11 }
  0x96   :  { %v139_v14 = vpack.c.bf16 %v131_v13, %v131_v13 }
  0x98   :  { %v145_v16 = vunpack.c.l.b16 %v139_v14 }
  0x9a   :  { %v1737_v17 = vpack.c.b16 %v145_v16, %v144_v15 }
  0x9b   :  { %v133_v18 = vpop.f32.mrf.mxu0 }
  0x9c   :  { %307 = vrot.lane.b32.xlu1 %v1737_v17, %s1614_s1  ;;  %147 = vrot.lane.b32.xlu0 %v1737_v17, %s1615_s29  ;;  %v134_v19 = vadd.f32 %v1541_v9, %v133_v18 }
  0x9e   :  { %v140_v21 = vpack.c.bf16 %v134_v19, %v134_v19 }
  0xa0   :  { %v172_v24 = vunpack.c.l.b16 %v140_v21 }
  0xa3   :  { %v135_v20 = vpop.f32.mrf.mxu0 }
  0xa4   :  { %v136_v22 = vadd.f32 %v1541_v9, %v135_v20  ;;  %305 = vrot.lane.b32.xlu1 %v1737_v17, %s1616_s3 }
  0xa6   :  { %v141_v23 = vpack.c.bf16 %v136_v22, %v136_v22 }
  0xa8   :  { %v173_v25 = vunpack.c.l.b16 %v141_v23 }
  0xaa   :  { %v1743_v26 = vpack.c.b16 %v173_v25, %v172_v24 }
  0xac   :  { %331 = vrot.lane.b32.xlu2 %v1743_v26, %s1614_s1  ;;  %175 = vrot.lane.b32.xlu0 %v1743_v26, %s1615_s29 }
  0xb4   :  { %329 = vrot.lane.b32.xlu2 %v1743_v26, %s1616_s3 }
 0x106   :  { %v332_v31 = vpop.permute.xlu2 %331 }
 0x107   :  { %v337_v34 = vsel %vm149_vm1, %v332_v31, 0 }
 0x10e   :  { %v308_v27 = vpop.permute.xlu1 %307  ;;  %v148_v28 = vpop.permute.xlu0 %147 }
 0x10f   :  { %v313_v29 = vsel %vm149_vm1, %v308_v27, 0  ;;  %v154_v30 = vsel %vm149_vm1, %v148_v28, 0  ;;  %v330_v36 = vpop.permute.xlu2 %329 }
 0x110   :  { %163 = vmatpush.bf16.xpose.msra.mxu1 %v154_v30 }
 0x116   :  { %v306_v35 = vpop.permute.xlu1 %305 }
 0x117   :  { %1312 = vmatmul.msk.bf16.vlgmr.msra.gmra.mxu1 %vm149_vm1, %v1737_v17 }
 0x118   :  { %322 = vmatpush.bf16.xpose.msrb.mxu1 %v313_v29 }
 0x11e   :  { %v176_v32 = vpop.permute.xlu0 %175 }
 0x11f   :  { %v181_v33 = vsel %vm149_vm1, %v176_v32, 0 }
 0x120   :  { %190 = vmatpush.bf16.xpose.msra.mxu2 %v181_v33 }
 0x127   :  { %1313 = vmatmul.msk.bf16.vlgmr.msra.gmra.mxu2 %vm149_vm1, %v1743_v26  ;;  %1316 = vmatmul.msk.bf16.vlgmr.msrb.gmra.mxu1 %vm149_vm1, %v306_v35 }
 0x128   :  { %346 = vmatpush.bf16.xpose.msrb.mxu2 %v337_v34 }
 0x137   :  { %1317 = vmatmul.msk.bf16.vlgmr.msrb.gmra.mxu2 %vm149_vm1, %v330_v36 }
 0x194   :  { %v165_v43 = vpop.f32.mrf.mxu1 }
 0x195   :  { %v197_v44 = vmul.f32 0.25, %v165_v43 }
 0x197   :  { %v203_v45 = vadd.f32 %v201_v42, %v197_v44 }
 0x199   :  { %v207_v46 = vsel %vm149_vm1, %v203_v45, -inf }
 0x19a   :  { %208 = vmax.xlane.f32.xlu0 %v207_v46 }
 0x19c   :  { %v167_v47 = vpop.f32.mrf.mxu1 }
 0x19d   :  { %v198_v48 = vmul.f32 0.25, %v167_v47 }
 0x19f   :  { %v204_v49 = vadd.f32 %v201_v42, %v198_v48 }
 0x1a1   :  { %v210_v51 = vsel %vm149_vm1, %v204_v49, -inf }
 0x1a2   :  { %211 = vmax.xlane.f32.xlu1 %v210_v51 }
 0x1a4   :  { %v324_v52 = vpop.f32.mrf.mxu1 }
 0x1a5   :  { %v353_v53 = vmul.f32 0.25, %v324_v52 }
 0x1a7   :  { %v357_v55 = vadd.f32 %v353_v53, %v201_v42 }
 0x1a9   :  { %v361_v58 = vsel %vm149_vm1, %v357_v55, -inf }
 0x1aa   :  { %v192_v57 = vpop.f32.mrf.mxu2  ;;  %362 = vmax.xlane.f32.xlu0 %v361_v58 }
 0x1ab   :  { %v199_v59 = vmul.f32 0.25, %v192_v57 }
 0x1ac   :  { %v326_v60 = vpop.f32.mrf.mxu1 }
 0x1ad   :  { %v205_v61 = vadd.f32 %v202_v56, %v199_v59  ;;  %v354_v62 = vmul.f32 0.25, %v326_v60 }
 0x1af   :  { %v213_v63 = vsel %vm149_vm1, %v205_v61, -inf  ;;  %v358_v0 = vadd.f32 %v354_v62, %v201_v42 }
 0x1b0   :  { %214 = vmax.xlane.f32.xlu2 %v213_v63 }
 0x1b1   :  { %v364_v4 = vsel %vm149_vm1, %v358_v0, -inf }
 0x1b2   :  { %v194_v1 = vpop.f32.mrf.mxu2  ;;  %365 = vmax.xlane.f32.xlu1 %v364_v4 }
 0x1b3   :  { %v200_v7 = vmul.f32 0.25, %v194_v1 }
 0x1b5   :  { %v206_v8 = vadd.f32 %v202_v56, %v200_v7 }
 0x1b7   :  { %v216_v9 = vsel %vm149_vm1, %v206_v8, -inf }
 0x1b8   :  { %217 = vmax.xlane.f32.xlu2 %v216_v9 }
 0x1ba   :  { %v348_v10 = vpop.f32.mrf.mxu2 }
 0x1bb   :  { %v355_v11 = vmul.f32 0.25, %v348_v10 }
 0x1bd   :  { %v359_v12 = vadd.f32 %v355_v11, %v202_v56 }
 0x1bf   :  { %v367_v13 = vsel %vm149_vm1, %v359_v12, -inf }
 0x1c0   :  { %368 = vmax.xlane.f32.xlu1 %v367_v13 }
 0x1c2   :  { %v350_v14 = vpop.f32.mrf.mxu2 }
 0x1c3   :  { %v356_v15 = vmul.f32 0.25, %v350_v14 }
 0x1c5   :  { %v360_v16 = vadd.f32 %v356_v15, %v202_v56 }
 0x1c7   :  { %v370_v18 = vsel %vm149_vm1, %v360_v16, -inf }
 0x1c8   :  { %371 = vmax.xlane.f32.xlu2 %v370_v18 }
 0x20d   :  { %v209_v19 = vpop.xlane.xlu0 %208 }
 0x20e   :  { %v219_v20 = vsub.f32 %v203_v45, %v209_v19 }
 0x210   :  { %v223_v21 = vmul.f32 1.442695, %v219_v20 }
 0x212   :  { %1549 = vpow2.f32 %v223_v21 }
 0x215   :  { %v212_v22 = vpop.xlane.xlu1 %211 }
 0x216   :  { %v220_v23 = vsub.f32 %v204_v49, %v212_v22 }
 0x218   :  { %v1776_v24 = vpop.eup %1549  ;;  %v225_v25 = vmul.f32 1.442695, %v220_v23 }
 0x219   :  { %v231_v27 = vsel %vm149_vm1, %v1776_v24, 0.0 }
 0x21a   :  { %1551 = vpow2.f32 %v225_v25  ;;  %232 = vadd.xlane.f32.xlu2 %v231_v27 }
 0x21d   :  { %v363_v28 = vpop.xlane.xlu0 %362 }
 0x21e   :  { %v373_v29 = vsub.f32 %v357_v55, %v363_v28 }
 0x220   :  { %v1552_v30 = vpop.eup %1551  ;;  %v377_v31 = vmul.f32 1.442695, %v373_v29 }
 0x221   :  { %v234_v32 = vsel %vm149_vm1, %v1552_v30, 0.0 }
 0x222   :  { %1553 = vpow2.f32 %v377_v31  ;;  %235 = vadd.xlane.f32.xlu0 %v234_v32 }
 0x223   :  { %v215_v33 = vpop.xlane.xlu2 %214 }
 0x224   :  { %v221_v34 = vsub.f32 %v205_v61, %v215_v33 }
 0x225   :  { %v366_v48 = vpop.xlane.xlu1 %365 }
 0x226   :  { %v227_v35 = vmul.f32 1.442695, %v221_v34  ;;  %v374_v49 = vsub.f32 %v358_v0, %v366_v48 }
 0x228   :  { %1555 = vpow2.f32 %v227_v35  ;;  %v1781_v36 = vpop.eup %1553  ;;  %v379_v51 = vmul.f32 1.442695, %v374_v49 }
 0x229   :  { %v385_v38 = vsel %vm149_vm1, %v1781_v36, 0.0 }
 0x22a   :  { %386 = vadd.xlane.f32.xlu2 %v385_v38 }
 0x22b   :  { %v218_v41 = vpop.xlane.xlu2 %217 }
 0x22c   :  { %v222_v42 = vsub.f32 %v206_v8, %v218_v41 }
 0x22e   :  { %v1556_v43 = vpop.eup %1555  ;;  %v229_v44 = vmul.f32 1.442695, %v222_v42 }
 0x22f   :  { %v237_v45 = vsel %vm149_vm1, %v1556_v43, 0.0 }
 0x230   :  { %1557 = vpow2.f32 %v229_v44  ;;  %238 = vadd.xlane.f32.xlu1 %v237_v45 }
 0x231   :  { %1559 = vpow2.f32 %v379_v51 }
 0x233   :  { %v369_v53 = vpop.xlane.xlu1 %368 }
 0x234   :  { %v375_v55 = vsub.f32 %v359_v12, %v369_v53 }
 0x236   :  { %v1558_v46 = vpop.eup %1557  ;;  %260 = vrot.lane.b32.xlu0 %v1737_v17, %s1618_s16  ;;  %v381_v57 = vmul.f32 1.442695, %v375_v55 }
 0x237   :  { %v240_v47 = vsel %vm149_vm1, %v1558_v46, 0.0  ;;  %v1560_v52 = vpop.eup %1559 }
 0x238   :  { %241 = vadd.xlane.f32.xlu2 %v240_v47  ;;  %v388_v54 = vsel %vm149_vm1, %v1560_v52, 0.0  ;;  %1561 = vpow2.f32 %v381_v57 }
 0x23b   :  { %v372_v56 = vpop.xlane.xlu2 %371 }
 0x23c   :  { %v376_v58 = vsub.f32 %v360_v16, %v372_v56 }
 0x23e   :  { %v383_v59 = vmul.f32 1.442695, %v376_v58  ;;  %v1793_v60 = vpop.eup %1561 }
 0x23f   :  { %v391_v61 = vsel %vm149_vm1, %v1793_v60, 0.0 }
 0x240   :  { %1563 = vpow2.f32 %v383_v59 }
 0x249   :  { %285 = vrot.lane.b32.xlu1 %v1743_v26, %s1618_s16 }
 0x250   :  { %414 = vrot.lane.b32.xlu2 %v1737_v17, %s1619_s17  ;;  %v1564_v17 = vpop.eup %1563 }
 0x251   :  { %v394_v62 = vsel %vm149_vm1, %v1564_v17, 0.0 }
 0x260   :  { %389 = vadd.xlane.f32.xlu0 %v388_v54 }
 0x273   :  { %392 = vadd.xlane.f32.xlu1 %v391_v61  ;;  %v1425_v61 = vld [vmem:[%s2245_s4 + $0x8] sm:$0xff] }
 0x274   :  { %439 = vrot.lane.b32.xlu0 %v1743_v26, %s1619_s17  ;;  %513 = vmatpush.bf16.msra.mxu1 %v1425_v61 }
 0x279   :  { %395 = vadd.xlane.f32.xlu2 %v394_v62 }
 0x28d   :  { %v233_v63 = vpop.xlane.xlu2 %232 }
 0x295   :  { %v236_v0 = vpop.xlane.xlu0 %235 }
 0x296   :  { %1565 = vrcp.f32 %v236_v0 }
 0x297   :  { %1567 = vrcp.f32 %v233_v63 }
 0x29c   :  { %v1566_v1 = vpop.eup %1565 }
 0x29d   :  { %v1568_v4 = vpop.eup %1567  ;;  %v248_v7 = vmul.f32 %v1566_v1, %v1552_v30  ;;  %v387_v9 = vpop.xlane.xlu2 %386 }
 0x29e   :  { %v247_v8 = vmul.f32 %v1568_v4, %v1776_v24  ;;  %v1424_v4 = vld [vmem:[%s2245_s4] sm:$0xff] }
 0x29f   :  { %v252_v10 = vpack.c.bf16 %v248_v7, %v248_v7  ;;  %514 = vmatpush.bf16.msra.mxu1 %v1424_v4 }
 0x2a0   :  { %v251_v11 = vpack.c.bf16 %v247_v8, %v247_v8 }
 0x2a1   :  { %v258_v13 = vunpack.c.l.b16 %v252_v10 }
 0x2a2   :  { %v257_v15 = vunpack.c.l.b16 %v251_v11 }
 0x2a3   :  { %v239_v12 = vpop.xlane.xlu1 %238 }
 0x2a4   :  { %1569 = vrcp.f32 %v239_v12  ;;  %v259_v16 = vpack.c.b16 %v258_v13, %v257_v15 }
 0x2a8   :  { %v261_v14 = vpop.permute.xlu0 %260 }
 0x2a9   :  { %273 = vmatpush.bf16.msra.mxu3 %v261_v14 }
 0x2aa   :  { %v1570_v18 = vpop.eup %1569 }
 0x2ab   :  { %v242_v26 = vpop.xlane.xlu2 %241  ;;  %v249_v20 = vmul.f32 %v1570_v18, %v1556_v43 }
 0x2ac   :  { %1571 = vrcp.f32 %v242_v26  ;;  %1314 = vmatmul.msk.bf16.vlgmr.msra.gmra.mxu3 %vm149_vm1, %v259_v16 }
 0x2ad   :  { %v253_v23 = vpack.c.bf16 %v249_v20, %v249_v20  ;;  %1573 = vrcp.f32 %v387_v9 }
 0x2af   :  { %v282_v25 = vunpack.c.l.b16 %v253_v23 }
 0x2b2   :  { %v1572_v19 = vpop.eup %1571 }
 0x2b3   :  { %v250_v21 = vmul.f32 %v1572_v19, %v1558_v46  ;;  %v415_v28 = vpop.permute.xlu2 %414  ;;  %v1574_v31 = vpop.eup %1573  ;;  %v1542_v19 = vld [vmem:[%s2246_s5] ss:$0 sm:$0xff] }
 0x2b4   :  { %v401_v32 = vmul.f32 %v1574_v31, %v1781_v36 }
 0x2b5   :  { %v254_v22 = vpack.c.bf16 %v250_v21, %v250_v21 }
 0x2b6   :  { %v405_v34 = vpack.c.bf16 %v401_v32, %v401_v32 }
 0x2b7   :  { %v283_v24 = vunpack.c.l.b16 %v254_v22 }
 0x2b8   :  { %v411_v41 = vunpack.c.l.b16 %v405_v34 }
 0x2b9   :  { %v284_v29 = vpack.c.b16 %v283_v24, %v282_v25 }
 0x2bb   :  { %v286_v27 = vpop.permute.xlu1 %285 }
 0x2bc   :  { %298 = vmatpush.bf16.msrb.mxu3 %v286_v27 }
 0x2bf   :  { %1315 = vmatmul.msk.bf16.vlgmr.msrb.gmra.mxu3 %vm149_vm1, %v284_v29 }
 0x2c0   :  { %427 = vmatpush.bf16.msra.mxu3 %v415_v28  ;;  %v1621_v28 = vmov 0  }
 0x2c1   :  { %1469 = vset.pattern.permute.xlu0 %v1621_v28  ;;  %1475 = vset.pattern.permute.xlu2 %v1621_v28 }
 0x2d3   :  { %v390_v30 = vpop.xlane.xlu0 %389 }
 0x2d4   :  { %1575 = vrcp.f32 %v390_v30 }
 0x2da   :  { %v1576_v33 = vpop.eup %1575 }
 0x2db   :  { %v402_v35 = vmul.f32 %v1576_v33, %v1560_v52  ;;  %v72_v33 = vshrl.u32 %v62_v37, 7 }
 0x2dd   :  { %v406_v38 = vpack.c.bf16 %v402_v35, %v402_v35  ;;  %vm74_vm4 = vcmp.lt.s32.totalorder %v72_v33, %v1760_v39  ;;  %vm80_vm6 = vcmp.lt.s32.totalorder %v72_v33, %v1765_v50 }
 0x2df   :  { %v412_v42 = vunpack.c.l.b16 %v406_v38  ;;  %v73_v38 = vadd.s32 8, %v72_v33 }
 0x2e1   :  { %v413_v43 = vpack.c.b16 %v412_v42, %v411_v41  ;;  %vm75_vm5 = vcmp.lt.s32.totalorder %v73_v38, %v1760_v39  ;;  %vm81_vm7 = vcmp.lt.s32.totalorder %v73_v38, %v1765_v50  ;;  %v1886_v38 = vld [vmem:[%s2247_s6] ss:$0 sm:$0xff]  ;;  %s1623_s6 = smov 32  }
 0x2e2   :  { %v1299_v37 = vsel %vm75_vm5, 1.0, %v1617_v40 }
 0x2e3   :  { %1318 = vmatmul.msk.bf16.vlgmr.msra.gmra.mxu3 %vm149_vm1, %v413_v43  ;;  %v1298_v43 = vsel %vm74_vm4, 1.0, %v1617_v40 }
 0x2e6   :  { %v393_v44 = vpop.xlane.xlu1 %392  ;;  %v440_v45 = vpop.permute.xlu0 %439 }
 0x2e7   :  { %1577 = vrcp.f32 %v393_v44  ;;  %452 = vmatpush.bf16.msrb.mxu0 %v440_v45  ;;  %v1470_v45 = vpack.i.bf16 %v1299_v37, %v1298_v43 }
 0x2ec   :  { %v396_v46 = vpop.xlane.xlu2 %395 }
 0x2ed   :  { %v1578_v47 = vpop.eup %1577  ;;  %1579 = vrcp.f32 %v396_v46 }
 0x2ee   :  { %v403_v48 = vmul.f32 %v1578_v47, %v1793_v60 }
 0x2f0   :  { %v407_v36 = vpack.c.bf16 %v403_v48, %v403_v48 }
 0x2f2   :  { %v436_v52 = vunpack.c.l.b16 %v407_v36  ;;  %v1300_v36 = vsel %vm80_vm6, 1.0, %v1617_v40 }
 0x2f3   :  { %v1580_v49 = vpop.eup %1579 }
 0x2f4   :  { %v404_v51 = vmul.f32 %v1580_v49, %v1564_v17 }
 0x2f6   :  { %v408_v53 = vpack.c.bf16 %v404_v51, %v404_v51  ;;  %v1301_v51 = vsel %vm81_vm7, 1.0, %v1617_v40  ;;  %vm748_vm7 = vcmask 1044480  }
 0x2f8   :  { %v437_v54 = vunpack.c.l.b16 %v408_v53  ;;  %v1622_v53 = vmov 32.0  }
 0x2f9   :  { %1581 = vrcp.f32 %v1622_v53 }
 0x2fa   :  { %v438_v55 = vpack.c.b16 %v437_v54, %v436_v52 }
 0x2fc   :  { %1319 = vmatmul.msk.bf16.vlgmr.msrb.gmra.mxu0 %vm149_vm1, %v438_v55 }
 0x2ff   :  { %v1582_v52 = vpop.eup %1581 }
 0x300   :  { %v545_v54 = vmul.f32 32.0, %v1582_v52  ;;  %vm549_vm8 = vweird.f32 %v1582_v52 }
 0x302   :  { %v546_v55 = vsub.f32 1.0, %v545_v54 }
 0x32f   :  { %v275_v56 = vpop.f32.mrf.mxu3 }
 0x337   :  { %v277_v57 = vpop.f32.mrf.mxu3 }
 0x342   :  { %v300_v58 = vpop.f32.mrf.mxu3 }
 0x34a   :  { %v302_v59 = vpop.f32.mrf.mxu3 }
 0x366   :  { %v429_v62 = vpop.f32.mrf.mxu3 }
 0x36e   :  { %v431_v60 = vpop.f32.mrf.mxu3 }
 0x36f   :  { %v1459_v63 = vpack.i.bf16 %v431_v60, %v429_v62 }
 0x371   :  { %1460 = vrot.lane.b32.xlu1 %v1459_v63, %s1620_s20 }
 0x379   :  { %v454_v17 = vpop.f32.mrf.mxu0 }
 0x381   :  { %v456_v0 = vpop.f32.mrf.mxu0 }
 0x382   :  { %v1464_v1 = vpack.i.bf16 %v456_v0, %v454_v17  ;;  %v1443_v17 = vld [vmem:[%s2249_s8 + $0x88] sm:$0xff] }
 0x383   :  { %1084 = vmatpush.bf16.msra.mxu0 %v1443_v17 }
 0x384   :  { %1465 = vrot.lane.b32.xlu0 %v1464_v1, %s1620_s20 }
 0x3e3   :  { %v1461_v7 = vpop.permute.xlu1 %1460 }
 0x3e4   :  { %v1463_v8 = vunpack.i.h.bf16 %v1461_v7  ;;  %v1462_v9 = vunpack.i.l.bf16 %v1461_v7 }
 0x3e6   :  { %v476_v10 = vsel %vm149_vm1, %v277_v57, %v1463_v8  ;;  %v475_v11 = vsel %vm149_vm1, %v275_v56, %v1462_v9  ;;  %v547_v56 = vmul.f32 %v1582_v52, %v546_v55 }
 0x3e7   :  { %v479_v12 = vpack.c.bf16 %v476_v10, %v475_v11  ;;  %v1442_v10 = vld [vmem:[%s2249_s8 + $0x80] sm:$0xff] }
 0x3e8   :  { %v548_v57 = vadd.f32 %v1582_v52, %v547_v56  ;;  %1085 = vmatpush.bf16.msra.mxu0 %v1442_v10 }
 0x3e9   :  { %1328 = vmatmul.msk.bf16.vlgmr.msra.gmra.mxu1 %vm112_vm0, %v479_v12 }
 0x3f6   :  { %v1466_v13 = vpop.permute.xlu0 %1465 }
 0x3f7   :  { %v1468_v14 = vunpack.i.h.bf16 %v1466_v13  ;;  %v1467_v15 = vunpack.i.l.bf16 %v1466_v13 }
 0x3f9   :  { %v477_v26 = vsel %vm149_vm1, %v300_v58, %v1467_v15  ;;  %v478_v16 = vsel %vm149_vm1, %v302_v59, %v1468_v14  ;;  %v1862_v59 = vsel %vm549_vm8, %v1582_v52, %v548_v57  ;;  %vm808_vm1 = vcmask 1041408  }
 0x3fa   :  { %v480_v18 = vpack.c.bf16 %v478_v16, %v477_v26  ;;  %vm785_vm8 = vcmask 1042432  }
 0x3fc   :  { %1329 = vmatmul.msk.bf16.gmra.mxu1 %vm112_vm0, %v480_v18 }
 0x466   :  { %v516_v20 = vpop.f32.mrf.mxu1 }
 0x467   :  { %v517_v21 = vadd.f32 %v1542_v19, %v516_v20 }
 0x469   :  { %v1822_v22 = vadd.f32 %v517_v21, %v1711_v2 }
 0x46b   :  { %v532_v23 = vsel %vm112_vm0, %v1822_v22, 0.0  ;;  %v555_v27 = vmul.f32 %v1822_v22, %v1822_v22 }
 0x46c   :  { %533 = vadd.xlane.f32.xlu2 %v532_v23 }
 0x46d   :  { %v559_v30 = vsel %vm112_vm0, %v555_v27, 0.0 }
 0x46e   :  { %v518_v24 = vpop.f32.mrf.mxu1 }
 0x46f   :  { %v519_v25 = vadd.f32 %v1542_v19, %v518_v24 }
 0x471   :  { %v1829_v29 = vadd.f32 %v519_v25, %v1716_v3 }
 0x473   :  { %v535_v2 = vsel %vm112_vm0, %v1829_v29, 0.0  ;;  %v556_v31 = vmul.f32 %v1829_v29, %v1829_v29 }
 0x474   :  { %560 = vadd.xlane.f32.xlu2 %v559_v30  ;;  %536 = vadd.xlane.f32.xlu0 %v535_v2 }
 0x475   :  { %v562_v32 = vsel %vm112_vm0, %v556_v31, 0.0 }
 0x476   :  { %563 = vadd.xlane.f32.xlu1 %v562_v32 }
 0x479   :  { %v521_v34 = vpop.f32.mrf.mxu1 }
 0x47a   :  { %v522_v35 = vadd.f32 %v1542_v19, %v521_v34 }
 0x47c   :  { %v1839_v3 = vadd.f32 %v522_v35, %v1724_v5 }
 0x47e   :  { %v538_v41 = vsel %vm112_vm0, %v1839_v3, 0.0  ;;  %v557_v42 = vmul.f32 %v1839_v3, %v1839_v3 }
 0x47f   :  { %539 = vadd.xlane.f32.xlu2 %v538_v41 }
 0x480   :  { %v565_v5 = vsel %vm112_vm0, %v557_v42, 0.0 }
 0x481   :  { %v523_v44 = vpop.f32.mrf.mxu1 }
 0x482   :  { %v524_v46 = vadd.f32 %v1542_v19, %v523_v44 }
 0x484   :  { %v1851_v47 = vadd.f32 %v524_v46, %v1729_v6  ;;  %v1476_v6 = vpack.i.bf16 %v1301_v51, %v1300_v36 }
 0x486   :  { %v541_v39 = vsel %vm112_vm0, %v1851_v47, 0.0  ;;  %v558_v48 = vmul.f32 %v1851_v47, %v1851_v47 }
 0x487   :  { %566 = vadd.xlane.f32.xlu2 %v565_v5 }
 0x488   :  { %1471 = vperm.xlu0 %1469, %v1470_v45   ;;  %v568_v49 = vsel %vm112_vm0, %v558_v48, 0.0  ;;  %v1895_v45 = vld [vmem:[%s2248_s7] ss:$0 sm:$0xff] }
 0x48f   :  { %542 = vadd.xlane.f32.xlu2 %v541_v39 }
 0x497   :  { %569 = vadd.xlane.f32.xlu2 %v568_v49 }
 0x4af   :  { %1477 = vperm.xlu2 %1475, %v1476_v6  }
 0x4df   :  { %v534_v58 = vpop.xlane.xlu2 %533 }
 0x4e0   :  { %v551_v61 = vmul.f32 %v1862_v59, %v534_v58 }
 0x4e2   :  { %v575_v60 = vmul.f32 %v551_v61, %v551_v61  ;;  %v587_v34 = vsub.f32 %v1822_v22, %v551_v61 }
 0x4e7   :  { %v561_v50 = vpop.xlane.xlu2 %560  ;;  %v537_v62 = vpop.xlane.xlu0 %536 }
 0x4e8   :  { %v571_v40 = vmul.f32 %v561_v50, %v1862_v59  ;;  %v552_v63 = vmul.f32 %v1862_v59, %v537_v62 }
 0x4e9   :  { %v564_v0 = vpop.xlane.xlu1 %563 }
 0x4ea   :  { %v579_v1 = vsub.f32 %v571_v40, %v575_v60  ;;  %v576_v4 = vmul.f32 %v552_v63, %v552_v63  ;;  %v572_v7 = vmul.f32 %v564_v0, %v1862_v59  ;;  %v588_v44 = vsub.f32 %v1829_v29, %v552_v63 }
 0x4ec   :  { %v583_v8 = vmax.f32 %v579_v1, 0.0  ;;  %v580_v9 = vsub.f32 %v572_v7, %v576_v4 }
 0x4ee   :  { %v591_v11 = vadd.f32 1e-05, %v583_v8  ;;  %v584_v12 = vmax.f32 %v580_v9, 0.0 }
 0x4f0   :  { %1583 = vrsqrt.f32 %v591_v11  ;;  %v592_v13 = vadd.f32 1e-05, %v584_v12  ;;  %vm601_vm10 = vweird.f32 %v591_v11 }
 0x4f2   :  { %v540_v14 = vpop.xlane.xlu2 %539  ;;  %1585 = vrsqrt.f32 %v592_v13  ;;  %vm611_vm13 = vweird.f32 %v592_v13 }
 0x4f3   :  { %v1875_v26 = vmul.f32 %v1862_v59, %v540_v14 }
 0x4f5   :  { %v577_v23 = vmul.f32 %v1875_v26, %v1875_v26 }
 0x4f6   :  { %v1584_v15 = vpop.eup %1583 }
 0x4f7   :  { %v596_v16 = vmul.f32 %v1584_v15, %v591_v11  ;;  %vm602_vm9 = vweird.f32 %v1584_v15 }
 0x4f8   :  { %v1586_v18 = vpop.eup %1585  ;;  %vm603_vm12 = vmor %vm601_vm10, %vm602_vm9  ;;  %vm831_vm9 = vcmask 1040384  }
 0x4f9   :  { %v597_v19 = vmul.f32 %v1584_v15, %v596_v16  ;;  %v606_v20 = vmul.f32 %v1586_v18, %v592_v13  ;;  %vm612_vm11 = vweird.f32 %v1586_v18 }
 0x4fa   :  { %v567_v21 = vpop.xlane.xlu2 %566  ;;  %v1888_v37 = vpop.permute.xlu0 %1471  ;;  %vm613_vm14 = vmor %vm611_vm13, %vm612_vm11  ;;  %vm858_vm13 = vcmask 523264  }
 0x4fb   :  { %v573_v24 = vmul.f32 %v567_v21, %v1862_v59  ;;  %v598_v25 = vmul.f32 0.5, %v597_v19  ;;  %v607_v27 = vmul.f32 %v1586_v18, %v606_v20  ;;  %v1473_v48 = vunpack.i.l.bf16 %v1888_v37 }
 0x4fc   :  { %v1474_v51 = vunpack.i.h.bf16 %v1888_v37 }
 0x4fd   :  { %v581_v28 = vsub.f32 %v573_v24, %v577_v23  ;;  %v599_v30 = vsub.f32 1.5, %v598_v25  ;;  %v608_v2 = vmul.f32 0.5, %v607_v27 }
 0x4ff   :  { %v585_v31 = vmax.f32 %v581_v28, 0.0  ;;  %v600_v32 = vmul.f32 %v1584_v15, %v599_v30  ;;  %v609_v33 = vsub.f32 1.5, %v608_v2 }
 0x501   :  { %v1881_v35 = vadd.f32 1e-05, %v585_v31  ;;  %v610_v41 = vmul.f32 %v1586_v18, %v609_v33  ;;  %v604_v43 = vsel %vm603_vm12, %v1584_v15, %v600_v32  ;;  %v589_v33 = vsub.f32 %v1839_v3, %v1875_v26 }
 0x502   :  { %v543_v42 = vpop.xlane.xlu2 %542  ;;  %v635_v22 = vmul.f32 %v604_v43, %v587_v34 }
 0x503   :  { %1587 = vrsqrt.f32 %v1881_v35  ;;  %v614_v46 = vsel %vm613_vm14, %v1586_v18, %v610_v41  ;;  %v1900_v49 = vmul.f32 %v1862_v59, %v543_v42  ;;  %vm621_vm5 = vweird.f32 %v1881_v35 }
 0x504   :  { %v636_v5 = vmul.f32 %v614_v46, %v588_v44  ;;  %v642_v39 = vmul.f32 %v1886_v38, %v635_v22  ;;  %vm863_vm14 = vcmask 785408  }
 0x505   :  { %v578_v56 = vmul.f32 %v1900_v49, %v1900_v49 }
 0x506   :  { %v643_v29 = vmul.f32 %v1886_v38, %v636_v5  ;;  %v649_v36 = vadd.f32 %v1895_v45, %v642_v39 }
 0x508   :  { %v650_v53 = vadd.f32 %v1895_v45, %v643_v29  ;;  %v1908_v52 = vmul.f32 %v1473_v48, %v649_v36 }
 0x509   :  { %v1588_v6 = vpop.eup %1587 }
 0x50a   :  { %v616_v54 = vmul.f32 %v1588_v6, %v1881_v35  ;;  %v570_v55 = vpop.xlane.xlu2 %569  ;;  %v1915_v57 = vmul.f32 %v1474_v51, %v650_v53  ;;  %v682_v58 = vrot.slane %v1908_v52, 4  ;;  %vm622_vm4 = vweird.f32 %v1588_v6 }
 0x50b   :  { %v574_v61 = vmul.f32 %v570_v55, %v1862_v59  ;;  %vm1949_vm6 = vmor %vm621_vm5, %vm622_vm4 }
 0x50c   :  { %v617_v50 = vmul.f32 %v1588_v6, %v616_v54  ;;  %v683_v62 = vrot.slane %v1915_v57, 4  ;;  %v1921_v60 = vsel %vm681_vm15, 0.0, %v682_v58 }
 0x50d   :  { %v582_v40 = vsub.f32 %v574_v61, %v578_v56  ;;  %v809_v17 = vrot.slane %v1921_v60, 6  ;;  %v703_v0 = vrot.slane %v1921_v60, 1  ;;  %v726_v8 = vrot.slane %v1921_v60, 2 }
 0x50e   :  { %v618_v63 = vmul.f32 0.5, %v617_v50  ;;  %v1926_v1 = vsel %vm681_vm15, %v683_v62, 0.0  ;;  %v1929_v4 = vsel %vm681_vm15, %v682_v58, %v683_v62  ;;  %v749_v41 = vrot.slane %v1921_v60, 3 }
 0x50f   :  { %v586_v7 = vmax.f32 %v582_v40, 0.0  ;;  %v882_v10 = vpack.c.bf16 %v1926_v1, %v1929_v4  ;;  %v810_v11 = vrot.slane %v1929_v4, 6  ;;  %v812_v12 = vrot.slane %v1926_v1, 6 }
 0x510   :  { %v619_v9 = vsub.f32 1.5, %v618_v63  ;;  %v704_v14 = vrot.slane %v1929_v4, 1  ;;  %v706_v15 = vrot.slane %v1926_v1, 1  ;;  %v727_v16 = vrot.slane %v1929_v4, 2 }
 0x511   :  { %v1936_v13 = vadd.f32 1e-05, %v586_v7  ;;  %1402 = vmatmul.msk.bf16.vlgmr.msra.gmra.mxu0 %vm112_vm0, %v882_v10  ;;  %v811_v19 = vsel %vm808_vm1, %v809_v17, %v810_v11  ;;  %v813_v20 = vsel %vm808_vm1, %v810_v11, %v812_v12  ;;  %v729_v21 = vrot.slane %v1926_v1, 2 }
 0x512   :  { %v620_v18 = vmul.f32 %v1588_v6, %v619_v9  ;;  %v1501_v23 = vpack.i.bf16 %v813_v20, %v811_v19  ;;  %v705_v24 = vsel %vm702_vm2, %v703_v0, %v704_v14  ;;  %v707_v27 = vsel %vm702_vm2, %v704_v14, %v706_v15  ;;  %v1976_v54 = vpop.permute.xlu2 %1477 }
 0x513   :  { %1589 = vrsqrt.f32 %v1936_v13  ;;  %v728_v28 = vsel %vm725_vm3, %v726_v8, %v727_v16  ;;  %v730_v30 = vsel %vm725_vm3, %v727_v16, %v729_v21  ;;  %v1481_v2 = vpack.i.bf16 %v707_v27, %v705_v24 }
 0x514   :  { %1502 = vrot.lane.b32.xlu0 %v1501_v23, %s1618_s16  ;;  %v1486_v31 = vpack.i.bf16 %v730_v30, %v728_v28  ;;  %v624_v32 = vsel %vm1949_vm6, %v1588_v6, %v620_v18  ;;  %v750_v34 = vrot.slane %v1929_v4, 3  ;;  %v752_v35 = vrot.slane %v1926_v1, 3 }
 0x515   :  { %1482 = vrot.lane.b32.xlu1 %v1481_v2, %s1623_s6  ;;  %v787_v42 = vrot.slane %v1929_v4, 5  ;;  %v789_v43 = vrot.slane %v1926_v1, 5  ;;  %v637_v44 = vmul.f32 %v624_v32, %v589_v33  ;;  %v786_v3 = vrot.slane %v1921_v60, 5 }
 0x516   :  { %1487 = vrot.lane.b32.xlu2 %v1486_v31, %s1618_s16  ;;  %v751_v22 = vsel %vm748_vm7, %v749_v41, %v750_v34  ;;  %v753_v5 = vsel %vm748_vm7, %v750_v34, %v752_v35  ;;  %v772_v36 = vrot.slane %v1929_v4, 4  ;;  %v774_v55 = vrot.slane %v1926_v1, 4 }
 0x517   :  { %v788_v39 = vsel %vm785_vm8, %v786_v3, %v787_v42  ;;  %v790_v29 = vsel %vm785_vm8, %v787_v42, %v789_v43  ;;  %v644_v53 = vmul.f32 %v1886_v38, %v637_v44  ;;  %v1491_v56 = vpack.i.bf16 %v753_v5, %v751_v22 }
 0x518   :  { %v1496_v58 = vpack.i.bf16 %v790_v29, %v788_v39  ;;  %v833_v50 = vrot.slane %v1929_v4, 7  ;;  %v835_v62 = vrot.slane %v1926_v1, 7  ;;  %v1984_v40 = vsel %vm681_vm15, %v772_v36, %v774_v55 }
 0x519   :  { %v1590_v26 = vpop.eup %1589  ;;  %v1479_v63 = vunpack.i.l.bf16 %v1976_v54  ;;  %v651_v0 = vadd.f32 %v1895_v45, %v644_v53  ;;  %v832_v7 = vrot.slane %v1921_v60, 7  ;;  %vm631_vm11 = vweird.f32 %v1936_v13 }
 0x51a   :  { %v626_v46 = vmul.f32 %v1590_v26, %v1936_v13  ;;  %vm632_vm10 = vweird.f32 %v1590_v26  ;;  %v836_v9 = vsel %vm831_vm9, %v833_v50, %v835_v62  ;;  %v590_v10 = vsub.f32 %v1851_v47, %v1900_v49 }
 0x51b   :  { %v834_v1 = vsel %vm831_vm9, %v832_v7, %v833_v50  ;;  %vm633_vm12 = vmor %vm631_vm11, %vm632_vm10  ;;  %v1998_v12 = vmul.f32 %v1479_v63, %v651_v0  ;;  %v1480_v18 = vunpack.i.h.bf16 %v1976_v54 }
 0x51c   :  { %v627_v6 = vmul.f32 %v1590_v26, %v626_v46  ;;  %v1506_v15 = vpack.i.bf16 %v836_v9, %v834_v1 }
 0x51d   :  { %1492 = vrot.lane.b32.xlu1 %v1491_v56, %s1615_s29  ;;  %v685_v13 = vrot.slane %v1998_v12, 4 }
 0x51e   :  { %v628_v61 = vmul.f32 0.5, %v627_v6  ;;  %1497 = vrot.lane.b32.xlu2 %v1496_v58, %s1623_s6 }
 0x51f   :  { %v2010_v49 = vsel %vm681_vm15, 0.0, %v685_v13 }
 0x520   :  { %v629_v17 = vsub.f32 1.5, %v628_v61  ;;  %v754_v23 = vrot.slane %v2010_v49, 3  ;;  %v731_v24 = vrot.slane %v2010_v49, 2  ;;  %v708_v2 = vrot.slane %v2010_v49, 1 }
 0x521   :  { %v837_v6 = vrot.slane %v2010_v49, 7  ;;  %v814_v58 = vrot.slane %v2010_v49, 6  ;;  %v791_v61 = vrot.slane %v2010_v49, 5 }
 0x522   :  { %v630_v8 = vmul.f32 %v1590_v26, %v629_v17 }
 0x524   :  { %v634_v11 = vsel %vm633_vm12, %v1590_v26, %v630_v8 }
 0x525   :  { %v638_v14 = vmul.f32 %v634_v11, %v590_v10  ;;  %1507 = vrot.lane.b32.xlu1 %v1506_v15, %s1615_s29  ;;  %v1432_v15 = vld [vmem:[%s2249_s8 + $0x30] sm:$0xff] }
 0x527   :  { %v645_v16 = vmul.f32 %v1886_v38, %v638_v14  ;;  %v1433_v14 = vld [vmem:[%s2249_s8 + $0x38] sm:$0xff] }
 0x528   :  { %1040 = vmatpush.bf16.msra.mxu2 %v1433_v14 }
 0x529   :  { %v652_v19 = vadd.f32 %v1895_v45, %v645_v16  ;;  %v1441_v16 = vld [vmem:[%s2249_s8 + $0x78] sm:$0xff] }
 0x52a   :  { %1059 = vmatpush.bf16.msrb.mxu3 %v1441_v16 }
 0x52b   :  { %v2007_v47 = vmul.f32 %v1480_v18, %v652_v19  ;;  %v1440_v19 = vld [vmem:[%s2249_s8 + $0x70] sm:$0xff] }
 0x52c   :  { %1041 = vmatpush.bf16.msra.mxu2 %v1432_v15 }
 0x52d   :  { %v686_v20 = vrot.slane %v2007_v47, 4 }
 0x52e   :  { %1060 = vmatpush.bf16.msrb.mxu3 %v1440_v19 }
 0x52f   :  { %v697_v21 = vsel %vm681_vm15, %v686_v20, 0.0  ;;  %v2015_v38 = vsel %vm681_vm15, %v685_v13, %v686_v20  ;;  %v1431_v13 = vld [vmem:[%s2249_s8 + $0x28] sm:$0xff]  ;;  %v1430_v20 = vld [vmem:[%s2249_s8 + $0x20] sm:$0xff] }
 0x530   :  { %v885_v45 = vpack.c.bf16 %v697_v21, %v2015_v38  ;;  %v755_v25 = vrot.slane %v2015_v38, 3  ;;  %v757_v27 = vrot.slane %v697_v21, 3  ;;  %v732_v28 = vrot.slane %v2015_v38, 2  ;;  %1042 = vmatpush.bf16.msra.mxu2 %v1431_v13 }
 0x531   :  { %v734_v30 = vrot.slane %v697_v21, 2  ;;  %v709_v31 = vrot.slane %v2015_v38, 1  ;;  %v711_v32 = vrot.slane %v697_v21, 1  ;;  %v838_v22 = vrot.slane %v2015_v38, 7 }
 0x532   :  { %1403 = vmatmul.msk.bf16.gmra.mxu0 %vm112_vm0, %v885_v45  ;;  %v756_v33 = vsel %vm748_vm7, %v754_v23, %v755_v25  ;;  %v758_v34 = vsel %vm748_vm7, %v755_v25, %v757_v27  ;;  %v733_v35 = vsel %vm725_vm3, %v731_v24, %v732_v28  ;;  %v840_v46 = vrot.slane %v697_v21, 7  ;;  %v1429_v23 = vld [vmem:[%s2249_s8 + $0x18] sm:$0xff]  ;;  %v1428_v24 = vld [vmem:[%s2249_s8 + $0x10] sm:$0xff]  ;;  %v1438_v45 = vld [vmem:[%s2249_s8 + $0x60] sm:$0xff] }
 0x533   :  { %v1521_v41 = vpack.i.bf16 %v758_v34, %v756_v33  ;;  %v735_v42 = vsel %vm725_vm3, %v732_v28, %v734_v30  ;;  %v710_v43 = vsel %vm702_vm2, %v708_v2, %v709_v31  ;;  %v712_v44 = vsel %vm702_vm2, %v709_v31, %v711_v32  ;;  %v1427_v25 = vld [vmem:[%s2249_s8 + $0x8] sm:$0xff]  ;;  %v1437_v27 = vld [vmem:[%s2249_s8 + $0x58] sm:$0xff]  ;;  %v1426_v28 = vld [vmem:[%s2249_s8] sm:$0xff] }
 0x534   :  { %v1516_v3 = vpack.i.bf16 %v735_v42, %v733_v35  ;;  %v1511_v26 = vpack.i.bf16 %v712_v44, %v710_v43  ;;  %v815_v5 = vrot.slane %v2015_v38, 6  ;;  %v817_v39 = vrot.slane %v697_v21, 6  ;;  %1043 = vmatpush.bf16.msra.mxu2 %v1430_v20  ;;  %v1436_v30 = vld [vmem:[%s2249_s8 + $0x50] sm:$0xff]  ;;  %v1435_v2 = vld [vmem:[%s2249_s8 + $0x48] sm:$0xff]  ;;  %v1434_v31 = vld [vmem:[%s2249_s8 + $0x40] sm:$0xff] }
 0x535   :  { %1522 = vrot.lane.b32.xlu1 %v1521_v41, %s1615_s29  ;;  %v792_v29 = vrot.slane %v2015_v38, 5  ;;  %v794_v53 = vrot.slane %v697_v21, 5  ;;  %v777_v55 = vrot.slane %v2015_v38, 4  ;;  %v779_v56 = vrot.slane %v697_v21, 4  ;;  %v1439_v21 = vld [vmem:[%s2249_s8 + $0x68] sm:$0xff] }
 0x536   :  { %1517 = vrot.lane.b32.xlu0 %v1516_v3, %s1618_s16  ;;  %1512 = vrot.lane.b32.xlu2 %v1511_v26, %s1623_s6  ;;  %v839_v50 = vsel %vm831_vm9, %v837_v6, %v838_v22  ;;  %v841_v62 = vsel %vm831_vm9, %v838_v22, %v840_v46  ;;  %v816_v0 = vsel %vm808_vm1, %v814_v58, %v815_v5 }
 0x537   :  { %v2046_v17 = vsel %vm681_vm15, %v777_v55, %v779_v56  ;;  %v818_v7 = vsel %vm808_vm1, %v815_v5, %v817_v39  ;;  %v793_v8 = vsel %vm785_vm8, %v791_v61, %v792_v29  ;;  %v795_v1 = vsel %vm785_vm8, %v792_v29, %v794_v53  ;;  %1061 = vmatpush.bf16.msrb.mxu3 %v1439_v21 }
 0x538   :  { %v1536_v9 = vpack.i.bf16 %v841_v62, %v839_v50  ;;  %v1531_v10 = vpack.i.bf16 %v818_v7, %v816_v0  ;;  %v1526_v11 = vpack.i.bf16 %v795_v1, %v793_v8  ;;  %1044 = vmatpush.bf16.msra.mxu2 %v1429_v23  ;;  %v771_v50 = vrot.slane %v1921_v60, 4 }
 0x53a   :  { %v773_v7 = vsel %vm681_vm15, %v771_v50, %v772_v36  ;;  %v1545_v50 = vld [vmem:[%s2250_s9] ss:$0 sm:$0xff] }
 0x53b   :  { %1062 = vmatpush.bf16.msrb.mxu3 %v1438_v45 }
 0x53c   :  { %1045 = vmatpush.bf16.msra.mxu2 %v1428_v24 }
 0x53d   :  { %1537 = vrot.lane.b32.xlu1 %v1536_v9, %s1615_s29 }
 0x53e   :  { %1532 = vrot.lane.b32.xlu0 %v1531_v10, %s1618_s16  ;;  %1527 = vrot.lane.b32.xlu2 %v1526_v11, %s1623_s6 }
 0x53f   :  { %1063 = vmatpush.bf16.msrb.mxu3 %v1437_v27 }
 0x540   :  { %1046 = vmatpush.bf16.msra.mxu2 %v1427_v25 }
 0x543   :  { %1064 = vmatpush.bf16.msrb.mxu3 %v1436_v30 }
 0x544   :  { %1047 = vmatpush.bf16.msra.mxu2 %v1426_v28 }
 0x547   :  { %1065 = vmatpush.bf16.msrb.mxu3 %v1435_v2 }
 0x54b   :  { %1066 = vmatpush.bf16.msrb.mxu3 %v1434_v31 }
 0x570   :  { %v1488_v32 = vpop.permute.xlu2 %1487 }
 0x571   :  { %v1490_v43 = vunpack.i.h.bf16 %v1488_v32  ;;  %v1489_v44 = vunpack.i.l.bf16 %v1488_v32 }
 0x578   :  { %v1498_v46 = vpop.permute.xlu2 %1497 }
 0x579   :  { %v1500_v58 = vunpack.i.h.bf16 %v1498_v46  ;;  %v1499_v61 = vunpack.i.l.bf16 %v1498_v46 }
 0x57b   :  { %v869_v1 = vsel %vm112_vm0, %v1984_v40, %v1500_v58  ;;  %v868_v9 = vsel %vm112_vm0, %v773_v7, %v1499_v61  ;;  %v1444_v58 = vld [vmem:[%s2251_s10] sm:$0xff] }
 0x586   :  { %v1503_v29 = vpop.permute.xlu0 %1502 }
 0x587   :  { %v1483_v33 = vpop.permute.xlu1 %1482  ;;  %v1505_v62 = vunpack.i.h.bf16 %v1503_v29  ;;  %v1504_v0 = vunpack.i.l.bf16 %v1503_v29 }
 0x588   :  { %v1485_v34 = vunpack.i.h.bf16 %v1483_v33  ;;  %v1484_v35 = vunpack.i.l.bf16 %v1483_v33 }
 0x589   :  { %v872_v14 = vsel %vm858_vm13, %v868_v9, %v1504_v0  ;;  %v873_v15 = vsel %vm858_vm13, %v869_v1, %v1505_v62 }
 0x58a   :  { %v855_v41 = vsel %vm112_vm0, %v1929_v4, %v1485_v34  ;;  %v854_v42 = vsel %vm112_vm0, %v1921_v60, %v1484_v35 }
 0x58b   :  { %v859_v5 = vsel %vm858_vm13, %v854_v42, %v1489_v44  ;;  %v860_v39 = vsel %vm858_vm13, %v855_v41, %v1490_v43  ;;  %v776_v41 = vrot.slane %v2010_v49, 4 }
 0x58e   :  { %v1087_v62 = vpop.f32.mrf.mxu0 }
 0x58f   :  { %v1493_v3 = vpop.permute.xlu1 %1492 }
 0x590   :  { %v1495_v26 = vunpack.i.h.bf16 %v1493_v3  ;;  %v1494_v22 = vunpack.i.l.bf16 %v1493_v3  ;;  %v1513_v4 = vpop.permute.xlu2 %1512 }
 0x591   :  { %v1515_v36 = vunpack.i.h.bf16 %v1513_v4  ;;  %v1514_v19 = vunpack.i.l.bf16 %v1513_v4 }
 0x592   :  { %v864_v6 = vsel %vm863_vm14, %v859_v5, %v1494_v22  ;;  %v865_v53 = vsel %vm863_vm14, %v860_v39, %v1495_v26  ;;  %v778_v26 = vsel %vm681_vm15, %v776_v41, %v777_v55  ;;  %v1446_v55 = vld [vmem:[%s2251_s10 + $0x10] sm:$0xff] }
 0x593   :  { %v880_v56 = vpack.c.bf16 %v865_v53, %v864_v6  ;;  %v857_v25 = vsel %vm112_vm0, %v2015_v38, %v1515_v36  ;;  %v856_v27 = vsel %vm112_vm0, %v2010_v49, %v1514_v19  ;;  %v1447_v38 = vld [vmem:[%s2251_s10 + $0x18] sm:$0xff] }
 0x594   :  { %1149 = vmatpush.bf16.msrb.mxu1 %v1447_v38 }
 0x595   :  { %1048 = vmatmul.bf16.vlgmr.msra.gmra.mxu2 %v880_v56 }
 0x597   :  { %v1508_v8 = vpop.permute.xlu1 %1507 }
 0x598   :  { %v1510_v10 = vunpack.i.h.bf16 %v1508_v8  ;;  %v1509_v11 = vunpack.i.l.bf16 %v1508_v8  ;;  %v1528_v28 = vpop.permute.xlu2 %1527  ;;  %1150 = vmatpush.bf16.msrb.mxu1 %v1446_v55 }
 0x599   :  { %v1530_v34 = vunpack.i.h.bf16 %v1528_v28  ;;  %v1529_v35 = vunpack.i.l.bf16 %v1528_v28 }
 0x59a   :  { %v876_v60 = vsel %vm863_vm14, %v872_v14, %v1509_v11  ;;  %v877_v16 = vsel %vm863_vm14, %v873_v15, %v1510_v10  ;;  %v1089_v15 = vpop.f32.mrf.mxu0 }
 0x59b   :  { %v881_v13 = vpack.c.bf16 %v877_v16, %v876_v60  ;;  %v871_v5 = vsel %vm112_vm0, %v2046_v17, %v1530_v34  ;;  %v870_v39 = vsel %vm112_vm0, %v778_v26, %v1529_v35  ;;  %v1445_v17 = vld [vmem:[%s2251_s10 + $0x8] sm:$0xff] }
 0x59c   :  { %1151 = vmatpush.bf16.msrb.mxu1 %v1445_v17 }
 0x59d   :  { %1067 = vmatmul.bf16.vlgmr.msrb.gmra.mxu3 %v881_v13 }
 0x5a0   :  { %1152 = vmatpush.bf16.msrb.mxu1 %v1444_v58 }
 0x5a7   :  { %v1523_v20 = vpop.permute.xlu1 %1522 }
 0x5a8   :  { %v1525_v21 = vunpack.i.h.bf16 %v1523_v20  ;;  %v1524_v40 = vunpack.i.l.bf16 %v1523_v20  ;;  %v1518_v23 = vpop.permute.xlu0 %1517 }
 0x5a9   :  { %v1520_v24 = vunpack.i.h.bf16 %v1518_v23  ;;  %v1519_v45 = vunpack.i.l.bf16 %v1518_v23 }
 0x5ab   :  { %v861_v30 = vsel %vm858_vm13, %v856_v27, %v1519_v45  ;;  %v862_v2 = vsel %vm858_vm13, %v857_v25, %v1520_v24 }
 0x5ac   :  { %v866_v31 = vsel %vm863_vm14, %v861_v30, %v1524_v40  ;;  %v867_v32 = vsel %vm863_vm14, %v862_v2, %v1525_v21 }
 0x5ad   :  { %v883_v33 = vpack.c.bf16 %v867_v32, %v866_v31 }
 0x5af   :  { %1053 = vmatmul.bf16.gmra.mxu2 %v883_v33  ;;  %v1538_v42 = vpop.permute.xlu1 %1537  ;;  %v1092_v19 = vpop.f32.mrf.mxu0  ;;  %v1546_v33 = vld [vmem:[%s2252_s11] ss:$0 sm:$0xff] }
 0x5b0   :  { %v1540_v43 = vunpack.i.h.bf16 %v1538_v42  ;;  %v1539_v44 = vunpack.i.l.bf16 %v1538_v42  ;;  %v1533_v3 = vpop.permute.xlu0 %1532 }
 0x5b1   :  { %v1535_v22 = vunpack.i.h.bf16 %v1533_v3  ;;  %v1534_v46 = vunpack.i.l.bf16 %v1533_v3 }
 0x5b3   :  { %v874_v29 = vsel %vm858_vm13, %v870_v39, %v1534_v46  ;;  %v875_v49 = vsel %vm858_vm13, %v871_v5, %v1535_v22 }
 0x5b4   :  { %v878_v6 = vsel %vm863_vm14, %v874_v29, %v1539_v44  ;;  %v879_v53 = vsel %vm863_vm14, %v875_v49, %v1540_v43 }
 0x5b5   :  { %v884_v56 = vpack.c.bf16 %v879_v53, %v878_v6 }
 0x5b7   :  { %1072 = vmatmul.bf16.gmra.mxu3 %v884_v56  ;;  %v1094_v28 = vpop.f32.mrf.mxu0 }
 0x618   :  { %v1049_v61 = vpop.f32.mrf.mxu2 }
 0x619   :  { %v1050_v7 = vadd.f32 %v1545_v50, %v1049_v61 }
 0x620   :  { %v1068_v0 = vpop.f32.mrf.mxu3  ;;  %v1051_v8 = vpop.f32.mrf.mxu2 }
 0x621   :  { %v1069_v1 = vadd.f32 %v1068_v0, %v1050_v7  ;;  %v1052_v9 = vadd.f32 %v1545_v50, %v1051_v8 }
 0x623   :  { %v1088_v11 = vadd.f32 %v1087_v62, %v1069_v1 }
 0x625   :  { %v1097_v16 = vmax.f32 %v1088_v11, 0.0 }
 0x628   :  { %v1070_v10 = vpop.f32.mrf.mxu3 }
 0x629   :  { %v1071_v14 = vadd.f32 %v1070_v10, %v1052_v9 }
 0x62b   :  { %v1090_v60 = vadd.f32 %v1089_v15, %v1071_v14 }
 0x62d   :  { %v1098_v13 = vmax.f32 %v1090_v60, 0.0 }
 0x62f   :  { %v1101_v4 = vpack.c.bf16 %v1098_v13, %v1097_v16 }
 0x631   :  { %1420 = vmatmul.msk.bf16.vlgmr.msrb.gmra.mxu1 %vm858_vm13, %v1101_v4 }
 0x632   :  { %v1054_v36 = vpop.f32.mrf.mxu2 }
 0x633   :  { %v1055_v21 = vadd.f32 %v1545_v50, %v1054_v36  ;;  %v2193_v36 = vld [vmem:[%s2253_s12] ss:$0 sm:$0xff] }
 0x63a   :  { %v1073_v20 = vpop.f32.mrf.mxu3  ;;  %v1056_v40 = vpop.f32.mrf.mxu2 }
 0x63b   :  { %v1074_v23 = vadd.f32 %v1073_v20, %v1055_v21  ;;  %v1057_v24 = vadd.f32 %v1545_v50, %v1056_v40  ;;  %v2198_v20 = vld [vmem:[%s2254_s13] ss:$0 sm:$0xff] }
 0x63d   :  { %v1093_v25 = vadd.f32 %v1092_v19, %v1074_v23 }
 0x63f   :  { %v1099_v2 = vmax.f32 %v1093_v25, 0.0 }
 0x642   :  { %v1075_v45 = vpop.f32.mrf.mxu3 }
 0x643   :  { %v1076_v27 = vadd.f32 %v1075_v45, %v1057_v24 }
 0x645   :  { %v1095_v30 = vadd.f32 %v1094_v28, %v1076_v27 }
 0x647   :  { %v1100_v31 = vmax.f32 %v1095_v30, 0.0 }
 0x649   :  { %v1102_v32 = vpack.c.bf16 %v1100_v31, %v1099_v2 }
 0x64b   :  { %1421 = vmatmul.msk.bf16.gmra.mxu1 %vm858_vm13, %v1102_v32 }
 0x6ae   :  { %v1154_v34 = vpop.f32.mrf.mxu1 }
 0x6af   :  { %v1155_v35 = vadd.f32 %v1546_v33, %v1154_v34 }
 0x6b1   :  { %v1164_v41 = vadd.f32 %v1155_v35, %v1908_v52 }
 0x6b3   :  { %v1170_v42 = vsel %vm112_vm0, %v1164_v41, 0.0  ;;  %v1186_v43 = vmul.f32 %v1164_v41, %v1164_v41 }
 0x6b4   :  { %1171 = vadd.xlane.f32.xlu2 %v1170_v42 }
 0x6b5   :  { %v1190_v44 = vsel %vm112_vm0, %v1186_v43, 0.0 }
 0x6b6   :  { %v1156_v3 = vpop.f32.mrf.mxu1  ;;  %1191 = vadd.xlane.f32.xlu0 %v1190_v44 }
 0x6b7   :  { %v1157_v26 = vadd.f32 %v1546_v33, %v1156_v3 }
 0x6b9   :  { %v2165_v22 = vadd.f32 %v1157_v26, %v1915_v57 }
 0x6bb   :  { %v1173_v46 = vsel %vm112_vm0, %v2165_v22, 0.0  ;;  %v1187_v53 = vmul.f32 %v2165_v22, %v2165_v22 }
 0x6bd   :  { %v1193_v38 = vsel %vm112_vm0, %v1187_v53, 0.0 }
 0x6be   :  { %1174 = vadd.xlane.f32.xlu0 %v1173_v46 }
 0x6c8   :  { %v1159_v5 = vpop.f32.mrf.mxu1 }
 0x6c9   :  { %v1160_v39 = vadd.f32 %v1546_v33, %v1159_v5 }
 0x6cb   :  { %v2170_v52 = vadd.f32 %v1160_v39, %v1998_v12 }
 0x6cd   :  { %v1176_v29 = vsel %vm112_vm0, %v2170_v52, 0.0  ;;  %v1188_v17 = vmul.f32 %v2170_v52, %v2170_v52 }
 0x6ce   :  { %1177 = vadd.xlane.f32.xlu1 %v1176_v29 }
 0x6cf   :  { %v1196_v58 = vsel %vm112_vm0, %v1188_v17, 0.0 }
 0x6d0   :  { %v1161_v49 = vpop.f32.mrf.mxu1 }
 0x6d1   :  { %v1162_v6 = vadd.f32 %v1546_v33, %v1161_v49 }
 0x6d3   :  { %v2177_v57 = vadd.f32 %v1162_v6, %v2007_v47 }
 0x6d5   :  { %v1179_v56 = vsel %vm112_vm0, %v2177_v57, 0.0  ;;  %v1189_v12 = vmul.f32 %v2177_v57, %v2177_v57 }
 0x6d6   :  { %1180 = vadd.xlane.f32.xlu2 %v1179_v56  ;;  %1194 = vadd.xlane.f32.xlu1 %v1193_v38 }
 0x6d7   :  { %v1199_v55 = vsel %vm112_vm0, %v1189_v12, 0.0 }
 0x6d8   :  { %1200 = vadd.xlane.f32.xlu0 %v1199_v55 }
 0x6de   :  { %1197 = vadd.xlane.f32.xlu2 %v1196_v58 }
 0x727   :  { %v1172_v47 = vpop.xlane.xlu2 %1171 }
 0x728   :  { %v1182_v61 = vmul.f32 %v1172_v47, %v1862_v59 }
 0x729   :  { %v1192_v50 = vpop.xlane.xlu0 %1191 }
 0x72a   :  { %v1206_v62 = vmul.f32 %v1182_v61, %v1182_v61  ;;  %v1202_v0 = vmul.f32 %v1192_v50, %v1862_v59  ;;  %v1218_v4 = vsub.f32 %v1164_v41, %v1182_v61 }
 0x72c   :  { %v1210_v7 = vsub.f32 %v1202_v0, %v1206_v62 }
 0x72e   :  { %v1214_v8 = vmax.f32 %v1210_v7, 0.0 }
 0x730   :  { %v1222_v1 = vadd.f32 1e-05, %v1214_v8 }
 0x731   :  { %v1175_v13 = vpop.xlane.xlu0 %1174 }
 0x732   :  { %1591 = vrsqrt.f32 %v1222_v1  ;;  %vm1232_vm1 = vweird.f32 %v1222_v1  ;;  %v1183_v40 = vmul.f32 %v1175_v13, %v1862_v59 }
 0x734   :  { %v1207_v27 = vmul.f32 %v1183_v40, %v1183_v40  ;;  %v1219_v50 = vsub.f32 %v2165_v22, %v1183_v40 }
 0x738   :  { %v1592_v9 = vpop.eup %1591 }
 0x739   :  { %v1227_v10 = vmul.f32 %v1592_v9, %v1222_v1  ;;  %vm1233_vm15 = vweird.f32 %v1592_v9 }
 0x73a   :  { %vm1234_vm2 = vmor %vm1232_vm1, %vm1233_vm15 }
 0x73b   :  { %v1228_v11 = vmul.f32 %v1592_v9, %v1227_v10 }
 0x73d   :  { %v1229_v14 = vmul.f32 0.5, %v1228_v11 }
 0x73f   :  { %v1230_v15 = vsub.f32 1.5, %v1229_v14 }
 0x741   :  { %v1178_v60 = vpop.xlane.xlu1 %1177  ;;  %v1231_v16 = vmul.f32 %v1592_v9, %v1230_v15 }
 0x742   :  { %v1184_v35 = vmul.f32 %v1178_v60, %v1862_v59 }
 0x743   :  { %v1235_v19 = vsel %vm1234_vm2, %v1592_v9, %v1231_v16 }
 0x744   :  { %v1266_v21 = vmul.f32 %v1235_v19, %v1218_v4  ;;  %v1208_v26 = vmul.f32 %v1184_v35, %v1184_v35  ;;  %v1220_v4 = vsub.f32 %v2170_v52, %v1184_v35 }
 0x746   :  { %v1273_v23 = vmul.f32 %v2193_v36, %v1266_v21 }
 0x748   :  { %v1280_v25 = vadd.f32 %v2198_v20, %v1273_v23 }
 0x749   :  { %v1181_v24 = vpop.xlane.xlu2 %1180  ;;  %v1195_v45 = vpop.xlane.xlu1 %1194 }
 0x74a   :  { %v1185_v28 = vmul.f32 %v1181_v24, %v1862_v59  ;;  %v1203_v30 = vmul.f32 %v1195_v45, %v1862_v59  ;;  %v1284_v31 = vmul.f32 %v1473_v48, %v1280_v25 }
 0x74b   :  { %v1201_v2 = vpop.xlane.xlu0 %1200 }
 0x74c   :  { %v1209_v32 = vmul.f32 %v1185_v28, %v1185_v28  ;;  %v1211_v33 = vsub.f32 %v1203_v30, %v1207_v27  ;;  %v1205_v34 = vmul.f32 %v1201_v2, %v1862_v59  ;;  %1288 = vst.msk [vmem:[%s2255_s14] sm:$0xff] %vm112_vm0, %v1284_v31  ;;  %v1221_v9 = vsub.f32 %v2177_v57, %v1185_v28 }
 0x74e   :  { %v1215_v41 = vmax.f32 %v1211_v33, 0.0  ;;  %v1213_v42 = vsub.f32 %v1205_v34, %v1209_v32 }
 0x750   :  { %v1223_v43 = vadd.f32 1e-05, %v1215_v41  ;;  %v1217_v44 = vmax.f32 %v1213_v42, 0.0 }
 0x751   :  { %v1198_v3 = vpop.xlane.xlu2 %1197 }
 0x752   :  { %1593 = vrsqrt.f32 %v1223_v43  ;;  %v1204_v48 = vmul.f32 %v1198_v3, %v1862_v59  ;;  %v1225_v46 = vadd.f32 1e-05, %v1217_v44  ;;  %vm1242_vm4 = vweird.f32 %v1223_v43 }
 0x754   :  { %v1212_v5 = vsub.f32 %v1204_v48, %v1208_v26  ;;  %1595 = vrsqrt.f32 %v1225_v46  ;;  %vm1262_vm7 = vweird.f32 %v1225_v46 }
 0x756   :  { %v1216_v39 = vmax.f32 %v1212_v5, 0.0 }
 0x758   :  { %v1594_v29 = vpop.eup %1593  ;;  %v1224_v49 = vadd.f32 1e-05, %v1216_v39 }
 0x759   :  { %v1237_v6 = vmul.f32 %v1594_v29, %v1223_v43  ;;  %vm1243_vm3 = vweird.f32 %v1594_v29 }
 0x75a   :  { %1597 = vrsqrt.f32 %v1224_v49  ;;  %v1596_v53 = vpop.eup %1595  ;;  %vm1244_vm5 = vmor %vm1242_vm4, %vm1243_vm3  ;;  %vm1252_vm10 = vweird.f32 %v1224_v49 }
 0x75b   :  { %v1238_v56 = vmul.f32 %v1594_v29, %v1237_v6  ;;  %v1257_v38 = vmul.f32 %v1596_v53, %v1225_v46  ;;  %vm1263_vm6 = vweird.f32 %v1596_v53 }
 0x75c   :  { %vm1264_vm8 = vmor %vm1262_vm7, %vm1263_vm6 }
 0x75d   :  { %v1239_v12 = vmul.f32 0.5, %v1238_v56  ;;  %v1258_v55 = vmul.f32 %v1596_v53, %v1257_v38 }
 0x75f   :  { %v1240_v17 = vsub.f32 1.5, %v1239_v12  ;;  %v1259_v47 = vmul.f32 0.5, %v1258_v55 }
 0x760   :  { %v1598_v58 = vpop.eup %1597 }
 0x761   :  { %v1241_v61 = vmul.f32 %v1594_v29, %v1240_v17  ;;  %v1247_v59 = vmul.f32 %v1598_v58, %v1224_v49  ;;  %v1260_v62 = vsub.f32 1.5, %v1259_v47  ;;  %vm1253_vm9 = vweird.f32 %v1598_v58 }
 0x762   :  { %vm1254_vm11 = vmor %vm1252_vm10, %vm1253_vm9 }
 0x763   :  { %v1245_v0 = vsel %vm1244_vm5, %v1594_v29, %v1241_v61  ;;  %v1248_v7 = vmul.f32 %v1598_v58, %v1247_v59  ;;  %v1261_v1 = vmul.f32 %v1596_v53, %v1260_v62 }
 0x764   :  { %v1267_v8 = vmul.f32 %v1245_v0, %v1219_v50 }
 0x765   :  { %v1249_v10 = vmul.f32 0.5, %v1248_v7  ;;  %v1265_v14 = vsel %vm1264_vm8, %v1596_v53, %v1261_v1 }
 0x766   :  { %v1274_v11 = vmul.f32 %v2193_v36, %v1267_v8  ;;  %v1269_v15 = vmul.f32 %v1265_v14, %v1221_v9 }
 0x767   :  { %v1250_v60 = vsub.f32 1.5, %v1249_v10 }
 0x768   :  { %v1281_v22 = vadd.f32 %v2198_v20, %v1274_v11  ;;  %v1276_v16 = vmul.f32 %v2193_v36, %v1269_v15 }
 0x769   :  { %v1251_v13 = vmul.f32 %v1598_v58, %v1250_v60 }
 0x76a   :  { %v1285_v19 = vmul.f32 %v1474_v51, %v1281_v22  ;;  %v1283_v57 = vadd.f32 %v2198_v20, %v1276_v16 }
 0x76b   :  { %v1255_v21 = vsel %vm1254_vm11, %v1598_v58, %v1251_v13 }
 0x76c   :  { %1289 = vst.msk [vmem:[%s2255_s14 + $0x8] sm:$0xff] %vm112_vm0, %v1285_v19  ;;  %v1268_v40 = vmul.f32 %v1255_v21, %v1220_v4  ;;  %v1287_v23 = vmul.f32 %v1480_v18, %v1283_v57 }
 0x76e   :  { %v1275_v24 = vmul.f32 %v2193_v36, %v1268_v40  ;;  %1291 = vst.msk [vmem:[%s2255_s14 + $0x18] sm:$0xff] %vm112_vm0, %v1287_v23 }
 0x770   :  { %v1282_v37 = vadd.f32 %v2198_v20, %v1275_v24 }
 0x772   :  { %v1286_v51 = vmul.f32 %v1479_v63, %v1282_v37 }
 0x774   :  { %1290 = vst.msk [vmem:[%s2255_s14 + $0x10] sm:$0xff] %vm112_vm0, %v1286_v51 }
 0x775   :  { %1296 = vsyncpa [#allocation3], 1 }

// kernel: fastspeech2_forward.13
= control target key start
LH: loop header
LB: loop body
LE: loop exit
PB: predicated region body
PF: predicated region fallthrough
CT: control target
= control target key end

     0   :  { %20 = vsyncpa [#allocation3], 0  ;;  %s2539_s0 = inlined_call_operand.vmem [shape: f32[2,16,32], index: 0, kind: input, shape index: {}]   ;;  %s2540_s1 = inlined_call_operand.vmem [shape: bf16[32,16], index: 1, kind: input, shape index: {}]   ;;  %s2541_s2 = inlined_call_operand.vmem [shape: f32[1,16], index: 2, kind: input, shape index: {}]   ;;  %s2542_s3 = inlined_call_operand.vmem [shape: bf16[80,32], index: 3, kind: input, shape index: {}]   ;;  %s2543_s4 = inlined_call_operand.vmem [shape: f32[1,32], index: 4, kind: input, shape index: {}]   ;;  %s2544_s5 = inlined_call_operand.vmem [shape: bf16[160,32], index: 5, kind: input, shape index: {}]   ;;  %s2545_s6 = inlined_call_operand.vmem [shape: f32[1,32], index: 6, kind: input, shape index: {}]   ;;  %s2546_s7 = inlined_call_operand.vmem [shape: bf16[160,32], index: 7, kind: input, shape index: {}]   ;;  %s2547_s8 = inlined_call_operand.vmem [shape: f32[1,32], index: 8, kind: input, shape index: {}]   ;;  %s2548_s9 = inlined_call_operand.vmem [shape: bf16[160,32], index: 9, kind: input, shape index: {}]   ;;  %s2549_s10 = inlined_call_operand.vmem [shape: f32[1,32], index: 10, kind: input, shape index: {}]   ;;  %s2550_s11 = inlined_call_operand.vmem [shape: bf16[160,16], index: 11, kind: input, shape index: {}]   ;;  %s2551_s12 = inlined_call_operand.vmem [shape: f32[1,16], index: 12, kind: input, shape index: {}]   ;;  %s2552_s13 = inlined_call_operand.hbm [shape: f32[2,16,16], index: 13, kind: output, shape index: {0}]   ;;  %s2553_s14 = inlined_call_operand.hbm [shape: f32[2,16,16], index: 14, kind: output, shape index: {1}]  }
   0x1   :  { %v1567_v0 = vld [vmem:[%s2540_s1 + $0x8] sm:$0xff]  ;;  %v1566_v1 = vld [vmem:[%s2540_s1] sm:$0xff] }
   0x2   :  { %v49_v2 = vld [vmem:[%s2539_s0] sm:$0xff]  ;;  %88 = vmatpush.bf16.msra.mxu0 %v1567_v0  ;;  %v50_v3 = vld [vmem:[%s2539_s0 + $0x8] sm:$0xff] }
   0x3   :  { %21 = vsyncpa [#allocation5], 0  ;;  %v53_v4 = vpack.c.bf16 %v50_v3, %v49_v2  ;;  %vm75_vm0 = vcmask 261120   ;;  %v51_v5 = vld [vmem:[%s2539_s0 + $0x10] sm:$0xff]  ;;  %v52_v6 = vld [vmem:[%s2539_s0 + $0x18] sm:$0xff]  ;;  %vm101_vm1 = vcmask 130048  }
   0x4   :  { %v54_v7 = vpack.c.bf16 %v52_v6, %v51_v5  ;;  %v1790_v8 = vld [vmem:[%s2541_s2] ss:$0 sm:$0xff]  ;;  %vm110_vm2 = vcmask 1041408   ;;  %vm177_vm3 = vcmask 1044480   ;;  %vm131_vm4 = vcmask 1046528   ;;  %s1880_s0 = smov 48  }
   0x5   :  { %s1881_s2 = smov 16   ;;  %vm200_vm5 = vcmask 1043456   ;;  %vm154_vm6 = vcmask 1045504   ;;  %s1882_s26 = smov 64   ;;  %vm231_vm7 = vcmask 392192   ;;  %vm236_vm8 = vcmask 523264  }
   0x6   :  { %89 = vmatpush.bf16.msra.mxu0 %v1566_v1  ;;  %s1883_s27 = smov 32   ;;  %vm287_vm9 = vcmask 654336   ;;  %vm429_vm10 = vcmask 785408   ;;  %s1336_s1 = sshll.u32 %s2552_s13, 4  ;;  %s1337_s1 = int_to_ptr.hbm [resolvable:$true] %s1336_s1 }
   0x7   :  { %s1885_s23 = smov [#allocation2]   ;;  %s1886_s24 = smov 128  }
   0x8   :  { %s1349_s28 = sshll.u32 %s2553_s14, 4  ;;  %s1350_s28 = int_to_ptr.hbm [resolvable:$true] %s1349_s28 }
   0x9   :  { %1374 = vmatmul.msk.bf16.vlgmr.msra.gmra.mxu0 %vm75_vm0, %v53_v4 }
  0x19   :  { %1375 = vmatmul.msk.bf16.gmra.mxu0 %vm75_vm0, %v54_v7 }
  0x86   :  { %v91_v9 = vpop.f32.mrf.mxu0 }
  0x87   :  { %v1987_v10 = vadd.f32 %v1790_v8, %v91_v9 }
  0x89   :  { %102 = vst.msk [vmem:[#allocation2] sm:$0xff] %vm101_vm1, %v1987_v10  ;;  %v111_v11 = vrot.slane %v1987_v10, 6 }
  0x8b   :  { %v1995_v14 = vsel %vm110_vm2, 0.0, %v111_v11 }
  0x8c   :  { %v178_v18 = vrot.slane %v1995_v14, 3  ;;  %v132_v19 = vrot.slane %v1995_v14, 1  ;;  %v201_v36 = vrot.slane %v1995_v14, 4  ;;  %v155_v37 = vrot.slane %v1995_v14, 2 }
  0x8e   :  { %v93_v12 = vpop.f32.mrf.mxu0 }
  0x8f   :  { %v1992_v13 = vadd.f32 %v1790_v8, %v93_v12  ;;  %v1572_v12 = vld [vmem:[%s2542_s3 + $0x20] sm:$0xff] }
  0x90   :  { %297 = vmatpush.bf16.msra.mxu1 %v1572_v12 }
  0x91   :  { %103 = vst.msk [vmem:[#allocation2 + $0x8] sm:$0xff] %vm101_vm1, %v1992_v13  ;;  %v112_v15 = vrot.slane %v1992_v13, 6 }
  0x93   :  { %v2001_v16 = vsel %vm110_vm2, %v111_v11, %v112_v15  ;;  %v125_v17 = vsel %vm110_vm2, %v112_v15, 0.0  ;;  %v1571_v15 = vld [vmem:[%s2542_s3 + $0x18] sm:$0xff] }
  0x94   :  { %v179_v20 = vrot.slane %v2001_v16, 3  ;;  %v181_v21 = vrot.slane %v125_v17, 3  ;;  %v133_v22 = vrot.slane %v2001_v16, 1  ;;  %v135_v23 = vrot.slane %v125_v17, 1  ;;  %298 = vmatpush.bf16.msra.mxu1 %v1571_v15 }
  0x95   :  { %v202_v32 = vrot.slane %v2001_v16, 4  ;;  %v204_v33 = vrot.slane %v125_v17, 4  ;;  %v156_v34 = vrot.slane %v2001_v16, 2  ;;  %v158_v35 = vrot.slane %v125_v17, 2  ;;  %v1570_v17 = vld [vmem:[%s2542_s3 + $0x10] sm:$0xff] }
  0x96   :  { %v96_v24 = vpop.f32.mrf.mxu0  ;;  %v180_v25 = vsel %vm177_vm3, %v178_v18, %v179_v20  ;;  %v182_v26 = vsel %vm177_vm3, %v179_v20, %v181_v21  ;;  %v134_v27 = vsel %vm131_vm4, %v132_v19, %v133_v22  ;;  %v136_v28 = vsel %vm131_vm4, %v133_v22, %v135_v23  ;;  %v1569_v18 = vld [vmem:[%s2542_s3 + $0x8] sm:$0xff]  ;;  %v1568_v19 = vld [vmem:[%s2542_s3] sm:$0xff] }
  0x97   :  { %v2012_v29 = vadd.f32 %v1790_v8, %v96_v24  ;;  %v1640_v30 = vpack.i.bf16 %v182_v26, %v180_v25  ;;  %v1630_v31 = vpack.i.bf16 %v136_v28, %v134_v27  ;;  %v203_v39 = vsel %vm200_vm5, %v201_v36, %v202_v32 }
  0x98   :  { %v205_v40 = vsel %vm200_vm5, %v202_v32, %v204_v33  ;;  %v157_v41 = vsel %vm154_vm6, %v155_v37, %v156_v34  ;;  %v159_v42 = vsel %vm154_vm6, %v156_v34, %v158_v35  ;;  %299 = vmatpush.bf16.msra.mxu1 %v1570_v17 }
  0x99   :  { %104 = vst.msk [vmem:[#allocation2 + $0x10] sm:$0xff] %vm101_vm1, %v2012_v29  ;;  %1641 = vrot.lane.b32.xlu1 %v1640_v30, %s1880_s0  ;;  %1631 = vrot.lane.b32.xlu0 %v1630_v31, %s1881_s2  ;;  %v114_v38 = vrot.slane %v2012_v29, 6  ;;  %v1645_v46 = vpack.i.bf16 %v205_v40, %v203_v39  ;;  %v1635_v47 = vpack.i.bf16 %v159_v42, %v157_v41 }
  0x9b   :  { %v2028_v44 = vsel %vm110_vm2, 0.0, %v114_v38 }
  0x9c   :  { %v137_v49 = vrot.slane %v2028_v44, 1  ;;  %v183_v50 = vrot.slane %v2028_v44, 3  ;;  %v206_v53 = vrot.slane %v2028_v44, 4  ;;  %v160_v5 = vrot.slane %v2028_v44, 2  ;;  %300 = vmatpush.bf16.msra.mxu1 %v1569_v18 }
  0x9e   :  { %v98_v43 = vpop.f32.mrf.mxu0 }
  0x9f   :  { %v2030_v45 = vadd.f32 %v1790_v8, %v98_v43 }
  0xa0   :  { %301 = vmatpush.bf16.msra.mxu1 %v1568_v19 }
  0xa1   :  { %105 = vst.msk [vmem:[#allocation2 + $0x18] sm:$0xff] %vm101_vm1, %v2030_v45  ;;  %v115_v48 = vrot.slane %v2030_v45, 6  ;;  %1646 = vrot.lane.b32.xlu1 %v1645_v46, %s1882_s26  ;;  %1636 = vrot.lane.b32.xlu0 %v1635_v47, %s1883_s27 }
  0xa3   :  { %v2040_v51 = vsel %vm110_vm2, %v114_v38, %v115_v48  ;;  %v126_v52 = vsel %vm110_vm2, %v115_v48, 0.0 }
  0xa4   :  { %v138_v54 = vrot.slane %v2040_v51, 1  ;;  %v140_v55 = vrot.slane %v126_v52, 1  ;;  %v184_v56 = vrot.slane %v2040_v51, 3  ;;  %v186_v57 = vrot.slane %v126_v52, 3 }
  0xa5   :  { %v207_v58 = vrot.slane %v2040_v51, 4  ;;  %v209_v59 = vrot.slane %v126_v52, 4  ;;  %v161_v6 = vrot.slane %v2040_v51, 2  ;;  %v163_v7 = vrot.slane %v126_v52, 2 }
  0xa6   :  { %v139_v60 = vsel %vm131_vm4, %v137_v49, %v138_v54  ;;  %v141_v61 = vsel %vm131_vm4, %v138_v54, %v140_v55  ;;  %v185_v62 = vsel %vm177_vm3, %v183_v50, %v184_v56  ;;  %v187_v63 = vsel %vm177_vm3, %v184_v56, %v186_v57 }
  0xa7   :  { %v1650_v0 = vpack.i.bf16 %v141_v61, %v139_v60  ;;  %v1660_v1 = vpack.i.bf16 %v187_v63, %v185_v62  ;;  %v208_v2 = vsel %vm200_vm5, %v206_v53, %v207_v58  ;;  %v210_v3 = vsel %vm200_vm5, %v207_v58, %v209_v59 }
  0xa8   :  { %v1665_v4 = vpack.i.bf16 %v210_v3, %v208_v2  ;;  %v162_v8 = vsel %vm154_vm6, %v160_v5, %v161_v6  ;;  %v164_v9 = vsel %vm154_vm6, %v161_v6, %v163_v7  ;;  %v1580_v7 = vld [vmem:[%s2544_s5 + $0x38] sm:$0xff] }
  0xa9   :  { %1651 = vrot.lane.b32.xlu2 %v1650_v0, %s1881_s2  ;;  %1661 = vrot.lane.b32.xlu0 %v1660_v1, %s1880_s0  ;;  %v1655_v11 = vpack.i.bf16 %v164_v9, %v162_v8  ;;  %v1791_v0 = vld [vmem:[%s2543_s4] ss:$0 sm:$0xff]  ;;  %s1884_s4 = smov 96  }
  0xaa   :  { %1666 = vrot.lane.b32.xlu1 %v1665_v4, %s1882_s26  ;;  %528 = vmatpush.bf16.msra.mxu2 %v1580_v7 }
  0xb1   :  { %1656 = vrot.lane.b32.xlu2 %v1655_v11, %s1883_s27 }
 0x103   :  { %v1652_v22 = vpop.permute.xlu2 %1651 }
 0x104   :  { %v1654_v43 = vunpack.i.h.bf16 %v1652_v22  ;;  %v1653_v46 = vunpack.i.l.bf16 %v1652_v22 }
 0x106   :  { %v226_v53 = vsel %vm101_vm1, %v2040_v51, %v1654_v43  ;;  %v225_v54 = vsel %vm101_vm1, %v2028_v44, %v1653_v46  ;;  %v1582_v44 = vld [vmem:[%s2544_s5 + $0x48] sm:$0xff]  ;;  %v1581_v51 = vld [vmem:[%s2544_s5 + $0x40] sm:$0xff] }
 0x107   :  { %553 = vmatpush.bf16.msra.mxu3 %v1582_v44 }
 0x10b   :  { %v1642_v20 = vpop.permute.xlu1 %1641  ;;  %v1632_v21 = vpop.permute.xlu0 %1631  ;;  %554 = vmatpush.bf16.msra.mxu3 %v1581_v51 }
 0x10c   :  { %v1634_v23 = vunpack.i.h.bf16 %v1632_v21  ;;  %v1633_v24 = vunpack.i.l.bf16 %v1632_v21  ;;  %v1644_v30 = vunpack.i.h.bf16 %v1642_v20  ;;  %v1643_v31 = vunpack.i.l.bf16 %v1642_v20 }
 0x10e   :  { %v224_v32 = vsel %vm101_vm1, %v2001_v16, %v1634_v23  ;;  %v223_v33 = vsel %vm101_vm1, %v1995_v14, %v1633_v24  ;;  %v1657_v16 = vpop.permute.xlu2 %1656 }
 0x10f   :  { %v1659_v47 = vunpack.i.h.bf16 %v1657_v16  ;;  %v1658_v48 = vunpack.i.l.bf16 %v1657_v16 }
 0x111   :  { %v229_v55 = vsel %vm75_vm0, %v225_v54, %v1658_v48  ;;  %v230_v56 = vsel %vm75_vm0, %v226_v53, %v1659_v47 }
 0x113   :  { %v1647_v25 = vpop.permute.xlu1 %1646  ;;  %v1637_v26 = vpop.permute.xlu0 %1636 }
 0x114   :  { %v1639_v27 = vunpack.i.h.bf16 %v1637_v26  ;;  %v1638_v28 = vunpack.i.l.bf16 %v1637_v26  ;;  %v1649_v34 = vunpack.i.h.bf16 %v1647_v25  ;;  %v1648_v35 = vunpack.i.l.bf16 %v1647_v25 }
 0x116   :  { %v227_v36 = vsel %vm75_vm0, %v223_v33, %v1638_v28  ;;  %v228_v37 = vsel %vm75_vm0, %v224_v32, %v1639_v27 }
 0x117   :  { %v232_v38 = vsel %vm231_vm7, %v227_v36, %v1643_v31  ;;  %v233_v39 = vsel %vm231_vm7, %v228_v37, %v1644_v30 }
 0x118   :  { %v237_v40 = vsel %vm236_vm8, %v232_v38, %v1648_v35  ;;  %v238_v41 = vsel %vm236_vm8, %v233_v39, %v1649_v34 }
 0x119   :  { %v241_v42 = vpack.c.bf16 %v238_v41, %v237_v40 }
 0x11b   :  { %1396 = vmatmul.msk.bf16.vlgmr.msra.gmra.mxu1 %vm287_vm9, %v241_v42  ;;  %v1662_v14 = vpop.permute.xlu0 %1661 }
 0x11c   :  { %v1664_v49 = vunpack.i.h.bf16 %v1662_v14  ;;  %v1663_v50 = vunpack.i.l.bf16 %v1662_v14  ;;  %v1667_v52 = vpop.permute.xlu1 %1666 }
 0x11d   :  { %v1669_v57 = vunpack.i.h.bf16 %v1667_v52  ;;  %v1668_v58 = vunpack.i.l.bf16 %v1667_v52 }
 0x11e   :  { %v235_v59 = vsel %vm231_vm7, %v230_v56, %v1664_v49  ;;  %v234_v60 = vsel %vm231_vm7, %v229_v55, %v1663_v50 }
 0x11f   :  { %v239_v61 = vsel %vm236_vm8, %v234_v60, %v1668_v58  ;;  %v240_v62 = vsel %vm236_vm8, %v235_v59, %v1669_v57 }
 0x120   :  { %v242_v63 = vpack.c.bf16 %v240_v62, %v239_v61 }
 0x12b   :  { %1397 = vmatmul.msk.bf16.gmra.mxu1 %vm287_vm9, %v242_v63 }
 0x198   :  { %v303_v1 = vpop.f32.mrf.mxu1 }
 0x199   :  { %v304_v2 = vadd.f32 %v1791_v0, %v303_v1 }
 0x19b   :  { %1796 = vtanh.f32 %v304_v2 }
 0x1a0   :  { %v305_v3 = vpop.f32.mrf.mxu1 }
 0x1a1   :  { %v1797_v4 = vpop.eup %1796  ;;  %v306_v5 = vadd.f32 %v1791_v0, %v305_v3 }
 0x1a2   :  { %v321_v6 = vrot.slane %v1797_v4, 6 }
 0x1a3   :  { %1798 = vtanh.f32 %v306_v5 }
 0x1a4   :  { %v2111_v8 = vsel %vm110_vm2, 0.0, %v321_v6 }
 0x1a5   :  { %v407_v17 = vrot.slane %v2111_v8, 4  ;;  %v385_v20 = vrot.slane %v2111_v8, 3  ;;  %v363_v30 = vrot.slane %v2111_v8, 2  ;;  %v341_v31 = vrot.slane %v2111_v8, 1 }
 0x1a8   :  { %v308_v9 = vpop.f32.mrf.mxu1 }
 0x1a9   :  { %v1799_v11 = vpop.eup %1798  ;;  %v309_v12 = vadd.f32 %v1791_v0, %v308_v9 }
 0x1aa   :  { %v322_v15 = vrot.slane %v1799_v11, 6 }
 0x1ab   :  { %1800 = vtanh.f32 %v309_v12 }
 0x1ac   :  { %v2115_v18 = vsel %vm110_vm2, %v321_v6, %v322_v15  ;;  %v335_v19 = vsel %vm110_vm2, %v322_v15, 0.0 }
 0x1ad   :  { %v344_v21 = vrot.slane %v335_v19, 1  ;;  %v366_v22 = vrot.slane %v335_v19, 2  ;;  %v388_v23 = vrot.slane %v335_v19, 3  ;;  %v410_v24 = vrot.slane %v335_v19, 4  ;;  %v1578_v19 = vld [vmem:[%s2544_s5 + $0x28] sm:$0xff] }
 0x1ae   :  { %v408_v25 = vrot.slane %v2115_v18, 4  ;;  %v386_v26 = vrot.slane %v2115_v18, 3  ;;  %v364_v27 = vrot.slane %v2115_v18, 2  ;;  %v342_v28 = vrot.slane %v2115_v18, 1 }
 0x1b0   :  { %v310_v32 = vpop.f32.mrf.mxu1  ;;  %v409_v33 = vsel %vm200_vm5, %v407_v17, %v408_v25  ;;  %v411_v34 = vsel %vm200_vm5, %v408_v25, %v410_v24  ;;  %v387_v35 = vsel %vm177_vm3, %v385_v20, %v386_v26  ;;  %v389_v36 = vsel %vm177_vm3, %v386_v26, %v388_v23  ;;  %v1579_v17 = vld [vmem:[%s2544_s5 + $0x30] sm:$0xff]  ;;  %v1577_v20 = vld [vmem:[%s2544_s5 + $0x20] sm:$0xff]  ;;  %v1574_v23 = vld [vmem:[%s2544_s5 + $0x8] sm:$0xff] }
 0x1b1   :  { %v311_v37 = vadd.f32 %v1791_v0, %v310_v32  ;;  %v435_v38 = vpack.c.bf16 %v411_v34, %v409_v33  ;;  %v1680_v39 = vpack.i.bf16 %v389_v36, %v387_v35  ;;  %v365_v40 = vsel %vm154_vm6, %v363_v30, %v364_v27  ;;  %v1801_v41 = vpop.eup %1800  ;;  %529 = vmatpush.bf16.msra.mxu2 %v1579_v17  ;;  %v1573_v24 = vld [vmem:[%s2544_s5] sm:$0xff] }
 0x1b2   :  { %v367_v42 = vsel %vm154_vm6, %v364_v27, %v366_v22  ;;  %v343_v16 = vsel %vm131_vm4, %v341_v31, %v342_v28  ;;  %v345_v14 = vsel %vm131_vm4, %v342_v28, %v344_v21  ;;  %v324_v47 = vrot.slane %v1801_v41, 6  ;;  %v1576_v21 = vld [vmem:[%s2544_s5 + $0x18] sm:$0xff]  ;;  %v1575_v22 = vld [vmem:[%s2544_s5 + $0x10] sm:$0xff]  ;;  %s1334_s5 = sshll.u32 %s1885_s23, 4  ;;  %s1335_s5 = int_to_ptr.vmem [resolvable:$true] %s1334_s5 }
 0x1b3   :  { %1802 = vtanh.f32 %v311_v37  ;;  %1438 = vmatmul.msk.bf16.vlgmr.msra.gmra.mxu3 %vm75_vm0, %v435_v38  ;;  %1681 = vrot.lane.b32.xlu1 %v1680_v39, %s1884_s4  ;;  %v1675_v43 = vpack.i.bf16 %v367_v42, %v365_v40  ;;  %v1670_v46 = vpack.i.bf16 %v345_v14, %v343_v16 }
 0x1b4   :  { %v2138_v49 = vsel %vm110_vm2, 0.0, %v324_v47 }
 0x1b5   :  { %1676 = vrot.lane.b32.xlu0 %v1675_v43, %s1882_s26  ;;  %1671 = vrot.lane.b32.xlu2 %v1670_v46, %s1883_s27  ;;  %v412_v54 = vrot.slane %v2138_v49, 4  ;;  %v390_v55 = vrot.slane %v2138_v49, 3  ;;  %v368_v44 = vrot.slane %v2138_v49, 2  ;;  %v346_v51 = vrot.slane %v2138_v49, 1 }
 0x1b6   :  { %530 = vmatpush.bf16.msra.mxu2 %v1578_v19 }
 0x1b9   :  { %v1803_v48 = vpop.eup %1802 }
 0x1ba   :  { %v325_v50 = vrot.slane %v1803_v48, 6  ;;  %531 = vmatpush.bf16.msra.mxu2 %v1577_v20 }
 0x1bc   :  { %v2141_v52 = vsel %vm110_vm2, %v324_v47, %v325_v50  ;;  %v336_v53 = vsel %vm110_vm2, %v325_v50, 0.0 }
 0x1bd   :  { %v349_v56 = vrot.slane %v336_v53, 1  ;;  %v371_v57 = vrot.slane %v336_v53, 2  ;;  %v393_v58 = vrot.slane %v336_v53, 3  ;;  %v415_v59 = vrot.slane %v336_v53, 4 }
 0x1be   :  { %v413_v60 = vrot.slane %v2141_v52, 4  ;;  %v391_v61 = vrot.slane %v2141_v52, 3  ;;  %v369_v62 = vrot.slane %v2141_v52, 2  ;;  %v347_v63 = vrot.slane %v2141_v52, 1  ;;  %532 = vmatpush.bf16.msra.mxu2 %v1576_v21 }
 0x1c0   :  { %v414_v0 = vsel %vm200_vm5, %v412_v54, %v413_v60  ;;  %v416_v1 = vsel %vm200_vm5, %v413_v60, %v415_v59  ;;  %v392_v2 = vsel %vm177_vm3, %v390_v55, %v391_v61  ;;  %v394_v3 = vsel %vm177_vm3, %v391_v61, %v393_v58  ;;  %v1592_v59 = vld [vmem:[%s2546_s7 + $0x48] sm:$0xff]  ;;  %v1792_v60 = vld [vmem:[%s2545_s6] ss:$0 sm:$0xff] }
 0x1c1   :  { %v437_v4 = vpack.c.bf16 %v416_v1, %v414_v0  ;;  %v1695_v5 = vpack.i.bf16 %v394_v3, %v392_v2  ;;  %v370_v6 = vsel %vm154_vm6, %v368_v44, %v369_v62  ;;  %v372_v7 = vsel %vm154_vm6, %v369_v62, %v371_v57  ;;  %805 = vmatpush.bf16.msrb.mxu3 %v1592_v59 }
 0x1c2   :  { %v1690_v9 = vpack.i.bf16 %v372_v7, %v370_v6  ;;  %v348_v11 = vsel %vm131_vm4, %v346_v51, %v347_v63  ;;  %v350_v12 = vsel %vm131_vm4, %v347_v63, %v349_v56  ;;  %533 = vmatpush.bf16.msra.mxu2 %v1575_v22 }
 0x1c3   :  { %1439 = vmatmul.msk.bf16.gmra.mxu3 %vm75_vm0, %v437_v4  ;;  %1696 = vrot.lane.b32.xlu1 %v1695_v5, %s1884_s4  ;;  %v1685_v15 = vpack.i.bf16 %v350_v12, %v348_v11  ;;  %v1590_v4 = vld [vmem:[%s2546_s7 + $0x38] sm:$0xff] }
 0x1c4   :  { %1691 = vrot.lane.b32.xlu0 %v1690_v9, %s1882_s26  ;;  %780 = vmatpush.bf16.msrb.mxu0 %v1590_v4 }
 0x1c5   :  { %1686 = vrot.lane.b32.xlu2 %v1685_v15, %s1883_s27 }
 0x1c6   :  { %534 = vmatpush.bf16.msra.mxu2 %v1574_v23 }
 0x1ca   :  { %535 = vmatpush.bf16.msra.mxu2 %v1573_v24 }
 0x20f   :  { %v1672_v25 = vpop.permute.xlu2 %1671 }
 0x210   :  { %v1674_v26 = vunpack.i.h.bf16 %v1672_v25  ;;  %v1673_v27 = vunpack.i.l.bf16 %v1672_v25 }
 0x212   :  { %v422_v35 = vsel %vm75_vm0, %v2115_v18, %v1674_v26  ;;  %v421_v36 = vsel %vm75_vm0, %v2111_v8, %v1673_v27 }
 0x21f   :  { %v1687_v42 = vpop.permute.xlu2 %1686 }
 0x220   :  { %v1689_v16 = vunpack.i.h.bf16 %v1687_v42  ;;  %v1688_v14 = vunpack.i.l.bf16 %v1687_v42 }
 0x222   :  { %v424_v8 = vsel %vm75_vm0, %v2141_v52, %v1689_v16  ;;  %v423_v53 = vsel %vm75_vm0, %v2138_v49, %v1688_v14  ;;  %v1591_v52 = vld [vmem:[%s2546_s7 + $0x40] sm:$0xff] }
 0x223   :  { %806 = vmatpush.bf16.msrb.mxu3 %v1591_v52 }
 0x225   :  { %v1682_v28 = vpop.permute.xlu1 %1681 }
 0x226   :  { %v1684_v30 = vunpack.i.h.bf16 %v1682_v28  ;;  %v1683_v31 = vunpack.i.l.bf16 %v1682_v28 }
 0x227   :  { %v1677_v32 = vpop.permute.xlu0 %1676 }
 0x228   :  { %v1679_v33 = vunpack.i.h.bf16 %v1677_v32  ;;  %v1678_v34 = vunpack.i.l.bf16 %v1677_v32 }
 0x22a   :  { %v425_v37 = vsel %vm236_vm8, %v421_v36, %v1678_v34  ;;  %v426_v38 = vsel %vm236_vm8, %v422_v35, %v1679_v33 }
 0x22b   :  { %v430_v39 = vsel %vm429_vm10, %v425_v37, %v1683_v31  ;;  %v431_v40 = vsel %vm429_vm10, %v426_v38, %v1684_v30 }
 0x22c   :  { %v434_v41 = vpack.c.bf16 %v431_v40, %v430_v39 }
 0x22e   :  { %536 = vmatmul.bf16.vlgmr.msra.gmra.mxu2 %v434_v41 }
 0x235   :  { %v1697_v43 = vpop.permute.xlu1 %1696 }
 0x236   :  { %v1699_v46 = vunpack.i.h.bf16 %v1697_v43  ;;  %v1698_v47 = vunpack.i.l.bf16 %v1697_v43  ;;  %v1692_v18 = vpop.permute.xlu0 %1691  ;;  %v556_v49 = vpop.f32.mrf.mxu3 }
 0x237   :  { %v1694_v48 = vunpack.i.h.bf16 %v1692_v18  ;;  %v1693_v50 = vunpack.i.l.bf16 %v1692_v18 }
 0x239   :  { %v427_v54 = vsel %vm236_vm8, %v423_v53, %v1693_v50  ;;  %v428_v55 = vsel %vm236_vm8, %v424_v8, %v1694_v48 }
 0x23a   :  { %v432_v56 = vsel %vm429_vm10, %v427_v54, %v1698_v47  ;;  %v433_v57 = vsel %vm429_vm10, %v428_v55, %v1699_v46 }
 0x23b   :  { %v436_v58 = vpack.c.bf16 %v433_v57, %v432_v56 }
 0x23e   :  { %541 = vmatmul.bf16.gmra.mxu2 %v436_v58  ;;  %v558_v44 = vpop.f32.mrf.mxu3 }
 0x246   :  { %v561_v5 = vpop.f32.mrf.mxu3 }
 0x24e   :  { %v563_v38 = vpop.f32.mrf.mxu3 }
 0x2b1   :  { %v537_v61 = vpop.f32.mrf.mxu2 }
 0x2b2   :  { %v538_v62 = vadd.f32 %v1792_v60, %v537_v61 }
 0x2b4   :  { %v557_v63 = vadd.f32 %v556_v49, %v538_v62 }
 0x2b6   :  { %1804 = vtanh.f32 %v557_v63 }
 0x2b9   :  { %v539_v51 = vpop.f32.mrf.mxu2 }
 0x2ba   :  { %v540_v0 = vadd.f32 %v1792_v60, %v539_v51 }
 0x2bc   :  { %v1805_v1 = vpop.eup %1804  ;;  %v559_v2 = vadd.f32 %v558_v44, %v540_v0 }
 0x2bd   :  { %v574_v3 = vrot.slane %v1805_v1, 6 }
 0x2be   :  { %1806 = vtanh.f32 %v559_v2 }
 0x2bf   :  { %v2214_v9 = vsel %vm110_vm2, 0.0, %v574_v3 }
 0x2c0   :  { %v660_v17 = vrot.slane %v2214_v9, 4  ;;  %v638_v19 = vrot.slane %v2214_v9, 3  ;;  %v616_v22 = vrot.slane %v2214_v9, 2  ;;  %v594_v23 = vrot.slane %v2214_v9, 1 }
 0x2c1   :  { %v542_v6 = vpop.f32.mrf.mxu2 }
 0x2c2   :  { %v543_v7 = vadd.f32 %v1792_v60, %v542_v6 }
 0x2c4   :  { %v1807_v11 = vpop.eup %1806  ;;  %v562_v12 = vadd.f32 %v561_v5, %v543_v7 }
 0x2c5   :  { %v575_v15 = vrot.slane %v1807_v11, 6 }
 0x2c6   :  { %1808 = vtanh.f32 %v562_v12 }
 0x2c7   :  { %v2219_v20 = vsel %vm110_vm2, %v574_v3, %v575_v15  ;;  %v588_v21 = vsel %vm110_vm2, %v575_v15, 0.0 }
 0x2c8   :  { %v663_v24 = vrot.slane %v588_v21, 4  ;;  %v661_v25 = vrot.slane %v2219_v20, 4  ;;  %v639_v26 = vrot.slane %v2219_v20, 3  ;;  %v641_v27 = vrot.slane %v588_v21, 3 }
 0x2c9   :  { %v544_v28 = vpop.f32.mrf.mxu2  ;;  %v617_v30 = vrot.slane %v2219_v20, 2  ;;  %v619_v31 = vrot.slane %v588_v21, 2  ;;  %v595_v32 = vrot.slane %v2219_v20, 1  ;;  %v597_v33 = vrot.slane %v588_v21, 1  ;;  %v1589_v21 = vld [vmem:[%s2546_s7 + $0x30] sm:$0xff] }
 0x2ca   :  { %v545_v34 = vadd.f32 %v1792_v60, %v544_v28  ;;  %v662_v35 = vsel %vm200_vm5, %v660_v17, %v661_v25  ;;  %v664_v36 = vsel %vm200_vm5, %v661_v25, %v663_v24  ;;  %v640_v37 = vsel %vm177_vm3, %v638_v19, %v639_v26  ;;  %781 = vmatpush.bf16.msrb.mxu0 %v1589_v21  ;;  %v1586_v24 = vld [vmem:[%s2546_s7 + $0x18] sm:$0xff]  ;;  %v1585_v25 = vld [vmem:[%s2546_s7 + $0x10] sm:$0xff] }
 0x2cb   :  { %v687_v39 = vpack.c.bf16 %v664_v36, %v662_v35  ;;  %v642_v40 = vsel %vm177_vm3, %v639_v26, %v641_v27  ;;  %v618_v41 = vsel %vm154_vm6, %v616_v22, %v617_v30  ;;  %v620_v42 = vsel %vm154_vm6, %v617_v30, %v619_v31  ;;  %v1588_v22 = vld [vmem:[%s2546_s7 + $0x28] sm:$0xff]  ;;  %v1583_v27 = vld [vmem:[%s2546_s7] sm:$0xff] }
 0x2cc   :  { %v1809_v16 = vpop.eup %1808  ;;  %v564_v14 = vadd.f32 %v563_v38, %v545_v34  ;;  %v1710_v43 = vpack.i.bf16 %v642_v40, %v640_v37  ;;  %v1705_v46 = vpack.i.bf16 %v620_v42, %v618_v41  ;;  %v596_v47 = vsel %vm131_vm4, %v594_v23, %v595_v32  ;;  %v1587_v23 = vld [vmem:[%s2546_s7 + $0x20] sm:$0xff]  ;;  %v1584_v26 = vld [vmem:[%s2546_s7 + $0x8] sm:$0xff] }
 0x2cd   :  { %1480 = vmatmul.msk.bf16.vlgmr.msrb.gmra.mxu3 %vm75_vm0, %v687_v39  ;;  %v598_v18 = vsel %vm131_vm4, %v595_v32, %v597_v33  ;;  %v577_v50 = vrot.slane %v1809_v16, 6 }
 0x2ce   :  { %1810 = vtanh.f32 %v564_v14  ;;  %1711 = vrot.lane.b32.xlu1 %v1710_v43, %s1884_s4  ;;  %1706 = vrot.lane.b32.xlu0 %v1705_v46, %s1882_s26  ;;  %v1700_v48 = vpack.i.bf16 %v598_v18, %v596_v47 }
 0x2cf   :  { %v2241_v8 = vsel %vm110_vm2, 0.0, %v577_v50  ;;  %782 = vmatpush.bf16.msrb.mxu0 %v1588_v22 }
 0x2d0   :  { %1701 = vrot.lane.b32.xlu2 %v1700_v48, %s1883_s27  ;;  %v665_v55 = vrot.slane %v2241_v8, 4  ;;  %v643_v56 = vrot.slane %v2241_v8, 3  ;;  %v621_v59 = vrot.slane %v2241_v8, 2  ;;  %v599_v52 = vrot.slane %v2241_v8, 1 }
 0x2d3   :  { %783 = vmatpush.bf16.msrb.mxu0 %v1587_v23 }
 0x2d4   :  { %v1811_v53 = vpop.eup %1810 }
 0x2d5   :  { %v578_v54 = vrot.slane %v1811_v53, 6 }
 0x2d7   :  { %v2246_v57 = vsel %vm110_vm2, %v577_v50, %v578_v54  ;;  %v589_v58 = vsel %vm110_vm2, %v578_v54, 0.0  ;;  %784 = vmatpush.bf16.msrb.mxu0 %v1586_v24 }
 0x2d8   :  { %v666_v49 = vrot.slane %v2246_v57, 4  ;;  %v668_v60 = vrot.slane %v589_v58, 4  ;;  %v644_v61 = vrot.slane %v2246_v57, 3  ;;  %v646_v62 = vrot.slane %v589_v58, 3 }
 0x2d9   :  { %v622_v63 = vrot.slane %v2246_v57, 2  ;;  %v624_v44 = vrot.slane %v589_v58, 2  ;;  %v600_v51 = vrot.slane %v2246_v57, 1  ;;  %v602_v0 = vrot.slane %v589_v58, 1 }
 0x2da   :  { %v667_v1 = vsel %vm200_vm5, %v665_v55, %v666_v49  ;;  %v669_v2 = vsel %vm200_vm5, %v666_v49, %v668_v60  ;;  %v645_v3 = vsel %vm177_vm3, %v643_v56, %v644_v61  ;;  %v647_v4 = vsel %vm177_vm3, %v644_v61, %v646_v62  ;;  %v1602_v60 = vld [vmem:[%s2548_s9 + $0x48] sm:$0xff]  ;;  %v1793_v61 = vld [vmem:[%s2547_s8] ss:$0 sm:$0xff] }
 0x2db   :  { %v689_v5 = vpack.c.bf16 %v669_v2, %v667_v1  ;;  %v1725_v6 = vpack.i.bf16 %v647_v4, %v645_v3  ;;  %v623_v7 = vsel %vm154_vm6, %v621_v59, %v622_v63  ;;  %v625_v11 = vsel %vm154_vm6, %v622_v63, %v624_v44  ;;  %785 = vmatpush.bf16.msrb.mxu0 %v1585_v25 }
 0x2dc   :  { %v1720_v12 = vpack.i.bf16 %v625_v11, %v623_v7  ;;  %v601_v15 = vsel %vm131_vm4, %v599_v52, %v600_v51  ;;  %v603_v17 = vsel %vm131_vm4, %v600_v51, %v602_v0  ;;  %1057 = vmatpush.bf16.msrb.mxu2 %v1602_v60 }
 0x2dd   :  { %1481 = vmatmul.msk.bf16.gmra.mxu3 %vm75_vm0, %v689_v5  ;;  %1726 = vrot.lane.b32.xlu1 %v1725_v6, %s1884_s4  ;;  %v1715_v19 = vpack.i.bf16 %v603_v17, %v601_v15  ;;  %v1600_v5 = vld [vmem:[%s2548_s9 + $0x38] sm:$0xff] }
 0x2de   :  { %1721 = vrot.lane.b32.xlu0 %v1720_v12, %s1882_s26  ;;  %1032 = vmatpush.bf16.msrb.mxu1 %v1600_v5 }
 0x2df   :  { %1716 = vrot.lane.b32.xlu2 %v1715_v19, %s1883_s27  ;;  %786 = vmatpush.bf16.msrb.mxu0 %v1584_v26 }
 0x2e3   :  { %787 = vmatpush.bf16.msrb.mxu0 %v1583_v27 }
 0x32a   :  { %v1702_v28 = vpop.permute.xlu2 %1701 }
 0x32b   :  { %v1704_v30 = vunpack.i.h.bf16 %v1702_v28  ;;  %v1703_v31 = vunpack.i.l.bf16 %v1702_v28 }
 0x32d   :  { %v675_v38 = vsel %vm75_vm0, %v2219_v20, %v1704_v30  ;;  %v674_v39 = vsel %vm75_vm0, %v2214_v9, %v1703_v31 }
 0x339   :  { %v1717_v43 = vpop.permute.xlu2 %1716 }
 0x33a   :  { %v1719_v46 = vunpack.i.h.bf16 %v1717_v43  ;;  %v1718_v47 = vunpack.i.l.bf16 %v1717_v43 }
 0x33c   :  { %v677_v9 = vsel %vm75_vm0, %v2246_v57, %v1719_v46  ;;  %v676_v55 = vsel %vm75_vm0, %v2241_v8, %v1718_v47  ;;  %v1601_v57 = vld [vmem:[%s2548_s9 + $0x40] sm:$0xff] }
 0x33d   :  { %1058 = vmatpush.bf16.msrb.mxu2 %v1601_v57 }
 0x340   :  { %v1712_v32 = vpop.permute.xlu1 %1711  ;;  %v1707_v33 = vpop.permute.xlu0 %1706 }
 0x341   :  { %v1714_v34 = vunpack.i.h.bf16 %v1712_v32  ;;  %v1713_v35 = vunpack.i.l.bf16 %v1712_v32  ;;  %v1709_v36 = vunpack.i.h.bf16 %v1707_v33  ;;  %v1708_v37 = vunpack.i.l.bf16 %v1707_v33 }
 0x343   :  { %v678_v40 = vsel %vm236_vm8, %v674_v39, %v1708_v37  ;;  %v679_v41 = vsel %vm236_vm8, %v675_v38, %v1709_v36 }
 0x344   :  { %v682_v42 = vsel %vm429_vm10, %v678_v40, %v1713_v35  ;;  %v683_v16 = vsel %vm429_vm10, %v679_v41, %v1714_v34 }
 0x345   :  { %v686_v14 = vpack.c.bf16 %v683_v16, %v682_v42 }
 0x347   :  { %788 = vmatmul.bf16.vlgmr.msrb.gmra.mxu0 %v686_v14 }
 0x34f   :  { %v1727_v18 = vpop.permute.xlu1 %1726 }
 0x350   :  { %v1729_v48 = vunpack.i.h.bf16 %v1727_v18  ;;  %v1728_v50 = vunpack.i.l.bf16 %v1727_v18  ;;  %v1722_v20 = vpop.permute.xlu0 %1721  ;;  %v808_v8 = vpop.f32.mrf.mxu3 }
 0x351   :  { %v1724_v53 = vunpack.i.h.bf16 %v1722_v20  ;;  %v1723_v54 = vunpack.i.l.bf16 %v1722_v20 }
 0x353   :  { %v680_v56 = vsel %vm236_vm8, %v676_v55, %v1723_v54  ;;  %v681_v58 = vsel %vm236_vm8, %v677_v9, %v1724_v53 }
 0x354   :  { %v684_v59 = vsel %vm429_vm10, %v680_v56, %v1728_v50  ;;  %v685_v52 = vsel %vm429_vm10, %v681_v58, %v1729_v48 }
 0x355   :  { %v688_v49 = vpack.c.bf16 %v685_v52, %v684_v59 }
 0x357   :  { %793 = vmatmul.bf16.gmra.mxu0 %v688_v49 }
 0x358   :  { %v810_v51 = vpop.f32.mrf.mxu3 }
 0x360   :  { %v813_v6 = vpop.f32.mrf.mxu3 }
 0x368   :  { %v815_v41 = vpop.f32.mrf.mxu3 }
 0x3c4   :  { %v789_v62 = vpop.f32.mrf.mxu0 }
 0x3c5   :  { %v790_v63 = vadd.f32 %v1793_v61, %v789_v62 }
 0x3c7   :  { %v809_v44 = vadd.f32 %v808_v8, %v790_v63 }
 0x3c9   :  { %1812 = vtanh.f32 %v809_v44 }
 0x3cc   :  { %v791_v0 = vpop.f32.mrf.mxu0 }
 0x3cd   :  { %v792_v1 = vadd.f32 %v1793_v61, %v791_v0 }
 0x3cf   :  { %v1813_v2 = vpop.eup %1812  ;;  %v811_v3 = vadd.f32 %v810_v51, %v792_v1 }
 0x3d0   :  { %v826_v4 = vrot.slane %v1813_v2, 6 }
 0x3d1   :  { %1814 = vtanh.f32 %v811_v3 }
 0x3d2   :  { %v2317_v12 = vsel %vm110_vm2, 0.0, %v826_v4 }
 0x3d3   :  { %v912_v21 = vrot.slane %v2317_v12, 4  ;;  %v890_v22 = vrot.slane %v2317_v12, 3  ;;  %v868_v25 = vrot.slane %v2317_v12, 2  ;;  %v846_v26 = vrot.slane %v2317_v12, 1 }
 0x3d4   :  { %v794_v7 = vpop.f32.mrf.mxu0 }
 0x3d5   :  { %v795_v11 = vadd.f32 %v1793_v61, %v794_v7 }
 0x3d7   :  { %v1815_v15 = vpop.eup %1814  ;;  %v814_v17 = vadd.f32 %v813_v6, %v795_v11 }
 0x3d8   :  { %v827_v19 = vrot.slane %v1815_v15, 6 }
 0x3d9   :  { %1816 = vtanh.f32 %v814_v17 }
 0x3da   :  { %v2322_v23 = vsel %vm110_vm2, %v826_v4, %v827_v19  ;;  %v840_v24 = vsel %vm110_vm2, %v827_v19, 0.0 }
 0x3db   :  { %v915_v27 = vrot.slane %v840_v24, 4  ;;  %v913_v28 = vrot.slane %v2322_v23, 4  ;;  %v891_v30 = vrot.slane %v2322_v23, 3  ;;  %v893_v31 = vrot.slane %v840_v24, 3 }
 0x3dc   :  { %v796_v32 = vpop.f32.mrf.mxu0  ;;  %v869_v33 = vrot.slane %v2322_v23, 2  ;;  %v871_v34 = vrot.slane %v840_v24, 2  ;;  %v847_v35 = vrot.slane %v2322_v23, 1  ;;  %v849_v36 = vrot.slane %v840_v24, 1  ;;  %v1599_v24 = vld [vmem:[%s2548_s9 + $0x30] sm:$0xff] }
 0x3dd   :  { %v797_v37 = vadd.f32 %v1793_v61, %v796_v32  ;;  %v914_v38 = vsel %vm200_vm5, %v912_v21, %v913_v28  ;;  %v916_v39 = vsel %vm200_vm5, %v913_v28, %v915_v27  ;;  %v892_v40 = vsel %vm177_vm3, %v890_v22, %v891_v30  ;;  %1033 = vmatpush.bf16.msrb.mxu1 %v1599_v24  ;;  %v1596_v27 = vld [vmem:[%s2548_s9 + $0x18] sm:$0xff]  ;;  %v1595_v28 = vld [vmem:[%s2548_s9 + $0x10] sm:$0xff] }
 0x3de   :  { %v939_v42 = vpack.c.bf16 %v916_v39, %v914_v38  ;;  %v894_v16 = vsel %vm177_vm3, %v891_v30, %v893_v31  ;;  %v870_v14 = vsel %vm154_vm6, %v868_v25, %v869_v33  ;;  %v872_v43 = vsel %vm154_vm6, %v869_v33, %v871_v34  ;;  %v1598_v25 = vld [vmem:[%s2548_s9 + $0x28] sm:$0xff]  ;;  %v1593_v31 = vld [vmem:[%s2548_s9] sm:$0xff] }
 0x3df   :  { %v1817_v46 = vpop.eup %1816  ;;  %v816_v47 = vadd.f32 %v815_v41, %v797_v37  ;;  %v1740_v18 = vpack.i.bf16 %v894_v16, %v892_v40  ;;  %v1735_v48 = vpack.i.bf16 %v872_v43, %v870_v14  ;;  %v848_v50 = vsel %vm131_vm4, %v846_v26, %v847_v35  ;;  %v1597_v26 = vld [vmem:[%s2548_s9 + $0x20] sm:$0xff]  ;;  %v1594_v30 = vld [vmem:[%s2548_s9 + $0x8] sm:$0xff]  ;;  %s1887_s9 = smov 8  }
 0x3e0   :  { %1522 = vmatmul.msk.bf16.vlgmr.msrb.gmra.mxu2 %vm75_vm0, %v939_v42  ;;  %v850_v20 = vsel %vm131_vm4, %v847_v35, %v849_v36  ;;  %v829_v54 = vrot.slane %v1817_v46, 6  ;;  %1342 = dma.vmem_to_hbm [thread:$0]  %s1335_s5, 512, %s1337_s1, [#allocation3], %s1886_s24, %s1886_s24, %s1887_s9  }
 0x3e1   :  { %1818 = vtanh.f32 %v816_v47  ;;  %1741 = vrot.lane.b32.xlu1 %v1740_v18, %s1884_s4  ;;  %1736 = vrot.lane.b32.xlu0 %v1735_v48, %s1882_s26  ;;  %v1730_v53 = vpack.i.bf16 %v850_v20, %v848_v50 }
 0x3e2   :  { %v2344_v9 = vsel %vm110_vm2, 0.0, %v829_v54  ;;  %1034 = vmatpush.bf16.msrb.mxu1 %v1598_v25 }
 0x3e3   :  { %1731 = vrot.lane.b32.xlu2 %v1730_v53, %s1883_s27  ;;  %v917_v58 = vrot.slane %v2344_v9, 4  ;;  %v895_v59 = vrot.slane %v2344_v9, 3  ;;  %v873_v60 = vrot.slane %v2344_v9, 2  ;;  %v851_v57 = vrot.slane %v2344_v9, 1 }
 0x3e6   :  { %1035 = vmatpush.bf16.msrb.mxu1 %v1597_v26 }
 0x3e7   :  { %v1819_v55 = vpop.eup %1818 }
 0x3e8   :  { %v830_v56 = vrot.slane %v1819_v55, 6 }
 0x3ea   :  { %v2349_v52 = vsel %vm110_vm2, %v829_v54, %v830_v56  ;;  %v841_v49 = vsel %vm110_vm2, %v830_v56, 0.0  ;;  %1036 = vmatpush.bf16.msrb.mxu1 %v1596_v27 }
 0x3eb   :  { %v918_v8 = vrot.slane %v2349_v52, 4  ;;  %v920_v61 = vrot.slane %v841_v49, 4  ;;  %v896_v62 = vrot.slane %v2349_v52, 3  ;;  %v898_v63 = vrot.slane %v841_v49, 3 }
 0x3ec   :  { %v874_v44 = vrot.slane %v2349_v52, 2  ;;  %v876_v51 = vrot.slane %v841_v49, 2  ;;  %v852_v0 = vrot.slane %v2349_v52, 1  ;;  %v854_v1 = vrot.slane %v841_v49, 1 }
 0x3ed   :  { %v919_v2 = vsel %vm200_vm5, %v917_v58, %v918_v8  ;;  %v921_v3 = vsel %vm200_vm5, %v918_v8, %v920_v61  ;;  %v897_v4 = vsel %vm177_vm3, %v895_v59, %v896_v62  ;;  %v899_v5 = vsel %vm177_vm3, %v896_v62, %v898_v63  ;;  %v1612_v61 = vld [vmem:[%s2550_s11 + $0x48] sm:$0xff]  ;;  %v1794_v62 = vld [vmem:[%s2549_s10] ss:$0 sm:$0xff] }
 0x3ee   :  { %v941_v6 = vpack.c.bf16 %v921_v3, %v919_v2  ;;  %v1755_v7 = vpack.i.bf16 %v899_v5, %v897_v4  ;;  %v875_v11 = vsel %vm154_vm6, %v873_v60, %v874_v44  ;;  %v877_v15 = vsel %vm154_vm6, %v874_v44, %v876_v51  ;;  %1037 = vmatpush.bf16.msrb.mxu1 %v1595_v28 }
 0x3ef   :  { %v1750_v17 = vpack.i.bf16 %v877_v15, %v875_v11  ;;  %v853_v19 = vsel %vm131_vm4, %v851_v57, %v852_v0  ;;  %v855_v21 = vsel %vm131_vm4, %v852_v0, %v854_v1  ;;  %1309 = vmatpush.bf16.msra.mxu3 %v1612_v61 }
 0x3f0   :  { %1523 = vmatmul.msk.bf16.gmra.mxu2 %vm75_vm0, %v941_v6  ;;  %1756 = vrot.lane.b32.xlu1 %v1755_v7, %s1884_s4  ;;  %v1745_v22 = vpack.i.bf16 %v855_v21, %v853_v19 }
 0x3f1   :  { %1751 = vrot.lane.b32.xlu0 %v1750_v17, %s1882_s26 }
 0x3f2   :  { %1746 = vrot.lane.b32.xlu2 %v1745_v22, %s1883_s27  ;;  %1038 = vmatpush.bf16.msrb.mxu1 %v1594_v30 }
 0x3f6   :  { %1039 = vmatpush.bf16.msrb.mxu1 %v1593_v31 }
 0x43d   :  { %v1732_v32 = vpop.permute.xlu2 %1731 }
 0x43e   :  { %v1734_v33 = vunpack.i.h.bf16 %v1732_v32  ;;  %v1733_v34 = vunpack.i.l.bf16 %v1732_v32 }
 0x440   :  { %v927_v41 = vsel %vm75_vm0, %v2322_v23, %v1734_v33  ;;  %v926_v42 = vsel %vm75_vm0, %v2317_v12, %v1733_v34 }
 0x44c   :  { %v1747_v18 = vpop.permute.xlu2 %1746 }
 0x44d   :  { %v1749_v48 = vunpack.i.h.bf16 %v1747_v18  ;;  %v1748_v50 = vunpack.i.l.bf16 %v1747_v18 }
 0x44f   :  { %v929_v12 = vsel %vm75_vm0, %v2349_v52, %v1749_v48  ;;  %v928_v58 = vsel %vm75_vm0, %v2344_v9, %v1748_v50  ;;  %v1611_v52 = vld [vmem:[%s2550_s11 + $0x40] sm:$0xff] }
 0x450   :  { %1310 = vmatpush.bf16.msra.mxu3 %v1611_v52 }
 0x453   :  { %v1742_v35 = vpop.permute.xlu1 %1741  ;;  %v1737_v36 = vpop.permute.xlu0 %1736 }
 0x454   :  { %v1744_v37 = vunpack.i.h.bf16 %v1742_v35  ;;  %v1743_v38 = vunpack.i.l.bf16 %v1742_v35  ;;  %v1739_v39 = vunpack.i.h.bf16 %v1737_v36  ;;  %v1738_v40 = vunpack.i.l.bf16 %v1737_v36 }
 0x456   :  { %v930_v16 = vsel %vm236_vm8, %v926_v42, %v1738_v40  ;;  %v931_v14 = vsel %vm236_vm8, %v927_v41, %v1739_v39 }
 0x457   :  { %v934_v43 = vsel %vm429_vm10, %v930_v16, %v1743_v38  ;;  %v935_v46 = vsel %vm429_vm10, %v931_v14, %v1744_v37 }
 0x458   :  { %v938_v47 = vpack.c.bf16 %v935_v46, %v934_v43 }
 0x45a   :  { %1040 = vmatmul.bf16.vlgmr.msrb.gmra.mxu1 %v938_v47 }
 0x462   :  { %v1757_v20 = vpop.permute.xlu1 %1756 }
 0x463   :  { %v1759_v53 = vunpack.i.h.bf16 %v1757_v20  ;;  %v1758_v54 = vunpack.i.l.bf16 %v1757_v20  ;;  %v1752_v23 = vpop.permute.xlu0 %1751  ;;  %v1060_v9 = vpop.f32.mrf.mxu2 }
 0x464   :  { %v1754_v55 = vunpack.i.h.bf16 %v1752_v23  ;;  %v1753_v56 = vunpack.i.l.bf16 %v1752_v23 }
 0x466   :  { %v932_v59 = vsel %vm236_vm8, %v928_v58, %v1753_v56  ;;  %v933_v49 = vsel %vm236_vm8, %v929_v12, %v1754_v55 }
 0x467   :  { %v936_v60 = vsel %vm429_vm10, %v932_v59, %v1758_v54  ;;  %v937_v57 = vsel %vm429_vm10, %v933_v49, %v1759_v53 }
 0x468   :  { %v940_v8 = vpack.c.bf16 %v937_v57, %v936_v60 }
 0x46a   :  { %1045 = vmatmul.bf16.gmra.mxu1 %v940_v8 }
 0x46b   :  { %v1062_v0 = vpop.f32.mrf.mxu2 }
 0x473   :  { %v1065_v6 = vpop.f32.mrf.mxu2 }
 0x47b   :  { %v1067_v40 = vpop.f32.mrf.mxu2 }
 0x4d7   :  { %v1041_v63 = vpop.f32.mrf.mxu1 }
 0x4d8   :  { %v1042_v44 = vadd.f32 %v1794_v62, %v1041_v63 }
 0x4da   :  { %v1061_v51 = vadd.f32 %v1060_v9, %v1042_v44 }
 0x4dc   :  { %1820 = vtanh.f32 %v1061_v51 }
 0x4df   :  { %v1043_v1 = vpop.f32.mrf.mxu1 }
 0x4e0   :  { %v1044_v2 = vadd.f32 %v1794_v62, %v1043_v1 }
 0x4e2   :  { %v1063_v3 = vadd.f32 %v1062_v0, %v1044_v2  ;;  %v1821_v4 = vpop.eup %1820 }
 0x4e3   :  { %v1078_v5 = vrot.slane %v1821_v4, 6 }
 0x4e4   :  { %1822 = vtanh.f32 %v1063_v3 }
 0x4e5   :  { %v2417_v17 = vsel %vm110_vm2, 0.0, %v1078_v5 }
 0x4e6   :  { %v1164_v22 = vrot.slane %v2417_v17, 4  ;;  %v1120_v26 = vrot.slane %v2417_v17, 2  ;;  %v1098_v33 = vrot.slane %v2417_v17, 1 }
 0x4e7   :  { %v1046_v7 = vpop.f32.mrf.mxu1 }
 0x4e8   :  { %v1047_v11 = vadd.f32 %v1794_v62, %v1046_v7 }
 0x4ea   :  { %v1823_v15 = vpop.eup %1822  ;;  %v1066_v19 = vadd.f32 %v1065_v6, %v1047_v11 }
 0x4eb   :  { %v1079_v21 = vrot.slane %v1823_v15, 6 }
 0x4ec   :  { %1824 = vtanh.f32 %v1066_v19  ;;  %v1142_v19 = vrot.slane %v2417_v17, 3 }
 0x4ed   :  { %v2421_v24 = vsel %vm110_vm2, %v1078_v5, %v1079_v21  ;;  %v2424_v25 = vsel %vm110_vm2, %v1079_v21, 0.0 }
 0x4ee   :  { %v1165_v27 = vrot.slane %v2421_v24, 4  ;;  %v1167_v28 = vrot.slane %v2424_v25, 4  ;;  %v1121_v30 = vrot.slane %v2421_v24, 2  ;;  %v1123_v31 = vrot.slane %v2424_v25, 2 }
 0x4ef   :  { %v1048_v32 = vpop.f32.mrf.mxu1  ;;  %v1099_v34 = vrot.slane %v2421_v24, 1  ;;  %v1101_v35 = vrot.slane %v2424_v25, 1  ;;  %v1143_v55 = vrot.slane %v2421_v24, 3  ;;  %v1145_v11 = vrot.slane %v2424_v25, 3  ;;  %v1610_v25 = vld [vmem:[%s2550_s11 + $0x38] sm:$0xff] }
 0x4f0   :  { %v1049_v36 = vadd.f32 %v1794_v62, %v1048_v32  ;;  %v1166_v37 = vsel %vm200_vm5, %v1164_v22, %v1165_v27  ;;  %v1168_v38 = vsel %vm200_vm5, %v1165_v27, %v1167_v28  ;;  %v1122_v39 = vsel %vm154_vm6, %v1120_v26, %v1121_v30  ;;  %1613 = vmatpush.bf16.msra.mxu1 %v1610_v25  ;;  %v1609_v27 = vld [vmem:[%s2550_s11 + $0x30] sm:$0xff]  ;;  %v1608_v28 = vld [vmem:[%s2550_s11 + $0x28] sm:$0xff] }
 0x4f1   :  { %v1191_v41 = vpack.c.bf16 %v1168_v38, %v1166_v37  ;;  %v1124_v42 = vsel %vm154_vm6, %v1121_v30, %v1123_v31  ;;  %v1100_v16 = vsel %vm131_vm4, %v1098_v33, %v1099_v34  ;;  %v1102_v14 = vsel %vm131_vm4, %v1099_v34, %v1101_v35  ;;  %1284 = vmatpush.bf16.msra.mxu0 %v1610_v25  ;;  %v1607_v30 = vld [vmem:[%s2550_s11 + $0x20] sm:$0xff]  ;;  %v1606_v31 = vld [vmem:[%s2550_s11 + $0x18] sm:$0xff]  ;;  %v1605_v32 = vld [vmem:[%s2550_s11 + $0x10] sm:$0xff] }
 0x4f2   :  { %v1825_v43 = vpop.eup %1824  ;;  %v1068_v46 = vadd.f32 %v1067_v40, %v1049_v36  ;;  %v1765_v47 = vpack.i.bf16 %v1124_v42, %v1122_v39  ;;  %v1760_v18 = vpack.i.bf16 %v1102_v14, %v1100_v16  ;;  %v1144_v21 = vsel %vm177_vm3, %v1142_v19, %v1143_v55  ;;  %v1604_v33 = vld [vmem:[%s2550_s11 + $0x8] sm:$0xff]  ;;  %v1603_v34 = vld [vmem:[%s2550_s11] sm:$0xff] }
 0x4f3   :  { %1564 = vmatmul.msk.bf16.vlgmr.msra.gmra.mxu3 %vm75_vm0, %v1191_v41  ;;  %v1081_v48 = vrot.slane %v1825_v43, 6  ;;  %v1146_v22 = vsel %vm177_vm3, %v1143_v55, %v1145_v11 }
 0x4f4   :  { %1826 = vtanh.f32 %v1068_v46  ;;  %1766 = vrot.lane.b32.xlu1 %v1765_v47, %s1882_s26  ;;  %1761 = vrot.lane.b32.xlu2 %v1760_v18, %s1883_s27  ;;  %v1780_v26 = vpack.i.bf16 %v1146_v22, %v1144_v21 }
 0x4f5   :  { %v2444_v50 = vsel %vm110_vm2, 0.0, %v1081_v48  ;;  %1614 = vmatpush.bf16.msra.mxu1 %v1609_v27  ;;  %1285 = vmatpush.bf16.msra.mxu0 %v1609_v27 }
 0x4f6   :  { %v1103_v54 = vrot.slane %v2444_v50, 1  ;;  %v1169_v23 = vrot.slane %v2444_v50, 4  ;;  %v1147_v58 = vrot.slane %v2444_v50, 3  ;;  %v1125_v59 = vrot.slane %v2444_v50, 2 }
 0x4f9   :  { %1615 = vmatpush.bf16.msra.mxu1 %v1608_v28  ;;  %1286 = vmatpush.bf16.msra.mxu0 %v1608_v28 }
 0x4fa   :  { %v1827_v20 = vpop.eup %1826 }
 0x4fb   :  { %v1082_v53 = vrot.slane %v1827_v20, 6 }
 0x4fd   :  { %v2450_v56 = vsel %vm110_vm2, %v1081_v48, %v1082_v53  ;;  %v1093_v12 = vsel %vm110_vm2, %v1082_v53, 0.0  ;;  %1616 = vmatpush.bf16.msra.mxu1 %v1607_v30  ;;  %1287 = vmatpush.bf16.msra.mxu0 %v1607_v30 }
 0x4fe   :  { %v1104_v49 = vrot.slane %v2450_v56, 1  ;;  %v1106_v60 = vrot.slane %v1093_v12, 1  ;;  %v1170_v57 = vrot.slane %v2450_v56, 4  ;;  %v1172_v8 = vrot.slane %v1093_v12, 4 }
 0x4ff   :  { %v1148_v61 = vrot.slane %v2450_v56, 3  ;;  %v1150_v52 = vrot.slane %v1093_v12, 3  ;;  %v1126_v9 = vrot.slane %v2450_v56, 2  ;;  %v1128_v62 = vrot.slane %v1093_v12, 2 }
 0x500   :  { %v1105_v63 = vsel %vm131_vm4, %v1103_v54, %v1104_v49  ;;  %v1107_v44 = vsel %vm131_vm4, %v1104_v49, %v1106_v60  ;;  %v1171_v51 = vsel %vm200_vm5, %v1169_v23, %v1170_v57  ;;  %v1173_v0 = vsel %vm200_vm5, %v1170_v57, %v1172_v8 }
 0x501   :  { %v1770_v1 = vpack.i.bf16 %v1107_v44, %v1105_v63  ;;  %v1193_v2 = vpack.c.bf16 %v1173_v0, %v1171_v51  ;;  %v1149_v3 = vsel %vm177_vm3, %v1147_v58, %v1148_v61  ;;  %v1151_v4 = vsel %vm177_vm3, %v1148_v61, %v1150_v52  ;;  %1617 = vmatpush.bf16.msra.mxu1 %v1606_v31 }
 0x502   :  { %v1785_v5 = vpack.i.bf16 %v1151_v4, %v1149_v3  ;;  %v1127_v6 = vsel %vm154_vm6, %v1125_v59, %v1126_v9  ;;  %v1129_v7 = vsel %vm154_vm6, %v1126_v9, %v1128_v62  ;;  %1288 = vmatpush.bf16.msra.mxu0 %v1606_v31  ;;  %v1795_v62 = vld [vmem:[%s2551_s12] ss:$0 sm:$0xff]  ;;  %s1888_s12 = smov [#allocation4]  }
 0x503   :  { %1771 = vrot.lane.b32.xlu0 %v1770_v1, %s1883_s27  ;;  %1565 = vmatmul.msk.bf16.gmra.mxu3 %vm75_vm0, %v1193_v2  ;;  %v1775_v15 = vpack.i.bf16 %v1129_v7, %v1127_v6  ;;  %s1347_s13 = sshll.u32 %s1888_s12, 4  ;;  %s1348_s13 = int_to_ptr.vmem [resolvable:$true] %s1347_s13 }
 0x504   :  { %1786 = vrot.lane.b32.xlu1 %v1785_v5, %s1884_s4 }
 0x505   :  { %1776 = vrot.lane.b32.xlu2 %v1775_v15, %s1882_s26  ;;  %1618 = vmatpush.bf16.msra.mxu1 %v1605_v32 }
 0x506   :  { %1289 = vmatpush.bf16.msra.mxu0 %v1605_v32 }
 0x509   :  { %1619 = vmatpush.bf16.msra.mxu1 %v1604_v33 }
 0x50a   :  { %1290 = vmatpush.bf16.msra.mxu0 %v1604_v33 }
 0x50b   :  { %1781 = vrot.lane.b32.xlu0 %v1780_v26, %s1884_s4 }
 0x50d   :  { %1620 = vmatpush.bf16.msra.mxu1 %v1603_v34 }
 0x50e   :  { %1291 = vmatpush.bf16.msra.mxu0 %v1603_v34 }
 0x54e   :  { %v1762_v35 = vpop.permute.xlu2 %1761 }
 0x54f   :  { %v1764_v20 = vunpack.i.h.bf16 %v1762_v35  ;;  %v1763_v53 = vunpack.i.l.bf16 %v1762_v35 }
 0x55f   :  { %v1777_v37 = vpop.permute.xlu2 %1776 }
 0x560   :  { %v1779_v42 = vunpack.i.h.bf16 %v1777_v37  ;;  %v1778_v16 = vunpack.i.l.bf16 %v1777_v37 }
 0x566   :  { %v1767_v36 = vpop.permute.xlu1 %1766 }
 0x567   :  { %v1769_v55 = vunpack.i.h.bf16 %v1767_v36  ;;  %v1768_v12 = vunpack.i.l.bf16 %v1767_v36 }
 0x575   :  { %v1772_v38 = vpop.permute.xlu0 %1771 }
 0x576   :  { %v1774_v39 = vunpack.i.h.bf16 %v1772_v38  ;;  %v1773_v40 = vunpack.i.l.bf16 %v1772_v38  ;;  %v1787_v41 = vpop.permute.xlu1 %1786 }
 0x577   :  { %v1789_v46 = vunpack.i.h.bf16 %v1787_v41  ;;  %v1788_v47 = vunpack.i.l.bf16 %v1787_v41 }
 0x578   :  { %v1181_v14 = vsel %vm75_vm0, %v2450_v56, %v1774_v39  ;;  %v1180_v43 = vsel %vm75_vm0, %v2444_v50, %v1773_v40  ;;  %v1179_v50 = vsel %vm75_vm0, %v2421_v24, %v1764_v20  ;;  %v1178_v56 = vsel %vm75_vm0, %v2417_v17, %v1763_v53  ;;  %v1312_v17 = vpop.f32.mrf.mxu3 }
 0x579   :  { %v1184_v18 = vsel %vm236_vm8, %v1180_v43, %v1778_v16  ;;  %v1185_v48 = vsel %vm236_vm8, %v1181_v14, %v1779_v42  ;;  %v1182_v57 = vsel %vm236_vm8, %v1178_v56, %v1768_v12  ;;  %v1183_v8 = vsel %vm236_vm8, %v1179_v50, %v1769_v55 }
 0x57a   :  { %v1188_v54 = vsel %vm429_vm10, %v1184_v18, %v1788_v47  ;;  %v1189_v23 = vsel %vm429_vm10, %v1185_v48, %v1789_v46 }
 0x57b   :  { %v1192_v58 = vpack.c.bf16 %v1189_v23, %v1188_v54 }
 0x57d   :  { %v1782_v59 = vpop.permute.xlu0 %1781  ;;  %1297 = vmatmul.bf16.vlgmr.msra.gmra.mxu1 %v1192_v58 }
 0x57e   :  { %v1784_v49 = vunpack.i.h.bf16 %v1782_v59  ;;  %v1783_v60 = vunpack.i.l.bf16 %v1782_v59 }
 0x580   :  { %v1186_v61 = vsel %vm429_vm10, %v1182_v57, %v1783_v60  ;;  %v1187_v52 = vsel %vm429_vm10, %v1183_v8, %v1784_v49  ;;  %v1314_v24 = vpop.f32.mrf.mxu3 }
 0x581   :  { %v1190_v9 = vpack.c.bf16 %v1187_v52, %v1186_v61 }
 0x583   :  { %1292 = vmatmul.bf16.vlgmr.msra.gmra.mxu0 %v1190_v9 }
 0x588   :  { %v1317_v63 = vpop.f32.mrf.mxu3 }
 0x590   :  { %v1319_v7 = vpop.f32.mrf.mxu3 }
 0x5fa   :  { %v1298_v44 = vpop.f32.mrf.mxu1 }
 0x5fb   :  { %v1299_v51 = vadd.f32 %v1795_v62, %v1298_v44 }
 0x5fd   :  { %v1318_v0 = vadd.f32 %v1317_v63, %v1299_v51 }
 0x5ff   :  { %v1324_v1 = vadd.f32 %v1318_v0, %v2012_v29 }
 0x600   :  { %v1293_v2 = vpop.f32.mrf.mxu0 }
 0x601   :  { %1328 = vst.msk [vmem:[#allocation4 + $0x10] sm:$0xff] %vm101_vm1, %v1324_v1  ;;  %v1294_v3 = vadd.f32 %v1795_v62, %v1293_v2 }
 0x602   :  { %v1300_v4 = vpop.f32.mrf.mxu1 }
 0x603   :  { %v1313_v5 = vadd.f32 %v1312_v17, %v1294_v3  ;;  %v1301_v6 = vadd.f32 %v1795_v62, %v1300_v4 }
 0x605   :  { %v1322_v11 = vadd.f32 %v1313_v5, %v1987_v10  ;;  %v1320_v15 = vadd.f32 %v1319_v7, %v1301_v6 }
 0x607   :  { %1326 = vst.msk [vmem:[#allocation4] sm:$0xff] %vm101_vm1, %v1322_v11  ;;  %v1325_v19 = vadd.f32 %v1320_v15, %v2030_v45 }
 0x608   :  { %v1295_v21 = vpop.f32.mrf.mxu0 }
 0x609   :  { %1329 = vst.msk [vmem:[#allocation4 + $0x18] sm:$0xff] %vm101_vm1, %v1325_v19  ;;  %v1296_v22 = vadd.f32 %v1795_v62, %v1295_v21 }
 0x60b   :  { %v1315_v29 = vadd.f32 %v1314_v24, %v1296_v22 }
 0x60d   :  { %v1323_v26 = vadd.f32 %v1315_v29, %v1992_v13 }
 0x60f   :  { %1327 = vst.msk [vmem:[#allocation4 + $0x8] sm:$0xff] %vm101_vm1, %v1323_v26 }
 0x610   :  { %1355 = dma.vmem_to_hbm [thread:$0]  %s1348_s13, 512, %s1350_s28, [#allocation5], %s1886_s24, %s1886_s24, %s1887_s9  }
 0x611   :  { %1876 = dma.done.wait [#allocation3], 512  }
 0x612   :  { %1877 = vsyncadd [#allocation3], 4294966784 }
 0x613   :  { %1878 = dma.done.wait [#allocation5], 512  }
 0x614   :  { %1879 = vsyncadd [#allocation5], 4294966784 }
 0x615   :  { %1364 = vsyncpa [#allocation3], 1 }
 0x616   :  { %1365 = vsyncpa [#allocation5], 1 }

// kernel: fastspeech2_forward.9
= control target key start
LH: loop header
LB: loop body
LE: loop exit
PB: predicated region body
PF: predicated region fallthrough
CT: control target
= control target key end

     0   :  { %s1453_s0 = inlined_call_operand.vmem [shape: s32[2], index: 0, kind: input, shape index: {}]   ;;  %s1454_s1 = inlined_call_operand.vmem [shape: f32[2,8,32], index: 1, kind: input, shape index: {}]   ;;  %s1455_s2 = inlined_call_operand.vmem [shape: bf16[96,32], index: 2, kind: input, shape index: {}]   ;;  %s1456_s3 = inlined_call_operand.vmem [shape: f32[1,32], index: 3, kind: input, shape index: {}]   ;;  %s1457_s4 = inlined_call_operand.vmem [shape: f32[1,32], index: 4, kind: input, shape index: {}]   ;;  %s1458_s5 = inlined_call_operand.vmem [shape: f32[1,32], index: 5, kind: input, shape index: {}]   ;;  %s1459_s6 = inlined_call_operand.vmem [shape: bf16[96,32], index: 6, kind: input, shape index: {}]   ;;  %s1460_s7 = inlined_call_operand.vmem [shape: f32[1,32], index: 7, kind: input, shape index: {}]   ;;  %s1461_s8 = inlined_call_operand.vmem [shape: f32[1,32], index: 8, kind: input, shape index: {}]   ;;  %s1462_s9 = inlined_call_operand.vmem [shape: f32[1,32], index: 9, kind: input, shape index: {}]   ;;  %s1463_s10 = inlined_call_operand.vmem [shape: f32[1,32], index: 10, kind: input, shape index: {}]   ;;  %s1464_s11 = inlined_call_operand.<no memory space> [shape: f32[1,1], index: 11, kind: input, shape index: {}]   ;;  %s1465_s12 = inlined_call_operand.vmem [shape: bf16[96,32], index: 12, kind: input, shape index: {}]   ;;  %s1466_s13 = inlined_call_operand.vmem [shape: f32[1,32], index: 13, kind: input, shape index: {}]   ;;  %s1467_s14 = inlined_call_operand.vmem [shape: f32[1,32], index: 14, kind: input, shape index: {}]   ;;  %s1468_s15 = inlined_call_operand.vmem [shape: f32[1,32], index: 15, kind: input, shape index: {}]   ;;  %s1469_s16 = inlined_call_operand.vmem [shape: bf16[96,32], index: 16, kind: input, shape index: {}]   ;;  %s1470_s17 = inlined_call_operand.vmem [shape: f32[1,32], index: 17, kind: input, shape index: {}]   ;;  %s1471_s18 = inlined_call_operand.vmem [shape: f32[1,32], index: 18, kind: input, shape index: {}]   ;;  %s1472_s19 = inlined_call_operand.vmem [shape: f32[1,32], index: 19, kind: input, shape index: {}]   ;;  %s1473_s20 = inlined_call_operand.vmem [shape: f32[1,32], index: 20, kind: input, shape index: {}]   ;;  %s1474_s22 = inlined_call_operand.vmem [shape: f32[2,8,2], index: 22, kind: output, shape index: {}]   ;;  %s1475_s21 = inlined_call_operand.<no memory space> [shape: f32[1,1], index: 21, kind: input, shape index: {}]  }
   0x1   :  { %1479 = sst [smem:[#allocation7_spill]] %s1453_s0  ;;  %v27_v0 = vstv %s1464_s11  ;;  %v29_v1 = vstv %s1475_s21 }
   0x2   :  { %1480 = sst [smem:[#allocation8_spill]] %s1454_s1  ;;  %28 = vst [vmem:[#allocation2] sm:$0x1] %v27_v0 }
   0x3   :  { %1481 = sst [smem:[#allocation9_spill]] %s1455_s2  ;;  %30 = vst [vmem:[#allocation3] sm:$0x1] %v29_v1 }
   0x4   :  { %1482 = sst [smem:[#allocation10_spill]] %s1456_s3 }
   0x5   :  { %1483 = sst [smem:[#allocation11_spill]] %s1457_s4 }
   0x6   :  { %1484 = sst [smem:[#allocation12_spill]] %s1458_s5 }
   0x7   :  { %1485 = sst [smem:[#allocation13_spill]] %s1459_s6 }
   0x8   :  { %31 = vsyncpa [#allocation5], 0  ;;  %s1486_s23 = sld [smem:[#allocation7_spill]]  ;;  %s1044_s5 = smov [#allocation4]  }
   0xe   :  { %s37_s1 = sshll.u32 %s1486_s23, 4  ;;  %s38_s1 = int_to_ptr.vmem [resolvable:$true] %s37_s1 }
   0xf   :  { %40 = dma.vmem_to_smem %s38_s1, 16, %s1044_s5, [#allocation5]  }
  0x10   :  { %1042 = dma.done.wait [#allocation5], 16  }
  0x11   :  { %1043 = vsyncadd [#allocation5], 4294967280 }
  0x12   :  { %87 = sfence }
  0x13   :  { %s1487_s11 = sld [smem:[#allocation8_spill]]  ;;  %vm109_vm0 = vcmask 1040384   ;;  %v953_v7 = vld [vmem:[%s1465_s12 + $0x28] sm:$0xff]  ;;  %vm118_vm1 = vcmask 1046528   ;;  %vm131_vm2 = vcmask 1045504   ;;  %v952_v9 = vld [vmem:[%s1465_s12 + $0x20] sm:$0xff] }
  0x14   :  { %s1488_s27 = sld [smem:[#allocation9_spill]]  ;;  %542 = vmatpush.bf16.msra.mxu2 %v953_v7  ;;  %v951_v23 = vld [vmem:[%s1465_s12 + $0x18] sm:$0xff]  ;;  %s1045_s6 = smov 32   ;;  %v950_v31 = vld [vmem:[%s1465_s12 + $0x10] sm:$0xff]  ;;  %v949_v33 = vld [vmem:[%s1465_s12 + $0x8] sm:$0xff]  ;;  %vm144_vm3 = vcmask 261120  }
  0x15   :  { %v948_v35 = vld [vmem:[%s1465_s12] sm:$0xff]  ;;  %vm147_vm4 = vcmask 523264   ;;  %vm203_vm5 = vcmask 785408   ;;  %s1489_s5 = sld [smem:[#allocation10_spill]] }
  0x16   :  { %v997_v51 = vld [vmem:[%s1466_s13] ss:$0 sm:$0xff]  ;;  %s1490_s3 = sld [smem:[#allocation11_spill]] }
  0x17   :  { %s1491_s30 = sld [smem:[#allocation12_spill]] }
  0x18   :  { %543 = vmatpush.bf16.msra.mxu2 %v952_v9  ;;  %v1047_v9 = vmov 32.0   ;;  %s1492_s23 = sld [smem:[#allocation13_spill]] }
  0x19   :  { %v101_v2 = vld [vmem:[%s1487_s11] sm:$0xff]  ;;  %v102_v3 = vld [vmem:[%s1487_s11 + $0x8] sm:$0xff]  ;;  %s1046_s11 = smov 64   ;;  %1012 = vrcp.f32 %v1047_v9 }
  0x1a   :  { %v105_v4 = vrot.slane %v101_v2, 7  ;;  %v106_v5 = vrot.slane %v102_v3, 7  ;;  %v941_v6 = vld [vmem:[%s1488_s27 + $0x28] sm:$0xff]  ;;  %v940_v8 = vld [vmem:[%s1488_s27 + $0x20] sm:$0xff]  ;;  %v939_v22 = vld [vmem:[%s1488_s27 + $0x18] sm:$0xff] }
  0x1b   :  { %209 = vmatpush.bf16.msra.mxu0 %v941_v6  ;;  %v938_v30 = vld [vmem:[%s1488_s27 + $0x10] sm:$0xff]  ;;  %v937_v32 = vld [vmem:[%s1488_s27 + $0x8] sm:$0xff]  ;;  %v936_v34 = vld [vmem:[%s1488_s27] sm:$0xff] }
  0x1c   :  { %v110_v10 = vsel %vm109_vm0, 0.0, %v105_v4  ;;  %v111_v11 = vsel %vm109_vm0, 0.0, %v106_v5  ;;  %v112_v12 = vsel %vm109_vm0, %v105_v4, 0.0  ;;  %v113_v13 = vsel %vm109_vm0, %v106_v5, 0.0  ;;  %544 = vmatpush.bf16.msra.mxu2 %v951_v23  ;;  %v996_v47 = vld [vmem:[%s1489_s5] ss:$0 sm:$0xff] }
  0x1d   :  { %v119_v14 = vrot.slane %v110_v10, 1  ;;  %v120_v15 = vrot.slane %v112_v12, 1  ;;  %v122_v16 = vrot.slane %v111_v11, 1  ;;  %v123_v17 = vrot.slane %v113_v13, 1 }
  0x1e   :  { %v133_v18 = vrot.slane %v112_v12, 2  ;;  %v136_v19 = vrot.slane %v113_v13, 2  ;;  %v132_v20 = vrot.slane %v110_v10, 2  ;;  %v135_v21 = vrot.slane %v111_v11, 2 }
  0x1f   :  { %v121_v24 = vsel %vm118_vm1, %v119_v14, %v120_v15  ;;  %v124_v25 = vsel %vm118_vm1, %v122_v16, %v123_v17  ;;  %210 = vmatpush.bf16.msra.mxu0 %v940_v8 }
  0x20   :  { %v966_v26 = vpack.i.bf16 %v124_v25, %v121_v24  ;;  %v134_v27 = vsel %vm131_vm2, %v132_v20, %v133_v18  ;;  %v137_v28 = vsel %vm131_vm2, %v135_v21, %v136_v19  ;;  %545 = vmatpush.bf16.msra.mxu2 %v950_v31 }
  0x21   :  { %v971_v29 = vpack.i.bf16 %v137_v28, %v134_v27 }
  0x22   :  { %967 = vrot.lane.b32.xlu0 %v966_v26, %s1045_s6 }
  0x23   :  { %211 = vmatpush.bf16.msra.mxu0 %v939_v22 }
  0x24   :  { %546 = vmatpush.bf16.msra.mxu2 %v949_v33 }
  0x27   :  { %212 = vmatpush.bf16.msra.mxu0 %v938_v30 }
  0x28   :  { %547 = vmatpush.bf16.msra.mxu2 %v948_v35 }
  0x2a   :  { %972 = vrot.lane.b32.xlu0 %v971_v29, %s1046_s11 }
  0x2b   :  { %213 = vmatpush.bf16.msra.mxu0 %v937_v32 }
  0x2f   :  { %214 = vmatpush.bf16.msra.mxu0 %v936_v34 }
  0x94   :  { %v968_v36 = vpop.permute.xlu0 %967 }
  0x95   :  { %v970_v37 = vunpack.i.h.bf16 %v968_v36  ;;  %v969_v38 = vunpack.i.l.bf16 %v968_v36 }
  0x97   :  { %v146_v42 = vsel %vm144_vm3, %v111_v11, %v970_v37  ;;  %v145_v43 = vsel %vm144_vm3, %v110_v10, %v969_v38  ;;  %v1013_v10 = vpop.eup %1012 }
  0x98   :  { %v232_v11 = vmul.f32 32.0, %v1013_v10  ;;  %vm236_vm6 = vweird.f32 %v1013_v10 }
  0x9a   :  { %v233_v12 = vsub.f32 1.0, %v232_v11 }
  0x9c   :  { %v973_v39 = vpop.permute.xlu0 %972  ;;  %v234_v13 = vmul.f32 %v1013_v10, %v233_v12 }
  0x9d   :  { %v975_v40 = vunpack.i.h.bf16 %v973_v39  ;;  %v974_v41 = vunpack.i.l.bf16 %v973_v39 }
  0x9e   :  { %v235_v14 = vadd.f32 %v1013_v10, %v234_v13 }
  0x9f   :  { %v148_v44 = vsel %vm147_vm4, %v145_v43, %v974_v41  ;;  %v149_v45 = vsel %vm147_vm4, %v146_v42, %v975_v40 }
  0xa0   :  { %v150_v46 = vpack.c.bf16 %v149_v45, %v148_v44  ;;  %v1266_v15 = vsel %vm236_vm6, %v1013_v10, %v235_v14 }
  0xa2   :  { %860 = vmatmul.msk.bf16.vlgmr.msra.gmra.mxu0 %vm203_vm5, %v150_v46  ;;  %910 = vmatmul.msk.bf16.vlgmr.msra.gmra.mxu2 %vm203_vm5, %v150_v46 }
 0x11f   :  { %v216_v48 = vpop.f32.mrf.mxu0 }
 0x120   :  { %v217_v49 = vadd.f32 %v996_v47, %v216_v48 }
 0x122   :  { %v1235_v50 = vmax.f32 %v217_v49, 0.0 }
 0x124   :  { %v225_v52 = vsel %vm144_vm3, %v1235_v50, 0.0  ;;  %v240_v4 = vmul.f32 %v1235_v50, %v1235_v50 }
 0x125   :  { %v549_v53 = vpop.f32.mrf.mxu2  ;;  %226 = vadd.xlane.f32.xlu0 %v225_v52 }
 0x126   :  { %v550_v54 = vadd.f32 %v997_v51, %v549_v53  ;;  %v242_v6 = vsel %vm144_vm3, %v240_v4, 0.0 }
 0x127   :  { %v218_v61 = vpop.f32.mrf.mxu0 }
 0x128   :  { %v1242_v55 = vmax.f32 %v550_v54, 0.0  ;;  %v219_v63 = vadd.f32 %v996_v47, %v218_v61  ;;  %v998_v54 = vld [vmem:[%s1467_s14] ss:$0 sm:$0xff] }
 0x129   :  { %v1000_v61 = vld [vmem:[%s1468_s15] ss:$0 sm:$0xff] }
 0x12a   :  { %v558_v56 = vsel %vm144_vm3, %v1242_v55, 0.0  ;;  %v566_v57 = vmul.f32 %v1242_v55, %v1242_v55  ;;  %v1256_v3 = vmax.f32 %v219_v63, 0.0 }
 0x12b   :  { %559 = vadd.xlane.f32.xlu1 %v558_v56 }
 0x12c   :  { %v568_v58 = vsel %vm144_vm3, %v566_v57, 0.0  ;;  %v228_v5 = vsel %vm144_vm3, %v1256_v3, 0.0  ;;  %v241_v7 = vmul.f32 %v1256_v3, %v1256_v3 }
 0x12d   :  { %v551_v59 = vpop.f32.mrf.mxu2  ;;  %569 = vadd.xlane.f32.xlu2 %v568_v58 }
 0x12e   :  { %v552_v60 = vadd.f32 %v997_v51, %v551_v59  ;;  %v245_v8 = vsel %vm144_vm3, %v241_v7, 0.0 }
 0x130   :  { %v1249_v62 = vmax.f32 %v552_v60, 0.0 }
 0x132   :  { %v561_v0 = vsel %vm144_vm3, %v1249_v62, 0.0  ;;  %v567_v1 = vmul.f32 %v1249_v62, %v1249_v62 }
 0x133   :  { %562 = vadd.xlane.f32.xlu1 %v561_v0 }
 0x134   :  { %v571_v2 = vsel %vm144_vm3, %v567_v1, 0.0 }
 0x135   :  { %572 = vadd.xlane.f32.xlu2 %v571_v2 }
 0x13b   :  { %229 = vadd.xlane.f32.xlu1 %v228_v5 }
 0x13d   :  { %243 = vadd.xlane.f32.xlu2 %v242_v6 }
 0x143   :  { %246 = vadd.xlane.f32.xlu1 %v245_v8 }
 0x198   :  { %v227_v28 = vpop.xlane.xlu0 %226 }
 0x199   :  { %v1273_v31 = vmul.f32 %v1266_v15, %v227_v28 }
 0x19b   :  { %v250_v38 = vmul.f32 %v1273_v31, %v1273_v31 }
 0x19e   :  { %v560_v16 = vpop.xlane.xlu1 %559 }
 0x19f   :  { %v564_v17 = vmul.f32 %v560_v16, %v1266_v15 }
 0x1a0   :  { %v570_v18 = vpop.xlane.xlu2 %569 }
 0x1a1   :  { %v576_v19 = vmul.f32 %v564_v17, %v564_v17  ;;  %v574_v20 = vmul.f32 %v570_v18, %v1266_v15  ;;  %v582_v53 = vsub.f32 %v1242_v55, %v564_v17 }
 0x1a3   :  { %v578_v21 = vsub.f32 %v574_v20, %v576_v19 }
 0x1a5   :  { %v580_v22 = vmax.f32 %v578_v21, 0.0 }
 0x1a6   :  { %v563_v23 = vpop.xlane.xlu1 %562 }
 0x1a7   :  { %v584_v24 = vadd.f32 1e-05, %v580_v22  ;;  %v565_v25 = vmul.f32 %v563_v23, %v1266_v15  ;;  %v999_v23 = vld [vmem:[%s1490_s3] ss:$0 sm:$0xff] }
 0x1a8   :  { %v573_v26 = vpop.xlane.xlu2 %572 }
 0x1a9   :  { %1014 = vrsqrt.f32 %v584_v24  ;;  %v577_v27 = vmul.f32 %v565_v25, %v565_v25  ;;  %v575_v29 = vmul.f32 %v573_v26, %v1266_v15  ;;  %vm592_vm8 = vweird.f32 %v584_v24 }
 0x1aa   :  { %v583_v8 = vsub.f32 %v1249_v62, %v565_v25  ;;  %v256_v62 = vsub.f32 %v1235_v50, %v1273_v31 }
 0x1ab   :  { %v579_v30 = vsub.f32 %v575_v29, %v577_v27 }
 0x1ad   :  { %v581_v32 = vmax.f32 %v579_v30, 0.0 }
 0x1ae   :  { %v230_v33 = vpop.xlane.xlu1 %229 }
 0x1af   :  { %v1015_v34 = vpop.eup %1014  ;;  %v585_v36 = vadd.f32 1e-05, %v581_v32  ;;  %v1279_v43 = vmul.f32 %v1266_v15, %v230_v33  ;;  %v1001_v33 = vld [vmem:[%s1491_s30] ss:$0 sm:$0xff] }
 0x1b0   :  { %v587_v35 = vmul.f32 %v1015_v34, %v584_v24  ;;  %v244_v37 = vpop.xlane.xlu2 %243  ;;  %vm593_vm7 = vweird.f32 %v1015_v34 }
 0x1b1   :  { %v248_v39 = vmul.f32 %v244_v37, %v1266_v15  ;;  %1016 = vrsqrt.f32 %v585_v36  ;;  %v251_v52 = vmul.f32 %v1279_v43, %v1279_v43  ;;  %vm594_vm9 = vmor %vm592_vm8, %vm593_vm7  ;;  %vm602_vm11 = vweird.f32 %v585_v36 }
 0x1b2   :  { %v588_v40 = vmul.f32 %v1015_v34, %v587_v35 }
 0x1b3   :  { %v252_v41 = vsub.f32 %v248_v39, %v250_v38 }
 0x1b4   :  { %v589_v42 = vmul.f32 0.5, %v588_v40 }
 0x1b5   :  { %v254_v44 = vmax.f32 %v252_v41, 0.0 }
 0x1b6   :  { %v590_v45 = vsub.f32 1.5, %v589_v42  ;;  %v247_v46 = vpop.xlane.xlu1 %246 }
 0x1b7   :  { %v258_v47 = vadd.f32 1e-05, %v254_v44  ;;  %v249_v48 = vmul.f32 %v247_v46, %v1266_v15  ;;  %v1017_v49 = vpop.eup %1016  ;;  %v257_v46 = vsub.f32 %v1256_v3, %v1279_v43 }
 0x1b8   :  { %v591_v51 = vmul.f32 %v1015_v34, %v590_v45  ;;  %v597_v56 = vmul.f32 %v1017_v49, %v585_v36  ;;  %vm603_vm10 = vweird.f32 %v1017_v49 }
 0x1b9   :  { %1018 = vrsqrt.f32 %v258_v47  ;;  %v253_v58 = vsub.f32 %v249_v48, %v251_v52  ;;  %vm604_vm12 = vmor %vm602_vm11, %vm603_vm10  ;;  %vm266_vm14 = vweird.f32 %v258_v47 }
 0x1ba   :  { %v595_v57 = vsel %vm594_vm9, %v1015_v34, %v591_v51  ;;  %v598_v60 = vmul.f32 %v1017_v49, %v597_v56 }
 0x1bb   :  { %v606_v59 = vmul.f32 %v595_v57, %v582_v53  ;;  %v255_v63 = vmax.f32 %v253_v58, 0.0 }
 0x1bc   :  { %v599_v1 = vmul.f32 0.5, %v598_v60 }
 0x1bd   :  { %v611_v0 = vmul.f32 %v998_v54, %v606_v59  ;;  %v259_v2 = vadd.f32 1e-05, %v255_v63 }
 0x1be   :  { %v600_v4 = vsub.f32 1.5, %v599_v1 }
 0x1bf   :  { %v1019_v55 = vpop.eup %1018  ;;  %v616_v5 = vadd.f32 %v1000_v61, %v611_v0  ;;  %1020 = vrsqrt.f32 %v259_v2  ;;  %vm276_vm7 = vweird.f32 %v259_v2 }
 0x1c0   :  { %v261_v6 = vmul.f32 %v1019_v55, %v258_v47  ;;  %v601_v7 = vmul.f32 %v1017_v49, %v600_v4  ;;  %vm267_vm13 = vweird.f32 %v1019_v55 }
 0x1c1   :  { %v620_v11 = vrot.slane %v616_v5, 7  ;;  %vm268_vm15 = vmor %vm266_vm14, %vm267_vm13 }
 0x1c2   :  { %v262_v9 = vmul.f32 %v1019_v55, %v261_v6  ;;  %v605_v10 = vsel %vm604_vm12, %v1017_v49, %v601_v7 }
 0x1c3   :  { %v607_v12 = vmul.f32 %v605_v10, %v583_v8  ;;  %v1293_v19 = vsel %vm109_vm0, 0.0, %v620_v11  ;;  %v626_v22 = vsel %vm109_vm0, %v620_v11, 0.0 }
 0x1c4   :  { %v263_v13 = vmul.f32 0.5, %v262_v9  ;;  %v644_v27 = vrot.slane %v1293_v19, 2  ;;  %v645_v30 = vrot.slane %v626_v22, 2  ;;  %v632_v32 = vrot.slane %v1293_v19, 1 }
 0x1c5   :  { %v1021_v14 = vpop.eup %1020  ;;  %v612_v16 = vmul.f32 %v998_v54, %v607_v12  ;;  %v633_v34 = vrot.slane %v626_v22, 1  ;;  %v947_v12 = vld [vmem:[%s1492_s23 + $0x28] sm:$0xff] }
 0x1c6   :  { %v264_v17 = vsub.f32 1.5, %v263_v13  ;;  %v271_v18 = vmul.f32 %v1021_v14, %v259_v2  ;;  %vm277_vm6 = vweird.f32 %v1021_v14  ;;  %v646_v42 = vsel %vm131_vm2, %v644_v27, %v645_v30  ;;  %v959_v13 = vld [vmem:[%s1469_s16 + $0x28] sm:$0xff]  ;;  %392 = vmatpush.bf16.msra.mxu1 %v947_v12 }
 0x1c7   :  { %v617_v21 = vadd.f32 %v1000_v61, %v612_v16  ;;  %vm278_vm8 = vmor %vm276_vm7, %vm277_vm6  ;;  %v634_v48 = vsel %vm118_vm1, %v632_v32, %v633_v34  ;;  %718 = vmatpush.bf16.msra.mxu3 %v959_v13  ;;  %v958_v16 = vld [vmem:[%s1469_s16 + $0x20] sm:$0xff]  ;;  %v943_v22 = vld [vmem:[%s1492_s23 + $0x8] sm:$0xff] }
 0x1c8   :  { %v265_v20 = vmul.f32 %v1019_v55, %v264_v17  ;;  %v272_v24 = vmul.f32 %v1021_v14, %v271_v18  ;;  %v945_v17 = vld [vmem:[%s1492_s23 + $0x18] sm:$0xff] }
 0x1c9   :  { %v621_v26 = vrot.slane %v617_v21, 7  ;;  %v957_v18 = vld [vmem:[%s1469_s16 + $0x18] sm:$0xff]  ;;  %v956_v21 = vld [vmem:[%s1469_s16 + $0x10] sm:$0xff] }
 0x1ca   :  { %v269_v25 = vsel %vm268_vm15, %v1019_v55, %v265_v20  ;;  %v273_v29 = vmul.f32 0.5, %v272_v24  ;;  %v944_v20 = vld [vmem:[%s1492_s23 + $0x10] sm:$0xff]  ;;  %v954_v24 = vld [vmem:[%s1469_s16] sm:$0xff] }
 0x1cb   :  { %v280_v28 = vmul.f32 %v269_v25, %v256_v62  ;;  %v1307_v50 = vsel %vm109_vm0, 0.0, %v621_v26  ;;  %v627_v31 = vsel %vm109_vm0, %v621_v26, 0.0  ;;  %719 = vmatpush.bf16.msra.mxu3 %v958_v16  ;;  %v955_v62 = vld [vmem:[%s1469_s16 + $0x8] sm:$0xff] }
 0x1cc   :  { %v274_v36 = vsub.f32 1.5, %v273_v29  ;;  %v647_v37 = vrot.slane %v1307_v50, 2  ;;  %v648_v38 = vrot.slane %v627_v31, 2  ;;  %v635_v39 = vrot.slane %v1307_v50, 1 }
 0x1cd   :  { %v285_v35 = vmul.f32 %v999_v23, %v280_v28  ;;  %v636_v40 = vrot.slane %v627_v31, 1 }
 0x1ce   :  { %v275_v41 = vmul.f32 %v1021_v14, %v274_v36  ;;  %v649_v44 = vsel %vm131_vm2, %v647_v37, %v648_v38 }
 0x1cf   :  { %v290_v45 = vadd.f32 %v1001_v33, %v285_v35  ;;  %v981_v47 = vpack.i.bf16 %v649_v44, %v646_v42  ;;  %v637_v49 = vsel %vm118_vm1, %v635_v39, %v636_v40  ;;  %720 = vmatpush.bf16.msra.mxu3 %v957_v18 }
 0x1d0   :  { %v279_v51 = vsel %vm278_vm8, %v1021_v14, %v275_v41  ;;  %v976_v52 = vpack.i.bf16 %v637_v49, %v634_v48  ;;  %v946_v14 = vld [vmem:[%s1492_s23 + $0x20] sm:$0xff]  ;;  %vm825_vm8 = vcmask 15360  }
 0x1d1   :  { %v281_v53 = vmul.f32 %v279_v51, %v257_v46  ;;  %982 = vrot.lane.b32.xlu1 %v981_v47, %s1046_s11  ;;  %v294_v54 = vrot.slane %v290_v45, 7  ;;  %393 = vmatpush.bf16.msra.mxu1 %v946_v14  ;;  %v1003_v48 = vld [vmem:[%s1470_s17] ss:$0 sm:$0xff] }
 0x1d2   :  { %977 = vrot.lane.b32.xlu2 %v976_v52, %s1045_s6 }
 0x1d3   :  { %v286_v56 = vmul.f32 %v999_v23, %v281_v53  ;;  %v298_v58 = vsel %vm109_vm0, 0.0, %v294_v54  ;;  %v300_v3 = vsel %vm109_vm0, %v294_v54, 0.0  ;;  %721 = vmatpush.bf16.msra.mxu3 %v956_v21  ;;  %v942_v23 = vld [vmem:[%s1492_s23] sm:$0xff] }
 0x1d4   :  { %v306_v59 = vrot.slane %v298_v58, 1  ;;  %v307_v60 = vrot.slane %v300_v3, 1  ;;  %v318_v7 = vrot.slane %v298_v58, 2  ;;  %v319_v8 = vrot.slane %v300_v3, 2 }
 0x1d5   :  { %v291_v57 = vadd.f32 %v1001_v33, %v286_v56  ;;  %394 = vmatpush.bf16.msra.mxu1 %v945_v17 }
 0x1d6   :  { %v308_v2 = vsel %vm118_vm1, %v306_v59, %v307_v60  ;;  %v320_v10 = vsel %vm131_vm2, %v318_v7, %v319_v8 }
 0x1d7   :  { %v295_v43 = vrot.slane %v291_v57, 7  ;;  %722 = vmatpush.bf16.msra.mxu3 %v955_v62 }
 0x1d9   :  { %v299_v61 = vsel %vm109_vm0, 0.0, %v295_v43  ;;  %v301_v63 = vsel %vm109_vm0, %v295_v43, 0.0  ;;  %395 = vmatpush.bf16.msra.mxu1 %v944_v20  ;;  %v1002_v43 = vld [vmem:[%s1460_s7] ss:$0 sm:$0xff] }
 0x1da   :  { %v309_v0 = vrot.slane %v299_v61, 1  ;;  %v310_v1 = vrot.slane %v301_v63, 1  ;;  %v321_v5 = vrot.slane %v299_v61, 2  ;;  %v322_v6 = vrot.slane %v301_v63, 2 }
 0x1db   :  { %723 = vmatpush.bf16.msra.mxu3 %v954_v24 }
 0x1dc   :  { %v311_v55 = vsel %vm118_vm1, %v309_v0, %v310_v1  ;;  %v323_v9 = vsel %vm131_vm2, %v321_v5, %v322_v6 }
 0x1dd   :  { %v986_v4 = vpack.i.bf16 %v311_v55, %v308_v2  ;;  %v991_v11 = vpack.i.bf16 %v323_v9, %v320_v10  ;;  %396 = vmatpush.bf16.msra.mxu1 %v943_v22 }
 0x1df   :  { %987 = vrot.lane.b32.xlu2 %v986_v4, %s1045_s6 }
 0x1e1   :  { %397 = vmatpush.bf16.msra.mxu1 %v942_v23 }
 0x1e7   :  { %992 = vrot.lane.b32.xlu2 %v991_v11, %s1046_s11 }
 0x22c   :  { %v978_v25 = vpop.permute.xlu2 %977 }
 0x22d   :  { %v980_v29 = vunpack.i.h.bf16 %v978_v25  ;;  %v979_v30 = vunpack.i.l.bf16 %v978_v25 }
 0x22f   :  { %v657_v41 = vsel %vm144_vm3, %v1307_v50, %v980_v29  ;;  %v656_v42 = vsel %vm144_vm3, %v1293_v19, %v979_v30 }
 0x239   :  { %v988_v26 = vpop.permute.xlu2 %987 }
 0x23a   :  { %v990_v27 = vunpack.i.h.bf16 %v988_v26  ;;  %v989_v28 = vunpack.i.l.bf16 %v988_v26 }
 0x23c   :  { %v331_v34 = vsel %vm144_vm3, %v299_v61, %v990_v27  ;;  %v330_v35 = vsel %vm144_vm3, %v298_v58, %v989_v28 }
 0x241   :  { %v993_v32 = vpop.permute.xlu2 %992 }
 0x242   :  { %v995_v33 = vunpack.i.h.bf16 %v993_v32  ;;  %v994_v31 = vunpack.i.l.bf16 %v993_v32 }
 0x243   :  { %v983_v36 = vpop.permute.xlu1 %982 }
 0x244   :  { %v985_v37 = vunpack.i.h.bf16 %v983_v36  ;;  %v984_v38 = vunpack.i.l.bf16 %v983_v36  ;;  %v332_v39 = vsel %vm147_vm4, %v330_v35, %v994_v31  ;;  %v333_v40 = vsel %vm147_vm4, %v331_v34, %v995_v33  ;;  %v1004_v34 = vld [vmem:[%s1471_s18] ss:$0 sm:$0xff] }
 0x245   :  { %v334_v44 = vpack.c.bf16 %v333_v40, %v332_v39  ;;  %v1006_v40 = vld [vmem:[%s1473_s20] ss:$0 sm:$0xff] }
 0x246   :  { %v658_v45 = vsel %vm147_vm4, %v656_v42, %v984_v38  ;;  %v659_v46 = vsel %vm147_vm4, %v657_v41, %v985_v37  ;;  %v1005_v37 = vld [vmem:[%s1472_s19] ss:$0 sm:$0xff] }
 0x247   :  { %885 = vmatmul.msk.bf16.vlgmr.msra.gmra.mxu1 %vm203_vm5, %v334_v44  ;;  %v660_v47 = vpack.c.bf16 %v659_v46, %v658_v45 }
 0x249   :  { %935 = vmatmul.msk.bf16.vlgmr.msra.gmra.mxu3 %vm203_vm5, %v660_v47 }
 0x2c4   :  { %v399_v3 = vpop.f32.mrf.mxu1 }
 0x2c5   :  { %v400_v60 = vadd.f32 %v1002_v43, %v399_v3 }
 0x2c7   :  { %v1399_v63 = vmax.f32 %v400_v60, 0.0 }
 0x2c9   :  { %v408_v2 = vsel %vm144_vm3, %v1399_v63, 0.0  ;;  %v416_v5 = vmul.f32 %v1399_v63, %v1399_v63 }
 0x2cb   :  { %v418_v6 = vsel %vm144_vm3, %v416_v5, 0.0 }
 0x2cc   :  { %v725_v49 = vpop.f32.mrf.mxu3  ;;  %v401_v0 = vpop.f32.mrf.mxu1 }
 0x2cd   :  { %v726_v51 = vadd.f32 %v1003_v48, %v725_v49  ;;  %v402_v1 = vadd.f32 %v1002_v43, %v401_v0 }
 0x2cf   :  { %v1382_v50 = vmax.f32 %v726_v51, 0.0  ;;  %v1403_v55 = vmax.f32 %v402_v1, 0.0 }
 0x2d1   :  { %v734_v19 = vsel %vm144_vm3, %v1382_v50, 0.0  ;;  %v742_v52 = vmul.f32 %v1382_v50, %v1382_v50  ;;  %v411_v4 = vsel %vm144_vm3, %v1403_v55, 0.0  ;;  %v417_v7 = vmul.f32 %v1403_v55, %v1403_v55 }
 0x2d2   :  { %735 = vadd.xlane.f32.xlu1 %v734_v19 }
 0x2d3   :  { %v744_v53 = vsel %vm144_vm3, %v742_v52, 0.0  ;;  %v421_v8 = vsel %vm144_vm3, %v417_v7, 0.0 }
 0x2d4   :  { %v727_v54 = vpop.f32.mrf.mxu3  ;;  %745 = vadd.xlane.f32.xlu2 %v744_v53 }
 0x2d5   :  { %v728_v56 = vadd.f32 %v1003_v48, %v727_v54 }
 0x2d7   :  { %v1389_v57 = vmax.f32 %v728_v56, 0.0 }
 0x2d9   :  { %v737_v58 = vsel %vm144_vm3, %v1389_v57, 0.0  ;;  %v743_v59 = vmul.f32 %v1389_v57, %v1389_v57 }
 0x2da   :  { %738 = vadd.xlane.f32.xlu0 %v737_v58 }
 0x2db   :  { %v747_v61 = vsel %vm144_vm3, %v743_v59, 0.0 }
 0x2e2   :  { %748 = vadd.xlane.f32.xlu0 %v747_v61 }
 0x2ea   :  { %409 = vadd.xlane.f32.xlu0 %v408_v2 }
 0x2f2   :  { %412 = vadd.xlane.f32.xlu0 %v411_v4 }
 0x2fa   :  { %419 = vadd.xlane.f32.xlu0 %v418_v6 }
 0x302   :  { %422 = vadd.xlane.f32.xlu0 %v421_v8 }
 0x345   :  { %v736_v9 = vpop.xlane.xlu1 %735 }
 0x346   :  { %v740_v10 = vmul.f32 %v736_v9, %v1266_v15 }
 0x347   :  { %v746_v11 = vpop.xlane.xlu2 %745 }
 0x348   :  { %v752_v12 = vmul.f32 %v740_v10, %v740_v10  ;;  %v750_v13 = vmul.f32 %v746_v11, %v1266_v15  ;;  %v758_v31 = vsub.f32 %v1382_v50, %v740_v10 }
 0x34a   :  { %v754_v14 = vsub.f32 %v750_v13, %v752_v12 }
 0x34c   :  { %v756_v16 = vmax.f32 %v754_v14, 0.0 }
 0x34d   :  { %v739_v17 = vpop.xlane.xlu0 %738 }
 0x34e   :  { %v760_v18 = vadd.f32 1e-05, %v756_v16  ;;  %v741_v20 = vmul.f32 %v739_v17, %v1266_v15 }
 0x350   :  { %1022 = vrsqrt.f32 %v760_v18  ;;  %v753_v62 = vmul.f32 %v741_v20, %v741_v20  ;;  %vm768_vm1 = vweird.f32 %v760_v18  ;;  %v759_v52 = vsub.f32 %v1389_v57, %v741_v20 }
 0x355   :  { %v749_v21 = vpop.xlane.xlu0 %748 }
 0x356   :  { %v1023_v22 = vpop.eup %1022  ;;  %v751_v23 = vmul.f32 %v749_v21, %v1266_v15 }
 0x357   :  { %v763_v24 = vmul.f32 %v1023_v22, %v760_v18  ;;  %vm769_vm0 = vweird.f32 %v1023_v22  ;;  %v1007_v18 = vld [vmem:[%s1461_s8] ss:$0 sm:$0xff]  ;;  %s89_s8 = sld [smem:[#allocation4]] }
 0x358   :  { %v755_v25 = vsub.f32 %v751_v23, %v753_v62  ;;  %vm770_vm2 = vmor %vm768_vm1, %vm769_vm0  ;;  %v1008_v62 = vld [vmem:[%s1462_s9] ss:$0 sm:$0xff]  ;;  %s834_s9 = sld [smem:[#allocation4 + $0x1]] }
 0x359   :  { %v764_v26 = vmul.f32 %v1023_v22, %v763_v24 }
 0x35a   :  { %v757_v27 = vmax.f32 %v755_v25, 0.0  ;;  %v1009_v25 = vld [vmem:[%s1463_s10] ss:$0 sm:$0xff]  ;;  %s1049_s10 = smov 1  }
 0x35b   :  { %v765_v28 = vmul.f32 0.5, %v764_v26 }
 0x35c   :  { %v761_v29 = vadd.f32 1e-05, %v757_v27 }
 0x35d   :  { %v766_v30 = vsub.f32 1.5, %v765_v28  ;;  %v410_v32 = vpop.xlane.xlu0 %409 }
 0x35e   :  { %1024 = vrsqrt.f32 %v761_v29  ;;  %v414_v48 = vmul.f32 %v410_v32, %v1266_v15  ;;  %vm778_vm5 = vweird.f32 %v761_v29 }
 0x35f   :  { %v767_v33 = vmul.f32 %v1023_v22, %v766_v30 }
 0x360   :  { %v426_v53 = vmul.f32 %v414_v48, %v414_v48 }
 0x361   :  { %v771_v35 = vsel %vm770_vm2, %v1023_v22, %v767_v33 }
 0x362   :  { %v782_v36 = vmul.f32 %v771_v35, %v758_v31 }
 0x364   :  { %v1025_v38 = vpop.eup %1024  ;;  %v787_v39 = vmul.f32 %v1004_v34, %v782_v36 }
 0x365   :  { %v773_v41 = vmul.f32 %v1025_v38, %v761_v29  ;;  %v413_v42 = vpop.xlane.xlu0 %412  ;;  %vm779_vm4 = vweird.f32 %v1025_v38 }
 0x366   :  { %v792_v44 = vadd.f32 %v1005_v37, %v787_v39  ;;  %vm780_vm9 = vmor %vm778_vm5, %vm779_vm4  ;;  %v415_v43 = vmul.f32 %v413_v42, %v1266_v15  ;;  %v92_v39 = vstv %s89_s8 }
 0x367   :  { %v774_v45 = vmul.f32 %v1025_v38, %v773_v41  ;;  %v1048_v41 = vmov 0.0  }
 0x368   :  { %v798_v46 = vmul.f32 %v1006_v40, %v792_v44  ;;  %v427_v2 = vmul.f32 %v415_v43, %v415_v43  ;;  %v433_v28 = vsub.f32 %v1403_v55, %v415_v43 }
 0x369   :  { %v775_v47 = vmul.f32 0.5, %v774_v45 }
 0x36a   :  { %v800_v49 = vsel %vm144_vm3, %v798_v46, 0.0  ;;  %v97_v46 = vstv %s834_s9 }
 0x36b   :  { %v776_v51 = vsub.f32 1.5, %v775_v47  ;;  %801 = vadd.xlane.f32.xlu1 %v800_v49 }
 0x36d   :  { %v777_v50 = vmul.f32 %v1025_v38, %v776_v51  ;;  %v420_v19 = vpop.xlane.xlu0 %419 }
 0x36e   :  { %v424_v54 = vmul.f32 %v420_v19, %v1266_v15 }
 0x36f   :  { %v781_v56 = vsel %vm780_vm9, %v1025_v38, %v777_v50  ;;  %v1011_v50 = vld [vmem:[#allocation2] ss:$0 sm:$0xff] }
 0x370   :  { %v428_v58 = vsub.f32 %v424_v54, %v426_v53  ;;  %v783_v3 = vmul.f32 %v781_v56, %v759_v52 }
 0x372   :  { %v430_v59 = vmax.f32 %v428_v58, 0.0  ;;  %v788_v60 = vmul.f32 %v1004_v34, %v783_v3 }
 0x374   :  { %v434_v61 = vadd.f32 1e-05, %v430_v59  ;;  %v793_v0 = vadd.f32 %v1005_v37, %v788_v60  ;;  %v90_v37 = vlaneseq }
 0x375   :  { %v423_v1 = vpop.xlane.xlu0 %422 }
 0x376   :  { %1026 = vrsqrt.f32 %v434_v61  ;;  %v425_v4 = vmul.f32 %v423_v1, %v1266_v15  ;;  %v799_v5 = vmul.f32 %v1006_v40, %v793_v0  ;;  %vm442_vm11 = vweird.f32 %v434_v61  ;;  %v1010_v40 = vld [vmem:[#allocation3] ss:$0 sm:$0xff] }
 0x377   :  { %v432_v15 = vsub.f32 %v1399_v63, %v414_v48  ;;  %v91_v38 = vshrl.u32 %v90_v37, 7 }
 0x378   :  { %v429_v57 = vsub.f32 %v425_v4, %v427_v2  ;;  %v803_v6 = vsel %vm144_vm3, %v799_v5, 0.0 }
 0x379   :  { %804 = vadd.xlane.f32.xlu2 %v803_v6  ;;  %vm93_vm6 = vcmp.lt.s32.totalorder %v91_v38, %v92_v39  ;;  %vm98_vm7 = vcmp.lt.s32.totalorder %v91_v38, %v97_v46 }
 0x37a   :  { %v431_v7 = vmax.f32 %v429_v57, 0.0  ;;  %v833_v42 = vsel %vm93_vm6, 1.0, %v1048_v41  ;;  %v835_v48 = vsel %vm98_vm7, 1.0, %v1048_v41 }
 0x37c   :  { %v1027_v8 = vpop.eup %1026  ;;  %v435_v9 = vadd.f32 1e-05, %v431_v7 }
 0x37d   :  { %v437_v10 = vmul.f32 %v1027_v8, %v434_v61  ;;  %vm443_vm10 = vweird.f32 %v1027_v8 }
 0x37e   :  { %1028 = vrsqrt.f32 %v435_v9  ;;  %vm444_vm12 = vmor %vm442_vm11, %vm443_vm10  ;;  %vm452_vm14 = vweird.f32 %v435_v9 }
 0x37f   :  { %v438_v11 = vmul.f32 %v1027_v8, %v437_v10 }
 0x381   :  { %v439_v12 = vmul.f32 0.5, %v438_v11 }
 0x383   :  { %v440_v13 = vsub.f32 1.5, %v439_v12 }
 0x384   :  { %v1029_v14 = vpop.eup %1028 }
 0x385   :  { %v441_v16 = vmul.f32 %v1027_v8, %v440_v13  ;;  %v447_v17 = vmul.f32 %v1029_v14, %v435_v9  ;;  %vm453_vm13 = vweird.f32 %v1029_v14 }
 0x386   :  { %vm454_vm15 = vmor %vm452_vm14, %vm453_vm13 }
 0x387   :  { %v448_v20 = vmul.f32 %v1029_v14, %v447_v17  ;;  %v445_v21 = vsel %vm444_vm12, %v1027_v8, %v441_v16 }
 0x388   :  { %v456_v22 = vmul.f32 %v445_v21, %v432_v15 }
 0x389   :  { %v449_v23 = vmul.f32 0.5, %v448_v20 }
 0x38a   :  { %v461_v24 = vmul.f32 %v1007_v18, %v456_v22 }
 0x38b   :  { %v450_v26 = vsub.f32 1.5, %v449_v23 }
 0x38c   :  { %v466_v63 = vadd.f32 %v1008_v62, %v461_v24 }
 0x38d   :  { %v451_v27 = vmul.f32 %v1029_v14, %v450_v26 }
 0x38e   :  { %v472_v29 = vmul.f32 %v1009_v25, %v466_v63 }
 0x38f   :  { %v455_v30 = vsel %vm454_vm15, %v1029_v14, %v451_v27 }
 0x390   :  { %v474_v32 = vsel %vm144_vm3, %v472_v29, 0.0  ;;  %v457_v33 = vmul.f32 %v455_v30, %v433_v28 }
 0x391   :  { %475 = vadd.xlane.f32.xlu0 %v474_v32 }
 0x392   :  { %v462_v31 = vmul.f32 %v1007_v18, %v457_v33 }
 0x394   :  { %v467_v34 = vadd.f32 %v1008_v62, %v462_v31 }
 0x396   :  { %v473_v35 = vmul.f32 %v1009_v25, %v467_v34 }
 0x398   :  { %v477_v36 = vsel %vm144_vm3, %v473_v35, 0.0  ;;  %vm822_vm3 = vcmask 7168  }
 0x399   :  { %478 = vadd.xlane.f32.xlu1 %v477_v36 }
 0x3de   :  { %v802_v55 = vpop.xlane.xlu1 %801 }
 0x3df   :  { %v810_v44 = vadd.f32 %v1010_v40, %v802_v55 }
 0x3e1   :  { %v812_v45 = vmul.f32 %v833_v42, %v810_v44 }
 0x3e3   :  { %816 = vrot.lane.b32.xlu2 %v812_v45, %s1049_s10 }
 0x3ec   :  { %v805_v47 = vpop.xlane.xlu2 %804 }
 0x3ed   :  { %v811_v49 = vadd.f32 %v1010_v40, %v805_v47 }
 0x3ef   :  { %v813_v51 = vmul.f32 %v835_v48, %v811_v49 }
 0x3f1   :  { %818 = vrot.lane.b32.xlu0 %v813_v51, %s1049_s10 }
 0x404   :  { %v476_v19 = vpop.xlane.xlu0 %475 }
 0x405   :  { %v484_v52 = vadd.f32 %v1011_v50, %v476_v19 }
 0x407   :  { %v486_v53 = vmul.f32 %v833_v42, %v484_v52 }
 0x40c   :  { %v479_v58 = vpop.xlane.xlu1 %478 }
 0x40d   :  { %v485_v3 = vadd.f32 %v1011_v50, %v479_v58 }
 0x40f   :  { %v487_v43 = vmul.f32 %v835_v48, %v485_v3 }
 0x43d   :  { %v817_v54 = vpop.permute.xlu2 %816 }
 0x43e   :  { %v823_v56 = vsel %vm822_vm3, %v486_v53, %v817_v54 }
 0x43f   :  { %826 = vst.msk [vmem:[%s1474_s22] sm:$0xff] %vm825_vm8, %v823_v56 }
 0x463   :  { %v819_v59 = vpop.permute.xlu0 %818 }
 0x464   :  { %v824_v60 = vsel %vm822_vm3, %v487_v43, %v819_v59 }
 0x465   :  { %827 = vst.msk [vmem:[%s1474_s22 + $0x8] sm:$0xff] %vm825_vm8, %v824_v60 }
 0x466   :  { %832 = vsyncpa [#allocation5], 1 }

</bundles_post_ra>
